<compile_context>
chip_gen: v5e
topology: v5e:2x2
jax: 0.10.0
libtpu: 0.0.40
codegen_flags: <defaults>
</compile_context>

<pallas_src>
import functools
import math

import jax
import jax.numpy as jnp
from jax.experimental import pallas as pl
from jax.experimental.pallas import tpu as pltpu

HIDDEN = 256
BN_EPS = 1e-5

# --- slab index constants (row-block order inside the packed parameter slabs) ---
(W_FW2, W_FW3, W_IW1A, W_IW1B, W_IW2,
 W_F1W1A, W_F1W2, W_F1W3, W_F1W4, W_F1W5,
 W_RW1A, W_RW2,
 W_F2W1A, W_F2W2, W_F2W3, W_F2W4, W_F2W5) = range(17)
N_W = 17

(B_FB1, B_FB2, B_FB3,
 B_IB1, B_IG1, B_IBE1, B_IB2, B_IG2, B_IBE2,
 B_F1B1, B_F1B2, B_F1B3, B_F1B4, B_F1B5,
 B_RB1, B_RB2,
 B_F2B1, B_F2B2, B_F2B3, B_F2B4, B_F2B5) = range(21)
N_B = 21

AW_F1, AW_R, AW_F2 = range(3)
N_AW = 3


def _round_up(x, m):
    return ((x + m - 1) // m) * m


# ----------------------------------------------------------------------------
# Pallas kernel: the entire ICM forward pass runs in VMEM in one invocation.
# ----------------------------------------------------------------------------
def icm_kernel(sn_ref, act_ref, wslab, bslab, awslab, fw1, iw3, ib3,
               enc_next_out, pred_next_out, pred_act_out,
               *, real_b, half, a_in_p):
    H = HIDDEN
    f32 = jnp.float32
    bf16 = jnp.bfloat16
    relu = lambda v: jnp.maximum(v, 0.0)
    inv_b = 1.0 / float(real_b)

    def wt(i):                                   # (H, H) bf16 weight block
        return wslab[pl.ds(i * H, H), :]

    def bias(i):                                 # (1, H) f32 bias / BN affine
        return bslab[pl.ds(i, 1), :]

    def aw(i):                                   # (a_in_p, H) bf16 action weight
        return awslab[pl.ds(i * a_in_p, a_in_p), :]

    def mm(x, w):                                # bf16 MXU inputs, f32 accumulation
        return jnp.dot(x.astype(bf16), w, preferred_element_type=f32)

    def lin(x, wi, bi):
        return mm(x, wt(wi)) + bias(bi)

    # BN row mask generated in-kernel: training-mode stats over REAL rows only.
    row = jax.lax.broadcasted_iota(jnp.int32, (half, H), 0)
    mask = (row < real_b).astype(f32)

    def batchnorm(x, gi, bei):
        mean = jnp.sum(x * mask, axis=0, keepdims=True) * inv_b
        cen = x - mean
        var = jnp.sum((cen * cen) * mask, axis=0, keepdims=True) * inv_b
        return cen * jax.lax.rsqrt(var + BN_EPS) * bias(gi) + bias(bei)

    # ---- feature net, run ONCE on the stacked (state ; next_state) batch ----
    sn = sn_ref[...]                                          # (2*half, IN_p) bf16
    h = relu(jnp.dot(sn, fw1[...], preferred_element_type=f32) + bias(B_FB1))
    h = relu(lin(h, W_FW2, B_FB2))
    enc = lin(h, W_FW3, B_FB3)
    enc_s = enc[:half]
    enc_ns = enc[half:]

    a = act_ref[...]                                          # (half, a_in_p) bf16

    # ---- inverse_net ----
    h = relu(batchnorm(mm(enc_s, wt(W_IW1A)) + mm(enc_ns, wt(W_IW1B)) + bias(B_IB1),
                       B_IG1, B_IBE1))
    h = relu(batchnorm(lin(h, W_IW2, B_IB2), B_IG2, B_IBE2))
    pred_act_out[...] = (jnp.dot(h.astype(bf16), iw3[...],
                                 preferred_element_type=f32) + ib3[...])

    # ---- forward_net_1 ----
    h = relu(mm(enc_s, wt(W_F1W1A)) + mm(a, aw(AW_F1)) + bias(B_F1B1))
    h = relu(lin(h, W_F1W2, B_F1B2))
    h = relu(lin(h, W_F1W3, B_F1B3))
    h = relu(lin(h, W_F1W4, B_F1B4))
    x = lin(h, W_F1W5, B_F1B5)

    # ---- residual stack: all 8 blocks share ONE set of weights (PyTorch's
    #      `[Sequential(...)] * 8`).  All loop-invariants are hoisted. ----
    rw1a = wt(W_RW1A)
    rw2 = wt(W_RW2)
    rb2 = jnp.broadcast_to(bias(B_RB2), (half, H))            # broadcast once
    act_proj = mm(a, aw(AW_R)) + bias(B_RB1)                  # loop-invariant

    def res_block(inp):
        hh = relu(jnp.dot(inp.astype(bf16), rw1a,
                          preferred_element_type=f32) + act_proj)
        return jnp.dot(hh.astype(bf16), rw2, preferred_element_type=f32) + rb2

    for _ in range(4):
        f = res_block(x)
        x = res_block(f) + x

    # ---- forward_net_2 ----
    h = relu(mm(x, wt(W_F2W1A)) + mm(a, aw(AW_F2)) + bias(B_F2B1))
    h = relu(lin(h, W_F2W2, B_F2B2))
    h = relu(lin(h, W_F2W3, B_F2B3))
    h = relu(lin(h, W_F2W4, B_F2B4))
    pred_next_out[...] = lin(h, W_F2W5, B_F2B5)

    enc_next_out[...] = enc_ns


# ----------------------------------------------------------------------------
# Parameter construction (deterministic, PyTorch-Linear-style uniform init).
# Returns the "logical" f32, unpadded parameter list (used by the reference).
# ----------------------------------------------------------------------------
def _linear_init(key, fan_in, fan_out):
    k1, k2 = jax.random.split(key)
    bound = 1.0 / float(fan_in) ** 0.5
    w = jax.random.uniform(k1, (fan_in, fan_out), jnp.float32, -bound, bound)
    b = jax.random.uniform(k2, (1, fan_out), jnp.float32, -bound, bound)
    return w, b


def init_icm_params(key, input_size, output_size):
    H = HIDDEN
    A = output_size
    keys = iter(jax.random.split(key, 32))
    p = []

    # feature: Linear(in, 256), Linear(256, 256), Linear(256, 256)
    for fi, fo in [(input_size, H), (H, H), (H, H)]:
        w, b = _linear_init(next(keys), fi, fo)
        p += [w, b]

    # inverse_net: Linear(512, 256) [split], BN, Linear(256,256), BN, Linear(256, A)
    w, b = _linear_init(next(keys), 2 * H, H)
    p += [w[:H], w[H:], b, jnp.ones((1, H), jnp.float32), jnp.zeros((1, H), jnp.float32)]
    w, b = _linear_init(next(keys), H, H)
    p += [w, b, jnp.ones((1, H), jnp.float32), jnp.zeros((1, H), jnp.float32)]
    w, b = _linear_init(next(keys), H, A)
    p += [w, b]

    # forward_net_1: Linear(A+256, 256) [split], 4 x Linear(256, 256)
    w, b = _linear_init(next(keys), A + H, H)
    p += [w[:H], w[H:], b]
    for _ in range(4):
        w, b = _linear_init(next(keys), H, H)
        p += [w, b]

    # shared residual block: Linear(A+256, 256) [split], Linear(256, 256)
    w, b = _linear_init(next(keys), A + H, H)
    p += [w[:H], w[H:], b]
    w, b = _linear_init(next(keys), H, H)
    p += [w, b]

    # forward_net_2: Linear(A+256, 256) [split], 4 x Linear(256, 256)
    w, b = _linear_init(next(keys), A + H, H)
    p += [w[:H], w[H:], b]
    for _ in range(4):
        w, b = _linear_init(next(keys), H, H)
        p += [w, b]

    return p  # 44 entries


# ----------------------------------------------------------------------------
# Pack parameters into a few large slabs (few big DMAs instead of ~47 tiny ones).
# ----------------------------------------------------------------------------
def pack_params(params, input_size, output_size):
    (fw1, fb1, fw2, fb2, fw3, fb3,
     iw1a, iw1b, ib1, ig1, ibe1, iw2, ib2, ig2, ibe2, iw3, ib3,
     f1w1a, f1w1b, f1b1, f1w2, f1b2, f1w3, f1b3, f1w4, f1b4, f1w5, f1b5,
     rw1a, rw1b, rb1, rw2, rb2,
     f2w1a, f2w1b, f2b1, f2w2, f2b2, f2w3, f2b3, f2w4, f2b4, f2w5, f2b5) = params

    bf16 = jnp.bfloat16
    f32 = jnp.float32
    in_p = _round_up(input_size, 128)
    a_in_p = _round_up(output_size, 16)    # action fan-in: bf16 sublane tile only
    a_out_p = _round_up(output_size, 128)  # pred_action fan-out: lane-dense store

    wslab = jnp.concatenate(
        [fw2, fw3, iw1a, iw1b, iw2,
         f1w1a, f1w2, f1w3, f1w4, f1w5,
         rw1a, rw2,
         f2w1a, f2w2, f2w3, f2w4, f2w5], axis=0).astype(bf16)    # (17*H, H) bf16

    bslab = jnp.concatenate(
        [fb1, fb2, fb3,
         ib1, ig1, ibe1, ib2, ig2, ibe2,
         f1b1, f1b2, f1b3, f1b4, f1b5,
         rb1, rb2,
         f2b1, f2b2, f2b3, f2b4, f2b5], axis=0).astype(f32)      # (21, H) f32

    pad_a = lambda w: jnp.pad(w, ((0, a_in_p - output_size), (0, 0)))
    awslab = jnp.concatenate(
        [pad_a(f1w1b), pad_a(rw1b), pad_a(f2w1b)], axis=0).astype(bf16)  # (3*a_in_p, H)

    return {
        "wslab": wslab,
        "bslab": bslab,
        "awslab": awslab,
        "fw1": jnp.pad(fw1, ((0, in_p - input_size), (0, 0))).astype(bf16),
        "iw3": jnp.pad(iw3, ((0, 0), (0, a_out_p - output_size))).astype(bf16),
        "ib3": jnp.pad(ib3, ((0, 0), (0, a_out_p - output_size))).astype(f32),
    }


# ----------------------------------------------------------------------------
# Wrapper around pallas_call.
# ----------------------------------------------------------------------------
@jax.jit
def icm_forward(state, next_state, action, packed):
    B, IN = state.shape
    A = action.shape[1]
    H = HIDDEN
    f32 = jnp.float32
    bf16 = jnp.bfloat16

    Bp = max(8, _round_up(B, 8))
    IN_p = packed["fw1"].shape[0]
    a_in_p = packed["awslab"].shape[0] // N_AW
    a_out_p = packed["iw3"].shape[1]

    # Pad batch to a sublane multiple, features to lane/tile multiples, cast the
    # activation streams to bf16 in the wrapper (halves those input DMAs), and
    # stack state / next_state along batch so the feature net runs once.
    s = jnp.pad(state.astype(f32), ((0, Bp - B), (0, IN_p - IN)))
    ns = jnp.pad(next_state.astype(f32), ((0, Bp - B), (0, IN_p - IN)))
    sn = jnp.concatenate([s, ns], axis=0).astype(bf16)             # (2*Bp, IN_p)
    act = jnp.pad(action.astype(f32), ((0, Bp - B), (0, a_in_p - A))).astype(bf16)

    out_shapes = (
        jax.ShapeDtypeStruct((Bp, H), f32),        # real_next_state_feature
        jax.ShapeDtypeStruct((Bp, H), f32),        # pred_next_state_feature
        jax.ShapeDtypeStruct((Bp, a_out_p), f32),  # pred_action (lane-dense, padded)
    )

    vmem = pl.BlockSpec(memory_space=pltpu.MemorySpace.VMEM)
    inputs = (sn, act, packed["wslab"], packed["bslab"], packed["awslab"],
              packed["fw1"], packed["iw3"], packed["ib3"])

    # Advisory cost hint for XLA scheduling around the custom call.
    macs = (2 * Bp * (IN_p * H + 2 * H * H)            # feature net (stacked)
            + Bp * (3 * H * H + H * a_out_p)           # inverse net
            + 2 * Bp * (5 * H * H + a_in_p * H)        # forward_net_1 + forward_net_2
            + Bp * (a_in_p * H + 16 * H * H))          # residual stack
    in_bytes = sum(math.prod(x.shape) * x.dtype.itemsize for x in inputs)
    out_bytes = sum(math.prod(o.shape) * 4 for o in out_shapes)
    cost = pl.CostEstimate(flops=2 * macs, transcendentals=0,
                           bytes_accessed=in_bytes + out_bytes)

    fn = pl.pallas_call(
        functools.partial(icm_kernel, real_b=B, half=Bp, a_in_p=a_in_p),
        out_shape=out_shapes,
        in_specs=[vmem] * len(inputs),
        out_specs=(vmem,) * 3,
        compiler_params=pltpu.CompilerParams(vmem_limit_bytes=8 << 20),
        cost_estimate=cost,
    )
    enc_ns, pred_ns, pred_act = fn(*inputs)
    return enc_ns[:B], pred_ns[:B], pred_act[:B, :A]


# ----------------------------------------------------------------------------
# Pure-JAX reference with the same mixed precision (bf16 matmul inputs,
# f32 accumulation, f32 biases / BN) on the unpadded parameters.
# ----------------------------------------------------------------------------
def icm_reference(state, next_state, action, params):
    (fw1, fb1, fw2, fb2, fw3, fb3,
     iw1a, iw1b, ib1, ig1, ibe1, iw2, ib2, ig2, ibe2, iw3, ib3,
     f1w1a, f1w1b, f1b1, f1w2, f1b2, f1w3, f1b3, f1w4, f1b4, f1w5, f1b5,
     rw1a, rw1b, rb1, rw2, rb2,
     f2w1a, f2w1b, f2b1, f2w2, f2b2, f2w3, f2b3, f2w4, f2b4, f2w5, f2b5) = params

    bf16 = jnp.bfloat16
    relu = lambda v: jnp.maximum(v, 0.0)

    def mm(x, w):
        return jnp.dot(x.astype(bf16), w.astype(bf16),
                       preferred_element_type=jnp.float32)

    def lin(x, w, b):
        return mm(x, w) + b

    def bn(x, g, be):
        m = jnp.mean(x, axis=0, keepdims=True)
        v = jnp.mean((x - m) ** 2, axis=0, keepdims=True)
        return (x - m) * jax.lax.rsqrt(v + BN_EPS) * g + be

    def feat(x):
        return lin(relu(lin(relu(lin(x, fw1, fb1)), fw2, fb2)), fw3, fb3)

    enc_s, enc_ns = feat(state), feat(next_state)

    h = relu(bn(mm(enc_s, iw1a) + mm(enc_ns, iw1b) + ib1, ig1, ibe1))
    h = relu(bn(lin(h, iw2, ib2), ig2, ibe2))
    pred_act = lin(h, iw3, ib3)

    h = relu(mm(enc_s, f1w1a) + mm(action, f1w1b) + f1b1)
    h = relu(lin(h, f1w2, f1b2)); h = relu(lin(h, f1w3, f1b3)); h = relu(lin(h, f1w4, f1b4))
    x = lin(h, f1w5, f1b5)

    def res(inp):
        return lin(relu(mm(inp, rw1a) + mm(action, rw1b) + rb1), rw2, rb2)

    for _ in range(4):
        x = res(res(x)) + x

    h = relu(mm(x, f2w1a) + mm(action, f2w1b) + f2b1)
    h = relu(lin(h, f2w2, f2b2)); h = relu(lin(h, f2w3, f2b3)); h = relu(lin(h, f2w4, f2b4))
    pred_next = lin(h, f2w5, f2b5)
    return enc_ns, pred_next, pred_act


if __name__ == "__main__":
    B, INPUT_SIZE, OUTPUT_SIZE = 4, 32, 8

    key = jax.random.PRNGKey(0)
    k_s, k_ns, k_a, k_p = jax.random.split(key, 4)
    state = jax.random.normal(k_s, (B, INPUT_SIZE), jnp.float32)
    next_state = jax.random.normal(k_ns, (B, INPUT_SIZE), jnp.float32)
    action = jax.random.normal(k_a, (B, OUTPUT_SIZE), jnp.float32)

    params = init_icm_params(k_p, INPUT_SIZE, OUTPUT_SIZE)
    packed = pack_params(params, INPUT_SIZE, OUTPUT_SIZE)

    real_ns, pred_ns, pred_act = icm_forward(state, next_state, action, packed)
    jax.block_until_ready((real_ns, pred_ns, pred_act))

    # silent correctness check against a pure-JAX mixed-precision reference
    ref = icm_reference(state, next_state, action, params)
    for got, exp in zip((real_ns, pred_ns, pred_act), ref):
        assert got.shape == exp.shape and got.dtype == exp.dtype
        assert jnp.allclose(got, exp, atol=5e-3, rtol=5e-3)

    print("KERNEL_OK")
</pallas_src>

<mosaic_0001>
module attributes {stable_mosaic.version = 11 : i64} {
  func.func @icm_kernel(%arg0: memref<16x128xbf16, #tpu.memory_space<vmem>>, %arg1: memref<8x16xbf16, #tpu.memory_space<vmem>>, %arg2: memref<4352x256xbf16, #tpu.memory_space<vmem>>, %arg3: memref<21x256xf32, #tpu.memory_space<vmem>>, %arg4: memref<48x256xbf16, #tpu.memory_space<vmem>>, %arg5: memref<128x256xbf16, #tpu.memory_space<vmem>>, %arg6: memref<256x128xbf16, #tpu.memory_space<vmem>>, %arg7: memref<1x128xf32, #tpu.memory_space<vmem>>, %arg8: memref<8x256xf32, #tpu.memory_space<vmem>>, %arg9: memref<8x256xf32, #tpu.memory_space<vmem>>, %arg10: memref<8x128xf32, #tpu.memory_space<vmem>>) attributes {dimension_semantics = [], scalar_prefetch = 0 : i64, scratch_operands = 0 : i64, tpu.core_type = #tpu.core_type<tc>} {
    %0 = tpu.iota {dimensions = array<i32: 0>} : vector<8x256xi32>
    %c4_i32 = arith.constant 4 : i32
    %1 = vector.broadcast %c4_i32 : i32 to vector<8x256xi32>
    %2 = arith.cmpi slt, %0, %1 : vector<8x256xi32>
    %3 = arith.extui %2 : vector<8x256xi1> to vector<8x256xi32>
    %4 = arith.sitofp %3 : vector<8x256xi32> to vector<8x256xf32>
    %c0 = arith.constant 0 : index
    %c0_0 = arith.constant 0 : index
    %5 = vector.load %arg0[%c0, %c0_0] : memref<16x128xbf16, #tpu.memory_space<vmem>>, vector<16x128xbf16>
    %c0_1 = arith.constant 0 : index
    %c0_2 = arith.constant 0 : index
    %6 = vector.load %arg5[%c0_1, %c0_2] : memref<128x256xbf16, #tpu.memory_space<vmem>>, vector<128x256xbf16>
    %cst = arith.constant dense<0.000000e+00> : vector<16x256xf32>
    %7 = tpu.matmul %5, %6, %cst {dimension_numbers = #tpu.dot_dimension_numbers<[1], [0], [0], [1], [0, 0, 1, 1], [], []>} : vector<16x128xbf16>, vector<128x256xbf16>, vector<16x256xf32> -> vector<16x256xf32>
    %c0_3 = arith.constant 0 : index
    %c0_4 = arith.constant 0 : index
    %8 = vector.load %arg3[%c0_3, %c0_4] : memref<21x256xf32, #tpu.memory_space<vmem>>, vector<1x256xf32>
    %9 = vector.broadcast %8 : vector<1x256xf32> to vector<16x256xf32>
    %10 = arith.addf %7, %9 : vector<16x256xf32>
    %cst_5 = arith.constant 0.000000e+00 : f32
    %11 = vector.broadcast %cst_5 : f32 to vector<16x256xf32>
    %12 = arith.maximumf %10, %11 : vector<16x256xf32>
    %c0_6 = arith.constant 0 : index
    %c0_7 = arith.constant 0 : index
    %13 = vector.load %arg2[%c0_6, %c0_7] : memref<4352x256xbf16, #tpu.memory_space<vmem>>, vector<256x256xbf16>
    %14 = arith.truncf %12 : vector<16x256xf32> to vector<16x256xbf16>
    %cst_8 = arith.constant dense<0.000000e+00> : vector<16x256xf32>
    %15 = tpu.matmul %14, %13, %cst_8 {dimension_numbers = #tpu.dot_dimension_numbers<[1], [0], [0], [1], [0, 0, 1, 1], [], []>} : vector<16x256xbf16>, vector<256x256xbf16>, vector<16x256xf32> -> vector<16x256xf32>
    %c1 = arith.constant 1 : index
    %c0_9 = arith.constant 0 : index
    %16 = vector.load %arg3[%c1, %c0_9] : memref<21x256xf32, #tpu.memory_space<vmem>>, vector<1x256xf32>
    %17 = vector.broadcast %16 : vector<1x256xf32> to vector<16x256xf32>
    %18 = arith.addf %15, %17 : vector<16x256xf32>
    %cst_10 = arith.constant 0.000000e+00 : f32
    %19 = vector.broadcast %cst_10 : f32 to vector<16x256xf32>
    %20 = arith.maximumf %18, %19 : vector<16x256xf32>
    %c256 = arith.constant 256 : index
    %c0_11 = arith.constant 0 : index
    %21 = vector.load %arg2[%c256, %c0_11] : memref<4352x256xbf16, #tpu.memory_space<vmem>>, vector<256x256xbf16>
    %22 = arith.truncf %20 : vector<16x256xf32> to vector<16x256xbf16>
    %cst_12 = arith.constant dense<0.000000e+00> : vector<16x256xf32>
    %23 = tpu.matmul %22, %21, %cst_12 {dimension_numbers = #tpu.dot_dimension_numbers<[1], [0], [0], [1], [0, 0, 1, 1], [], []>} : vector<16x256xbf16>, vector<256x256xbf16>, vector<16x256xf32> -> vector<16x256xf32>
    %c2 = arith.constant 2 : index
    %c0_13 = arith.constant 0 : index
    %24 = vector.load %arg3[%c2, %c0_13] : memref<21x256xf32, #tpu.memory_space<vmem>>, vector<1x256xf32>
    %25 = vector.broadcast %24 : vector<1x256xf32> to vector<16x256xf32>
    %26 = arith.addf %23, %25 : vector<16x256xf32>
    %27 = vector.extract_strided_slice %26 {offsets = [0, 0], sizes = [8, 256], strides = [1, 1]} : vector<16x256xf32> to vector<8x256xf32>
    %28 = vector.extract_strided_slice %26 {offsets = [8, 0], sizes = [8, 256], strides = [1, 1]} : vector<16x256xf32> to vector<8x256xf32>
    %c0_14 = arith.constant 0 : index
    %c0_15 = arith.constant 0 : index
    %29 = vector.load %arg1[%c0_14, %c0_15] : memref<8x16xbf16, #tpu.memory_space<vmem>>, vector<8x16xbf16>
    %c512 = arith.constant 512 : index
    %c0_16 = arith.constant 0 : index
    %30 = vector.load %arg2[%c512, %c0_16] : memref<4352x256xbf16, #tpu.memory_space<vmem>>, vector<256x256xbf16>
    %31 = arith.truncf %27 : vector<8x256xf32> to vector<8x256xbf16>
    %cst_17 = arith.constant dense<0.000000e+00> : vector<8x256xf32>
    %32 = tpu.matmul %31, %30, %cst_17 {dimension_numbers = #tpu.dot_dimension_numbers<[1], [0], [0], [1], [0, 0, 1, 1], [], []>} : vector<8x256xbf16>, vector<256x256xbf16>, vector<8x256xf32> -> vector<8x256xf32>
    %c768 = arith.constant 768 : index
    %c0_18 = arith.constant 0 : index
    %33 = vector.load %arg2[%c768, %c0_18] : memref<4352x256xbf16, #tpu.memory_space<vmem>>, vector<256x256xbf16>
    %34 = arith.truncf %28 : vector<8x256xf32> to vector<8x256xbf16>
    %cst_19 = arith.constant dense<0.000000e+00> : vector<8x256xf32>
    %35 = tpu.matmul %34, %33, %cst_19 {dimension_numbers = #tpu.dot_dimension_numbers<[1], [0], [0], [1], [0, 0, 1, 1], [], []>} : vector<8x256xbf16>, vector<256x256xbf16>, vector<8x256xf32> -> vector<8x256xf32>
    %36 = arith.addf %32, %35 : vector<8x256xf32>
    %c3 = arith.constant 3 : index
    %c0_20 = arith.constant 0 : index
    %37 = vector.load %arg3[%c3, %c0_20] : memref<21x256xf32, #tpu.memory_space<vmem>>, vector<1x256xf32>
    %38 = vector.broadcast %37 : vector<1x256xf32> to vector<8x256xf32>
    %39 = arith.addf %36, %38 : vector<8x256xf32>
    %40 = arith.mulf %39, %4 : vector<8x256xf32>
    %cst_21 = arith.constant dense<0.000000e+00> : vector<256xf32>
    %41 = vector.multi_reduction <add>, %40, %cst_21 [0] : vector<8x256xf32> to vector<256xf32>
    %42 = vector.shape_cast %41 : vector<256xf32> to vector<1x256xf32>
    %cst_22 = arith.constant 2.500000e-01 : f32
    %43 = vector.broadcast %cst_22 : f32 to vector<1x256xf32>
    %44 = arith.mulf %42, %43 : vector<1x256xf32>
    %45 = vector.broadcast %44 : vector<1x256xf32> to vector<8x256xf32>
    %46 = arith.subf %39, %45 : vector<8x256xf32>
    %47 = arith.mulf %46, %46 : vector<8x256xf32>
    %48 = arith.mulf %47, %4 : vector<8x256xf32>
    %cst_23 = arith.constant dense<0.000000e+00> : vector<256xf32>
    %49 = vector.multi_reduction <add>, %48, %cst_23 [0] : vector<8x256xf32> to vector<256xf32>
    %50 = vector.shape_cast %49 : vector<256xf32> to vector<1x256xf32>
    %cst_24 = arith.constant 2.500000e-01 : f32
    %51 = vector.broadcast %cst_24 : f32 to vector<1x256xf32>
    %52 = arith.mulf %50, %51 : vector<1x256xf32>
    %cst_25 = arith.constant 9.99999974E-6 : f32
    %53 = vector.broadcast %cst_25 : f32 to vector<1x256xf32>
    %54 = arith.addf %52, %53 : vector<1x256xf32>
    %55 = math.rsqrt %54 : vector<1x256xf32>
    %56 = vector.broadcast %55 : vector<1x256xf32> to vector<8x256xf32>
    %57 = arith.mulf %46, %56 : vector<8x256xf32>
    %c4 = arith.constant 4 : index
    %c0_26 = arith.constant 0 : index
    %58 = vector.load %arg3[%c4, %c0_26] : memref<21x256xf32, #tpu.memory_space<vmem>>, vector<1x256xf32>
    %59 = vector.broadcast %58 : vector<1x256xf32> to vector<8x256xf32>
    %60 = arith.mulf %57, %59 : vector<8x256xf32>
    %c5 = arith.constant 5 : index
    %c0_27 = arith.constant 0 : index
    %61 = vector.load %arg3[%c5, %c0_27] : memref<21x256xf32, #tpu.memory_space<vmem>>, vector<1x256xf32>
    %62 = vector.broadcast %61 : vector<1x256xf32> to vector<8x256xf32>
    %63 = arith.addf %60, %62 : vector<8x256xf32>
    %cst_28 = arith.constant 0.000000e+00 : f32
    %64 = vector.broadcast %cst_28 : f32 to vector<8x256xf32>
    %65 = arith.maximumf %63, %64 : vector<8x256xf32>
    %c1024 = arith.constant 1024 : index
    %c0_29 = arith.constant 0 : index
    %66 = vector.load %arg2[%c1024, %c0_29] : memref<4352x256xbf16, #tpu.memory_space<vmem>>, vector<256x256xbf16>
    %67 = arith.truncf %65 : vector<8x256xf32> to vector<8x256xbf16>
    %cst_30 = arith.constant dense<0.000000e+00> : vector<8x256xf32>
    %68 = tpu.matmul %67, %66, %cst_30 {dimension_numbers = #tpu.dot_dimension_numbers<[1], [0], [0], [1], [0, 0, 1, 1], [], []>} : vector<8x256xbf16>, vector<256x256xbf16>, vector<8x256xf32> -> vector<8x256xf32>
    %c6 = arith.constant 6 : index
    %c0_31 = arith.constant 0 : index
    %69 = vector.load %arg3[%c6, %c0_31] : memref<21x256xf32, #tpu.memory_space<vmem>>, vector<1x256xf32>
    %70 = vector.broadcast %69 : vector<1x256xf32> to vector<8x256xf32>
    %71 = arith.addf %68, %70 : vector<8x256xf32>
    %72 = arith.mulf %71, %4 : vector<8x256xf32>
    %cst_32 = arith.constant dense<0.000000e+00> : vector<256xf32>
    %73 = vector.multi_reduction <add>, %72, %cst_32 [0] : vector<8x256xf32> to vector<256xf32>
    %74 = vector.shape_cast %73 : vector<256xf32> to vector<1x256xf32>
    %cst_33 = arith.constant 2.500000e-01 : f32
    %75 = vector.broadcast %cst_33 : f32 to vector<1x256xf32>
    %76 = arith.mulf %74, %75 : vector<1x256xf32>
    %77 = vector.broadcast %76 : vector<1x256xf32> to vector<8x256xf32>
    %78 = arith.subf %71, %77 : vector<8x256xf32>
    %79 = arith.mulf %78, %78 : vector<8x256xf32>
    %80 = arith.mulf %79, %4 : vector<8x256xf32>
    %cst_34 = arith.constant dense<0.000000e+00> : vector<256xf32>
    %81 = vector.multi_reduction <add>, %80, %cst_34 [0] : vector<8x256xf32> to vector<256xf32>
    %82 = vector.shape_cast %81 : vector<256xf32> to vector<1x256xf32>
    %cst_35 = arith.constant 2.500000e-01 : f32
    %83 = vector.broadcast %cst_35 : f32 to vector<1x256xf32>
    %84 = arith.mulf %82, %83 : vector<1x256xf32>
    %cst_36 = arith.constant 9.99999974E-6 : f32
    %85 = vector.broadcast %cst_36 : f32 to vector<1x256xf32>
    %86 = arith.addf %84, %85 : vector<1x256xf32>
    %87 = math.rsqrt %86 : vector<1x256xf32>
    %88 = vector.broadcast %87 : vector<1x256xf32> to vector<8x256xf32>
    %89 = arith.mulf %78, %88 : vector<8x256xf32>
    %c7 = arith.constant 7 : index
    %c0_37 = arith.constant 0 : index
    %90 = vector.load %arg3[%c7, %c0_37] : memref<21x256xf32, #tpu.memory_space<vmem>>, vector<1x256xf32>
    %91 = vector.broadcast %90 : vector<1x256xf32> to vector<8x256xf32>
    %92 = arith.mulf %89, %91 : vector<8x256xf32>
    %c8 = arith.constant 8 : index
    %c0_38 = arith.constant 0 : index
    %93 = vector.load %arg3[%c8, %c0_38] : memref<21x256xf32, #tpu.memory_space<vmem>>, vector<1x256xf32>
    %94 = vector.broadcast %93 : vector<1x256xf32> to vector<8x256xf32>
    %95 = arith.addf %92, %94 : vector<8x256xf32>
    %cst_39 = arith.constant 0.000000e+00 : f32
    %96 = vector.broadcast %cst_39 : f32 to vector<8x256xf32>
    %97 = arith.maximumf %95, %96 : vector<8x256xf32>
    %98 = arith.truncf %97 : vector<8x256xf32> to vector<8x256xbf16>
    %c0_40 = arith.constant 0 : index
    %c0_41 = arith.constant 0 : index
    %99 = vector.load %arg6[%c0_40, %c0_41] : memref<256x128xbf16, #tpu.memory_space<vmem>>, vector<256x128xbf16>
    %cst_42 = arith.constant dense<0.000000e+00> : vector<8x128xf32>
    %100 = tpu.matmul %98, %99, %cst_42 {dimension_numbers = #tpu.dot_dimension_numbers<[1], [0], [0], [1], [0, 0, 1, 1], [], []>} : vector<8x256xbf16>, vector<256x128xbf16>, vector<8x128xf32> -> vector<8x128xf32>
    %c0_43 = arith.constant 0 : index
    %c0_44 = arith.constant 0 : index
    %101 = vector.load %arg7[%c0_43, %c0_44] : memref<1x128xf32, #tpu.memory_space<vmem>>, vector<1x128xf32>
    %102 = vector.broadcast %101 : vector<1x128xf32> to vector<8x128xf32>
    %103 = arith.addf %100, %102 : vector<8x128xf32>
    %c0_45 = arith.constant 0 : index
    %c0_46 = arith.constant 0 : index
    %104 = vector.load %arg10[%c0_45, %c0_46] : memref<8x128xf32, #tpu.memory_space<vmem>>, vector<8x128xf32>
    tpu.vector_store %arg10[%c0_45, %c0_46], %103 {strides = array<i32>} : memref<8x128xf32, #tpu.memory_space<vmem>>, vector<8x128xf32>,
    %c1280 = arith.constant 1280 : index
    %c0_47 = arith.constant 0 : index
    %105 = vector.load %arg2[%c1280, %c0_47] : memref<4352x256xbf16, #tpu.memory_space<vmem>>, vector<256x256xbf16>
    %106 = arith.truncf %27 : vector<8x256xf32> to vector<8x256xbf16>
    %cst_48 = arith.constant dense<0.000000e+00> : vector<8x256xf32>
    %107 = tpu.matmul %106, %105, %cst_48 {dimension_numbers = #tpu.dot_dimension_numbers<[1], [0], [0], [1], [0, 0, 1, 1], [], []>} : vector<8x256xbf16>, vector<256x256xbf16>, vector<8x256xf32> -> vector<8x256xf32>
    %c0_49 = arith.constant 0 : index
    %c0_50 = arith.constant 0 : index
    %108 = vector.load %arg4[%c0_49, %c0_50] : memref<48x256xbf16, #tpu.memory_space<vmem>>, vector<16x256xbf16>
    %cst_51 = arith.constant dense<0.000000e+00> : vector<8x256xf32>
    %109 = tpu.matmul %29, %108, %cst_51 {dimension_numbers = #tpu.dot_dimension_numbers<[1], [0], [0], [1], [0, 0, 1, 1], [], []>} : vector<8x16xbf16>, vector<16x256xbf16>, vector<8x256xf32> -> vector<8x256xf32>
    %110 = arith.addf %107, %109 : vector<8x256xf32>
    %c9 = arith.constant 9 : index
    %c0_52 = arith.constant 0 : index
    %111 = vector.load %arg3[%c9, %c0_52] : memref<21x256xf32, #tpu.memory_space<vmem>>, vector<1x256xf32>
    %112 = vector.broadcast %111 : vector<1x256xf32> to vector<8x256xf32>
    %113 = arith.addf %110, %112 : vector<8x256xf32>
    %cst_53 = arith.constant 0.000000e+00 : f32
    %114 = vector.broadcast %cst_53 : f32 to vector<8x256xf32>
    %115 = arith.maximumf %113, %114 : vector<8x256xf32>
    %c1536 = arith.constant 1536 : index
    %c0_54 = arith.constant 0 : index
    %116 = vector.load %arg2[%c1536, %c0_54] : memref<4352x256xbf16, #tpu.memory_space<vmem>>, vector<256x256xbf16>
    %117 = arith.truncf %115 : vector<8x256xf32> to vector<8x256xbf16>
    %cst_55 = arith.constant dense<0.000000e+00> : vector<8x256xf32>
    %118 = tpu.matmul %117, %116, %cst_55 {dimension_numbers = #tpu.dot_dimension_numbers<[1], [0], [0], [1], [0, 0, 1, 1], [], []>} : vector<8x256xbf16>, vector<256x256xbf16>, vector<8x256xf32> -> vector<8x256xf32>
    %c10 = arith.constant 10 : index
    %c0_56 = arith.constant 0 : index
    %119 = vector.load %arg3[%c10, %c0_56] : memref<21x256xf32, #tpu.memory_space<vmem>>, vector<1x256xf32>
    %120 = vector.broadcast %119 : vector<1x256xf32> to vector<8x256xf32>
    %121 = arith.addf %118, %120 : vector<8x256xf32>
    %cst_57 = arith.constant 0.000000e+00 : f32
    %122 = vector.broadcast %cst_57 : f32 to vector<8x256xf32>
    %123 = arith.maximumf %121, %122 : vector<8x256xf32>
    %c1792 = arith.constant 1792 : index
    %c0_58 = arith.constant 0 : index
    %124 = vector.load %arg2[%c1792, %c0_58] : memref<4352x256xbf16, #tpu.memory_space<vmem>>, vector<256x256xbf16>
    %125 = arith.truncf %123 : vector<8x256xf32> to vector<8x256xbf16>
    %cst_59 = arith.constant dense<0.000000e+00> : vector<8x256xf32>
    %126 = tpu.matmul %125, %124, %cst_59 {dimension_numbers = #tpu.dot_dimension_numbers<[1], [0], [0], [1], [0, 0, 1, 1], [], []>} : vector<8x256xbf16>, vector<256x256xbf16>, vector<8x256xf32> -> vector<8x256xf32>
    %c11 = arith.constant 11 : index
    %c0_60 = arith.constant 0 : index
    %127 = vector.load %arg3[%c11, %c0_60] : memref<21x256xf32, #tpu.memory_space<vmem>>, vector<1x256xf32>
    %128 = vector.broadcast %127 : vector<1x256xf32> to vector<8x256xf32>
    %129 = arith.addf %126, %128 : vector<8x256xf32>
    %cst_61 = arith.constant 0.000000e+00 : f32
    %130 = vector.broadcast %cst_61 : f32 to vector<8x256xf32>
    %131 = arith.maximumf %129, %130 : vector<8x256xf32>
    %c2048 = arith.constant 2048 : index
    %c0_62 = arith.constant 0 : index
    %132 = vector.load %arg2[%c2048, %c0_62] : memref<4352x256xbf16, #tpu.memory_space<vmem>>, vector<256x256xbf16>
    %133 = arith.truncf %131 : vector<8x256xf32> to vector<8x256xbf16>
    %cst_63 = arith.constant dense<0.000000e+00> : vector<8x256xf32>
    %134 = tpu.matmul %133, %132, %cst_63 {dimension_numbers = #tpu.dot_dimension_numbers<[1], [0], [0], [1], [0, 0, 1, 1], [], []>} : vector<8x256xbf16>, vector<256x256xbf16>, vector<8x256xf32> -> vector<8x256xf32>
    %c12 = arith.constant 12 : index
    %c0_64 = arith.constant 0 : index
    %135 = vector.load %arg3[%c12, %c0_64] : memref<21x256xf32, #tpu.memory_space<vmem>>, vector<1x256xf32>
    %136 = vector.broadcast %135 : vector<1x256xf32> to vector<8x256xf32>
    %137 = arith.addf %134, %136 : vector<8x256xf32>
    %cst_65 = arith.constant 0.000000e+00 : f32
    %138 = vector.broadcast %cst_65 : f32 to vector<8x256xf32>
    %139 = arith.maximumf %137, %138 : vector<8x256xf32>
    %c2304 = arith.constant 2304 : index
    %c0_66 = arith.constant 0 : index
    %140 = vector.load %arg2[%c2304, %c0_66] : memref<4352x256xbf16, #tpu.memory_space<vmem>>, vector<256x256xbf16>
    %141 = arith.truncf %139 : vector<8x256xf32> to vector<8x256xbf16>
    %cst_67 = arith.constant dense<0.000000e+00> : vector<8x256xf32>
    %142 = tpu.matmul %141, %140, %cst_67 {dimension_numbers = #tpu.dot_dimension_numbers<[1], [0], [0], [1], [0, 0, 1, 1], [], []>} : vector<8x256xbf16>, vector<256x256xbf16>, vector<8x256xf32> -> vector<8x256xf32>
    %c13 = arith.constant 13 : index
    %c0_68 = arith.constant 0 : index
    %143 = vector.load %arg3[%c13, %c0_68] : memref<21x256xf32, #tpu.memory_space<vmem>>, vector<1x256xf32>
    %144 = vector.broadcast %143 : vector<1x256xf32> to vector<8x256xf32>
    %145 = arith.addf %142, %144 : vector<8x256xf32>
    %c2560 = arith.constant 2560 : index
    %c0_69 = arith.constant 0 : index
    %146 = vector.load %arg2[%c2560, %c0_69] : memref<4352x256xbf16, #tpu.memory_space<vmem>>, vector<256x256xbf16>
    %c2816 = arith.constant 2816 : index
    %c0_70 = arith.constant 0 : index
    %147 = vector.load %arg2[%c2816, %c0_70] : memref<4352x256xbf16, #tpu.memory_space<vmem>>, vector<256x256xbf16>
    %c15 = arith.constant 15 : index
    %c0_71 = arith.constant 0 : index
    %148 = vector.load %arg3[%c15, %c0_71] : memref<21x256xf32, #tpu.memory_space<vmem>>, vector<1x256xf32>
    %149 = vector.shape_cast %148 : vector<1x256xf32> to vector<1x256xf32>
    %150 = vector.broadcast %149 : vector<1x256xf32> to vector<8x256xf32>
    %c16 = arith.constant 16 : index
    %c0_72 = arith.constant 0 : index
    %151 = vector.load %arg4[%c16, %c0_72] : memref<48x256xbf16, #tpu.memory_space<vmem>>, vector<16x256xbf16>
    %cst_73 = arith.constant dense<0.000000e+00> : vector<8x256xf32>
    %152 = tpu.matmul %29, %151, %cst_73 {dimension_numbers = #tpu.dot_dimension_numbers<[1], [0], [0], [1], [0, 0, 1, 1], [], []>} : vector<8x16xbf16>, vector<16x256xbf16>, vector<8x256xf32> -> vector<8x256xf32>
    %c14 = arith.constant 14 : index
    %c0_74 = arith.constant 0 : index
    %153 = vector.load %arg3[%c14, %c0_74] : memref<21x256xf32, #tpu.memory_space<vmem>>, vector<1x256xf32>
    %154 = vector.broadcast %153 : vector<1x256xf32> to vector<8x256xf32>
    %155 = arith.addf %152, %154 : vector<8x256xf32>
    %156 = arith.truncf %145 : vector<8x256xf32> to vector<8x256xbf16>
    %cst_75 = arith.constant dense<0.000000e+00> : vector<8x256xf32>
    %157 = tpu.matmul %156, %146, %cst_75 {dimension_numbers = #tpu.dot_dimension_numbers<[1], [0], [0], [1], [0, 0, 1, 1], [], []>} : vector<8x256xbf16>, vector<256x256xbf16>, vector<8x256xf32> -> vector<8x256xf32>
    %158 = arith.addf %157, %155 : vector<8x256xf32>
    %cst_76 = arith.constant 0.000000e+00 : f32
    %159 = vector.broadcast %cst_76 : f32 to vector<8x256xf32>
    %160 = arith.maximumf %158, %159 : vector<8x256xf32>
    %161 = arith.truncf %160 : vector<8x256xf32> to vector<8x256xbf16>
    %cst_77 = arith.constant dense<0.000000e+00> : vector<8x256xf32>
    %162 = tpu.matmul %161, %147, %cst_77 {dimension_numbers = #tpu.dot_dimension_numbers<[1], [0], [0], [1], [0, 0, 1, 1], [], []>} : vector<8x256xbf16>, vector<256x256xbf16>, vector<8x256xf32> -> vector<8x256xf32>
    %163 = arith.addf %162, %150 : vector<8x256xf32>
    %164 = arith.truncf %163 : vector<8x256xf32> to vector<8x256xbf16>
    %cst_78 = arith.constant dense<0.000000e+00> : vector<8x256xf32>
    %165 = tpu.matmul %164, %146, %cst_78 {dimension_numbers = #tpu.dot_dimension_numbers<[1], [0], [0], [1], [0, 0, 1, 1], [], []>} : vector<8x256xbf16>, vector<256x256xbf16>, vector<8x256xf32> -> vector<8x256xf32>
    %166 = arith.addf %165, %155 : vector<8x256xf32>
    %cst_79 = arith.constant 0.000000e+00 : f32
    %167 = vector.broadcast %cst_79 : f32 to vector<8x256xf32>
    %168 = arith.maximumf %166, %167 : vector<8x256xf32>
    %169 = arith.truncf %168 : vector<8x256xf32> to vector<8x256xbf16>
    %cst_80 = arith.constant dense<0.000000e+00> : vector<8x256xf32>
    %170 = tpu.matmul %169, %147, %cst_80 {dimension_numbers = #tpu.dot_dimension_numbers<[1], [0], [0], [1], [0, 0, 1, 1], [], []>} : vector<8x256xbf16>, vector<256x256xbf16>, vector<8x256xf32> -> vector<8x256xf32>
    %171 = arith.addf %170, %150 : vector<8x256xf32>
    %172 = arith.addf %171, %145 : vector<8x256xf32>
    %173 = arith.truncf %172 : vector<8x256xf32> to vector<8x256xbf16>
    %cst_81 = arith.constant dense<0.000000e+00> : vector<8x256xf32>
    %174 = tpu.matmul %173, %146, %cst_81 {dimension_numbers = #tpu.dot_dimension_numbers<[1], [0], [0], [1], [0, 0, 1, 1], [], []>} : vector<8x256xbf16>, vector<256x256xbf16>, vector<8x256xf32> -> vector<8x256xf32>
    %175 = arith.addf %174, %155 : vector<8x256xf32>
    %cst_82 = arith.constant 0.000000e+00 : f32
    %176 = vector.broadcast %cst_82 : f32 to vector<8x256xf32>
    %177 = arith.maximumf %175, %176 : vector<8x256xf32>
    %178 = arith.truncf %177 : vector<8x256xf32> to vector<8x256xbf16>
    %cst_83 = arith.constant dense<0.000000e+00> : vector<8x256xf32>
    %179 = tpu.matmul %178, %147, %cst_83 {dimension_numbers = #tpu.dot_dimension_numbers<[1], [0], [0], [1], [0, 0, 1, 1], [], []>} : vector<8x256xbf16>, vector<256x256xbf16>, vector<8x256xf32> -> vector<8x256xf32>
    %180 = arith.addf %179, %150 : vector<8x256xf32>
    %181 = arith.truncf %180 : vector<8x256xf32> to vector<8x256xbf16>
    %cst_84 = arith.constant dense<0.000000e+00> : vector<8x256xf32>
    %182 = tpu.matmul %181, %146, %cst_84 {dimension_numbers = #tpu.dot_dimension_numbers<[1], [0], [0], [1], [0, 0, 1, 1], [], []>} : vector<8x256xbf16>, vector<256x256xbf16>, vector<8x256xf32> -> vector<8x256xf32>
    %183 = arith.addf %182, %155 : vector<8x256xf32>
    %cst_85 = arith.constant 0.000000e+00 : f32
    %184 = vector.broadcast %cst_85 : f32 to vector<8x256xf32>
    %185 = arith.maximumf %183, %184 : vector<8x256xf32>
    %186 = arith.truncf %185 : vector<8x256xf32> to vector<8x256xbf16>
    %cst_86 = arith.constant dense<0.000000e+00> : vector<8x256xf32>
    %187 = tpu.matmul %186, %147, %cst_86 {dimension_numbers = #tpu.dot_dimension_numbers<[1], [0], [0], [1], [0, 0, 1, 1], [], []>} : vector<8x256xbf16>, vector<256x256xbf16>, vector<8x256xf32> -> vector<8x256xf32>
    %188 = arith.addf %187, %150 : vector<8x256xf32>
    %189 = arith.addf %188, %172 : vector<8x256xf32>
    %190 = arith.truncf %189 : vector<8x256xf32> to vector<8x256xbf16>
    %cst_87 = arith.constant dense<0.000000e+00> : vector<8x256xf32>
    %191 = tpu.matmul %190, %146, %cst_87 {dimension_numbers = #tpu.dot_dimension_numbers<[1], [0], [0], [1], [0, 0, 1, 1], [], []>} : vector<8x256xbf16>, vector<256x256xbf16>, vector<8x256xf32> -> vector<8x256xf32>
    %192 = arith.addf %191, %155 : vector<8x256xf32>
    %cst_88 = arith.constant 0.000000e+00 : f32
    %193 = vector.broadcast %cst_88 : f32 to vector<8x256xf32>
    %194 = arith.maximumf %192, %193 : vector<8x256xf32>
    %195 = arith.truncf %194 : vector<8x256xf32> to vector<8x256xbf16>
    %cst_89 = arith.constant dense<0.000000e+00> : vector<8x256xf32>
    %196 = tpu.matmul %195, %147, %cst_89 {dimension_numbers = #tpu.dot_dimension_numbers<[1], [0], [0], [1], [0, 0, 1, 1], [], []>} : vector<8x256xbf16>, vector<256x256xbf16>, vector<8x256xf32> -> vector<8x256xf32>
    %197 = arith.addf %196, %150 : vector<8x256xf32>
    %198 = arith.truncf %197 : vector<8x256xf32> to vector<8x256xbf16>
    %cst_90 = arith.constant dense<0.000000e+00> : vector<8x256xf32>
    %199 = tpu.matmul %198, %146, %cst_90 {dimension_numbers = #tpu.dot_dimension_numbers<[1], [0], [0], [1], [0, 0, 1, 1], [], []>} : vector<8x256xbf16>, vector<256x256xbf16>, vector<8x256xf32> -> vector<8x256xf32>
    %200 = arith.addf %199, %155 : vector<8x256xf32>
    %cst_91 = arith.constant 0.000000e+00 : f32
    %201 = vector.broadcast %cst_91 : f32 to vector<8x256xf32>
    %202 = arith.maximumf %200, %201 : vector<8x256xf32>
    %203 = arith.truncf %202 : vector<8x256xf32> to vector<8x256xbf16>
    %cst_92 = arith.constant dense<0.000000e+00> : vector<8x256xf32>
    %204 = tpu.matmul %203, %147, %cst_92 {dimension_numbers = #tpu.dot_dimension_numbers<[1], [0], [0], [1], [0, 0, 1, 1], [], []>} : vector<8x256xbf16>, vector<256x256xbf16>, vector<8x256xf32> -> vector<8x256xf32>
    %205 = arith.addf %204, %150 : vector<8x256xf32>
    %206 = arith.addf %205, %189 : vector<8x256xf32>
    %207 = arith.truncf %206 : vector<8x256xf32> to vector<8x256xbf16>
    %cst_93 = arith.constant dense<0.000000e+00> : vector<8x256xf32>
    %208 = tpu.matmul %207, %146, %cst_93 {dimension_numbers = #tpu.dot_dimension_numbers<[1], [0], [0], [1], [0, 0, 1, 1], [], []>} : vector<8x256xbf16>, vector<256x256xbf16>, vector<8x256xf32> -> vector<8x256xf32>
    %209 = arith.addf %208, %155 : vector<8x256xf32>
    %cst_94 = arith.constant 0.000000e+00 : f32
    %210 = vector.broadcast %cst_94 : f32 to vector<8x256xf32>
    %211 = arith.maximumf %209, %210 : vector<8x256xf32>
    %212 = arith.truncf %211 : vector<8x256xf32> to vector<8x256xbf16>
    %cst_95 = arith.constant dense<0.000000e+00> : vector<8x256xf32>
    %213 = tpu.matmul %212, %147, %cst_95 {dimension_numbers = #tpu.dot_dimension_numbers<[1], [0], [0], [1], [0, 0, 1, 1], [], []>} : vector<8x256xbf16>, vector<256x256xbf16>, vector<8x256xf32> -> vector<8x256xf32>
    %214 = arith.addf %213, %150 : vector<8x256xf32>
    %215 = arith.truncf %214 : vector<8x256xf32> to vector<8x256xbf16>
    %cst_96 = arith.constant dense<0.000000e+00> : vector<8x256xf32>
    %216 = tpu.matmul %215, %146, %cst_96 {dimension_numbers = #tpu.dot_dimension_numbers<[1], [0], [0], [1], [0, 0, 1, 1], [], []>} : vector<8x256xbf16>, vector<256x256xbf16>, vector<8x256xf32> -> vector<8x256xf32>
    %217 = arith.addf %216, %155 : vector<8x256xf32>
    %cst_97 = arith.constant 0.000000e+00 : f32
    %218 = vector.broadcast %cst_97 : f32 to vector<8x256xf32>
    %219 = arith.maximumf %217, %218 : vector<8x256xf32>
    %220 = arith.truncf %219 : vector<8x256xf32> to vector<8x256xbf16>
    %cst_98 = arith.constant dense<0.000000e+00> : vector<8x256xf32>
    %221 = tpu.matmul %220, %147, %cst_98 {dimension_numbers = #tpu.dot_dimension_numbers<[1], [0], [0], [1], [0, 0, 1, 1], [], []>} : vector<8x256xbf16>, vector<256x256xbf16>, vector<8x256xf32> -> vector<8x256xf32>
    %222 = arith.addf %221, %150 : vector<8x256xf32>
    %223 = arith.addf %222, %206 : vector<8x256xf32>
    %c3072 = arith.constant 3072 : index
    %c0_99 = arith.constant 0 : index
    %224 = vector.load %arg2[%c3072, %c0_99] : memref<4352x256xbf16, #tpu.memory_space<vmem>>, vector<256x256xbf16>
    %225 = arith.truncf %223 : vector<8x256xf32> to vector<8x256xbf16>
    %cst_100 = arith.constant dense<0.000000e+00> : vector<8x256xf32>
    %226 = tpu.matmul %225, %224, %cst_100 {dimension_numbers = #tpu.dot_dimension_numbers<[1], [0], [0], [1], [0, 0, 1, 1], [], []>} : vector<8x256xbf16>, vector<256x256xbf16>, vector<8x256xf32> -> vector<8x256xf32>
    %c32 = arith.constant 32 : index
    %c0_101 = arith.constant 0 : index
    %227 = vector.load %arg4[%c32, %c0_101] : memref<48x256xbf16, #tpu.memory_space<vmem>>, vector<16x256xbf16>
    %cst_102 = arith.constant dense<0.000000e+00> : vector<8x256xf32>
    %228 = tpu.matmul %29, %227, %cst_102 {dimension_numbers = #tpu.dot_dimension_numbers<[1], [0], [0], [1], [0, 0, 1, 1], [], []>} : vector<8x16xbf16>, vector<16x256xbf16>, vector<8x256xf32> -> vector<8x256xf32>
    %229 = arith.addf %226, %228 : vector<8x256xf32>
    %c16_103 = arith.constant 16 : index
    %c0_104 = arith.constant 0 : index
    %230 = vector.load %arg3[%c16_103, %c0_104] : memref<21x256xf32, #tpu.memory_space<vmem>>, vector<1x256xf32>
    %231 = vector.broadcast %230 : vector<1x256xf32> to vector<8x256xf32>
    %232 = arith.addf %229, %231 : vector<8x256xf32>
    %cst_105 = arith.constant 0.000000e+00 : f32
    %233 = vector.broadcast %cst_105 : f32 to vector<8x256xf32>
    %234 = arith.maximumf %232, %233 : vector<8x256xf32>
    %c3328 = arith.constant 3328 : index
    %c0_106 = arith.constant 0 : index
    %235 = vector.load %arg2[%c3328, %c0_106] : memref<4352x256xbf16, #tpu.memory_space<vmem>>, vector<256x256xbf16>
    %236 = arith.truncf %234 : vector<8x256xf32> to vector<8x256xbf16>
    %cst_107 = arith.constant dense<0.000000e+00> : vector<8x256xf32>
    %237 = tpu.matmul %236, %235, %cst_107 {dimension_numbers = #tpu.dot_dimension_numbers<[1], [0], [0], [1], [0, 0, 1, 1], [], []>} : vector<8x256xbf16>, vector<256x256xbf16>, vector<8x256xf32> -> vector<8x256xf32>
    %c17 = arith.constant 17 : index
    %c0_108 = arith.constant 0 : index
    %238 = vector.load %arg3[%c17, %c0_108] : memref<21x256xf32, #tpu.memory_space<vmem>>, vector<1x256xf32>
    %239 = vector.broadcast %238 : vector<1x256xf32> to vector<8x256xf32>
    %240 = arith.addf %237, %239 : vector<8x256xf32>
    %cst_109 = arith.constant 0.000000e+00 : f32
    %241 = vector.broadcast %cst_109 : f32 to vector<8x256xf32>
    %242 = arith.maximumf %240, %241 : vector<8x256xf32>
    %c3584 = arith.constant 3584 : index
    %c0_110 = arith.constant 0 : index
    %243 = vector.load %arg2[%c3584, %c0_110] : memref<4352x256xbf16, #tpu.memory_space<vmem>>, vector<256x256xbf16>
    %244 = arith.truncf %242 : vector<8x256xf32> to vector<8x256xbf16>
    %cst_111 = arith.constant dense<0.000000e+00> : vector<8x256xf32>
    %245 = tpu.matmul %244, %243, %cst_111 {dimension_numbers = #tpu.dot_dimension_numbers<[1], [0], [0], [1], [0, 0, 1, 1], [], []>} : vector<8x256xbf16>, vector<256x256xbf16>, vector<8x256xf32> -> vector<8x256xf32>
    %c18 = arith.constant 18 : index
    %c0_112 = arith.constant 0 : index
    %246 = vector.load %arg3[%c18, %c0_112] : memref<21x256xf32, #tpu.memory_space<vmem>>, vector<1x256xf32>
    %247 = vector.broadcast %246 : vector<1x256xf32> to vector<8x256xf32>
    %248 = arith.addf %245, %247 : vector<8x256xf32>
    %cst_113 = arith.constant 0.000000e+00 : f32
    %249 = vector.broadcast %cst_113 : f32 to vector<8x256xf32>
    %250 = arith.maximumf %248, %249 : vector<8x256xf32>
    %c3840 = arith.constant 3840 : index
    %c0_114 = arith.constant 0 : index
    %251 = vector.load %arg2[%c3840, %c0_114] : memref<4352x256xbf16, #tpu.memory_space<vmem>>, vector<256x256xbf16>
    %252 = arith.truncf %250 : vector<8x256xf32> to vector<8x256xbf16>
    %cst_115 = arith.constant dense<0.000000e+00> : vector<8x256xf32>
    %253 = tpu.matmul %252, %251, %cst_115 {dimension_numbers = #tpu.dot_dimension_numbers<[1], [0], [0], [1], [0, 0, 1, 1], [], []>} : vector<8x256xbf16>, vector<256x256xbf16>, vector<8x256xf32> -> vector<8x256xf32>
    %c19 = arith.constant 19 : index
    %c0_116 = arith.constant 0 : index
    %254 = vector.load %arg3[%c19, %c0_116] : memref<21x256xf32, #tpu.memory_space<vmem>>, vector<1x256xf32>
    %255 = vector.broadcast %254 : vector<1x256xf32> to vector<8x256xf32>
    %256 = arith.addf %253, %255 : vector<8x256xf32>
    %cst_117 = arith.constant 0.000000e+00 : f32
    %257 = vector.broadcast %cst_117 : f32 to vector<8x256xf32>
    %258 = arith.maximumf %256, %257 : vector<8x256xf32>
    %c4096 = arith.constant 4096 : index
    %c0_118 = arith.constant 0 : index
    %259 = vector.load %arg2[%c4096, %c0_118] : memref<4352x256xbf16, #tpu.memory_space<vmem>>, vector<256x256xbf16>
    %260 = arith.truncf %258 : vector<8x256xf32> to vector<8x256xbf16>
    %cst_119 = arith.constant dense<0.000000e+00> : vector<8x256xf32>
    %261 = tpu.matmul %260, %259, %cst_119 {dimension_numbers = #tpu.dot_dimension_numbers<[1], [0], [0], [1], [0, 0, 1, 1], [], []>} : vector<8x256xbf16>, vector<256x256xbf16>, vector<8x256xf32> -> vector<8x256xf32>
    %c20 = arith.constant 20 : index
    %c0_120 = arith.constant 0 : index
    %262 = vector.load %arg3[%c20, %c0_120] : memref<21x256xf32, #tpu.memory_space<vmem>>, vector<1x256xf32>
    %263 = vector.broadcast %262 : vector<1x256xf32> to vector<8x256xf32>
    %264 = arith.addf %261, %263 : vector<8x256xf32>
    %c0_121 = arith.constant 0 : index
    %c0_122 = arith.constant 0 : index
    %265 = vector.load %arg9[%c0_121, %c0_122] : memref<8x256xf32, #tpu.memory_space<vmem>>, vector<8x256xf32>
    tpu.vector_store %arg9[%c0_121, %c0_122], %264 {strides = array<i32>} : memref<8x256xf32, #tpu.memory_space<vmem>>, vector<8x256xf32>,
    %c0_123 = arith.constant 0 : index
    %c0_124 = arith.constant 0 : index
    %266 = vector.load %arg8[%c0_123, %c0_124] : memref<8x256xf32, #tpu.memory_space<vmem>>, vector<8x256xf32>
    tpu.vector_store %arg8[%c0_123, %c0_124], %28 {strides = array<i32>} : memref<8x256xf32, #tpu.memory_space<vmem>>, vector<8x256xf32>,
    return
  }
}

</mosaic_0001>

<bundles_post_ra>
// kernel: icm_forward.1
= control target key start
LH: loop header
LB: loop body
LE: loop exit
PB: predicated region body
PF: predicated region fallthrough
CT: control target
= control target key end

     0   :  { %16 = vsyncpa [#allocation3], 0  ;;  %s9861_s0 = inlined_call_operand.vmem [shape: bf16[16,128], index: 0, kind: input, shape index: {}]   ;;  %s9862_s1 = inlined_call_operand.vmem [shape: bf16[8,16], index: 1, kind: input, shape index: {}]   ;;  %s9863_s2 = inlined_call_operand.hbm [shape: bf16[4352,256], index: 2, kind: input, shape index: {}]   ;;  %s9864_s3 = inlined_call_operand.hbm [shape: f32[21,256], index: 3, kind: input, shape index: {}]   ;;  %s9865_s4 = inlined_call_operand.hbm [shape: bf16[48,256], index: 4, kind: input, shape index: {}]   ;;  %s9866_s5 = inlined_call_operand.hbm [shape: bf16[128,256], index: 5, kind: input, shape index: {}]   ;;  %s9867_s6 = inlined_call_operand.hbm [shape: bf16[256,128], index: 6, kind: input, shape index: {}]   ;;  %s9868_s7 = inlined_call_operand.hbm [shape: f32[1,128], index: 7, kind: input, shape index: {}]   ;;  %s9869_s8 = inlined_call_operand.vmem [shape: f32[8,256], index: 8, kind: output, shape index: {0}]   ;;  %s9870_s9 = inlined_call_operand.vmem [shape: f32[8,256], index: 9, kind: output, shape index: {1}]   ;;  %s9871_s10 = inlined_call_operand.vmem [shape: f32[8,128], index: 10, kind: output, shape index: {2}]  }
   0x1   :  { %17 = vsyncpa [#allocation5], 0 }
   0x2   :  { %18 = vsyncpa [#allocation8], 0  ;;  %s41_s15 = sshll.u32 %s9864_s3, 4  ;;  %s42_s15 = int_to_ptr.hbm [resolvable:$true] %s41_s15 }
   0x3   :  { %19 = vsyncpa [#allocation11], 0  ;;  %s8936_s16 = smov [#allocation4]   ;;  %s8937_s18 = smov 256  }
   0x4   :  { %s43_s17 = sshll.u32 %s8936_s16, 4  ;;  %s8938_s19 = smov 16   ;;  %s44_s17 = int_to_ptr.vmem [resolvable:$true] %s43_s17 }
   0x5   :  { %49 = dma.hbm_to_vmem [thread:$0]  %s42_s15, 768, %s44_s17, [#allocation5], %s8937_s18, %s8937_s18, %s8938_s19  }
   0x6   :  { %s67_s22 = sshll.u32 %s9866_s5, 4  ;;  %s8939_s23 = smov [#allocation7]   ;;  %s68_s22 = int_to_ptr.hbm [resolvable:$true] %s67_s22 }
   0x7   :  { %s69_s24 = sshll.u32 %s8939_s23, 4  ;;  %s28_s27 = sshll.u32 %s9863_s2, 4  ;;  %s70_s24 = int_to_ptr.vmem [resolvable:$true] %s69_s24  ;;  %s29_s27 = int_to_ptr.hbm [resolvable:$true] %s28_s27 }
   0x8   :  { %s8940_s3 = smov 128   ;;  %s8941_s28 = smov 8  }
   0x9   :  { %75 = dma.hbm_to_vmem [thread:$0]  %s68_s22, 2048, %s70_s24, [#allocation8], %s8940_s3, %s8940_s3, %s8941_s28  }
   0xa   :  { %s54_s11 = sshll.u32 %s9865_s4, 4  ;;  %s8942_s12 = smov [#allocation2]   ;;  %s55_s11 = int_to_ptr.hbm [resolvable:$true] %s54_s11 }
   0xb   :  { %s30_s13 = sshll.u32 %s8942_s12, 4  ;;  %s8943_s5 = smov [#allocation6]   ;;  %s31_s13 = int_to_ptr.vmem [resolvable:$true] %s30_s13 }
   0xc   :  { %36 = dma.hbm_to_vmem [thread:$0]  %s29_s27, 69632, %s31_s13, [#allocation3], %s8940_s3, %s8940_s3, %s8941_s28  }
   0xd   :  { %s56_s14 = sshll.u32 %s8943_s5, 4  ;;  %s80_s2 = sshll.u32 %s9867_s6, 4  ;;  %s57_s14 = int_to_ptr.vmem [resolvable:$true] %s56_s14  ;;  %s81_s2 = int_to_ptr.hbm [resolvable:$true] %s80_s2 }
   0xe   :  { %62 = dma.hbm_to_vmem [thread:$0]  %s55_s11, 768, %s57_s14, [#allocation5], %s8940_s3, %s8940_s3, %s8941_s28  }
   0xf   :  { %s8944_s17 = smov [#allocation9]   ;;  %s94_s4 = sshll.u32 %s9868_s7, 4  ;;  %s95_s4 = int_to_ptr.hbm [resolvable:$true] %s94_s4 }
  0x10   :  { %s82_s18 = sshll.u32 %s8944_s17, 4  ;;  %s8945_s21 = smov 64   ;;  %s83_s18 = int_to_ptr.vmem [resolvable:$true] %s82_s18 }
  0x11   :  { %s8946_s22 = smov 4   ;;  %s8947_s23 = smov [#allocation10]  }
  0x12   :  { %88 = dma.hbm_to_vmem [thread:$0]  %s81_s2, 2048, %s83_s18, [#allocation8], %s8945_s21, %s8945_s21, %s8946_s22  }
  0x13   :  { %s96_s24 = sshll.u32 %s8947_s23, 4  ;;  %s97_s24 = int_to_ptr.vmem [resolvable:$true] %s96_s24 }
  0x14   :  { %99 = dma.hbm_to_vmem [thread:$0]  %s95_s4, 16, %s97_s24, [#allocation11]  }
  0x15   :  { %8928 = dma.done.wait [#allocation3], 69632  }
  0x16   :  { %8929 = vsyncadd [#allocation3], 4294897664 }
  0x17   :  { %8930 = dma.done.wait [#allocation5], 1536  }
  0x18   :  { %8931 = vsyncadd [#allocation5], 4294965760 }
  0x19   :  { %8932 = dma.done.wait [#allocation8], 4096  }
  0x1a   :  { %8933 = vsyncadd [#allocation8], 4294963200 }
  0x1b   :  { %8934 = dma.done.wait [#allocation11], 16  }
  0x1c   :  { %8935 = vsyncadd [#allocation11], 4294967280  ;;  %v5901_v0 = vld [vmem:[#allocation7 + $0x70] sm:$0xf]  ;;  %v8193_v1 = vld [vmem:[#allocation7 + $0x74] sm:$0xf0] }
  0x1d   :  { %v8192_v2 = vld [vmem:[#allocation7 + $0x74] sm:$0xf]  ;;  %v5902_v3 = vor.u32 %v8193_v1, %v5901_v0  ;;  %v5903_v4 = vld [vmem:[#allocation7 + $0x78] sm:$0xf0]  ;;  %v5893_v5 = vld [vmem:[#allocation7 + $0x60] sm:$0xf] }
  0x1e   :  { %v8191_v6 = vld [vmem:[#allocation7 + $0x64] sm:$0xf0]  ;;  %v5906_v7 = vor.u32 %v8192_v2, %v5903_v4  ;;  %v8190_v8 = vld [vmem:[#allocation7 + $0x64] sm:$0xf]  ;;  %v5895_v9 = vld [vmem:[#allocation7 + $0x68] sm:$0xf0] }
  0x1f   :  { %240 = vmatpush.bf16.msra.mxu0 %v5902_v3  ;;  %v5894_v10 = vor.u32 %v8191_v6, %v5893_v5  ;;  %v5898_v11 = vor.u32 %v8190_v8, %v5895_v9  ;;  %v5885_v12 = vld [vmem:[#allocation7 + $0x50] sm:$0xf]  ;;  %v8189_v13 = vld [vmem:[#allocation7 + $0x54] sm:$0xf0]  ;;  %v8188_v14 = vld [vmem:[#allocation7 + $0x54] sm:$0xf] }
  0x20   :  { %254 = vmatpush.bf16.msra.mxu1 %v5906_v7  ;;  %v5887_v15 = vld [vmem:[#allocation7 + $0x58] sm:$0xf0]  ;;  %v5886_v16 = vor.u32 %v8189_v13, %v5885_v12  ;;  %v5877_v18 = vld [vmem:[#allocation7 + $0x40] sm:$0xf]  ;;  %v8187_v19 = vld [vmem:[#allocation7 + $0x44] sm:$0xf0] }
  0x21   :  { %v5890_v17 = vor.u32 %v8188_v14, %v5887_v15  ;;  %v8186_v20 = vld [vmem:[#allocation7 + $0x44] sm:$0xf]  ;;  %v5879_v21 = vld [vmem:[#allocation7 + $0x48] sm:$0xf0]  ;;  %v5878_v22 = vor.u32 %v8187_v19, %v5877_v18  ;;  %v5965_v23 = vld [vmem:[#allocation2 + $0x70] sm:$0xf] }
  0x22   :  { %v8209_v24 = vld [vmem:[#allocation2 + $0x74] sm:$0xf0]  ;;  %v6029_v25 = vld [vmem:[#allocation2 + $0xf0] sm:$0xf]  ;;  %v5882_v26 = vor.u32 %v8186_v20, %v5879_v21  ;;  %v8184_v31 = vld [vmem:[#allocation7 + $0x34] sm:$0xf] }
  0x23   :  { %241 = vmatpush.bf16.msra.mxu0 %v5894_v10  ;;  %v5869_v27 = vld [vmem:[#allocation7 + $0x30] sm:$0xf]  ;;  %v8185_v28 = vld [vmem:[#allocation7 + $0x34] sm:$0xf0]  ;;  %v5966_v29 = vor.u32 %v8209_v24, %v5965_v23  ;;  %v5871_v32 = vld [vmem:[#allocation7 + $0x38] sm:$0xf0] }
  0x24   :  { %255 = vmatpush.bf16.msra.mxu1 %v5898_v11  ;;  %v8225_v30 = vld [vmem:[#allocation2 + $0xf4] sm:$0xf0]  ;;  %v5957_v34 = vld [vmem:[#allocation2 + $0x60] sm:$0xf]  ;;  %v8207_v35 = vld [vmem:[#allocation2 + $0x64] sm:$0xf0]  ;;  %v5870_v38 = vor.u32 %v8185_v28, %v5869_v27  ;;  %v5874_v43 = vor.u32 %v8184_v31, %v5871_v32 }
  0x25   :  { %v6030_v33 = vor.u32 %v8225_v30, %v6029_v25  ;;  %473 = vmatpush.bf16.msra.mxu2 %v5966_v29  ;;  %v6021_v36 = vld [vmem:[#allocation2 + $0xe0] sm:$0xf]  ;;  %v8223_v37 = vld [vmem:[#allocation2 + $0xe4] sm:$0xf0]  ;;  %v5958_v41 = vor.u32 %v8207_v35, %v5957_v34  ;;  %v8182_v44 = vld [vmem:[#allocation7 + $0x24] sm:$0xf] }
  0x26   :  { %v5861_v39 = vld [vmem:[#allocation7 + $0x20] sm:$0xf]  ;;  %v8183_v40 = vld [vmem:[#allocation7 + $0x24] sm:$0xf0]  ;;  %v6022_v42 = vor.u32 %v8223_v37, %v6021_v36  ;;  %v5949_v45 = vld [vmem:[#allocation2 + $0x50] sm:$0xf] }
  0x27   :  { %242 = vmatpush.bf16.msra.mxu0 %v5886_v16  ;;  %487 = vmatpush.bf16.msra.mxu3 %v6030_v33  ;;  %v8205_v46 = vld [vmem:[#allocation2 + $0x54] sm:$0xf0]  ;;  %v5863_v47 = vld [vmem:[#allocation7 + $0x28] sm:$0xf0]  ;;  %v6013_v48 = vld [vmem:[#allocation2 + $0xd0] sm:$0xf]  ;;  %v5862_v51 = vor.u32 %v8183_v40, %v5861_v39 }
  0x28   :  { %256 = vmatpush.bf16.msra.mxu1 %v5890_v17  ;;  %v8221_v49 = vld [vmem:[#allocation2 + $0xd4] sm:$0xf0]  ;;  %v5950_v50 = vor.u32 %v8205_v46, %v5949_v45  ;;  %v5853_v52 = vld [vmem:[#allocation7 + $0x10] sm:$0xf]  ;;  %v5941_v54 = vld [vmem:[#allocation2 + $0x40] sm:$0xf]  ;;  %v5866_v56 = vor.u32 %v8182_v44, %v5863_v47 }
  0x29   :  { %474 = vmatpush.bf16.msra.mxu2 %v5958_v41  ;;  %v6014_v53 = vor.u32 %v8221_v49, %v6013_v48  ;;  %v8203_v55 = vld [vmem:[#allocation2 + $0x44] sm:$0xf0]  ;;  %v8181_v57 = vld [vmem:[#allocation7 + $0x14] sm:$0xf0]  ;;  %v6005_v58 = vld [vmem:[#allocation2 + $0xc0] sm:$0xf] }
  0x2a   :  { %v8219_v59 = vld [vmem:[#allocation2 + $0xc4] sm:$0xf0]  ;;  %v8180_v60 = vld [vmem:[#allocation7 + $0x14] sm:$0xf]  ;;  %v5855_v61 = vld [vmem:[#allocation7 + $0x18] sm:$0xf0]  ;;  %v5942_v62 = vor.u32 %v8203_v55, %v5941_v54  ;;  %v5854_v63 = vor.u32 %v8181_v57, %v5853_v52 }
  0x2b   :  { %243 = vmatpush.bf16.msra.mxu0 %v5878_v22  ;;  %488 = vmatpush.bf16.msra.mxu3 %v6022_v42  ;;  %v6006_v0 = vor.u32 %v8219_v59, %v6005_v58  ;;  %v5858_v1 = vor.u32 %v8180_v60, %v5855_v61  ;;  %v5845_v2 = vld [vmem:[#allocation7] sm:$0xf]  ;;  %v8179_v3 = vld [vmem:[#allocation7 + $0x4] sm:$0xf0]  ;;  %v8178_v4 = vld [vmem:[#allocation7 + $0x4] sm:$0xf] }
  0x2c   :  { %257 = vmatpush.bf16.msra.mxu1 %v5882_v26  ;;  %v5847_v5 = vld [vmem:[#allocation7 + $0x8] sm:$0xf0]  ;;  %v8208_v6 = vld [vmem:[#allocation2 + $0x74] sm:$0xf]  ;;  %v5967_v7 = vld [vmem:[#allocation2 + $0x78] sm:$0xf0]  ;;  %v5846_v10 = vor.u32 %v8179_v3, %v5845_v2 }
  0x2d   :  { %475 = vmatpush.bf16.msra.mxu2 %v5950_v50  ;;  %v8224_v8 = vld [vmem:[#allocation2 + $0xf4] sm:$0xf]  ;;  %v6031_v9 = vld [vmem:[#allocation2 + $0xf8] sm:$0xf0]  ;;  %v5850_v11 = vor.u32 %v8178_v4, %v5847_v5  ;;  %v5970_v12 = vor.u32 %v8208_v6, %v5967_v7  ;;  %v8206_v14 = vld [vmem:[#allocation2 + $0x64] sm:$0xf] }
  0x2e   :  { %v6034_v13 = vor.u32 %v8224_v8, %v6031_v9  ;;  %v5959_v15 = vld [vmem:[#allocation2 + $0x68] sm:$0xf0]  ;;  %v8177_v16 = vld [vmem:[%s9861_s0] sm:$0xff]  ;;  %v8204_v21 = vld [vmem:[#allocation2 + $0x54] sm:$0xf]  ;;  %vm1910_vm7 = vcmask 130048  }
  0x2f   :  { %244 = vmatpush.bf16.msra.mxu0 %v5870_v38  ;;  %489 = vmatpush.bf16.msra.mxu3 %v6014_v53  ;;  %v8222_v17 = vld [vmem:[#allocation2 + $0xe4] sm:$0xf]  ;;  %v6023_v18 = vld [vmem:[#allocation2 + $0xe8] sm:$0xf0]  ;;  %v5962_v19 = vor.u32 %v8206_v14, %v5959_v15  ;;  %v5951_v22 = vld [vmem:[#allocation2 + $0x58] sm:$0xf0] }
  0x30   :  { %258 = vmatpush.bf16.msra.mxu1 %v5874_v43  ;;  %v6026_v20 = vor.u32 %v8222_v17, %v6023_v18  ;;  %v8220_v23 = vld [vmem:[#allocation2 + $0xd4] sm:$0xf]  ;;  %v6015_v24 = vld [vmem:[#allocation2 + $0xd8] sm:$0xf0]  ;;  %v5954_v25 = vor.u32 %v8204_v21, %v5951_v22  ;;  %v8202_v27 = vld [vmem:[#allocation2 + $0x44] sm:$0xf] }
  0x31   :  { %476 = vmatpush.bf16.msra.mxu2 %v5942_v62  ;;  %v6018_v26 = vor.u32 %v8220_v23, %v6015_v24  ;;  %v5943_v28 = vld [vmem:[#allocation2 + $0x48] sm:$0xf0]  ;;  %v8218_v29 = vld [vmem:[#allocation2 + $0xc4] sm:$0xf]  ;;  %v5933_v33 = vld [vmem:[#allocation2 + $0x30] sm:$0xf] }
  0x32   :  { %v6007_v30 = vld [vmem:[#allocation2 + $0xc8] sm:$0xf0]  ;;  %v5946_v31 = vor.u32 %v8202_v27, %v5943_v28  ;;  %v8201_v34 = vld [vmem:[#allocation2 + $0x34] sm:$0xf0]  ;;  %v5997_v35 = vld [vmem:[#allocation2 + $0xb0] sm:$0xf] }
  0x33   :  { %245 = vmatpush.bf16.msra.mxu0 %v5862_v51  ;;  %490 = vmatpush.bf16.msra.mxu3 %v6006_v0  ;;  %v6010_v32 = vor.u32 %v8218_v29, %v6007_v30  ;;  %v5934_v36 = vor.u32 %v8201_v34, %v5933_v33  ;;  %v8217_v37 = vld [vmem:[#allocation2 + $0xb4] sm:$0xf0]  ;;  %v8200_v38 = vld [vmem:[#allocation2 + $0x34] sm:$0xf]  ;;  %v5935_v39 = vld [vmem:[#allocation2 + $0x38] sm:$0xf0] }
  0x34   :  { %259 = vmatpush.bf16.msra.mxu1 %v5866_v56  ;;  %v5998_v40 = vor.u32 %v8217_v37, %v5997_v35  ;;  %v5938_v41 = vor.u32 %v8200_v38, %v5935_v39  ;;  %v8216_v42 = vld [vmem:[#allocation2 + $0xb4] sm:$0xf]  ;;  %v5999_v43 = vld [vmem:[#allocation2 + $0xb8] sm:$0xf0]  ;;  %v5925_v45 = vld [vmem:[#allocation2 + $0x20] sm:$0xf] }
  0x35   :  { %477 = vmatpush.bf16.msra.mxu2 %v5934_v36  ;;  %v6002_v44 = vor.u32 %v8216_v42, %v5999_v43  ;;  %v8199_v46 = vld [vmem:[#allocation2 + $0x24] sm:$0xf0]  ;;  %v5989_v48 = vld [vmem:[#allocation2 + $0xa0] sm:$0xf]  ;;  %v8198_v50 = vld [vmem:[#allocation2 + $0x24] sm:$0xf] }
  0x36   :  { %v5926_v47 = vor.u32 %v8199_v46, %v5925_v45  ;;  %v8215_v49 = vld [vmem:[#allocation2 + $0xa4] sm:$0xf0]  ;;  %v5927_v52 = vld [vmem:[#allocation2 + $0x28] sm:$0xf0]  ;;  %v8214_v53 = vld [vmem:[#allocation2 + $0xa4] sm:$0xf] }
  0x37   :  { %246 = vmatpush.bf16.msra.mxu0 %v5854_v63  ;;  %491 = vmatpush.bf16.msra.mxu3 %v5998_v40  ;;  %v5990_v51 = vor.u32 %v8215_v49, %v5989_v48  ;;  %v5991_v54 = vld [vmem:[#allocation2 + $0xa8] sm:$0xf0]  ;;  %v5930_v55 = vor.u32 %v8198_v50, %v5927_v52  ;;  %v5917_v57 = vld [vmem:[#allocation2 + $0x10] sm:$0xf]  ;;  %v8197_v58 = vld [vmem:[#allocation2 + $0x14] sm:$0xf0] }
  0x38   :  { %260 = vmatpush.bf16.msra.mxu1 %v5858_v1  ;;  %v5994_v56 = vor.u32 %v8214_v53, %v5991_v54  ;;  %v5981_v59 = vld [vmem:[#allocation2 + $0x90] sm:$0xf]  ;;  %v5918_v60 = vor.u32 %v8197_v58, %v5917_v57  ;;  %v8213_v61 = vld [vmem:[#allocation2 + $0x94] sm:$0xf0]  ;;  %v8196_v62 = vld [vmem:[#allocation2 + $0x14] sm:$0xf] }
  0x39   :  { %478 = vmatpush.bf16.msra.mxu2 %v5926_v47  ;;  %v5919_v63 = vld [vmem:[#allocation2 + $0x18] sm:$0xf0]  ;;  %v5982_v0 = vor.u32 %v8213_v61, %v5981_v59  ;;  %v8212_v2 = vld [vmem:[#allocation2 + $0x94] sm:$0xf]  ;;  %v5909_v5 = vld [vmem:[#allocation2] sm:$0xf] }
  0x3a   :  { %v5922_v1 = vor.u32 %v8196_v62, %v5919_v63  ;;  %v5983_v3 = vld [vmem:[#allocation2 + $0x98] sm:$0xf0]  ;;  %v8195_v6 = vld [vmem:[#allocation2 + $0x4] sm:$0xf0]  ;;  %v5973_v7 = vld [vmem:[#allocation2 + $0x80] sm:$0xf] }
  0x3b   :  { %247 = vmatpush.bf16.msra.mxu0 %v5846_v10  ;;  %492 = vmatpush.bf16.msra.mxu3 %v5990_v51  ;;  %v5986_v4 = vor.u32 %v8212_v2, %v5983_v3  ;;  %v5910_v8 = vor.u32 %v8195_v6, %v5909_v5  ;;  %v8211_v9 = vld [vmem:[#allocation2 + $0x84] sm:$0xf0]  ;;  %v8194_v10 = vld [vmem:[#allocation2 + $0x4] sm:$0xf]  ;;  %v5975_v15 = vld [vmem:[#allocation2 + $0x88] sm:$0xf0] }
  0x3c   :  { %261 = vmatpush.bf16.msra.mxu1 %v5850_v11  ;;  %v5911_v11 = vld [vmem:[#allocation2 + $0x8] sm:$0xf0]  ;;  %v8210_v14 = vld [vmem:[#allocation2 + $0x84] sm:$0xf]  ;;  %v6157_v17 = vld [vmem:[#allocation2 + $0x1f0] sm:$0xf] }
  0x3d   :  { %479 = vmatpush.bf16.msra.mxu2 %v5918_v60  ;;  %v8257_v18 = vld [vmem:[#allocation2 + $0x1f4] sm:$0xf0]  ;;  %v6159_v21 = vld [vmem:[#allocation2 + $0x1f8] sm:$0xf0]  ;;  %v6149_v22 = vld [vmem:[#allocation2 + $0x1e0] sm:$0xf] }
  0x3e   :  { %248 = vmatmul.bf16.vlgmr.msra.gmra.mxu0 %v8177_v16  ;;  %v8255_v23 = vld [vmem:[#allocation2 + $0x1e4] sm:$0xf0]  ;;  %v6093_v27 = vld [vmem:[#allocation2 + $0x170] sm:$0xf]  ;;  %v8241_v29 = vld [vmem:[#allocation2 + $0x174] sm:$0xf0] }
  0x3f   :  { %501 = vmatpush.bf16.msrb.mxu0 %v5970_v12  ;;  %262 = vmatmul.bf16.vlgmr.msra.gmra.mxu1 %v8177_v16  ;;  %v5974_v12 = vor.u32 %v8211_v9, %v5973_v7  ;;  %v5978_v16 = vor.u32 %v8210_v14, %v5975_v15  ;;  %v6150_v28 = vor.u32 %v8255_v23, %v6149_v22  ;;  %v8240_v30 = vld [vmem:[#allocation2 + $0x174] sm:$0xf]  ;;  %v6141_v35 = vld [vmem:[#allocation2 + $0x1d0] sm:$0xf]  ;;  %v8253_v36 = vld [vmem:[#allocation2 + $0x1d4] sm:$0xf0] }
  0x40   :  { %515 = vmatpush.bf16.msrb.mxu1 %v6034_v13  ;;  %493 = vmatpush.bf16.msra.mxu3 %v5982_v0  ;;  %v5914_v13 = vor.u32 %v8194_v10, %v5911_v11  ;;  %v6094_v33 = vor.u32 %v8241_v29, %v6093_v27  ;;  %v8252_v37 = vld [vmem:[#allocation2 + $0x1d4] sm:$0xf]  ;;  %v6143_v38 = vld [vmem:[#allocation2 + $0x1d8] sm:$0xf0]  ;;  %v6085_v39 = vld [vmem:[#allocation2 + $0x160] sm:$0xf] }
  0x41   :  { %480 = vmatpush.bf16.msra.mxu2 %v5910_v8  ;;  %v8239_v40 = vld [vmem:[#allocation2 + $0x164] sm:$0xf0]  ;;  %v8238_v42 = vld [vmem:[#allocation2 + $0x164] sm:$0xf]  ;;  %v6087_v43 = vld [vmem:[#allocation2 + $0x168] sm:$0xf0]  ;;  %v6146_v46 = vor.u32 %v8252_v37, %v6143_v38 }
  0x42   :  { %v6090_v45 = vor.u32 %v8238_v42, %v6087_v43  ;;  %v6133_v47 = vld [vmem:[#allocation2 + $0x1c0] sm:$0xf]  ;;  %v8251_v48 = vld [vmem:[#allocation2 + $0x1c4] sm:$0xf0]  ;;  %v8250_v49 = vld [vmem:[#allocation2 + $0x1c4] sm:$0xf] }
  0x43   :  { %502 = vmatpush.bf16.msrb.mxu0 %v5962_v19  ;;  %v8256_v19 = vld [vmem:[#allocation2 + $0x1f4] sm:$0xf]  ;;  %v6135_v50 = vld [vmem:[#allocation2 + $0x1c8] sm:$0xf0]  ;;  %v6134_v51 = vor.u32 %v8251_v48, %v6133_v47  ;;  %v6077_v6 = vld [vmem:[#allocation2 + $0x150] sm:$0xf] }
  0x44   :  { %516 = vmatpush.bf16.msrb.mxu1 %v6026_v20  ;;  %494 = vmatpush.bf16.msra.mxu3 %v5974_v12  ;;  %v6158_v20 = vor.u32 %v8257_v18, %v6157_v17  ;;  %v6162_v24 = vor.u32 %v8256_v19, %v6159_v21  ;;  %v6138_v52 = vor.u32 %v8250_v49, %v6135_v50  ;;  %v148_v53 = vld [vmem:[#allocation4] ss:$8 sm:$0x3]  ;;  %v8237_v7 = vld [vmem:[#allocation2 + $0x154] sm:$0xf0] }
  0x45   :  { %734 = vmatpush.bf16.msrb.mxu2 %v6094_v33  ;;  %v151_v57 = vperm.slane %v148_v53, 1  ;;  %v8236_v8 = vld [vmem:[#allocation2 + $0x154] sm:$0xf]  ;;  %v6078_v9 = vor.u32 %v8237_v7, %v6077_v6  ;;  %v6079_v10 = vld [vmem:[#allocation2 + $0x158] sm:$0xf0] }
  0x46   :  { %v6082_v11 = vor.u32 %v8236_v8, %v6079_v10  ;;  %v6125_v12 = vld [vmem:[#allocation2 + $0x1b0] sm:$0xf]  ;;  %v8248_v14 = vld [vmem:[#allocation2 + $0x1b4] sm:$0xf]  ;;  %v6069_v18 = vld [vmem:[#allocation2 + $0x140] sm:$0xf] }
  0x47   :  { %503 = vmatpush.bf16.msrb.mxu0 %v5954_v25  ;;  %v8254_v25 = vld [vmem:[#allocation2 + $0x1e4] sm:$0xf]  ;;  %v8235_v19 = vld [vmem:[#allocation2 + $0x144] sm:$0xf0]  ;;  %v6071_v22 = vld [vmem:[#allocation2 + $0x148] sm:$0xf0] }
  0x48   :  { %517 = vmatpush.bf16.msrb.mxu1 %v6018_v26  ;;  %v6151_v26 = vld [vmem:[#allocation2 + $0x1e8] sm:$0xf0]  ;;  %748 = vmatpush.bf16.msrb.mxu3 %v6158_v20  ;;  %v8234_v20 = vld [vmem:[#allocation2 + $0x144] sm:$0xf]  ;;  %v6070_v21 = vor.u32 %v8235_v19, %v6069_v18  ;;  %v8245_v37 = vld [vmem:[#allocation2 + $0x194] sm:$0xf0] }
  0x49   :  { %v6074_v23 = vor.u32 %v8234_v20, %v6071_v22  ;;  %v8244_v38 = vld [vmem:[#allocation2 + $0x194] sm:$0xf]  ;;  %v6053_v42 = vld [vmem:[#allocation2 + $0x120] sm:$0xf]  ;;  %v8231_v43 = vld [vmem:[#allocation2 + $0x124] sm:$0xf0] }
  0x4a   :  { %v6101_v48 = vld [vmem:[#allocation2 + $0x180] sm:$0xf]  ;;  %v8243_v49 = vld [vmem:[#allocation2 + $0x184] sm:$0xf0]  ;;  %v8242_v50 = vld [vmem:[#allocation2 + $0x184] sm:$0xf] }
  0x4b   :  { %504 = vmatpush.bf16.msrb.mxu0 %v5946_v31  ;;  %v6095_v31 = vld [vmem:[#allocation2 + $0x178] sm:$0xf0]  ;;  %v6277_v7 = vld [vmem:[#allocation2 + $0x3e0] sm:$0xf]  ;;  %v8319_v8 = vld [vmem:[#allocation2 + $0x3e4] sm:$0xf0] }
  0x4c   :  { %518 = vmatpush.bf16.msrb.mxu1 %v6010_v32  ;;  %v6154_v32 = vor.u32 %v8254_v25, %v6151_v26  ;;  %v6098_v34 = vor.u32 %v8240_v30, %v6095_v31  ;;  %749 = vmatpush.bf16.msrb.mxu3 %v6150_v28  ;;  %v8247_v25 = vld [vmem:[#allocation2 + $0x1a4] sm:$0xf0]  ;;  %v8246_v26 = vld [vmem:[#allocation2 + $0x1a4] sm:$0xf]  ;;  %v6119_v28 = vld [vmem:[#allocation2 + $0x1a8] sm:$0xf0] }
  0x4d   :  { %v6122_v29 = vor.u32 %v8246_v26, %v6119_v28  ;;  %v6061_v30 = vld [vmem:[#allocation2 + $0x130] sm:$0xf]  ;;  %v8233_v31 = vld [vmem:[#allocation2 + $0x134] sm:$0xf0]  ;;  %v6287_v6 = vld [vmem:[#allocation2 + $0x3f8] sm:$0xf0] }
  0x4e   :  { %v6062_v33 = vor.u32 %v8233_v31, %v6061_v30  ;;  %v8317_v22 = vld [vmem:[#allocation2 + $0x3d4] sm:$0xf0]  ;;  %v8303_v26 = vld [vmem:[#allocation2 + $0x364] sm:$0xf0]  ;;  %v8302_v28 = vld [vmem:[#allocation2 + $0x364] sm:$0xf] }
  0x4f   :  { %505 = vmatpush.bf16.msrb.mxu0 %v5938_v41  ;;  %v6086_v41 = vor.u32 %v8239_v40, %v6085_v39  ;;  %v6111_v40 = vld [vmem:[#allocation2 + $0x198] sm:$0xf0] }
  0x50   :  { %519 = vmatpush.bf16.msrb.mxu1 %v6002_v44  ;;  %v6142_v44 = vor.u32 %v8253_v36, %v6141_v35  ;;  %v6109_v36 = vld [vmem:[#allocation2 + $0x190] sm:$0xf] }
  0x51   :  { %735 = vmatpush.bf16.msrb.mxu2 %v6086_v41  ;;  %v6110_v39 = vor.u32 %v8245_v37, %v6109_v36  ;;  %v6114_v41 = vor.u32 %v8244_v38, %v6111_v40  ;;  %v6205_v36 = vld [vmem:[#allocation2 + $0x350] sm:$0xf]  ;;  %v8301_v37 = vld [vmem:[#allocation2 + $0x354] sm:$0xf0]  ;;  %v8300_v38 = vld [vmem:[#allocation2 + $0x354] sm:$0xf] }
  0x52   :  { %750 = vmatpush.bf16.msrb.mxu3 %v6142_v44  ;;  %v8230_v44 = vld [vmem:[#allocation2 + $0x124] sm:$0xf] }
  0x53   :  { %506 = vmatpush.bf16.msrb.mxu0 %v5930_v55  ;;  %v8314_v40 = vld [vmem:[#allocation2 + $0x3c4] sm:$0xf] }
  0x54   :  { %520 = vmatpush.bf16.msrb.mxu1 %v5994_v56  ;;  %v150_v56 = vperm.slane %v148_v53, 0 }
  0x55   :  { %736 = vmatpush.bf16.msrb.mxu2 %v6078_v9  ;;  %v9025_v9 = vld [vmem:[#allocation4 + $0x1] ss:$8 sm:$0x3] }
  0x56   :  { %751 = vmatpush.bf16.msrb.mxu3 %v6134_v51  ;;  %v6102_v51 = vor.u32 %v8243_v49, %v6101_v48  ;;  %v310_v30 = vperm.slane %v9025_v9, 1  ;;  %v8299_v48 = vld [vmem:[#allocation2 + $0x344] sm:$0xf0]  ;;  %v8298_v49 = vld [vmem:[#allocation2 + $0x344] sm:$0xf] }
  0x57   :  { %507 = vmatpush.bf16.msrb.mxu0 %v5922_v1 }
  0x58   :  { %521 = vmatpush.bf16.msrb.mxu1 %v5986_v4 }
  0x59   :  { %737 = vmatpush.bf16.msrb.mxu2 %v6070_v21  ;;  %v6269_v21 = vld [vmem:[#allocation2 + $0x3d0] sm:$0xf] }
  0x5a   :  { %v6270_v31 = vor.u32 %v8317_v22, %v6269_v21 }
  0x5b   :  { %508 = vmatpush.bf16.msrb.mxu0 %v5914_v13  ;;  %v8249_v13 = vld [vmem:[#allocation2 + $0x1b4] sm:$0xf0] }
  0x5c   :  { %522 = vmatpush.bf16.msrb.mxu1 %v5978_v16  ;;  %v6126_v15 = vor.u32 %v8249_v13, %v6125_v12  ;;  %v6127_v16 = vld [vmem:[#allocation2 + $0x1b8] sm:$0xf0]  ;;  %v6279_v12 = vld [vmem:[#allocation2 + $0x3e8] sm:$0xf0]  ;;  %v6221_v13 = vld [vmem:[#allocation2 + $0x370] sm:$0xf] }
  0x5d   :  { %v6130_v17 = vor.u32 %v8248_v14, %v6127_v16  ;;  %738 = vmatpush.bf16.msrb.mxu2 %v6062_v33  ;;  %v6278_v14 = vor.u32 %v8319_v8, %v6277_v7  ;;  %v8304_v16 = vld [vmem:[#allocation2 + $0x374] sm:$0xf]  ;;  %v6261_v33 = vld [vmem:[#allocation2 + $0x3c0] sm:$0xf]  ;;  %v8310_v8 = vld [vmem:[#allocation2 + $0x3a4] sm:$0xf] }
  0x5e   :  { %752 = vmatpush.bf16.msrb.mxu3 %v6126_v15  ;;  %v8305_v15 = vld [vmem:[#allocation2 + $0x374] sm:$0xf0] }
  0x5f   :  { %762 = vmatpush.bf16.msra.mxu0 %v6098_v34  ;;  %v6063_v34 = vld [vmem:[#allocation2 + $0x138] sm:$0xf0]  ;;  %v6222_v19 = vor.u32 %v8305_v15, %v6221_v13 }
  0x60   :  { %776 = vmatpush.bf16.msra.mxu1 %v6162_v24  ;;  %v6117_v24 = vld [vmem:[#allocation2 + $0x1a0] sm:$0xf] }
  0x61   :  { %v6118_v27 = vor.u32 %v8247_v25, %v6117_v24  ;;  %v6271_v24 = vld [vmem:[#allocation2 + $0x3d8] sm:$0xf0]  ;;  %v6213_v25 = vld [vmem:[#allocation2 + $0x360] sm:$0xf] }
  0x63   :  { %763 = vmatpush.bf16.msra.mxu0 %v6090_v45  ;;  %753 = vmatpush.bf16.msrb.mxu3 %v6118_v27  ;;  %v6054_v45 = vor.u32 %v8231_v43, %v6053_v42  ;;  %v6214_v27 = vor.u32 %v8303_v26, %v6213_v25  ;;  %v6207_v42 = vld [vmem:[#allocation2 + $0x358] sm:$0xf0] }
  0x64   :  { %777 = vmatpush.bf16.msra.mxu1 %v6154_v32  ;;  %v8232_v32 = vld [vmem:[#allocation2 + $0x134] sm:$0xf] }
  0x65   :  { %v6066_v35 = vor.u32 %v8232_v32, %v6063_v34  ;;  %739 = vmatpush.bf16.msrb.mxu2 %v6054_v45  ;;  %v8315_v34 = vld [vmem:[#allocation2 + $0x3c4] sm:$0xf0]  ;;  %v6210_v45 = vor.u32 %v8300_v38, %v6207_v42  ;;  %v8294_v38 = vld [vmem:[#allocation2 + $0x324] sm:$0xf] }
  0x66   :  { %v8307_v42 = vld [vmem:[#allocation2 + $0x384] sm:$0xf0] }
  0x67   :  { %764 = vmatpush.bf16.msra.mxu0 %v6082_v11  ;;  %754 = vmatpush.bf16.msrb.mxu3 %v6110_v39  ;;  %v8318_v11 = vld [vmem:[#allocation2 + $0x3e4] sm:$0xf] }
  0x68   :  { %778 = vmatpush.bf16.msra.mxu1 %v6146_v46  ;;  %v6055_v46 = vld [vmem:[#allocation2 + $0x128] sm:$0xf0]  ;;  %v6282_v18 = vor.u32 %v8318_v11, %v6279_v12 }
  0x69   :  { %v6058_v47 = vor.u32 %v8230_v44, %v6055_v46  ;;  %v6206_v44 = vor.u32 %v8301_v37, %v6205_v36  ;;  %v6197_v46 = vld [vmem:[#allocation2 + $0x340] sm:$0xf] }
  0x6b   :  { %765 = vmatpush.bf16.msra.mxu0 %v6074_v23  ;;  %755 = vmatpush.bf16.msrb.mxu3 %v6102_v51  ;;  %v8316_v23 = vld [vmem:[#allocation2 + $0x3d4] sm:$0xf] }
  0x6c   :  { %779 = vmatpush.bf16.msra.mxu1 %v6138_v52  ;;  %v6103_v52 = vld [vmem:[#allocation2 + $0x188] sm:$0xf0] }
  0x6d   :  { %v6106_v53 = vor.u32 %v8242_v50, %v6103_v52  ;;  %v6199_v50 = vld [vmem:[#allocation2 + $0x348] sm:$0xf0]  ;;  %v6253_v52 = vld [vmem:[#allocation2 + $0x3b0] sm:$0xf] }
  0x6f   :  { %766 = vmatpush.bf16.msra.mxu0 %v6066_v35  ;;  %v6274_v35 = vor.u32 %v8316_v23, %v6271_v24 }
  0x70   :  { %780 = vmatpush.bf16.msra.mxu1 %v6130_v17  ;;  %v6223_v17 = vld [vmem:[#allocation2 + $0x378] sm:$0xf0] }
  0x71   :  { %v6226_v20 = vor.u32 %v8304_v16, %v6223_v17 }
  0x73   :  { %767 = vmatpush.bf16.msra.mxu0 %v6058_v47  ;;  %v6262_v47 = vor.u32 %v8315_v34, %v6261_v33  ;;  %v6239_v33 = vld [vmem:[#allocation2 + $0x398] sm:$0xf0]  ;;  %v6181_v34 = vld [vmem:[#allocation2 + $0x320] sm:$0xf] }
  0x74   :  { %781 = vmatpush.bf16.msra.mxu1 %v6122_v29  ;;  %v6215_v29 = vld [vmem:[#allocation2 + $0x368] sm:$0xf0] }
  0x75   :  { %v6218_v32 = vor.u32 %v8302_v28, %v6215_v29  ;;  %v6237_v29 = vld [vmem:[#allocation2 + $0x390] sm:$0xf] }
  0x78   :  { %782 = vmatpush.bf16.msra.mxu1 %v6114_v41  ;;  %v6263_v41 = vld [vmem:[#allocation2 + $0x3c8] sm:$0xf0] }
  0x79   :  { %v6266_v51 = vor.u32 %v8314_v40, %v6263_v41  ;;  %v6229_v40 = vld [vmem:[#allocation2 + $0x380] sm:$0xf] }
  0x7c   :  { %783 = vmatpush.bf16.msra.mxu1 %v6106_v53  ;;  %v8313_v53 = vld [vmem:[#allocation2 + $0x3b4] sm:$0xf0] }
  0xbb   :  { %v249_v54 = vpop.f32.mrf.mxu0 }
  0xbc   :  { %v263_v55 = vpop.f32.mrf.mxu1  ;;  %v250_v58 = vadd.f32 %v249_v54, %v150_v56  ;;  %v6045_v54 = vld [vmem:[#allocation2 + $0x110] sm:$0xf] }
  0xbd   :  { %v264_v59 = vadd.f32 %v263_v55, %v151_v57  ;;  %v8229_v55 = vld [vmem:[#allocation2 + $0x114] sm:$0xf0] }
  0xbe   :  { %v268_v0 = vmax.f32 %v250_v58, 0.0  ;;  %v6047_v58 = vld [vmem:[#allocation2 + $0x118] sm:$0xf0] }
  0xbf   :  { %v269_v2 = vmax.f32 %v264_v59, 0.0 }
  0xc3   :  { %v251_v60 = vpop.f32.mrf.mxu0 }
  0xc4   :  { %v252_v61 = vadd.f32 %v251_v60, %v150_v56  ;;  %v265_v62 = vpop.f32.mrf.mxu1  ;;  %v8228_v56 = vld [vmem:[#allocation2 + $0x114] sm:$0xf]  ;;  %v6037_v60 = vld [vmem:[#allocation2 + $0x100] sm:$0xf] }
  0xc5   :  { %v266_v63 = vadd.f32 %v265_v62, %v151_v57  ;;  %v6046_v57 = vor.u32 %v8229_v55, %v6045_v54  ;;  %v6050_v59 = vor.u32 %v8228_v56, %v6047_v58  ;;  %v8226_v62 = vld [vmem:[#allocation2 + $0x104] sm:$0xf]  ;;  %v8312_v55 = vld [vmem:[#allocation2 + $0x3b4] sm:$0xf]  ;;  %v6255_v56 = vld [vmem:[#allocation2 + $0x3b8] sm:$0xf0]  ;;  %v6202_v58 = vor.u32 %v8298_v49, %v6199_v50 }
  0xc6   :  { %v270_v1 = vmax.f32 %v252_v61, 0.0  ;;  %v8227_v61 = vld [vmem:[#allocation2 + $0x104] sm:$0xf0]  ;;  %v8288_v49 = vld [vmem:[#allocation2 + $0x2f4] sm:$0xf] }
  0xc7   :  { %v271_v3 = vmax.f32 %v266_v63, 0.0  ;;  %740 = vmatpush.bf16.msrb.mxu2 %v6046_v57  ;;  %768 = vmatpush.bf16.msra.mxu0 %v6050_v59  ;;  %v6038_v63 = vor.u32 %v8227_v61, %v6037_v60  ;;  %v6198_v57 = vor.u32 %v8299_v48, %v6197_v46  ;;  %v6189_v59 = vld [vmem:[#allocation2 + $0x330] sm:$0xf]  ;;  %v6254_v61 = vor.u32 %v8313_v53, %v6253_v52  ;;  %v8289_v48 = vld [vmem:[#allocation2 + $0x2f4] sm:$0xf0] }
  0xc8   :  { %v304_v4 = vpack.c.bf16 %v270_v1, %v268_v0  ;;  %v6039_v0 = vld [vmem:[#allocation2 + $0x108] sm:$0xf0]  ;;  %v6173_v53 = vld [vmem:[#allocation2 + $0x310] sm:$0xf] }
  0xc9   :  { %v305_v5 = vpack.c.bf16 %v271_v3, %v269_v2  ;;  %v6042_v1 = vor.u32 %v8226_v62, %v6039_v0  ;;  %v6285_v2 = vld [vmem:[#allocation2 + $0x3f0] sm:$0xf]  ;;  %v8321_v3 = vld [vmem:[#allocation2 + $0x3f4] sm:$0xf0]  ;;  %v6191_v0 = vld [vmem:[#allocation2 + $0x338] sm:$0xf0] }
  0xca   :  { %481 = vmatmul.bf16.vlgmr.msra.gmra.mxu2 %v304_v4  ;;  %509 = vmatmul.bf16.vlgmr.msrb.gmra.mxu0 %v304_v4  ;;  %v8320_v4 = vld [vmem:[#allocation2 + $0x3f4] sm:$0xf]  ;;  %v8297_v62 = vld [vmem:[#allocation2 + $0x334] sm:$0xf0] }
  0xcb   :  { %495 = vmatmul.bf16.vlgmr.msra.gmra.mxu3 %v305_v5  ;;  %523 = vmatmul.bf16.vlgmr.msrb.gmra.mxu1 %v305_v5  ;;  %v6286_v5 = vor.u32 %v8321_v3, %v6285_v2  ;;  %v6290_v10 = vor.u32 %v8320_v4, %v6287_v6  ;;  %v6258_v3 = vor.u32 %v8312_v55, %v6255_v56  ;;  %v6245_v4 = vld [vmem:[#allocation2 + $0x3a0] sm:$0xf]  ;;  %v8292_v56 = vld [vmem:[#allocation2 + $0x314] sm:$0xf] }
  0xcc   :  { %741 = vmatpush.bf16.msrb.mxu2 %v6038_v63  ;;  %769 = vmatpush.bf16.msra.mxu0 %v6042_v1  ;;  %v8296_v63 = vld [vmem:[#allocation2 + $0x334] sm:$0xf]  ;;  %v309_v1 = vperm.slane %v9025_v9, 0  ;;  %v6190_v12 = vor.u32 %v8297_v62, %v6189_v59  ;;  %v6405_v59 = vld [vmem:[#allocation2 + $0x2e0] sm:$0xf] }
  0xcd   :  { %1032 = vmatpush.bf16.msra.mxu3 %v6286_v5  ;;  %1058 = vmatpush.bf16.msrb.mxu1 %v6290_v10  ;;  %v8311_v5 = vld [vmem:[#allocation2 + $0x3a4] sm:$0xf0]  ;;  %v6247_v10 = vld [vmem:[#allocation2 + $0x3a8] sm:$0xf0]  ;;  %v6194_v13 = vor.u32 %v8296_v63, %v6191_v0  ;;  %v6165_v0 = vld [vmem:[#allocation2 + $0x300] sm:$0xf] }
  0xce   :  { %v6246_v15 = vor.u32 %v8311_v5, %v6245_v4  ;;  %v6250_v9 = vor.u32 %v8310_v8, %v6247_v10  ;;  %v6407_v63 = vld [vmem:[#allocation2 + $0x2e8] sm:$0xf0]  ;;  %v8290_v4 = vld [vmem:[#allocation2 + $0x304] sm:$0xf]  ;;  %v8273_v8 = vld [vmem:[#allocation2 + $0x274] sm:$0xf0] }
  0xcf   :  { %v6167_v5 = vld [vmem:[#allocation2 + $0x308] sm:$0xf0]  ;;  %v8272_v10 = vld [vmem:[#allocation2 + $0x274] sm:$0xf] }
  0xd0   :  { %1019 = vmatpush.bf16.msra.mxu2 %v6222_v19  ;;  %1045 = vmatpush.bf16.msrb.mxu0 %v6226_v20 }
  0xd1   :  { %1033 = vmatpush.bf16.msra.mxu3 %v6278_v14  ;;  %1059 = vmatpush.bf16.msrb.mxu1 %v6282_v18 }
  0xd4   :  { %1020 = vmatpush.bf16.msra.mxu2 %v6214_v27  ;;  %1046 = vmatpush.bf16.msrb.mxu0 %v6218_v32 }
  0xd5   :  { %1034 = vmatpush.bf16.msra.mxu3 %v6270_v31  ;;  %1060 = vmatpush.bf16.msrb.mxu1 %v6274_v35  ;;  %v8308_v31 = vld [vmem:[#allocation2 + $0x394] sm:$0xf]  ;;  %v8295_v35 = vld [vmem:[#allocation2 + $0x324] sm:$0xf0] }
  0xd6   :  { %v6242_v36 = vor.u32 %v8308_v31, %v6239_v33  ;;  %v6182_v37 = vor.u32 %v8295_v35, %v6181_v34  ;;  %v6333_v31 = vld [vmem:[#allocation2 + $0x250] sm:$0xf]  ;;  %v8268_v33 = vld [vmem:[#allocation2 + $0x254] sm:$0xf]  ;;  %v6335_v35 = vld [vmem:[#allocation2 + $0x258] sm:$0xf0] }
  0xd8   :  { %1021 = vmatpush.bf16.msra.mxu2 %v6206_v44  ;;  %1047 = vmatpush.bf16.msrb.mxu0 %v6210_v45  ;;  %v6231_v44 = vld [vmem:[#allocation2 + $0x388] sm:$0xf0]  ;;  %v6230_v45 = vor.u32 %v8307_v42, %v6229_v40 }
  0xd9   :  { %1035 = vmatpush.bf16.msra.mxu3 %v6262_v47  ;;  %1061 = vmatpush.bf16.msrb.mxu1 %v6266_v51  ;;  %v6413_v47 = vld [vmem:[#allocation2 + $0x2f0] sm:$0xf]  ;;  %v6415_v51 = vld [vmem:[#allocation2 + $0x2f8] sm:$0xf0] }
  0xda   :  { %v6414_v50 = vor.u32 %v8289_v48, %v6413_v47  ;;  %v6418_v52 = vor.u32 %v8288_v49, %v6415_v51  ;;  %v6327_v47 = vld [vmem:[#allocation2 + $0x248] sm:$0xf0]  ;;  %v6373_v49 = vld [vmem:[#allocation2 + $0x2a0] sm:$0xf]  ;;  %v8278_v51 = vld [vmem:[#allocation2 + $0x2a4] sm:$0xf] }
  0xdc   :  { %1022 = vmatpush.bf16.msra.mxu2 %v6198_v57  ;;  %1048 = vmatpush.bf16.msrb.mxu0 %v6202_v58  ;;  %v6175_v57 = vld [vmem:[#allocation2 + $0x318] sm:$0xf0] }
  0xdd   :  { %1036 = vmatpush.bf16.msra.mxu3 %v6254_v61  ;;  %1062 = vmatpush.bf16.msrb.mxu1 %v6258_v3  ;;  %v6178_v58 = vor.u32 %v8292_v56, %v6175_v57  ;;  %v8286_v61 = vld [vmem:[#allocation2 + $0x2e4] sm:$0xf]  ;;  %v8265_v56 = vld [vmem:[#allocation2 + $0x234] sm:$0xf0]  ;;  %v8264_v57 = vld [vmem:[#allocation2 + $0x234] sm:$0xf] }
  0xe0   :  { %1023 = vmatpush.bf16.msra.mxu2 %v6190_v12  ;;  %1049 = vmatpush.bf16.msrb.mxu0 %v6194_v13  ;;  %v6351_v12 = vld [vmem:[#allocation2 + $0x278] sm:$0xf0]  ;;  %v6397_v13 = vld [vmem:[#allocation2 + $0x2d0] sm:$0xf] }
  0xe1   :  { %1037 = vmatpush.bf16.msra.mxu3 %v6246_v15  ;;  %1063 = vmatpush.bf16.msrb.mxu1 %v6250_v9  ;;  %v6354_v15 = vor.u32 %v8272_v10, %v6351_v12  ;;  %v6399_v9 = vld [vmem:[#allocation2 + $0x2d8] sm:$0xf0]  ;;  %v8275_v10 = vld [vmem:[#allocation2 + $0x284] sm:$0xf0] }
  0xe4   :  { %1024 = vmatpush.bf16.msra.mxu2 %v6182_v37  ;;  %v6381_v37 = vld [vmem:[#allocation2 + $0x2b0] sm:$0xf] }
  0xe5   :  { %1064 = vmatpush.bf16.msrb.mxu1 %v6242_v36  ;;  %v6338_v36 = vor.u32 %v8268_v33, %v6335_v35 }
 0x147   :  { %v510_v39 = vpop.f32.mrf.mxu0 }
 0x148   :  { %v524_v43 = vpop.f32.mrf.mxu1  ;;  %v511_v54 = vadd.f32 %v510_v39, %v310_v30  ;;  %v6183_v39 = vld [vmem:[#allocation2 + $0x328] sm:$0xf0] }
 0x149   :  { %v6186_v41 = vor.u32 %v8294_v38, %v6183_v39  ;;  %v8281_v38 = vld [vmem:[#allocation2 + $0x2b4] sm:$0xf0]  ;;  %v8280_v39 = vld [vmem:[#allocation2 + $0x2b4] sm:$0xf] }
 0x14a   :  { %v525_v6 = vadd.f32 %v524_v43, %v511_v54  ;;  %v8306_v43 = vld [vmem:[#allocation2 + $0x384] sm:$0xf]  ;;  %v8293_v54 = vld [vmem:[#allocation2 + $0x314] sm:$0xf0]  ;;  %v6382_v40 = vor.u32 %v8281_v38, %v6381_v37 }
 0x14b   :  { %v6234_v46 = vor.u32 %v8306_v43, %v6231_v44  ;;  %1050 = vmatpush.bf16.msrb.mxu0 %v6186_v41  ;;  %v6174_v55 = vor.u32 %v8293_v54, %v6173_v53  ;;  %v6383_v41 = vld [vmem:[#allocation2 + $0x2b8] sm:$0xf0]  ;;  %v6325_v43 = vld [vmem:[#allocation2 + $0x240] sm:$0xf]  ;;  %v8267_v44 = vld [vmem:[#allocation2 + $0x244] sm:$0xf0] }
 0x14c   :  { %v530_v18 = vmax.f32 %v525_v6, 0.0  ;;  %v6349_v6 = vld [vmem:[#allocation2 + $0x270] sm:$0xf]  ;;  %v6386_v42 = vor.u32 %v8280_v39, %v6383_v41  ;;  %v6375_v53 = vld [vmem:[#allocation2 + $0x2a8] sm:$0xf0] }
 0x14d   :  { %v482_v60 = vpop.f32.mrf.mxu2  ;;  %1065 = vmatpush.bf16.msrb.mxu1 %v6234_v46  ;;  %1025 = vmatpush.bf16.msra.mxu2 %v6174_v55  ;;  %v6326_v46 = vor.u32 %v8267_v44, %v6325_v43  ;;  %v6378_v54 = vor.u32 %v8278_v51, %v6375_v53  ;;  %v6317_v55 = vld [vmem:[#allocation2 + $0x230] sm:$0xf] }
 0x14e   :  { %v496_v2 = vpop.f32.mrf.mxu3  ;;  %v483_v16 = vadd.f32 %v482_v60, %v309_v1  ;;  %v8287_v60 = vld [vmem:[#allocation2 + $0x2e4] sm:$0xf0] }
 0x14f   :  { %v512_v7 = vpop.f32.mrf.mxu0  ;;  %v6406_v62 = vor.u32 %v8287_v60, %v6405_v59  ;;  %1051 = vmatpush.bf16.msrb.mxu0 %v6178_v58  ;;  %v6318_v58 = vor.u32 %v8265_v56, %v6317_v55  ;;  %v6319_v59 = vld [vmem:[#allocation2 + $0x238] sm:$0xf0]  ;;  %v6365_v60 = vld [vmem:[#allocation2 + $0x290] sm:$0xf] }
 0x150   :  { %v513_v11 = vadd.f32 %v512_v7, %v310_v30  ;;  %v526_v14 = vpop.f32.mrf.mxu1  ;;  %v497_v21 = vadd.f32 %v496_v2, %v483_v16  ;;  %v8309_v30 = vld [vmem:[#allocation2 + $0x394] sm:$0xf0]  ;;  %v6410_v2 = vor.u32 %v8286_v61, %v6407_v63  ;;  %v6170_v7 = vor.u32 %v8290_v4, %v6167_v5  ;;  %v8263_v4 = vld [vmem:[#allocation2 + $0x224] sm:$0xf0]  ;;  %v8262_v5 = vld [vmem:[#allocation2 + $0x224] sm:$0xf] }
 0x151   :  { %v6238_v32 = vor.u32 %v8309_v30, %v6237_v29  ;;  %v6391_v29 = vld [vmem:[#allocation2 + $0x2c8] sm:$0xf0]  ;;  %v8277_v61 = vld [vmem:[#allocation2 + $0x294] sm:$0xf0] }
 0x152   :  { %v527_v17 = vadd.f32 %v526_v14, %v513_v11  ;;  %v529_v26 = vmax.f32 %v497_v21, 0.0  ;;  %v6350_v11 = vor.u32 %v8273_v8, %v6349_v6  ;;  %v8285_v14 = vld [vmem:[#allocation2 + $0x2d4] sm:$0xf0]  ;;  %v8270_v21 = vld [vmem:[#allocation2 + $0x264] sm:$0xf]  ;;  %v6366_v63 = vor.u32 %v8277_v61, %v6365_v60 }
 0x153   :  { %1038 = vmatpush.bf16.msra.mxu3 %v6238_v32  ;;  %v6398_v16 = vor.u32 %v8285_v14, %v6397_v13  ;;  %1052 = vmatpush.bf16.msrb.mxu0 %v6170_v7  ;;  %v8269_v32 = vld [vmem:[#allocation2 + $0x254] sm:$0xf0]  ;;  %v6311_v6 = vld [vmem:[#allocation2 + $0x228] sm:$0xf0]  ;;  %v6357_v8 = vld [vmem:[#allocation2 + $0x280] sm:$0xf] }
 0x154   :  { %v532_v19 = vmax.f32 %v527_v17, 0.0  ;;  %v8284_v17 = vld [vmem:[#allocation2 + $0x2d4] sm:$0xf]  ;;  %v6334_v34 = vor.u32 %v8269_v32, %v6333_v31  ;;  %v6314_v12 = vor.u32 %v8262_v5, %v6311_v6  ;;  %v6358_v13 = vor.u32 %v8275_v10, %v6357_v8  ;;  %v6359_v14 = vld [vmem:[#allocation2 + $0x288] sm:$0xf0] }
 0x155   :  { %v484_v20 = vpop.f32.mrf.mxu2  ;;  %v1284_v61 = vld [vmem:[#allocation4 + $0x3] ss:$8 sm:$0x3]  ;;  %v8948_v5 = vmov 0.0  }
 0x156   :  { %v485_v22 = vadd.f32 %v484_v20, %v309_v1  ;;  %v566_v23 = vpack.c.bf16 %v532_v19, %v530_v18  ;;  %v498_v24 = vpop.f32.mrf.mxu3  ;;  %v8291_v1 = vld [vmem:[#allocation2 + $0x304] sm:$0xf0]  ;;  %v6402_v18 = vor.u32 %v8284_v17, %v6399_v9  ;;  %v6341_v19 = vld [vmem:[#allocation2 + $0x260] sm:$0xf]  ;;  %v8260_v9 = vld [vmem:[#allocation2 + $0x214] sm:$0xf] }
 0x157   :  { %1039 = vmatpush.bf16.msra.mxu3 %v6230_v45  ;;  %v6166_v3 = vor.u32 %v8291_v1, %v6165_v0  ;;  %v8271_v20 = vld [vmem:[#allocation2 + $0x264] sm:$0xf0]  ;;  %v8266_v45 = vld [vmem:[#allocation2 + $0x244] sm:$0xf]  ;;  %v8276_v0 = vld [vmem:[#allocation2 + $0x294] sm:$0xf] }
 0x158   :  { %v499_v25 = vadd.f32 %v498_v24, %v485_v22  ;;  %756 = vmatmul.bf16.vlgmr.msrb.gmra.mxu3 %v566_v23  ;;  %784 = vmatmul.bf16.vlgmr.msra.gmra.mxu1 %v566_v23  ;;  %v6342_v22 = vor.u32 %v8271_v20, %v6341_v19  ;;  %v6343_v23 = vld [vmem:[#allocation2 + $0x268] sm:$0xf0]  ;;  %v6330_v48 = vor.u32 %v8266_v45, %v6327_v47  ;;  %v6367_v1 = vld [vmem:[#allocation2 + $0x298] sm:$0xf0] }
 0x159   :  { %1270 = vmatpush.bf16.msra.mxu1 %v6418_v52  ;;  %1026 = vmatpush.bf16.msra.mxu2 %v6166_v3  ;;  %v6346_v24 = vor.u32 %v8270_v21, %v6343_v23  ;;  %v6370_v3 = vor.u32 %v8276_v0, %v6367_v1  ;;  %v6293_v21 = vld [vmem:[#allocation2 + $0x200] sm:$0xf]  ;;  %v8258_v23 = vld [vmem:[#allocation2 + $0x204] sm:$0xf] }
 0x15a   :  { %v531_v27 = vmax.f32 %v499_v25, 0.0  ;;  %v6389_v25 = vld [vmem:[#allocation2 + $0x2c0] sm:$0xf] }
 0x15b   :  { %1244 = vmatpush.bf16.msrb.mxu3 %v6414_v50  ;;  %v8279_v50 = vld [vmem:[#allocation2 + $0x2a4] sm:$0xf0] }
 0x15c   :  { %v565_v28 = vpack.c.bf16 %v531_v27, %v529_v26  ;;  %v8283_v26 = vld [vmem:[#allocation2 + $0x2c4] sm:$0xf0]  ;;  %v8282_v27 = vld [vmem:[#allocation2 + $0x2c4] sm:$0xf]  ;;  %v6374_v52 = vor.u32 %v8279_v50, %v6373_v49 }
 0x15d   :  { %1271 = vmatpush.bf16.msra.mxu1 %v6410_v2  ;;  %v6394_v30 = vor.u32 %v8282_v27, %v6391_v29  ;;  %v6309_v2 = vld [vmem:[#allocation2 + $0x220] sm:$0xf]  ;;  %v6295_v27 = vld [vmem:[#allocation2 + $0x208] sm:$0xf0] }
 0x15e   :  { %742 = vmatmul.bf16.vlgmr.msrb.gmra.mxu2 %v565_v28  ;;  %770 = vmatmul.bf16.vlgmr.msra.gmra.mxu0 %v565_v28  ;;  %v6390_v28 = vor.u32 %v8283_v26, %v6389_v25  ;;  %v6310_v7 = vor.u32 %v8263_v4, %v6309_v2  ;;  %v568_v29 = vld [vmem:[#allocation4 + $0x2] ss:$8 sm:$0x3]  ;;  %v1287_v2 = vperm.slane %v1284_v61, 1 }
 0x15f   :  { %1245 = vmatpush.bf16.msrb.mxu3 %v6406_v62  ;;  %1231 = vmatpush.bf16.msrb.mxu2 %v6350_v11  ;;  %v6322_v62 = vor.u32 %v8264_v57, %v6319_v59  ;;  %v8274_v11 = vld [vmem:[#allocation2 + $0x284] sm:$0xf]  ;;  %v571_v32 = vperm.slane %v568_v29, 1  ;;  %v570_v37 = vperm.slane %v568_v29, 0  ;;  %v125_v57 = vlaneseq }
 0x160   :  { %1257 = vmatpush.bf16.msra.mxu0 %v6354_v15  ;;  %v6301_v15 = vld [vmem:[#allocation2 + $0x210] sm:$0xf]  ;;  %v6362_v17 = vor.u32 %v8274_v11, %v6359_v14 }
 0x161   :  { %1272 = vmatpush.bf16.msra.mxu1 %v6402_v18  ;;  %v6303_v18 = vld [vmem:[#allocation2 + $0x218] sm:$0xf0]  ;;  %v126_v59 = vshrl.u32 %v125_v57, 7 }
 0x162   :  { %v6306_v20 = vor.u32 %v8260_v9, %v6303_v18  ;;  %v8352_v9 = vld [vmem:[#allocation2 + $0x4f4] sm:$0xf] }
 0x163   :  { %1246 = vmatpush.bf16.msrb.mxu3 %v6398_v16  ;;  %1232 = vmatpush.bf16.msrb.mxu2 %v6342_v22  ;;  %v8261_v16 = vld [vmem:[#allocation2 + $0x214] sm:$0xf0]  ;;  %v8259_v22 = vld [vmem:[#allocation2 + $0x204] sm:$0xf0]  ;;  %vm127_vm0 = vcmp.lt.s32.totalorder %v126_v59, 4 }
 0x164   :  { %1258 = vmatpush.bf16.msra.mxu0 %v6346_v24  ;;  %v6302_v19 = vor.u32 %v8261_v16, %v6301_v15  ;;  %v6294_v26 = vor.u32 %v8259_v22, %v6293_v21  ;;  %v9043_v6 = vsel %vm127_vm0, 1.0, %v8948_v5  ;;  %v6541_v16 = vld [vmem:[#allocation2 + $0x4f0] sm:$0xf]  ;;  %v6543_v21 = vld [vmem:[#allocation2 + $0x4f8] sm:$0xf0] }
 0x165   :  { %1273 = vmatpush.bf16.msra.mxu1 %v6394_v30  ;;  %v6546_v22 = vor.u32 %v8352_v9, %v6543_v21  ;;  %v8333_v5 = vld [vmem:[#allocation2 + $0x454] sm:$0xf0] }
 0x167   :  { %1247 = vmatpush.bf16.msrb.mxu3 %v6390_v28  ;;  %1233 = vmatpush.bf16.msrb.mxu2 %v6334_v34  ;;  %v6298_v28 = vor.u32 %v8258_v23, %v6295_v27  ;;  %v8350_v27 = vld [vmem:[#allocation2 + $0x4e4] sm:$0xf] }
 0x168   :  { %1259 = vmatpush.bf16.msra.mxu0 %v6338_v36 }
 0x169   :  { %1274 = vmatpush.bf16.msra.mxu1 %v6386_v42 }
 0x16b   :  { %1248 = vmatpush.bf16.msrb.mxu3 %v6382_v40  ;;  %1234 = vmatpush.bf16.msrb.mxu2 %v6326_v46 }
 0x16c   :  { %1260 = vmatpush.bf16.msra.mxu0 %v6330_v48 }
 0x16d   :  { %1275 = vmatpush.bf16.msra.mxu1 %v6378_v54 }
 0x16f   :  { %1249 = vmatpush.bf16.msrb.mxu3 %v6374_v52  ;;  %1235 = vmatpush.bf16.msrb.mxu2 %v6318_v58 }
 0x170   :  { %1261 = vmatpush.bf16.msra.mxu0 %v6322_v62 }
 0x171   :  { %1276 = vmatpush.bf16.msra.mxu1 %v6370_v3 }
 0x173   :  { %1250 = vmatpush.bf16.msrb.mxu3 %v6366_v63  ;;  %1236 = vmatpush.bf16.msrb.mxu2 %v6310_v7 }
 0x174   :  { %1262 = vmatpush.bf16.msra.mxu0 %v6314_v12 }
 0x175   :  { %1277 = vmatpush.bf16.msra.mxu1 %v6362_v17  ;;  %v8353_v17 = vld [vmem:[#allocation2 + $0x4f4] sm:$0xf0] }
 0x177   :  { %1251 = vmatpush.bf16.msrb.mxu3 %v6358_v13  ;;  %1237 = vmatpush.bf16.msrb.mxu2 %v6302_v19  ;;  %v1286_v13 = vperm.slane %v1284_v61, 0  ;;  %v8347_v61 = vld [vmem:[#allocation2 + $0x4c4] sm:$0xf0] }
 0x178   :  { %1263 = vmatpush.bf16.msra.mxu0 %v6306_v20  ;;  %v6542_v20 = vor.u32 %v8353_v17, %v6541_v16  ;;  %v8345_v16 = vld [vmem:[#allocation2 + $0x4b4] sm:$0xf0]  ;;  %v8344_v17 = vld [vmem:[#allocation2 + $0x4b4] sm:$0xf] }
 0x17b   :  { %1238 = vmatpush.bf16.msrb.mxu2 %v6294_v26  ;;  %v8351_v26 = vld [vmem:[#allocation2 + $0x4e4] sm:$0xf0] }
 0x17c   :  { %1264 = vmatpush.bf16.msra.mxu0 %v6298_v28 }
 0x1d5   :  { %v785_v24 = vpop.f32.mrf.mxu1 }
 0x1db   :  { %v771_v25 = vpop.f32.mrf.mxu0  ;;  %v757_v30 = vpop.f32.mrf.mxu3 }
 0x1dc   :  { %v772_v44 = vadd.f32 %v771_v25, %v571_v32  ;;  %v6533_v25 = vld [vmem:[#allocation2 + $0x4e0] sm:$0xf] }
 0x1dd   :  { %v787_v35 = vpop.f32.mrf.mxu1 }
 0x1de   :  { %v786_v45 = vadd.f32 %v785_v24, %v772_v44  ;;  %v8348_v44 = vld [vmem:[#allocation2 + $0x4d4] sm:$0xf] }
 0x1e0   :  { %v9035_v47 = vpack.c.bf16 %v786_v45, %v786_v45 }
 0x1e1   :  { %v743_v31 = vpop.f32.mrf.mxu2 }
 0x1e2   :  { %v744_v46 = vadd.f32 %v743_v31, %v570_v37  ;;  %v6535_v31 = vld [vmem:[#allocation2 + $0x4e8] sm:$0xf0] }
 0x1e3   :  { %v773_v33 = vpop.f32.mrf.mxu0  ;;  %v759_v41 = vpop.f32.mrf.mxu3 }
 0x1e4   :  { %v774_v34 = vadd.f32 %v773_v33, %v571_v32  ;;  %v758_v48 = vadd.f32 %v757_v30, %v744_v46  ;;  %v6534_v30 = vor.u32 %v8351_v26, %v6533_v25  ;;  %v6538_v33 = vor.u32 %v8350_v27, %v6535_v31  ;;  %v8343_v31 = vld [vmem:[#allocation2 + $0x4a4] sm:$0xf0] }
 0x1e6   :  { %v788_v36 = vadd.f32 %v787_v35, %v774_v34  ;;  %v9039_v49 = vpack.c.bf16 %v758_v48, %v758_v48  ;;  %v6477_v34 = vld [vmem:[#allocation2 + $0x470] sm:$0xf]  ;;  %v8337_v35 = vld [vmem:[#allocation2 + $0x474] sm:$0xf0] }
 0x1e8   :  { %v858_v38 = vpack.c.bf16 %v788_v36, %v788_v36  ;;  %5821 = vst [vmem:[%s9869_s8 + $0x8] sm:$0xff] %v788_v36  ;;  %v8336_v36 = vld [vmem:[#allocation2 + $0x474] sm:$0xf] }
 0x1e9   :  { %v745_v39 = vpop.f32.mrf.mxu2 }
 0x1ea   :  { %v746_v40 = vadd.f32 %v745_v39, %v570_v37  ;;  %1040 = vmatmul.bf16.vlgmr.msra.gmra.mxu3 %v858_v38  ;;  %1066 = vmatmul.bf16.vlgmr.msrb.gmra.mxu1 %v858_v38  ;;  %v6478_v39 = vor.u32 %v8337_v35, %v6477_v34 }
 0x1eb   :  { %1586 = vmatpush.bf16.msra.mxu3 %v6542_v20  ;;  %1612 = vmatpush.bf16.msrb.mxu1 %v6546_v22  ;;  %v6511_v20 = vld [vmem:[#allocation2 + $0x4b8] sm:$0xf0]  ;;  %v8331_v22 = vld [vmem:[#allocation2 + $0x444] sm:$0xf0] }
 0x1ec   :  { %v760_v42 = vadd.f32 %v759_v41, %v746_v40  ;;  %v6479_v40 = vld [vmem:[#allocation2 + $0x478] sm:$0xf0]  ;;  %v6514_v21 = vor.u32 %v8344_v17, %v6511_v20 }
 0x1ed   :  { %v6482_v41 = vor.u32 %v8336_v36, %v6479_v40  ;;  %v6503_v36 = vld [vmem:[#allocation2 + $0x4a8] sm:$0xf0]  ;;  %v8328_v40 = vld [vmem:[#allocation2 + $0x434] sm:$0xf] }
 0x1ee   :  { %v857_v43 = vpack.c.bf16 %v760_v42, %v760_v42  ;;  %5820 = vst [vmem:[%s9869_s8] sm:$0xff] %v760_v42  ;;  %v6525_v42 = vld [vmem:[#allocation2 + $0x4d0] sm:$0xf] }
 0x1ef   :  { %1587 = vmatpush.bf16.msra.mxu3 %v6534_v30  ;;  %1613 = vmatpush.bf16.msrb.mxu1 %v6538_v33  ;;  %v6501_v30 = vld [vmem:[#allocation2 + $0x4a0] sm:$0xf] }
 0x1f0   :  { %1027 = vmatmul.bf16.vlgmr.msra.gmra.mxu2 %v857_v43  ;;  %1053 = vmatmul.bf16.vlgmr.msrb.gmra.mxu0 %v857_v43  ;;  %v8349_v43 = vld [vmem:[#allocation2 + $0x4d4] sm:$0xf0]  ;;  %v6502_v35 = vor.u32 %v8343_v31, %v6501_v30 }
 0x1f1   :  { %1573 = vmatpush.bf16.msra.mxu2 %v6478_v39  ;;  %v6526_v48 = vor.u32 %v8349_v43, %v6525_v42  ;;  %1599 = vmatpush.bf16.msrb.mxu0 %v6482_v41  ;;  %v8329_v39 = vld [vmem:[#allocation2 + $0x434] sm:$0xf0] }
 0x1f3   :  { %1588 = vmatpush.bf16.msra.mxu3 %v6526_v48  ;;  %v8340_v48 = vld [vmem:[#allocation2 + $0x494] sm:$0xf] }
 0x1fa   :  { %1252 = vmatmul.bf16.vlgmr.msrb.gmra.mxu3 %v9035_v47  ;;  %1278 = vmatmul.bf16.vlgmr.msra.gmra.mxu1 %v9035_v47 }
 0x200   :  { %1239 = vmatmul.bf16.vlgmr.msrb.gmra.mxu2 %v9039_v49  ;;  %1265 = vmatmul.bf16.vlgmr.msra.gmra.mxu0 %v9039_v49 }
 0x267   :  { %v1067_v50 = vpop.f32.mrf.mxu1 }
 0x26d   :  { %v1041_v51 = vpop.f32.mrf.mxu3  ;;  %v1054_v52 = vpop.f32.mrf.mxu0 }
 0x26e   :  { %v1068_v62 = vadd.f32 %v1067_v50, %v1054_v52  ;;  %v6527_v50 = vld [vmem:[#allocation2 + $0x4d8] sm:$0xf0]  ;;  %v6469_v52 = vld [vmem:[#allocation2 + $0x460] sm:$0xf] }
 0x26f   :  { %v1069_v53 = vpop.f32.mrf.mxu1 }
 0x270   :  { %v8335_v53 = vld [vmem:[#allocation2 + $0x464] sm:$0xf0] }
 0x271   :  { %v6470_v57 = vor.u32 %v8335_v53, %v6469_v52  ;;  %v6495_v53 = vld [vmem:[#allocation2 + $0x498] sm:$0xf0] }
 0x273   :  { %v1028_v54 = vpop.f32.mrf.mxu2  ;;  %1574 = vmatpush.bf16.msra.mxu2 %v6470_v57  ;;  %v8326_v57 = vld [vmem:[#allocation2 + $0x424] sm:$0xf] }
 0x274   :  { %v1042_v7 = vadd.f32 %v1041_v51, %v1028_v54  ;;  %v6530_v51 = vor.u32 %v8348_v44, %v6527_v50  ;;  %v8334_v54 = vld [vmem:[#allocation2 + $0x464] sm:$0xf]  ;;  %v6447_v44 = vld [vmem:[#allocation2 + $0x438] sm:$0xf0] }
 0x275   :  { %v1043_v55 = vpop.f32.mrf.mxu3  ;;  %v1056_v56 = vpop.f32.mrf.mxu0 }
 0x276   :  { %1614 = vmatpush.bf16.msrb.mxu1 %v6530_v51 }
 0x277   :  { %v1279_v58 = vpop.f32.mrf.mxu1 }
 0x27b   :  { %v1030_v60 = vpop.f32.mrf.mxu2 }
 0x27c   :  { %v6517_v60 = vld [vmem:[#allocation2 + $0x4c0] sm:$0xf] }
 0x27d   :  { %v1253_v63 = vpop.f32.mrf.mxu3  ;;  %v1266_v0 = vpop.f32.mrf.mxu0 }
 0x27e   :  { %v1267_v1 = vadd.f32 %v1266_v0, %v1068_v62  ;;  %v8346_v62 = vld [vmem:[#allocation2 + $0x4c4] sm:$0xf] }
 0x27f   :  { %v1281_v3 = vpop.f32.mrf.mxu1 }
 0x280   :  { %v1280_v4 = vadd.f32 %v1279_v58, %v1267_v1  ;;  %v6471_v58 = vld [vmem:[#allocation2 + $0x468] sm:$0xf0]  ;;  %v6518_v1 = vor.u32 %v8347_v61, %v6517_v60 }
 0x281   :  { %v6474_v59 = vor.u32 %v8334_v54, %v6471_v58  ;;  %v6498_v54 = vor.u32 %v8340_v48, %v6495_v53  ;;  %v6439_v61 = vld [vmem:[#allocation2 + $0x428] sm:$0xf0] }
 0x282   :  { %v9045_v8 = vadd.f32 %v1287_v2, %v1280_v4  ;;  %v6519_v2 = vld [vmem:[#allocation2 + $0x4c8] sm:$0xf0]  ;;  %v6461_v4 = vld [vmem:[#allocation2 + $0x450] sm:$0xf]  ;;  %1589 = vmatpush.bf16.msra.mxu3 %v6518_v1  ;;  %v8338_v1 = vld [vmem:[#allocation2 + $0x484] sm:$0xf] }
 0x283   :  { %v1240_v10 = vpop.f32.mrf.mxu2  ;;  %1600 = vmatpush.bf16.msrb.mxu0 %v6474_v59  ;;  %v6522_v3 = vor.u32 %v8346_v62, %v6519_v2  ;;  %v6442_v62 = vor.u32 %v8326_v57, %v6439_v61  ;;  %v1362_v48 = vld [vmem:[#allocation4 + $0x5] ss:$8 sm:$0x3] }
 0x284   :  { %v1293_v11 = vmul.f32 %v9043_v6, %v9045_v8  ;;  %v1241_v12 = vadd.f32 %v1240_v10, %v1042_v7  ;;  %v8332_v7 = vld [vmem:[#allocation2 + $0x454] sm:$0xf] }
 0x285   :  { %v1255_v14 = vpop.f32.mrf.mxu3  ;;  %v1268_v15 = vpop.f32.mrf.mxu0  ;;  %1615 = vmatpush.bf16.msrb.mxu1 %v6522_v3 }
 0x286   :  { %v1300_v18 = vrot.slane %v1293_v11, 4  ;;  %v1254_v19 = vadd.f32 %v1253_v63, %v1241_v12  ;;  %v6462_v12 = vor.u32 %v8333_v5, %v6461_v4  ;;  %v6509_v15 = vld [vmem:[#allocation2 + $0x4b0] sm:$0xf]  ;;  %v6487_v5 = vld [vmem:[#allocation2 + $0x488] sm:$0xf0] }
 0x288   :  { %v1301_v23 = vadd.f32 %v1300_v18, %v1293_v11  ;;  %v9049_v24 = vadd.f32 %v1286_v13, %v1254_v19  ;;  %v6463_v13 = vld [vmem:[#allocation2 + $0x458] sm:$0xf0]  ;;  %1575 = vmatpush.bf16.msra.mxu2 %v6462_v12  ;;  %v6510_v19 = vor.u32 %v8345_v16, %v6509_v15  ;;  %v8325_v12 = vld [vmem:[#allocation2 + $0x414] sm:$0xf0] }
 0x289   :  { %v6466_v14 = vor.u32 %v8332_v7, %v6463_v13  ;;  %1616 = vmatpush.bf16.msrb.mxu1 %v6514_v21  ;;  %v6429_v7 = vld [vmem:[#allocation2 + $0x410] sm:$0xf]  ;;  %v8324_v13 = vld [vmem:[#allocation2 + $0x414] sm:$0xf] }
 0x28a   :  { %v1302_v28 = vrot.slane %v1301_v23, 2  ;;  %v1292_v29 = vmul.f32 %v9043_v6, %v9049_v24  ;;  %1590 = vmatpush.bf16.msra.mxu3 %v6510_v19  ;;  %v6430_v17 = vor.u32 %v8325_v12, %v6429_v7  ;;  %v6615_v19 = vld [vmem:[#allocation6 + $0x8] sm:$0xf0] }
 0x28b   :  { %v1242_v32 = vpop.f32.mrf.mxu2  ;;  %1601 = vmatpush.bf16.msrb.mxu0 %v6466_v14  ;;  %v6431_v14 = vld [vmem:[#allocation2 + $0x418] sm:$0xf0] }
 0x28c   :  { %v1303_v37 = vadd.f32 %v1302_v28, %v1301_v23  ;;  %v1294_v38 = vrot.slane %v1292_v29, 4  ;;  %v8330_v23 = vld [vmem:[#allocation2 + $0x444] sm:$0xf]  ;;  %v6455_v28 = vld [vmem:[#allocation2 + $0x448] sm:$0xf0] }
 0x28d   :  { %v8342_v32 = vld [vmem:[#allocation2 + $0x4a4] sm:$0xf]  ;;  %v6681_v12 = vld [vmem:[#allocation2 + $0x578] sm:$0xf0] }
 0x28e   :  { %v1304_v45 = vrot.slane %v1303_v37, 1  ;;  %v1295_v46 = vadd.f32 %v1294_v38, %v1292_v29  ;;  %v6458_v29 = vor.u32 %v8330_v23, %v6455_v28  ;;  %v6445_v38 = vld [vmem:[#allocation2 + $0x430] sm:$0xf]  ;;  %1591 = vmatpush.bf16.msra.mxu3 %v6502_v35  ;;  %v8323_v23 = vld [vmem:[#allocation2 + $0x404] sm:$0xf0] }
 0x28f   :  { %v6446_v43 = vor.u32 %v8329_v39, %v6445_v38 }
 0x290   :  { %v1305_v55 = vadd.f32 %v1304_v45, %v1303_v37  ;;  %v1296_v56 = vrot.slane %v1295_v46, 2  ;;  %1602 = vmatpush.bf16.msrb.mxu0 %v6458_v29  ;;  %v6506_v37 = vor.u32 %v8342_v32, %v6503_v36  ;;  %v6450_v45 = vor.u32 %v8328_v40, %v6447_v44  ;;  %v6423_v29 = vld [vmem:[#allocation2 + $0x408] sm:$0xf0]  ;;  %v6613_v32 = vld [vmem:[#allocation6] sm:$0xf] }
 0x292   :  { %v1307_v63 = vmul.f32 0.25, %v1305_v55  ;;  %v1297_v0 = vadd.f32 %v1296_v56, %v1295_v46  ;;  %1617 = vmatpush.bf16.msrb.mxu1 %v6506_v37  ;;  %v6493_v46 = vld [vmem:[#allocation2 + $0x490] sm:$0xf]  ;;  %v6437_v55 = vld [vmem:[#allocation2 + $0x420] sm:$0xf] }
 0x293   :  { %v8327_v56 = vld [vmem:[#allocation2 + $0x424] sm:$0xf0] }
 0x294   :  { %v9054_v10 = vsub.f32 %v9045_v8, %v1307_v63  ;;  %v1298_v11 = vrot.slane %v1297_v0, 1  ;;  %v6453_v8 = vld [vmem:[#allocation2 + $0x440] sm:$0xf]  ;;  %1603 = vmatpush.bf16.msrb.mxu0 %v6450_v45  ;;  %v6438_v60 = vor.u32 %v8327_v56, %v6437_v55  ;;  %v1353_v45 = vld [vmem:[#allocation4 + $0x4] ss:$8 sm:$0x3] }
 0x295   :  { %v6454_v27 = vor.u32 %v8331_v22, %v6453_v8  ;;  %v6485_v63 = vld [vmem:[#allocation2 + $0x480] sm:$0xf]  ;;  %v1355_v61 = vperm.slane %v1353_v45, 0 }
 0x296   :  { %v1311_v9 = vmul.f32 %v9054_v10, %v9054_v10  ;;  %v1299_v18 = vadd.f32 %v1298_v11, %v1297_v0  ;;  %1618 = vmatpush.bf16.msrb.mxu1 %v6498_v54  ;;  %v8339_v0 = vld [vmem:[#allocation2 + $0x484] sm:$0xf0]  ;;  %v6490_v11 = vor.u32 %v8338_v1, %v6487_v5  ;;  %v6421_v22 = vld [vmem:[#allocation2 + $0x400] sm:$0xf]  ;;  %v1365_v54 = vperm.slane %v1362_v48, 1 }
 0x297   :  { %1576 = vmatpush.bf16.msra.mxu2 %v6454_v27  ;;  %v6486_v4 = vor.u32 %v8339_v0, %v6485_v63  ;;  %v6422_v28 = vor.u32 %v8323_v23, %v6421_v22  ;;  %v1364_v1 = vperm.slane %v1362_v48, 0  ;;  %v8380_v22 = vld [vmem:[#allocation2 + $0x554] sm:$0xf]  ;;  %v6665_v23 = vld [vmem:[#allocation2 + $0x558] sm:$0xf0] }
 0x298   :  { %v1313_v25 = vmul.f32 %v9043_v6, %v1311_v9  ;;  %v1306_v26 = vmul.f32 0.25, %v1299_v18  ;;  %1604 = vmatpush.bf16.msrb.mxu0 %v6442_v62  ;;  %v6434_v9 = vor.u32 %v8324_v13, %v6431_v14  ;;  %v8402_v18 = vld [vmem:[#allocation6 + $0x4] sm:$0xf] }
 0x299   :  { %v6618_v20 = vor.u32 %v8402_v18, %v6615_v19  ;;  %v6673_v18 = vld [vmem:[#allocation2 + $0x568] sm:$0xf0] }
 0x29a   :  { %v1320_v33 = vrot.slane %v1313_v25, 4  ;;  %v9060_v34 = vsub.f32 %v9049_v24, %v1306_v26  ;;  %v8341_v24 = vld [vmem:[#allocation2 + $0x494] sm:$0xf0]  ;;  %1619 = vmatpush.bf16.msrb.mxu1 %v6490_v11  ;;  %v8384_v11 = vld [vmem:[#allocation2 + $0x574] sm:$0xf] }
 0x29b   :  { %1577 = vmatpush.bf16.msra.mxu2 %v6446_v43  ;;  %v6494_v52 = vor.u32 %v8341_v24, %v6493_v46 }
 0x29c   :  { %v1321_v41 = vadd.f32 %v1320_v33, %v1313_v25  ;;  %v1310_v42 = vmul.f32 %v9060_v34, %v9060_v34  ;;  %1605 = vmatpush.bf16.msrb.mxu0 %v6434_v9  ;;  %v8322_v25 = vld [vmem:[#allocation2 + $0x404] sm:$0xf]  ;;  %v8403_v33 = vld [vmem:[#allocation6 + $0x4] sm:$0xf0] }
 0x29d   :  { %1592 = vmatpush.bf16.msra.mxu3 %v6494_v52  ;;  %v6426_v30 = vor.u32 %v8322_v25, %v6423_v29  ;;  %v6614_v35 = vor.u32 %v8403_v33, %v6613_v32  ;;  %v8378_v29 = vld [vmem:[#allocation2 + $0x544] sm:$0xf] }
 0x29e   :  { %v1322_v50 = vrot.slane %v1321_v41, 2  ;;  %v1312_v51 = vmul.f32 %v9043_v6, %v1310_v42  ;;  %1934 = vmatpush.bf16.msra.mxu1 %v6618_v20  ;;  %v8394_v20 = vld [vmem:[#allocation2 + $0x5c4] sm:$0xf] }
 0x29f   :  { %1578 = vmatpush.bf16.msra.mxu2 %v6438_v60  ;;  %v6745_v60 = vld [vmem:[#allocation2 + $0x5f8] sm:$0xf0]  ;;  %v8390_v33 = vld [vmem:[#allocation2 + $0x5a4] sm:$0xf] }
 0x2a0   :  { %v1323_v58 = vadd.f32 %v1322_v50, %v1321_v41  ;;  %v1314_v59 = vrot.slane %v1312_v51, 4  ;;  %1606 = vmatpush.bf16.msrb.mxu0 %v6426_v30  ;;  %v1356_v50 = vperm.slane %v1353_v45, 1  ;;  %v6657_v30 = vld [vmem:[#allocation2 + $0x548] sm:$0xf0] }
 0x2a1   :  { %1593 = vmatpush.bf16.msra.mxu3 %v6486_v4  ;;  %v8398_v4 = vld [vmem:[#allocation2 + $0x5e4] sm:$0xf] }
 0x2a2   :  { %v1324_v2 = vrot.slane %v1323_v58, 1  ;;  %v1315_v3 = vadd.f32 %v1314_v59, %v1312_v51  ;;  %v8400_v59 = vld [vmem:[#allocation2 + $0x5f4] sm:$0xf] }
 0x2a3   :  { %1579 = vmatpush.bf16.msra.mxu2 %v6430_v17  ;;  %v6684_v17 = vor.u32 %v8384_v11, %v6681_v12  ;;  %v1407_v11 = vld [vmem:[#allocation4 + $0x6] ss:$8 sm:$0x3] }
 0x2a4   :  { %v1325_v15 = vadd.f32 %v1324_v2, %v1323_v58  ;;  %v1316_v16 = vrot.slane %v1315_v3, 2  ;;  %1921 = vmatpush.bf16.msra.mxu0 %v6614_v35  ;;  %v6748_v2 = vor.u32 %v8400_v59, %v6745_v60  ;;  %v6705_v35 = vld [vmem:[#allocation2 + $0x5a8] sm:$0xf0]  ;;  %v8369_v60 = vld [vmem:[#allocation9 + $0x78] sm:$0xff]  ;;  %v8366_v12 = vld [vmem:[#allocation9 + $0x60] sm:$0xff] }
 0x2a5   :  { %1852 = vmatpush.bf16.msrb.mxu3 %v8369_v60 }
 0x2a6   :  { %v1327_v21 = vmul.f32 0.25, %v1325_v15  ;;  %v1317_v8 = vadd.f32 %v1316_v16, %v1315_v3  ;;  %v8396_v15 = vld [vmem:[#allocation2 + $0x5d4] sm:$0xf]  ;;  %v6729_v16 = vld [vmem:[#allocation2 + $0x5d8] sm:$0xf0] }
 0x2a7   :  { %1580 = vmatpush.bf16.msra.mxu2 %v6422_v28  ;;  %v6732_v19 = vor.u32 %v8396_v15, %v6729_v16  ;;  %v6668_v28 = vor.u32 %v8380_v22, %v6665_v23  ;;  %v6841_v15 = vld [vmem:[#allocation2 + $0x6b8] sm:$0xf0]  ;;  %v8364_v23 = vld [vmem:[#allocation9 + $0x50] sm:$0xff] }
 0x2a8   :  { %v1329_v26 = vadd.f32 1e-05, %v1327_v21  ;;  %v1318_v27 = vrot.slane %v1317_v8, 1  ;;  %v6721_v21 = vld [vmem:[#allocation2 + $0x5c8] sm:$0xf0] }
 0x2a9   :  { %v6724_v25 = vor.u32 %v8394_v20, %v6721_v21 }
 0x2aa   :  { %8774 = vrsqrt.f32 %v1329_v26  ;;  %v1319_v31 = vadd.f32 %v1318_v27, %v1317_v8  ;;  %vm1346_vm2 = vweird.f32 %v1329_v26  ;;  %v6713_v27 = vld [vmem:[#allocation2 + $0x5b8] sm:$0xf0] }
 0x2ac   :  { %v1326_v36 = vmul.f32 0.25, %v1319_v31  ;;  %v790_v31 = vld [vmem:[%s9862_s1] sm:$0xf] }
 0x2ae   :  { %v1328_v37 = vadd.f32 1e-05, %v1326_v36  ;;  %v6660_v36 = vor.u32 %v8378_v29, %v6657_v30  ;;  %v1409_v29 = vperm.slane %v1407_v11, 0 }
 0x2b0   :  { %v8775_v38 = vpop.eup %8774  ;;  %8776 = vrsqrt.f32 %v1328_v37  ;;  %vm1336_vm5 = vweird.f32 %v1328_v37 }
 0x2b1   :  { %v1341_v39 = vmul.f32 %v8775_v38, %v1329_v26  ;;  %vm1347_vm1 = vweird.f32 %v8775_v38  ;;  %v8392_v26 = vld [vmem:[#allocation2 + $0x5b4] sm:$0xf] }
 0x2b2   :  { %vm1348_vm3 = vmor %vm1346_vm2, %vm1347_vm1  ;;  %v6716_v32 = vor.u32 %v8392_v26, %v6713_v27  ;;  %v8422_v26 = vld [vmem:[#allocation2 + $0x694] sm:$0xf]  ;;  %v6825_v27 = vld [vmem:[#allocation2 + $0x698] sm:$0xf0] }
 0x2b3   :  { %v1342_v40 = vmul.f32 %v8775_v38, %v1341_v39  ;;  %v6708_v39 = vor.u32 %v8390_v33, %v6705_v35  ;;  %v6828_v30 = vor.u32 %v8422_v26, %v6825_v27  ;;  %v8363_v33 = vld [vmem:[#allocation9 + $0x48] sm:$0xff] }
 0x2b5   :  { %v1343_v41 = vmul.f32 0.5, %v1342_v40  ;;  %v8388_v40 = vld [vmem:[#allocation2 + $0x594] sm:$0xf] }
 0x2b6   :  { %v8777_v42 = vpop.eup %8776 }
 0x2b7   :  { %v1344_v43 = vsub.f32 1.5, %v1343_v41  ;;  %v1331_v44 = vmul.f32 %v8777_v42, %v1328_v37  ;;  %vm1337_vm4 = vweird.f32 %v8777_v42  ;;  %v8376_v37 = vld [vmem:[#allocation2 + $0x534] sm:$0xf]  ;;  %v6697_v41 = vld [vmem:[#allocation2 + $0x598] sm:$0xf0] }
 0x2b8   :  { %vm1338_vm6 = vmor %vm1336_vm5, %vm1337_vm4  ;;  %v6700_v45 = vor.u32 %v8388_v40, %v6697_v41 }
 0x2b9   :  { %v1345_v46 = vmul.f32 %v8775_v38, %v1344_v43  ;;  %v1332_v24 = vmul.f32 %v8777_v42, %v1331_v44  ;;  %v8374_v43 = vld [vmem:[#allocation2 + $0x524] sm:$0xf]  ;;  %v6641_v44 = vld [vmem:[#allocation2 + $0x528] sm:$0xf0] }
 0x2ba   :  { %v6644_v48 = vor.u32 %v8374_v43, %v6641_v44  ;;  %v8359_v43 = vld [vmem:[#allocation9 + $0x28] sm:$0xff] }
 0x2bb   :  { %v1349_v51 = vsel %vm1348_vm3, %v8775_v38, %v1345_v46  ;;  %v1333_v52 = vmul.f32 0.5, %v1332_v24  ;;  %v6649_v38 = vld [vmem:[#allocation2 + $0x538] sm:$0xf0]  ;;  %v8386_v46 = vld [vmem:[#allocation2 + $0x584] sm:$0xf] }
 0x2bc   :  { %v1351_v53 = vmul.f32 %v1349_v51, %v9054_v10  ;;  %v6737_v10 = vld [vmem:[#allocation2 + $0x5e8] sm:$0xf0]  ;;  %v6633_v51 = vld [vmem:[#allocation2 + $0x518] sm:$0xf0] }
 0x2bd   :  { %v1334_v55 = vsub.f32 1.5, %v1333_v52  ;;  %v6740_v13 = vor.u32 %v8398_v4, %v6737_v10  ;;  %v6689_v24 = vld [vmem:[#allocation2 + $0x588] sm:$0xf0]  ;;  %v8428_v10 = vld [vmem:[#allocation2 + $0x6c4] sm:$0xf] }
 0x2be   :  { %v1360_v56 = vmul.f32 %v1356_v50, %v1351_v53  ;;  %v8372_v50 = vld [vmem:[#allocation2 + $0x514] sm:$0xf]  ;;  %v6692_v52 = vor.u32 %v8386_v46, %v6689_v24  ;;  %v8367_v4 = vld [vmem:[#allocation9 + $0x68] sm:$0xff]  ;;  %v8362_v46 = vld [vmem:[#allocation9 + $0x40] sm:$0xff] }
 0x2bf   :  { %v1335_v57 = vmul.f32 %v8777_v42, %v1334_v55  ;;  %v6636_v53 = vor.u32 %v8372_v50, %v6633_v51  ;;  %v6625_v55 = vld [vmem:[#allocation2 + $0x508] sm:$0xf0]  ;;  %v6743_v24 = vld [vmem:[#allocation2 + $0x5f0] sm:$0xf] }
 0x2c0   :  { %v1369_v58 = vadd.f32 %v1365_v54, %v1360_v56  ;;  %v8370_v54 = vld [vmem:[#allocation2 + $0x504] sm:$0xf] }
 0x2c1   :  { %v1339_v62 = vsel %vm1338_vm6, %v8777_v42, %v1335_v57  ;;  %v6652_v42 = vor.u32 %v8376_v37, %v6649_v38  ;;  %v6628_v56 = vor.u32 %v8370_v54, %v6625_v55  ;;  %v8434_v57 = vld [vmem:[#allocation2 + $0x6f4] sm:$0xf]  ;;  %v6817_v37 = vld [vmem:[#allocation2 + $0x688] sm:$0xf0]  ;;  %v8358_v54 = vld [vmem:[#allocation9 + $0x20] sm:$0xff] }
 0x2c2   :  { %v1350_v63 = vmul.f32 %v1339_v62, %v9060_v34  ;;  %v1371_v0 = vmax.f32 %v1369_v58, 0.0  ;;  %v8382_v34 = vld [vmem:[#allocation2 + $0x564] sm:$0xf]  ;;  %v6873_v58 = vld [vmem:[#allocation2 + $0x6f8] sm:$0xf0] }
 0x2c3   :  { %v6676_v8 = vor.u32 %v8382_v34, %v6673_v18  ;;  %v6876_v59 = vor.u32 %v8434_v57, %v6873_v58  ;;  %v6865_v62 = vld [vmem:[#allocation2 + $0x6e8] sm:$0xf0]  ;;  %v8424_v34 = vld [vmem:[#allocation2 + $0x6a4] sm:$0xf]  ;;  %v6735_v57 = vld [vmem:[#allocation2 + $0x5e0] sm:$0xf] }
 0x2c4   :  { %v1405_v3 = vpack.c.bf16 %v1371_v0, %v1371_v0  ;;  %v1359_v5 = vmul.f32 %v1355_v61, %v1350_v63  ;;  %v8432_v61 = vld [vmem:[#allocation2 + $0x6e4] sm:$0xf]  ;;  %v8368_v0 = vld [vmem:[#allocation9 + $0x70] sm:$0xff]  ;;  %v6833_v18 = vld [vmem:[#allocation2 + $0x6a8] sm:$0xf0] }
 0x2c5   :  { %v6868_v63 = vor.u32 %v8432_v61, %v6865_v62  ;;  %1853 = vmatpush.bf16.msrb.mxu3 %v8368_v0  ;;  %v8399_v58 = vld [vmem:[#allocation2 + $0x5e4] sm:$0xf0]  ;;  %v8357_v0 = vld [vmem:[#allocation9 + $0x18] sm:$0xff] }
 0x2c6   :  { %1594 = vmatmul.bf16.vlgmr.msra.gmra.mxu3 %v1405_v3  ;;  %1620 = vmatmul.bf16.vlgmr.msrb.gmra.mxu1 %v1405_v3  ;;  %v1368_v7 = vadd.f32 %v1364_v1, %v1359_v5  ;;  %v8430_v1 = vld [vmem:[#allocation2 + $0x6d4] sm:$0xf]  ;;  %v6849_v5 = vld [vmem:[#allocation2 + $0x6c8] sm:$0xf0]  ;;  %v6736_v60 = vor.u32 %v8399_v58, %v6735_v57  ;;  %v6663_v57 = vld [vmem:[#allocation2 + $0x550] sm:$0xf] }
 0x2c7   :  { %2139 = vmatpush.bf16.msrb.mxu1 %v6748_v2  ;;  %v6857_v2 = vld [vmem:[#allocation2 + $0x6d8] sm:$0xf0]  ;;  %v8381_v58 = vld [vmem:[#allocation2 + $0x554] sm:$0xf0] }
 0x2c8   :  { %v1370_v14 = vmax.f32 %v1368_v7, 0.0  ;;  %v6860_v3 = vor.u32 %v8430_v1, %v6857_v2  ;;  %v6852_v7 = vor.u32 %v8428_v10, %v6849_v5 }
 0x2c9   :  { %1854 = vmatpush.bf16.msrb.mxu3 %v8367_v4  ;;  %v8397_v4 = vld [vmem:[#allocation2 + $0x5d4] sm:$0xf0] }
 0x2ca   :  { %v1404_v9 = vpack.c.bf16 %v1370_v14, %v1370_v14  ;;  %v8426_v14 = vld [vmem:[#allocation2 + $0x6b4] sm:$0xf] }
 0x2cb   :  { %2140 = vmatpush.bf16.msrb.mxu1 %v6740_v13  ;;  %v6844_v16 = vor.u32 %v8426_v14, %v6841_v15  ;;  %v6719_v15 = vld [vmem:[#allocation2 + $0x5c0] sm:$0xf] }
 0x2cc   :  { %1581 = vmatmul.bf16.vlgmr.msra.gmra.mxu2 %v1404_v9  ;;  %1607 = vmatmul.bf16.vlgmr.msrb.gmra.mxu0 %v1404_v9  ;;  %v8365_v9 = vld [vmem:[#allocation9 + $0x58] sm:$0xff] }
 0x2cd   :  { %2126 = vmatpush.bf16.msrb.mxu0 %v6684_v17  ;;  %1855 = vmatpush.bf16.msrb.mxu3 %v8366_v12  ;;  %v1410_v17 = vperm.slane %v1407_v11, 1  ;;  %v8356_v12 = vld [vmem:[#allocation9 + $0x10] sm:$0xff] }
 0x2cf   :  { %2141 = vmatpush.bf16.msrb.mxu1 %v6732_v19  ;;  %v6836_v19 = vor.u32 %v8424_v34, %v6833_v18 }
 0x2d1   :  { %2127 = vmatpush.bf16.msrb.mxu0 %v6676_v8  ;;  %1856 = vmatpush.bf16.msrb.mxu3 %v8365_v9  ;;  %v8361_v8 = vld [vmem:[#allocation9 + $0x38] sm:$0xff] }
 0x2d2   :  { %1839 = vmatpush.bf16.msrb.mxu2 %v8361_v8  ;;  %v6711_v8 = vld [vmem:[#allocation2 + $0x5b0] sm:$0xf] }
 0x2d3   :  { %2142 = vmatpush.bf16.msrb.mxu1 %v6724_v25 }
 0x2d5   :  { %2128 = vmatpush.bf16.msrb.mxu0 %v6668_v28  ;;  %1857 = vmatpush.bf16.msrb.mxu3 %v8364_v23 }
 0x2d6   :  { %6620 = vmatmul.msk.bf16.vlgmr.msra.gmra.mxu1 %vm1910_vm7, %v790_v31 }
 0x2d7   :  { %2143 = vmatpush.bf16.msrb.mxu1 %v6716_v32 }
 0x2d9   :  { %2129 = vmatpush.bf16.msrb.mxu0 %v6660_v36  ;;  %v8420_v36 = vld [vmem:[#allocation2 + $0x684] sm:$0xf]  ;;  %1858 = vmatpush.bf16.msrb.mxu3 %v8363_v33  ;;  %v9089_v33 = vld [vmem:[#allocation4 + $0x11] ss:$8 sm:$0x3] }
 0x2da   :  { %v6820_v40 = vor.u32 %v8420_v36, %v6817_v37  ;;  %v6703_v36 = vld [vmem:[#allocation2 + $0x5a0] sm:$0xf]  ;;  %v8391_v37 = vld [vmem:[#allocation2 + $0x5a4] sm:$0xf0] }
 0x2db   :  { %2144 = vmatpush.bf16.msrb.mxu1 %v6708_v39 }
 0x2dc   :  { %6619 = vmatmul.msk.bf16.vlgmr.msra.gmra.mxu0 %vm1910_vm7, %v790_v31  ;;  %v8360_v31 = vld [vmem:[#allocation9 + $0x30] sm:$0xff] }
 0x2dd   :  { %2130 = vmatpush.bf16.msrb.mxu0 %v6652_v42  ;;  %1840 = vmatpush.bf16.msrb.mxu2 %v8360_v31 }
 0x2de   :  { %1859 = vmatpush.bf16.msrb.mxu3 %v8362_v46 }
 0x2df   :  { %2145 = vmatpush.bf16.msrb.mxu1 %v6700_v45 }
 0x2e1   :  { %2131 = vmatpush.bf16.msrb.mxu0 %v6644_v48  ;;  %v8401_v48 = vld [vmem:[#allocation2 + $0x5f4] sm:$0xf0]  ;;  %1841 = vmatpush.bf16.msrb.mxu2 %v8359_v43  ;;  %v6671_v43 = vld [vmem:[#allocation2 + $0x560] sm:$0xf] }
 0x2e2   :  { %v6744_v51 = vor.u32 %v8401_v48, %v6743_v24 }
 0x2e3   :  { %2146 = vmatpush.bf16.msrb.mxu1 %v6692_v52 }
 0x2e4   :  { %2113 = vmatpush.bf16.msra.mxu3 %v6744_v51  ;;  %v6695_v51 = vld [vmem:[#allocation2 + $0x590] sm:$0xf] }
 0x2e5   :  { %2132 = vmatpush.bf16.msrb.mxu0 %v6636_v53  ;;  %1842 = vmatpush.bf16.msrb.mxu2 %v8358_v54 }
 0x2e6   :  { %2147 = vmatmul.bf16.vlgmr.msrb.gmra.mxu1 %v9035_v47 }
 0x2e7   :  { %2403 = vmatpush.bf16.msra.mxu1 %v6876_v59 }
 0x2e8   :  { %2114 = vmatpush.bf16.msra.mxu3 %v6736_v60 }
 0x2e9   :  { %2133 = vmatpush.bf16.msrb.mxu0 %v6628_v56  ;;  %1843 = vmatpush.bf16.msrb.mxu2 %v8357_v0  ;;  %v6687_v0 = vld [vmem:[#allocation2 + $0x580] sm:$0xf] }
 0x2eb   :  { %2404 = vmatpush.bf16.msra.mxu1 %v6868_v63 }
 0x2ec   :  { %2134 = vmatmul.bf16.vlgmr.msrb.gmra.mxu0 %v9039_v49 }
 0x2ed   :  { %1844 = vmatpush.bf16.msrb.mxu2 %v8356_v12 }
 0x2ef   :  { %2405 = vmatpush.bf16.msra.mxu1 %v6860_v3  ;;  %v6727_v3 = vld [vmem:[#allocation2 + $0x5d0] sm:$0xf] }
 0x2f0   :  { %v6728_v5 = vor.u32 %v8397_v4, %v6727_v3 }
 0x2f2   :  { %2115 = vmatpush.bf16.msra.mxu3 %v6728_v5  ;;  %v6655_v5 = vld [vmem:[#allocation2 + $0x540] sm:$0xf] }
 0x2f3   :  { %2406 = vmatpush.bf16.msra.mxu1 %v6852_v7 }
 0x2f7   :  { %2407 = vmatpush.bf16.msra.mxu1 %v6844_v16  ;;  %v8395_v16 = vld [vmem:[#allocation2 + $0x5c4] sm:$0xf0] }
 0x2fb   :  { %2408 = vmatpush.bf16.msra.mxu1 %v6836_v19  ;;  %v8355_v19 = vld [vmem:[#allocation9 + $0x8] sm:$0xff] }
 0x2fc   :  { %1845 = vmatpush.bf16.msrb.mxu2 %v8355_v19 }
 0x2ff   :  { %2409 = vmatpush.bf16.msra.mxu1 %v6828_v30  ;;  %v8385_v30 = vld [vmem:[#allocation2 + $0x574] sm:$0xf0] }
 0x303   :  { %2410 = vmatpush.bf16.msra.mxu1 %v6820_v40  ;;  %v6704_v40 = vor.u32 %v8391_v37, %v6703_v36  ;;  %v6623_v37 = vld [vmem:[#allocation2 + $0x500] sm:$0xf] }
 0x343   :  { %v1621_v13 = vpop.f32.mrf.mxu1 }
 0x349   :  { %v1595_v20 = vpop.f32.mrf.mxu3  ;;  %v1608_v21 = vpop.f32.mrf.mxu0 }
 0x34a   :  { %v1609_v22 = vadd.f32 %v1608_v21, %v1410_v17  ;;  %v6720_v17 = vor.u32 %v8395_v16, %v6719_v15 }
 0x34b   :  { %v1623_v25 = vpop.f32.mrf.mxu1 }
 0x34c   :  { %v1622_v28 = vadd.f32 %v1621_v13, %v1609_v22  ;;  %2116 = vmatpush.bf16.msra.mxu3 %v6720_v17  ;;  %v8393_v22 = vld [vmem:[#allocation2 + $0x5b4] sm:$0xf0]  ;;  %v6647_v17 = vld [vmem:[#allocation2 + $0x530] sm:$0xf] }
 0x34d   :  { %v6712_v25 = vor.u32 %v8393_v22, %v6711_v8 }
 0x34e   :  { %v1626_v32 = vmul.f32 %v9043_v6, %v1622_v28 }
 0x34f   :  { %v1582_v35 = vpop.f32.mrf.mxu2 }
 0x350   :  { %v1633_v38 = vrot.slane %v1626_v32, 4  ;;  %v1583_v39 = vadd.f32 %v1582_v35, %v1409_v29  ;;  %2117 = vmatpush.bf16.msra.mxu3 %v6712_v25  ;;  %v6679_v29 = vld [vmem:[#allocation2 + $0x570] sm:$0xf] }
 0x351   :  { %v1597_v41 = vpop.f32.mrf.mxu3  ;;  %v1610_v42 = vpop.f32.mrf.mxu0  ;;  %v6680_v35 = vor.u32 %v8385_v30, %v6679_v29 }
 0x352   :  { %v1634_v44 = vadd.f32 %v1633_v38, %v1626_v32  ;;  %v1596_v45 = vadd.f32 %v1595_v20, %v1583_v39  ;;  %v2156_v42 = vperm.slane %v9089_v33, 1 }
 0x353   :  { %v9075_v50 = vpop.f32.mrf.mxu1 }
 0x354   :  { %v1635_v52 = vrot.slane %v1634_v44, 2  ;;  %v1625_v53 = vmul.f32 %v9043_v6, %v1596_v45  ;;  %2118 = vmatpush.bf16.msra.mxu3 %v6704_v40 }
 0x356   :  { %v1636_v55 = vadd.f32 %v1635_v52, %v1634_v44  ;;  %v1627_v56 = vrot.slane %v1625_v53, 4  ;;  %v8383_v44 = vld [vmem:[#allocation2 + $0x564] sm:$0xf0]  ;;  %v8389_v52 = vld [vmem:[#allocation2 + $0x594] sm:$0xf0] }
 0x357   :  { %v1584_v59 = vpop.f32.mrf.mxu2  ;;  %v6672_v48 = vor.u32 %v8383_v44, %v6671_v43  ;;  %v6696_v54 = vor.u32 %v8389_v52, %v6695_v51 }
 0x358   :  { %v1637_v61 = vrot.slane %v1636_v55, 1  ;;  %v1628_v62 = vadd.f32 %v1627_v56, %v1625_v53 }
 0x359   :  { %v9078_v63 = vpop.f32.mrf.mxu0  ;;  %2119 = vmatpush.bf16.msra.mxu3 %v6696_v54 }
 0x35a   :  { %v1638_v1 = vadd.f32 %v1637_v61, %v1636_v55  ;;  %v1629_v2 = vrot.slane %v1628_v62, 2 }
 0x35b   :  { %v1938_v10 = vpop.f32.mrf.mxu1 }
 0x35c   :  { %v1640_v7 = vmul.f32 0.25, %v1638_v1  ;;  %v1630_v11 = vadd.f32 %v1629_v2, %v1628_v62  ;;  %v6664_v62 = vor.u32 %v8381_v58, %v6663_v57  ;;  %v8387_v1 = vld [vmem:[#allocation2 + $0x584] sm:$0xf0] }
 0x35e   :  { %v9080_v13 = vsub.f32 %v1622_v28, %v1640_v7  ;;  %v1631_v14 = vrot.slane %v1630_v11, 1  ;;  %v8354_v28 = vld [vmem:[#allocation9] sm:$0xff]  ;;  %v8379_v7 = vld [vmem:[#allocation2 + $0x544] sm:$0xf0] }
 0x35f   :  { %1846 = vmatpush.bf16.msrb.mxu2 %v8354_v28  ;;  %v6656_v15 = vor.u32 %v8379_v7, %v6655_v5  ;;  %v8373_v28 = vld [vmem:[#allocation2 + $0x514] sm:$0xf0]  ;;  %v6847_v7 = vld [vmem:[#allocation2 + $0x6c0] sm:$0xf] }
 0x360   :  { %v1644_v9 = vmul.f32 %v9080_v13, %v9080_v13  ;;  %v1632_v34 = vadd.f32 %v1631_v14, %v1630_v11 }
 0x361   :  { %v1925_v18 = vpop.f32.mrf.mxu0 }
 0x362   :  { %v1646_v20 = vmul.f32 %v9043_v6, %v1644_v9  ;;  %v1639_v21 = vmul.f32 0.25, %v1632_v34  ;;  %v8377_v9 = vld [vmem:[#allocation2 + $0x534] sm:$0xf0] }
 0x363   :  { %v2148_v23 = vpop.f32.mrf.mxu1  ;;  %2100 = vmatpush.bf16.msra.mxu2 %v6680_v35  ;;  %v6648_v18 = vor.u32 %v8377_v9, %v6647_v17  ;;  %v6831_v17 = vld [vmem:[#allocation2 + $0x6a0] sm:$0xf]  ;;  %v8425_v9 = vld [vmem:[#allocation2 + $0x6a4] sm:$0xf0] }
 0x364   :  { %v1653_v26 = vrot.slane %v1646_v20, 4  ;;  %v9085_v27 = vsub.f32 %v1596_v45, %v1639_v21  ;;  %v8375_v21 = vld [vmem:[#allocation2 + $0x524] sm:$0xf0] }
 0x366   :  { %v1654_v31 = vadd.f32 %v1653_v26, %v1646_v20  ;;  %v1643_v32 = vmul.f32 %v9085_v27, %v9085_v27  ;;  %v6639_v20 = vld [vmem:[#allocation2 + $0x520] sm:$0xf]  ;;  %v6631_v26 = vld [vmem:[#allocation2 + $0x510] sm:$0xf] }
 0x367   :  { %2101 = vmatpush.bf16.msra.mxu2 %v6672_v48  ;;  %v6640_v22 = vor.u32 %v8375_v21, %v6639_v20  ;;  %v6632_v29 = vor.u32 %v8373_v28, %v6631_v26  ;;  %v6815_v21 = vld [vmem:[#allocation2 + $0x680] sm:$0xf]  ;;  %v8419_v26 = vld [vmem:[#allocation2 + $0x674] sm:$0xf0] }
 0x368   :  { %v1655_v38 = vrot.slane %v1654_v31, 2  ;;  %v1645_v39 = vmul.f32 %v9043_v6, %v1643_v32  ;;  %v1686_v32 = vld [vmem:[#allocation4 + $0x7] ss:$8 sm:$0x3] }
 0x369   :  { %v2135_v41 = vpop.f32.mrf.mxu0  ;;  %v1689_v43 = vperm.slane %v1686_v32, 1 }
 0x36a   :  { %v1656_v45 = vadd.f32 %v1655_v38, %v1654_v31  ;;  %v1647_v46 = vrot.slane %v1645_v39, 4  ;;  %v2136_v24 = vadd.f32 %v2135_v41, %v9075_v50  ;;  %v6688_v50 = vor.u32 %v8387_v1, %v6687_v0  ;;  %v8371_v38 = vld [vmem:[#allocation2 + $0x504] sm:$0xf0] }
 0x36b   :  { %v2150_v53 = vpop.f32.mrf.mxu1  ;;  %2102 = vmatpush.bf16.msra.mxu2 %v6664_v62  ;;  %v8433_v0 = vld [vmem:[#allocation2 + $0x6e4] sm:$0xf0] }
 0x36c   :  { %v1657_v55 = vrot.slane %v1656_v45, 1  ;;  %v1648_v56 = vadd.f32 %v1647_v46, %v1645_v39  ;;  %v2149_v6 = vadd.f32 %v2148_v23, %v2136_v24  ;;  %2120 = vmatpush.bf16.msra.mxu3 %v6688_v50  ;;  %v6624_v39 = vor.u32 %v8371_v38, %v6623_v37 }
 0x36d   :  { %v1688_v53 = vperm.slane %v1686_v32, 0  ;;  %v8417_v32 = vld [vmem:[#allocation2 + $0x664] sm:$0xf0] }
 0x36e   :  { %v1658_v59 = vadd.f32 %v1657_v55, %v1656_v45  ;;  %v1649_v60 = vrot.slane %v1648_v56, 2  ;;  %v2160_v61 = vadd.f32 %v2156_v42, %v2149_v6  ;;  %v1695_v42 = vld [vmem:[#allocation4 + $0x10] ss:$8 sm:$0x3] }
 0x36f   :  { %2103 = vmatpush.bf16.msra.mxu2 %v6656_v15  ;;  %v1698_v24 = vperm.slane %v1695_v42, 1  ;;  %v6871_v55 = vld [vmem:[#allocation2 + $0x6f0] sm:$0xf]  ;;  %v8427_v15 = vld [vmem:[#allocation2 + $0x6b4] sm:$0xf0] }
 0x370   :  { %v1660_v2 = vmul.f32 0.25, %v1658_v59  ;;  %v1650_v3 = vadd.f32 %v1649_v60, %v1648_v56  ;;  %v2162_v4 = vmax.f32 %v2160_v61, 0.0  ;;  %v8435_v56 = vld [vmem:[#allocation2 + $0x6f4] sm:$0xf0]  ;;  %v1697_v59 = vperm.slane %v1695_v42, 0 }
 0x371   :  { %v2137_v10 = vpop.f32.mrf.mxu0  ;;  %v6872_v60 = vor.u32 %v8435_v56, %v6871_v55  ;;  %v6793_v42 = vld [vmem:[#allocation2 + $0x658] sm:$0xf0] }
 0x372   :  { %v1662_v11 = vadd.f32 1e-05, %v1660_v2  ;;  %v1651_v12 = vrot.slane %v1650_v3, 1  ;;  %v9094_v14 = vpack.c.bf16 %v2162_v4, %v2162_v4  ;;  %v8431_v4 = vld [vmem:[#allocation2 + $0x6d4] sm:$0xf0] }
 0x373   :  { %2104 = vmatpush.bf16.msra.mxu2 %v6648_v18  ;;  %v6823_v18 = vld [vmem:[#allocation2 + $0x690] sm:$0xf]  ;;  %v6777_v56 = vld [vmem:[#allocation2 + $0x638] sm:$0xf0] }
 0x374   :  { %8778 = vrsqrt.f32 %v1662_v11  ;;  %v1652_v16 = vadd.f32 %v1651_v12, %v1650_v3  ;;  %2411 = vmatmul.bf16.vlgmr.msra.gmra.mxu1 %v9094_v14  ;;  %vm1679_vm9 = vweird.f32 %v1662_v11  ;;  %v6855_v3 = vld [vmem:[#allocation2 + $0x6d0] sm:$0xf] }
 0x375   :  { %v6856_v5 = vor.u32 %v8431_v4, %v6855_v3  ;;  %v6839_v12 = vld [vmem:[#allocation2 + $0x6b0] sm:$0xf]  ;;  %v6751_v4 = vld [vmem:[#allocation2 + $0x600] sm:$0xf] }
 0x376   :  { %v1659_v34 = vmul.f32 0.25, %v1652_v16  ;;  %v6840_v16 = vor.u32 %v8427_v15, %v6839_v12  ;;  %v8773_v15 = vld [vmem:[#allocation10] ss:$0 sm:$0xff] }
 0x377   :  { %2105 = vmatpush.bf16.msra.mxu2 %v6640_v22 }
 0x378   :  { %v1661_v19 = vadd.f32 1e-05, %v1659_v34  ;;  %v6832_v34 = vor.u32 %v8425_v9, %v6831_v17 }
 0x37a   :  { %v8779_v8 = vpop.eup %8778  ;;  %8780 = vrsqrt.f32 %v1661_v19  ;;  %vm1669_vm12 = vweird.f32 %v1661_v19 }
 0x37b   :  { %v1674_v23 = vmul.f32 %v8779_v8, %v1662_v11  ;;  %2106 = vmatpush.bf16.msra.mxu2 %v6632_v29  ;;  %vm1680_vm8 = vweird.f32 %v8779_v8  ;;  %v6809_v29 = vld [vmem:[#allocation2 + $0x678] sm:$0xf0] }
 0x37c   :  { %vm1681_vm10 = vmor %vm1679_vm9, %vm1680_vm8 }
 0x37d   :  { %v1675_v25 = vmul.f32 %v8779_v8, %v1674_v23 }
 0x37f   :  { %v1676_v30 = vmul.f32 0.5, %v1675_v25  ;;  %2107 = vmatpush.bf16.msra.mxu2 %v6624_v39  ;;  %v6807_v25 = vld [vmem:[#allocation2 + $0x670] sm:$0xf]  ;;  %v8415_v39 = vld [vmem:[#allocation2 + $0x654] sm:$0xf0] }
 0x380   :  { %v8781_v31 = vpop.eup %8780  ;;  %v6808_v28 = vor.u32 %v8419_v26, %v6807_v25  ;;  %v8465_v25 = vld [vmem:[#allocation2 + $0x7e4] sm:$0xf0] }
 0x381   :  { %v1677_v35 = vsub.f32 1.5, %v1676_v30  ;;  %v1664_v36 = vmul.f32 %v8781_v31, %v1661_v19  ;;  %vm1670_vm11 = vweird.f32 %v8781_v31  ;;  %v8423_v19 = vld [vmem:[#allocation2 + $0x694] sm:$0xf0] }
 0x382   :  { %vm1671_vm13 = vmor %vm1669_vm12, %vm1670_vm11  ;;  %v6824_v20 = vor.u32 %v8423_v19, %v6823_v18  ;;  %v8467_v18 = vld [vmem:[#allocation2 + $0x7f4] sm:$0xf0]  ;;  %v8466_v19 = vld [vmem:[#allocation2 + $0x7f4] sm:$0xf] }
 0x383   :  { %v1678_v40 = vmul.f32 %v8779_v8, %v1677_v35  ;;  %v1665_v41 = vmul.f32 %v8781_v31, %v1664_v36  ;;  %v6801_v36 = vld [vmem:[#allocation2 + $0x668] sm:$0xf0] }
 0x385   :  { %v1682_v44 = vsel %vm1681_vm10, %v8779_v8, %v1678_v40  ;;  %v1666_v45 = vmul.f32 0.5, %v1665_v41  ;;  %v8421_v8 = vld [vmem:[#allocation2 + $0x684] sm:$0xf0]  ;;  %v8414_v40 = vld [vmem:[#allocation2 + $0x654] sm:$0xf] }
 0x386   :  { %v1684_v46 = vmul.f32 %v1682_v44, %v9080_v13  ;;  %v6863_v13 = vld [vmem:[#allocation2 + $0x6e0] sm:$0xf]  ;;  %v6816_v22 = vor.u32 %v8421_v8, %v6815_v21  ;;  %v7001_v8 = vld [vmem:[#allocation2 + $0x7f8] sm:$0xf0] }
 0x387   :  { %v1667_v48 = vsub.f32 1.5, %v1666_v45  ;;  %v6864_v50 = vor.u32 %v8433_v0, %v6863_v13  ;;  %v6783_v44 = vld [vmem:[#allocation2 + $0x640] sm:$0xf]  ;;  %v8413_v45 = vld [vmem:[#allocation2 + $0x644] sm:$0xf0]  ;;  %v7004_v26 = vor.u32 %v8466_v19, %v7001_v8 }
 0x388   :  { %v1693_v51 = vmul.f32 %v1689_v43, %v1684_v46  ;;  %v6796_v43 = vor.u32 %v8414_v40, %v6793_v42  ;;  %v8412_v46 = vld [vmem:[#allocation2 + $0x644] sm:$0xf]  ;;  %v6759_v13 = vld [vmem:[#allocation2 + $0x610] sm:$0xf]  ;;  %v8407_v0 = vld [vmem:[#allocation2 + $0x614] sm:$0xf0] }
 0x389   :  { %v1668_v52 = vmul.f32 %v8781_v31, %v1667_v48  ;;  %v6785_v48 = vld [vmem:[#allocation2 + $0x648] sm:$0xf0]  ;;  %2658 = vmatpush.bf16.msrb.mxu1 %v7004_v26  ;;  %v6985_v40 = vld [vmem:[#allocation2 + $0x7d8] sm:$0xf0]  ;;  %v8449_v42 = vld [vmem:[#allocation2 + $0x764] sm:$0xf0] }
 0x38a   :  { %v1702_v54 = vadd.f32 %v1698_v24, %v1693_v51  ;;  %v6784_v24 = vor.u32 %v8413_v45, %v6783_v44  ;;  %v6788_v51 = vor.u32 %v8412_v46, %v6785_v48  ;;  %v8448_v45 = vld [vmem:[#allocation2 + $0x764] sm:$0xf]  ;;  %v6929_v46 = vld [vmem:[#allocation2 + $0x768] sm:$0xf0] }
 0x38b   :  { %v1672_v6 = vsel %vm1671_vm13, %v8781_v31, %v1668_v52  ;;  %v6799_v31 = vld [vmem:[#allocation2 + $0x660] sm:$0xf]  ;;  %v6775_v52 = vld [vmem:[#allocation2 + $0x630] sm:$0xf]  ;;  %v6932_v48 = vor.u32 %v8448_v45, %v6929_v46  ;;  %v6897_v45 = vld [vmem:[#allocation2 + $0x728] sm:$0xf0] }
 0x38c   :  { %v1683_v57 = vmul.f32 %v1672_v6, %v9085_v27  ;;  %v1704_v58 = vmax.f32 %v1702_v54, 0.0  ;;  %v8429_v27 = vld [vmem:[#allocation2 + $0x6c4] sm:$0xf0]  ;;  %v6800_v35 = vor.u32 %v8417_v32, %v6799_v31  ;;  %v8410_v54 = vld [vmem:[#allocation2 + $0x634] sm:$0xf] }
 0x38d   :  { %v6848_v11 = vor.u32 %v8429_v27, %v6847_v7  ;;  %v6780_v6 = vor.u32 %v8410_v54, %v6777_v56  ;;  %v6753_v27 = vld [vmem:[#allocation2 + $0x608] sm:$0xf0]  ;;  %v8451_v31 = vld [vmem:[#allocation2 + $0x774] sm:$0xf0]  ;;  %v8450_v32 = vld [vmem:[#allocation2 + $0x774] sm:$0xf] }
 0x38e   :  { %v1692_v61 = vmul.f32 %v1688_v53, %v1683_v57  ;;  %v1706_v62 = vpack.c.bf16 %v1704_v58, %v1704_v58  ;;  %v8411_v53 = vld [vmem:[#allocation2 + $0x634] sm:$0xf0]  ;;  %v6767_v57 = vld [vmem:[#allocation2 + $0x620] sm:$0xf]  ;;  %v8409_v58 = vld [vmem:[#allocation2 + $0x624] sm:$0xf0] }
 0x38f   :  { %v6776_v55 = vor.u32 %v8411_v53, %v6775_v52  ;;  %v8461_v52 = vld [vmem:[#allocation2 + $0x7c4] sm:$0xf0]  ;;  %v8447_v56 = vld [vmem:[#allocation2 + $0x754] sm:$0xf0] }
 0x390   :  { %1860 = vmatmul.bf16.vlgmr.msrb.gmra.mxu3 %v1706_v62  ;;  %v1701_v1 = vadd.f32 %v1697_v59, %v1692_v61  ;;  %v8408_v59 = vld [vmem:[#allocation2 + $0x624] sm:$0xf]  ;;  %v6769_v61 = vld [vmem:[#allocation2 + $0x628] sm:$0xf0] }
 0x391   :  { %2377 = vmatpush.bf16.msrb.mxu3 %v6872_v60  ;;  %v6768_v60 = vor.u32 %v8409_v58, %v6767_v57  ;;  %v6772_v62 = vor.u32 %v8408_v59, %v6769_v61  ;;  %v8460_v57 = vld [vmem:[#allocation2 + $0x7c4] sm:$0xf]  ;;  %v6977_v58 = vld [vmem:[#allocation2 + $0x7c8] sm:$0xf0]  ;;  %v6921_v59 = vld [vmem:[#allocation2 + $0x758] sm:$0xf0] }
 0x392   :  { %v1703_v2 = vmax.f32 %v1701_v1, 0.0  ;;  %v8406_v1 = vld [vmem:[#allocation2 + $0x614] sm:$0xf] }
 0x394   :  { %v1705_v10 = vpack.c.bf16 %v1703_v2, %v1703_v2  ;;  %v6761_v2 = vld [vmem:[#allocation2 + $0x618] sm:$0xf0] }
 0x395   :  { %2378 = vmatpush.bf16.msrb.mxu3 %v6864_v50  ;;  %v6760_v50 = vor.u32 %v8407_v0, %v6759_v13  ;;  %v6764_v3 = vor.u32 %v8406_v1, %v6761_v2  ;;  %v8445_v0 = vld [vmem:[#allocation2 + $0x744] sm:$0xf0]  ;;  %v8444_v1 = vld [vmem:[#allocation2 + $0x744] sm:$0xf]  ;;  %v6980_v2 = vor.u32 %v8460_v57, %v6977_v58  ;;  %v8438_v57 = vld [vmem:[#allocation2 + $0x714] sm:$0xf] }
 0x396   :  { %1847 = vmatmul.bf16.vlgmr.msrb.gmra.mxu2 %v1705_v10  ;;  %v8405_v10 = vld [vmem:[#allocation2 + $0x604] sm:$0xf0]  ;;  %v6889_v58 = vld [vmem:[#allocation2 + $0x718] sm:$0xf0] }
 0x397   :  { %2364 = vmatpush.bf16.msrb.mxu2 %v6808_v28  ;;  %v6752_v7 = vor.u32 %v8405_v10, %v6751_v4  ;;  %v6993_v28 = vld [vmem:[#allocation2 + $0x7e8] sm:$0xf0]  ;;  %v8459_v4 = vld [vmem:[#allocation2 + $0x7b4] sm:$0xf0]  ;;  %v8458_v10 = vld [vmem:[#allocation2 + $0x7b4] sm:$0xf] }
 0x399   :  { %2379 = vmatpush.bf16.msrb.mxu3 %v6856_v5  ;;  %v8404_v5 = vld [vmem:[#allocation2 + $0x604] sm:$0xf] }
 0x39b   :  { %2365 = vmatpush.bf16.msrb.mxu2 %v6800_v35 }
 0x39d   :  { %2380 = vmatpush.bf16.msrb.mxu3 %v6848_v11  ;;  %v6756_v11 = vor.u32 %v8404_v5, %v6753_v27  ;;  %v6969_v5 = vld [vmem:[#allocation2 + $0x7b8] sm:$0xf0] }
 0x3a0   :  { %2121 = vmatmul.bf16.vlgmr.msra.gmra.mxu3 %v9035_v47  ;;  %v8418_v47 = vld [vmem:[#allocation2 + $0x674] sm:$0xf] }
 0x3a1   :  { %2381 = vmatpush.bf16.msrb.mxu3 %v6840_v16  ;;  %v6812_v30 = vor.u32 %v8418_v47, %v6809_v29  ;;  %v8464_v47 = vld [vmem:[#allocation2 + $0x7e4] sm:$0xf]  ;;  %v6935_v29 = vld [vmem:[#allocation2 + $0x770] sm:$0xf] }
 0x3a2   :  { %v6996_v35 = vor.u32 %v8464_v47, %v6993_v28 }
 0x3a3   :  { %2390 = vmatpush.bf16.msra.mxu0 %v6812_v30 }
 0x3a4   :  { %2659 = vmatpush.bf16.msrb.mxu1 %v6996_v35 }
 0x3a5   :  { %2382 = vmatpush.bf16.msrb.mxu3 %v6832_v34  ;;  %v6999_v34 = vld [vmem:[#allocation2 + $0x7f0] sm:$0xf] }
 0x3a6   :  { %2108 = vmatmul.bf16.vlgmr.msra.gmra.mxu2 %v9039_v49  ;;  %v8416_v49 = vld [vmem:[#allocation2 + $0x664] sm:$0xf]  ;;  %v7000_v21 = vor.u32 %v8467_v18, %v6999_v34  ;;  %v6959_v34 = vld [vmem:[#allocation2 + $0x7a0] sm:$0xf]  ;;  %v8457_v18 = vld [vmem:[#allocation2 + $0x7a4] sm:$0xf0] }
 0x3a7   :  { %v6804_v38 = vor.u32 %v8416_v49, %v6801_v36  ;;  %v6937_v49 = vld [vmem:[#allocation2 + $0x778] sm:$0xf0]  ;;  %v6936_v36 = vor.u32 %v8451_v31, %v6935_v29  ;;  %v6903_v29 = vld [vmem:[#allocation2 + $0x730] sm:$0xf]  ;;  %v8442_v31 = vld [vmem:[#allocation2 + $0x734] sm:$0xf] }
 0x3a9   :  { %2383 = vmatpush.bf16.msrb.mxu3 %v6824_v20  ;;  %2391 = vmatpush.bf16.msra.mxu0 %v6804_v38  ;;  %v6983_v38 = vld [vmem:[#allocation2 + $0x7d0] sm:$0xf] }
 0x3ad   :  { %2384 = vmatpush.bf16.msrb.mxu3 %v6816_v22  ;;  %2392 = vmatpush.bf16.msra.mxu0 %v6796_v43  ;;  %v6991_v22 = vld [vmem:[#allocation2 + $0x7e0] sm:$0xf] }
 0x3ae   :  { %v6992_v30 = vor.u32 %v8465_v25, %v6991_v22  ;;  %v6960_v22 = vor.u32 %v8457_v18, %v6959_v34  ;;  %v7065_v34 = vld [vmem:[#allocation2 + $0x878] sm:$0xf0] }
 0x3b0   :  { %2385 = vmatmul.bf16.vlgmr.msrb.gmra.mxu3 %v9094_v14  ;;  %v6791_v14 = vld [vmem:[#allocation2 + $0x650] sm:$0xf] }
 0x3b1   :  { %v6792_v41 = vor.u32 %v8415_v39, %v6791_v14  ;;  %2393 = vmatpush.bf16.msra.mxu0 %v6788_v51  ;;  %2632 = vmatpush.bf16.msra.mxu3 %v7000_v21  ;;  %v8463_v14 = vld [vmem:[#allocation2 + $0x7d4] sm:$0xf0]  ;;  %v8462_v39 = vld [vmem:[#allocation2 + $0x7d4] sm:$0xf]  ;;  %v6975_v51 = vld [vmem:[#allocation2 + $0x7c0] sm:$0xf] }
 0x3b2   :  { %v6988_v54 = vor.u32 %v8462_v39, %v6985_v40  ;;  %v6976_v13 = vor.u32 %v8461_v52, %v6975_v51  ;;  %v6961_v21 = vld [vmem:[#allocation2 + $0x7a8] sm:$0xf0]  ;;  %v6953_v39 = vld [vmem:[#allocation2 + $0x798] sm:$0xf0]  ;;  %v8452_v51 = vld [vmem:[#allocation2 + $0x784] sm:$0xf] }
 0x3b3   :  { %2366 = vmatpush.bf16.msrb.mxu2 %v6792_v41  ;;  %v6927_v41 = vld [vmem:[#allocation2 + $0x760] sm:$0xf] }
 0x3b4   :  { %v6928_v44 = vor.u32 %v8449_v42, %v6927_v41  ;;  %2660 = vmatpush.bf16.msrb.mxu1 %v6988_v54  ;;  %v6895_v41 = vld [vmem:[#allocation2 + $0x720] sm:$0xf]  ;;  %v8441_v42 = vld [vmem:[#allocation2 + $0x724] sm:$0xf0] }
 0x3b5   :  { %2394 = vmatpush.bf16.msra.mxu0 %v6780_v6  ;;  %2633 = vmatpush.bf16.msra.mxu3 %v6992_v30  ;;  %v8446_v6 = vld [vmem:[#allocation2 + $0x754] sm:$0xf]  ;;  %v8443_v30 = vld [vmem:[#allocation2 + $0x734] sm:$0xf0] }
 0x3b6   :  { %v6924_v61 = vor.u32 %v8446_v6, %v6921_v59  ;;  %v6892_v59 = vor.u32 %v8438_v57, %v6889_v58 }
 0x3b7   :  { %2367 = vmatpush.bf16.msrb.mxu2 %v6784_v24  ;;  %v6984_v24 = vor.u32 %v8463_v14, %v6983_v38  ;;  %v8454_v38 = vld [vmem:[#allocation2 + $0x794] sm:$0xf] }
 0x3b8   :  { %2661 = vmatpush.bf16.msrb.mxu1 %v6980_v2  ;;  %v6956_v40 = vor.u32 %v8454_v38, %v6953_v39  ;;  %v8499_v2 = vld [vmem:[#allocation2 + $0x8f4] sm:$0xf0]  ;;  %v8478_v38 = vld [vmem:[#allocation2 + $0x854] sm:$0xf]  ;;  %v7105_v39 = vld [vmem:[#allocation2 + $0x8c8] sm:$0xf0] }
 0x3b9   :  { %2395 = vmatpush.bf16.msra.mxu0 %v6772_v62  ;;  %v6911_v62 = vld [vmem:[#allocation2 + $0x740] sm:$0xf]  ;;  %2634 = vmatpush.bf16.msra.mxu3 %v6984_v24 }
 0x3ba   :  { %v6912_v27 = vor.u32 %v8445_v0, %v6911_v62  ;;  %v6943_v24 = vld [vmem:[#allocation2 + $0x780] sm:$0xf]  ;;  %v8436_v62 = vld [vmem:[#allocation2 + $0x704] sm:$0xf]  ;;  %v6881_v0 = vld [vmem:[#allocation2 + $0x708] sm:$0xf0] }
 0x3bb   :  { %2368 = vmatpush.bf16.msrb.mxu2 %v6776_v55  ;;  %v6919_v55 = vld [vmem:[#allocation2 + $0x750] sm:$0xf] }
 0x3bd   :  { %2396 = vmatpush.bf16.msra.mxu0 %v6764_v3  ;;  %v6967_v3 = vld [vmem:[#allocation2 + $0x7b0] sm:$0xf]  ;;  %2635 = vmatpush.bf16.msra.mxu3 %v6976_v13 }
 0x3bf   :  { %2369 = vmatpush.bf16.msrb.mxu2 %v6768_v60  ;;  %v6920_v60 = vor.u32 %v8447_v56, %v6919_v55  ;;  %v6887_v55 = vld [vmem:[#allocation2 + $0x710] sm:$0xf]  ;;  %v8439_v56 = vld [vmem:[#allocation2 + $0x714] sm:$0xf0] }
 0x3c0   :  { %v6888_v6 = vor.u32 %v8439_v56, %v6887_v55 }
 0x3c1   :  { %2397 = vmatpush.bf16.msra.mxu0 %v6756_v11 }
 0x3c3   :  { %2370 = vmatpush.bf16.msrb.mxu2 %v6760_v50  ;;  %v6913_v50 = vld [vmem:[#allocation2 + $0x748] sm:$0xf0] }
 0x3c4   :  { %v6916_v11 = vor.u32 %v8444_v1, %v6913_v50  ;;  %v6884_v1 = vor.u32 %v8436_v62, %v6881_v0  ;;  %v7127_v50 = vld [vmem:[#allocation2 + $0x8f0] sm:$0xf]  ;;  %v8491_v62 = vld [vmem:[#allocation2 + $0x8b4] sm:$0xf0] }
 0x3c7   :  { %2371 = vmatpush.bf16.msrb.mxu2 %v6752_v7 }
 0x3cb   :  { %2619 = vmatpush.bf16.msra.mxu2 %v6936_v36  ;;  %v6951_v36 = vld [vmem:[#allocation2 + $0x790] sm:$0xf] }
 0x3cf   :  { %2620 = vmatpush.bf16.msra.mxu2 %v6928_v44  ;;  %v6896_v44 = vor.u32 %v8441_v42, %v6895_v41 }
 0x3d3   :  { %2621 = vmatpush.bf16.msra.mxu2 %v6920_v60  ;;  %v6879_v60 = vld [vmem:[#allocation2 + $0x700] sm:$0xf] }
 0x3d7   :  { %2622 = vmatpush.bf16.msra.mxu2 %v6912_v27 }
 0x3f1   :  { %v9102_v23 = vpop.f32.mrf.mxu1 }
 0x3f9   :  { %v2414_v37 = vpop.f32.mrf.mxu1 }
 0x3fa   :  { %v6940_v37 = vor.u32 %v8450_v32, %v6937_v49  ;;  %v6904_v32 = vor.u32 %v8443_v30, %v6903_v29  ;;  %v6905_v49 = vld [vmem:[#allocation2 + $0x738] sm:$0xf0]  ;;  %v7057_v29 = vld [vmem:[#allocation2 + $0x868] sm:$0xf0] }
 0x3fb   :  { %v6908_v35 = vor.u32 %v8442_v31, %v6905_v49  ;;  %v8493_v49 = vld [vmem:[#allocation2 + $0x8c4] sm:$0xf0] }
 0x3fc   :  { %2645 = vmatpush.bf16.msrb.mxu0 %v6940_v37  ;;  %v8455_v37 = vld [vmem:[#allocation2 + $0x794] sm:$0xf0]  ;;  %2623 = vmatpush.bf16.msra.mxu2 %v6904_v32  ;;  %v7103_v32 = vld [vmem:[#allocation2 + $0x8c0] sm:$0xf] }
 0x3fd   :  { %v6952_v14 = vor.u32 %v8455_v37, %v6951_v36  ;;  %v7047_v36 = vld [vmem:[#allocation2 + $0x850] sm:$0xf]  ;;  %v8479_v37 = vld [vmem:[#allocation2 + $0x854] sm:$0xf0] }
 0x3fe   :  { %v7048_v41 = vor.u32 %v8479_v37, %v7047_v36  ;;  %v7073_v37 = vld [vmem:[#allocation2 + $0x888] sm:$0xf0] }
 0x400   :  { %2646 = vmatpush.bf16.msrb.mxu0 %v6932_v48  ;;  %v8453_v48 = vld [vmem:[#allocation2 + $0x784] sm:$0xf0]  ;;  %2624 = vmatpush.bf16.msra.mxu2 %v6896_v44  ;;  %v7104_v44 = vor.u32 %v8493_v49, %v7103_v32  ;;  %v7071_v32 = vld [vmem:[#allocation2 + $0x880] sm:$0xf] }
 0x401   :  { %v6944_v52 = vor.u32 %v8453_v48, %v6943_v24  ;;  %v8485_v49 = vld [vmem:[#allocation2 + $0x884] sm:$0xf0] }
 0x402   :  { %v7072_v36 = vor.u32 %v8485_v49, %v7071_v32 }
 0x404   :  { %2647 = vmatpush.bf16.msrb.mxu0 %v6924_v61  ;;  %2625 = vmatpush.bf16.msra.mxu2 %v6888_v6  ;;  %v8437_v61 = vld [vmem:[#allocation2 + $0x704] sm:$0xf0] }
 0x405   :  { %v6880_v13 = vor.u32 %v8437_v61, %v6879_v60  ;;  %v7095_v61 = vld [vmem:[#allocation2 + $0x8b0] sm:$0xf] }
 0x406   :  { %v7096_v0 = vor.u32 %v8491_v62, %v7095_v61  ;;  %v7191_v61 = vld [vmem:[#allocation2 + $0x970] sm:$0xf] }
 0x408   :  { %2648 = vmatpush.bf16.msrb.mxu0 %v6916_v11  ;;  %2626 = vmatpush.bf16.msra.mxu2 %v6880_v13  ;;  %v8496_v11 = vld [vmem:[#allocation2 + $0x8e4] sm:$0xf]  ;;  %v8490_v13 = vld [vmem:[#allocation2 + $0x8b4] sm:$0xf] }
 0x40c   :  { %2649 = vmatpush.bf16.msrb.mxu0 %v6908_v35 }
 0x413   :  { %v1861_v12 = vpop.f32.mrf.mxu3 }
 0x419   :  { %v1848_v16 = vpop.f32.mrf.mxu2 }
 0x41a   :  { %v1849_v17 = vadd.f32 %v8773_v15, %v1848_v16  ;;  %v2155_v15 = vperm.slane %v9089_v33, 0  ;;  %v6968_v16 = vor.u32 %v8459_v4, %v6967_v3  ;;  %v8498_v3 = vld [vmem:[#allocation2 + $0x8f4] sm:$0xf]  ;;  %v7128_v4 = vor.u32 %v8499_v2, %v7127_v50  ;;  %v7039_v50 = vld [vmem:[#allocation2 + $0x840] sm:$0xf] }
 0x41b   :  { %v1863_v9 = vpop.f32.mrf.mxu3  ;;  %v8477_v2 = vld [vmem:[#allocation2 + $0x844] sm:$0xf0] }
 0x41c   :  { %v1862_v20 = vadd.f32 %v1861_v12, %v1849_v17  ;;  %v6972_v9 = vor.u32 %v8458_v10, %v6969_v5  ;;  %2636 = vmatpush.bf16.msra.mxu3 %v6968_v16  ;;  %v7129_v10 = vld [vmem:[#allocation2 + $0x8f8] sm:$0xf0]  ;;  %v7119_v5 = vld [vmem:[#allocation2 + $0x8e0] sm:$0xf] }
 0x41d   :  { %v7132_v27 = vor.u32 %v8498_v3, %v7129_v10  ;;  %v8476_v3 = vld [vmem:[#allocation2 + $0x844] sm:$0xf]  ;;  %v7041_v10 = vld [vmem:[#allocation2 + $0x848] sm:$0xf0] }
 0x41e   :  { %1865 = vst [vmem:[%s9871_s10] sm:$0xff] %v1862_v20  ;;  %v8456_v20 = vld [vmem:[#allocation2 + $0x7a4] sm:$0xf]  ;;  %2662 = vmatpush.bf16.msrb.mxu1 %v6972_v9  ;;  %v8482_v9 = vld [vmem:[#allocation2 + $0x874] sm:$0xf] }
 0x41f   :  { %v6964_v25 = vor.u32 %v8456_v20, %v6961_v21  ;;  %v7068_v20 = vor.u32 %v8482_v9, %v7065_v34  ;;  %v7111_v21 = vld [vmem:[#allocation2 + $0x8d0] sm:$0xf]  ;;  %v8474_v9 = vld [vmem:[#allocation2 + $0x834] sm:$0xf] }
 0x420   :  { %2637 = vmatpush.bf16.msra.mxu3 %v6960_v22  ;;  %v8494_v22 = vld [vmem:[#allocation2 + $0x8d4] sm:$0xf] }
 0x421   :  { %v1850_v43 = vpop.f32.mrf.mxu2 }
 0x422   :  { %2663 = vmatpush.bf16.msrb.mxu1 %v6964_v25  ;;  %v8440_v43 = vld [vmem:[#allocation2 + $0x724] sm:$0xf]  ;;  %v7113_v25 = vld [vmem:[#allocation2 + $0x8d8] sm:$0xf0] }
 0x423   :  { %v2122_v53 = vpop.f32.mrf.mxu3  ;;  %v6900_v46 = vor.u32 %v8440_v43, %v6897_v45  ;;  %v7116_v35 = vor.u32 %v8494_v22, %v7113_v25  ;;  %v2198_v43 = vld [vmem:[#allocation4 + $0x12] ss:$8 sm:$0x3]  ;;  %v8486_v22 = vld [vmem:[#allocation2 + $0x894] sm:$0xf] }
 0x424   :  { %2638 = vmatpush.bf16.msra.mxu3 %v6952_v14  ;;  %v8492_v14 = vld [vmem:[#allocation2 + $0x8c4] sm:$0xf]  ;;  %v7081_v25 = vld [vmem:[#allocation2 + $0x898] sm:$0xf0] }
 0x425   :  { %2650 = vmatpush.bf16.msrb.mxu0 %v6900_v46  ;;  %v7108_v45 = vor.u32 %v8492_v14, %v7105_v39  ;;  %v2201_v46 = vperm.slane %v2198_v43, 1  ;;  %v7015_v14 = vld [vmem:[#allocation2 + $0x810] sm:$0xf]  ;;  %v8471_v39 = vld [vmem:[#allocation2 + $0x814] sm:$0xf0] }
 0x426   :  { %2664 = vmatpush.bf16.msrb.mxu1 %v6956_v40  ;;  %v7049_v40 = vld [vmem:[#allocation2 + $0x858] sm:$0xf0] }
 0x427   :  { %v7052_v42 = vor.u32 %v8478_v38, %v7049_v40  ;;  %v7016_v40 = vor.u32 %v8471_v39, %v7015_v14 }
 0x428   :  { %2639 = vmatpush.bf16.msra.mxu3 %v6944_v52  ;;  %v2200_v52 = vperm.slane %v2198_v43, 0 }
 0x429   :  { %v2109_v7 = vpop.f32.mrf.mxu2  ;;  %2651 = vmatpush.bf16.msrb.mxu0 %v6892_v59 }
 0x42a   :  { %v2110_v12 = vadd.f32 %v2109_v7, %v9078_v63  ;;  %v8497_v7 = vld [vmem:[#allocation2 + $0x8e4] sm:$0xf0] }
 0x42b   :  { %v2124_v17 = vpop.f32.mrf.mxu3  ;;  %v7120_v16 = vor.u32 %v8497_v7, %v7119_v5  ;;  %v8489_v5 = vld [vmem:[#allocation2 + $0x8a4] sm:$0xf0]  ;;  %v7044_v7 = vor.u32 %v8476_v3, %v7041_v10  ;;  %v7239_v3 = vld [vmem:[#allocation2 + $0x9d0] sm:$0xf]  ;;  %v8526_v10 = vld [vmem:[#allocation2 + $0x9d4] sm:$0xf] }
 0x42c   :  { %v2123_v19 = vadd.f32 %v2122_v53, %v2110_v12  ;;  %v6945_v53 = vld [vmem:[#allocation2 + $0x788] sm:$0xf0]  ;;  %2887 = vmatpush.bf16.msrb.mxu3 %v7128_v4  ;;  %v8483_v17 = vld [vmem:[#allocation2 + $0x874] sm:$0xf0]  ;;  %v7040_v4 = vor.u32 %v8477_v2, %v7039_v50 }
 0x42d   :  { %v6948_v54 = vor.u32 %v8452_v51, %v6945_v53  ;;  %2652 = vmatpush.bf16.msrb.mxu0 %v6884_v1  ;;  %v7121_v12 = vld [vmem:[#allocation2 + $0x8e8] sm:$0xf0] }
 0x42e   :  { %v2159_v8 = vadd.f32 %v2155_v15, %v2123_v19  ;;  %v7063_v15 = vld [vmem:[#allocation2 + $0x870] sm:$0xf]  ;;  %v7124_v18 = vor.u32 %v8496_v11, %v7121_v12  ;;  %v8488_v11 = vld [vmem:[#allocation2 + $0x8a4] sm:$0xf]  ;;  %v7089_v12 = vld [vmem:[#allocation2 + $0x8a8] sm:$0xf0] }
 0x42f   :  { %2665 = vmatpush.bf16.msrb.mxu1 %v6948_v54  ;;  %v7064_v19 = vor.u32 %v8483_v17, %v7063_v15  ;;  %v7092_v15 = vor.u32 %v8488_v11, %v7089_v12  ;;  %v8475_v17 = vld [vmem:[#allocation2 + $0x834] sm:$0xf0]  ;;  %v8512_v11 = vld [vmem:[#allocation2 + $0x964] sm:$0xf]  ;;  %v7185_v12 = vld [vmem:[#allocation2 + $0x968] sm:$0xf0] }
 0x430   :  { %v2161_v63 = vmax.f32 %v2159_v8, 0.0  ;;  %v8495_v8 = vld [vmem:[#allocation2 + $0x8d4] sm:$0xf0]  ;;  %2888 = vmatpush.bf16.msrb.mxu3 %v7120_v16  ;;  %v7031_v16 = vld [vmem:[#allocation2 + $0x830] sm:$0xf] }
 0x431   :  { %v2111_v26 = vpop.f32.mrf.mxu2  ;;  %v7112_v30 = vor.u32 %v8495_v8, %v7111_v21  ;;  %v7032_v34 = vor.u32 %v8475_v17, %v7031_v16  ;;  %v8487_v21 = vld [vmem:[#allocation2 + $0x894] sm:$0xf0]  ;;  %v7188_v16 = vor.u32 %v8512_v11, %v7185_v12  ;;  %v7231_v17 = vld [vmem:[#allocation2 + $0x9c0] sm:$0xf]  ;;  %v7209_v11 = vld [vmem:[#allocation2 + $0x998] sm:$0xf0] }
 0x432   :  { %v2195_v33 = vpack.c.bf16 %v2161_v63, %v2161_v63  ;;  %v7055_v63 = vld [vmem:[#allocation2 + $0x860] sm:$0xf]  ;;  %v8481_v26 = vld [vmem:[#allocation2 + $0x864] sm:$0xf0] }
 0x433   :  { %v9109_v47 = vpop.f32.mrf.mxu3  ;;  %2913 = vmatpush.bf16.msra.mxu1 %v7132_v27 }
 0x434   :  { %2372 = vmatmul.bf16.vlgmr.msrb.gmra.mxu2 %v2195_v33  ;;  %2398 = vmatmul.bf16.vlgmr.msra.gmra.mxu0 %v2195_v33  ;;  %v7056_v33 = vor.u32 %v8481_v26, %v7055_v63  ;;  %v7084_v63 = vor.u32 %v8486_v22, %v7081_v25  ;;  %v7023_v26 = vld [vmem:[#allocation2 + $0x820] sm:$0xf]  ;;  %v7177_v22 = vld [vmem:[#allocation2 + $0x958] sm:$0xf0] }
 0x435   :  { %2874 = vmatpush.bf16.msrb.mxu2 %v7064_v19  ;;  %2900 = vmatpush.bf16.msra.mxu0 %v7068_v20  ;;  %v7079_v20 = vld [vmem:[#allocation2 + $0x890] sm:$0xf] }
 0x436   :  { %2889 = vmatpush.bf16.msrb.mxu3 %v7112_v30  ;;  %v7080_v8 = vor.u32 %v8487_v21, %v7079_v20  ;;  %v7025_v30 = vld [vmem:[#allocation2 + $0x828] sm:$0xf0]  ;;  %v8510_v20 = vld [vmem:[#allocation2 + $0x954] sm:$0xf]  ;;  %v8524_v21 = vld [vmem:[#allocation2 + $0x9c4] sm:$0xf] }
 0x437   :  { %2914 = vmatpush.bf16.msra.mxu1 %v7124_v18  ;;  %v7033_v18 = vld [vmem:[#allocation2 + $0x838] sm:$0xf0] }
 0x438   :  { %v7036_v19 = vor.u32 %v8474_v9, %v7033_v18  ;;  %v8525_v9 = vld [vmem:[#allocation2 + $0x9c4] sm:$0xf0]  ;;  %v7175_v18 = vld [vmem:[#allocation2 + $0x950] sm:$0xf] }
 0x439   :  { %2875 = vmatpush.bf16.msrb.mxu2 %v7056_v33  ;;  %v8473_v33 = vld [vmem:[#allocation2 + $0x824] sm:$0xf0] }
 0x43a   :  { %2890 = vmatpush.bf16.msrb.mxu3 %v7104_v44  ;;  %v7007_v44 = vld [vmem:[#allocation2 + $0x800] sm:$0xf] }
 0x43b   :  { %v2388_v28 = vpop.f32.mrf.mxu3  ;;  %2915 = vmatpush.bf16.msra.mxu1 %v7116_v35  ;;  %v8484_v35 = vld [vmem:[#allocation2 + $0x884] sm:$0xf] }
 0x43c   :  { %v8480_v28 = vld [vmem:[#allocation2 + $0x864] sm:$0xf]  ;;  %v7076_v38 = vor.u32 %v8484_v35, %v7073_v37 }
 0x43d   :  { %v7060_v31 = vor.u32 %v8480_v28, %v7057_v29  ;;  %2876 = vmatpush.bf16.msrb.mxu2 %v7048_v41  ;;  %v8472_v28 = vld [vmem:[#allocation2 + $0x824] sm:$0xf]  ;;  %v7024_v29 = vor.u32 %v8473_v33, %v7023_v26  ;;  %v8470_v41 = vld [vmem:[#allocation2 + $0x814] sm:$0xf] }
 0x43e   :  { %2891 = vmatpush.bf16.msrb.mxu3 %v7096_v0  ;;  %v8514_v0 = vld [vmem:[#allocation2 + $0x974] sm:$0xf]  ;;  %v2453_v33 = vld [vmem:[#allocation4 + $0x13] ss:$8 sm:$0x3] }
 0x43f   :  { %2901 = vmatpush.bf16.msra.mxu0 %v7060_v31  ;;  %2916 = vmatpush.bf16.msra.mxu1 %v7108_v45  ;;  %v7028_v31 = vor.u32 %v8472_v28, %v7025_v30  ;;  %v8469_v45 = vld [vmem:[#allocation2 + $0x804] sm:$0xf0]  ;;  %v7232_v28 = vor.u32 %v8525_v9, %v7231_v17  ;;  %v2456_v30 = vperm.slane %v2453_v33, 1  ;;  %v2455_v37 = vperm.slane %v2453_v33, 0  ;;  %v8504_v17 = vld [vmem:[#allocation2 + $0x924] sm:$0xf] }
 0x441   :  { %2877 = vmatpush.bf16.msrb.mxu2 %v7040_v4  ;;  %v8527_v4 = vld [vmem:[#allocation2 + $0x9d4] sm:$0xf0] }
 0x443   :  { %2902 = vmatpush.bf16.msra.mxu0 %v7052_v42  ;;  %v7017_v42 = vld [vmem:[#allocation2 + $0x818] sm:$0xf0] }
 0x444   :  { %v7020_v43 = vor.u32 %v8470_v41, %v7017_v42 }
 0x445   :  { %2878 = vmatpush.bf16.msrb.mxu2 %v7032_v34 }
 0x447   :  { %2903 = vmatpush.bf16.msra.mxu0 %v7044_v7  ;;  %v8513_v7 = vld [vmem:[#allocation2 + $0x964] sm:$0xf0] }
 0x449   :  { %2879 = vmatpush.bf16.msrb.mxu2 %v7024_v29 }
 0x44b   :  { %2904 = vmatpush.bf16.msra.mxu0 %v7036_v19  ;;  %v8511_v19 = vld [vmem:[#allocation2 + $0x954] sm:$0xf0] }
 0x44c   :  { %v7176_v25 = vor.u32 %v8511_v19, %v7175_v18  ;;  %v7199_v19 = vld [vmem:[#allocation2 + $0x980] sm:$0xf] }
 0x44d   :  { %2880 = vmatpush.bf16.msrb.mxu2 %v7016_v40 }
 0x44f   :  { %2905 = vmatpush.bf16.msra.mxu0 %v7028_v31 }
 0x453   :  { %2906 = vmatpush.bf16.msra.mxu0 %v7020_v43 }
 0x4b1   :  { %v2399_v24 = vpop.f32.mrf.mxu0 }
 0x4b2   :  { %v2400_v48 = vadd.f32 %v2399_v24, %v2201_v46  ;;  %v8468_v46 = vld [vmem:[#allocation2 + $0x804] sm:$0xf]  ;;  %v7008_v24 = vor.u32 %v8469_v45, %v7007_v44 }
 0x4b4   :  { %v2413_v51 = vadd.f32 %v9102_v23, %v2400_v48  ;;  %v7097_v23 = vld [vmem:[#allocation2 + $0x8b8] sm:$0xf0]  ;;  %v7009_v48 = vld [vmem:[#allocation2 + $0x808] sm:$0xf0]  ;;  %2881 = vmatpush.bf16.msrb.mxu2 %v7008_v24  ;;  %v7223_v24 = vld [vmem:[#allocation2 + $0x9b0] sm:$0xf] }
 0x4b5   :  { %v7100_v1 = vor.u32 %v8490_v13, %v7097_v23  ;;  %v8515_v13 = vld [vmem:[#allocation2 + $0x974] sm:$0xf0]  ;;  %v7193_v23 = vld [vmem:[#allocation2 + $0x978] sm:$0xf0] }
 0x4b6   :  { %v2417_v53 = vmax.f32 %v2413_v51, 0.0  ;;  %v7012_v51 = vor.u32 %v8468_v46, %v7009_v48  ;;  %v7192_v50 = vor.u32 %v8515_v13, %v7191_v61  ;;  %v7196_v2 = vor.u32 %v8514_v0, %v7193_v23  ;;  %v8523_v48 = vld [vmem:[#allocation2 + $0x9b4] sm:$0xf0]  ;;  %v8520_v13 = vld [vmem:[#allocation2 + $0x9a4] sm:$0xf] }
 0x4b7   :  { %v2373_v54 = vpop.f32.mrf.mxu2  ;;  %2917 = vmatpush.bf16.msra.mxu1 %v7100_v1  ;;  %v7217_v0 = vld [vmem:[#allocation2 + $0x9a8] sm:$0xf0] }
 0x4b8   :  { %v2451_v55 = vpack.c.bf16 %v2417_v53, %v2417_v53  ;;  %v2374_v56 = vadd.f32 %v2373_v54, %v2200_v52  ;;  %2907 = vmatpush.bf16.msra.mxu0 %v7012_v51  ;;  %v7255_v52 = vld [vmem:[#allocation2 + $0x9f0] sm:$0xf]  ;;  %v8531_v53 = vld [vmem:[#allocation2 + $0x9f4] sm:$0xf0]  ;;  %v8530_v54 = vld [vmem:[#allocation2 + $0x9f4] sm:$0xf]  ;;  %v7220_v23 = vor.u32 %v8520_v13, %v7217_v0 }
 0x4b9   :  { %v2401_v6 = vpop.f32.mrf.mxu0  ;;  %v8522_v51 = vld [vmem:[#allocation2 + $0x9b4] sm:$0xf] }
 0x4ba   :  { %v2387_v57 = vadd.f32 %v9109_v47, %v2374_v56  ;;  %2640 = vmatmul.bf16.vlgmr.msra.gmra.mxu3 %v2451_v55  ;;  %2666 = vmatmul.bf16.vlgmr.msrb.gmra.mxu1 %v2451_v55  ;;  %v7087_v47 = vld [vmem:[#allocation2 + $0x8a0] sm:$0xf]  ;;  %v7256_v55 = vor.u32 %v8531_v53, %v7255_v52  ;;  %v7257_v56 = vld [vmem:[#allocation2 + $0x9f8] sm:$0xf0]  ;;  %v7224_v52 = vor.u32 %v8523_v48, %v7223_v24 }
 0x4bb   :  { %v7088_v27 = vor.u32 %v8489_v5, %v7087_v47  ;;  %2918 = vmatpush.bf16.msra.mxu1 %v7092_v15  ;;  %v7247_v6 = vld [vmem:[#allocation2 + $0x9e0] sm:$0xf]  ;;  %v7241_v47 = vld [vmem:[#allocation2 + $0x9d8] sm:$0xf0]  ;;  %v7240_v15 = vor.u32 %v8527_v4, %v7239_v3 }
 0x4bc   :  { %v2416_v58 = vmax.f32 %v2387_v57, 0.0  ;;  %v8529_v57 = vld [vmem:[#allocation2 + $0x9e4] sm:$0xf0]  ;;  %v7183_v5 = vld [vmem:[#allocation2 + $0x960] sm:$0xf]  ;;  %v7244_v34 = vor.u32 %v8526_v10, %v7241_v47 }
 0x4bd   :  { %2892 = vmatpush.bf16.msrb.mxu3 %v7088_v27  ;;  %v7248_v62 = vor.u32 %v8529_v57, %v7247_v6  ;;  %v7184_v27 = vor.u32 %v8513_v7, %v7183_v5  ;;  %v7225_v53 = vld [vmem:[#allocation2 + $0x9b8] sm:$0xf0]  ;;  %v8508_v6 = vld [vmem:[#allocation2 + $0x944] sm:$0xf]  ;;  %v7207_v47 = vld [vmem:[#allocation2 + $0x990] sm:$0xf] }
 0x4be   :  { %v2450_v59 = vpack.c.bf16 %v2416_v58, %v2416_v58  ;;  %v7260_v58 = vor.u32 %v8530_v54, %v7257_v56  ;;  %v7228_v54 = vor.u32 %v8522_v51, %v7225_v53  ;;  %v8509_v56 = vld [vmem:[#allocation2 + $0x944] sm:$0xf0]  ;;  %v7161_v4 = vld [vmem:[#allocation2 + $0x938] sm:$0xf0]  ;;  %v8519_v5 = vld [vmem:[#allocation2 + $0x994] sm:$0xf0] }
 0x4bf   :  { %v2375_v60 = vpop.f32.mrf.mxu2  ;;  %2919 = vmatpush.bf16.msra.mxu1 %v7084_v63  ;;  %v7180_v63 = vor.u32 %v8510_v20, %v7177_v22  ;;  %v7208_v7 = vor.u32 %v8519_v5, %v7207_v47  ;;  %v8517_v20 = vld [vmem:[#allocation2 + $0x984] sm:$0xf0]  ;;  %v7201_v22 = vld [vmem:[#allocation2 + $0x988] sm:$0xf0]  ;;  %v7329_v51 = vld [vmem:[#allocation2 + $0xa70] sm:$0xf] }
 0x4c0   :  { %2627 = vmatmul.bf16.vlgmr.msra.gmra.mxu2 %v2450_v59  ;;  %2653 = vmatmul.bf16.vlgmr.msrb.gmra.mxu0 %v2450_v59  ;;  %v8528_v59 = vld [vmem:[#allocation2 + $0x9e4] sm:$0xf]  ;;  %v7249_v60 = vld [vmem:[#allocation2 + $0x9e8] sm:$0xf0] }
 0x4c1   :  { %2893 = vmatpush.bf16.msrb.mxu3 %v7080_v8  ;;  %v7252_v1 = vor.u32 %v8528_v59, %v7249_v60  ;;  %3129 = vmatpush.bf16.msra.mxu2 %v7192_v50  ;;  %v7233_v8 = vld [vmem:[#allocation2 + $0x9c8] sm:$0xf0]  ;;  %v7215_v59 = vld [vmem:[#allocation2 + $0x9a0] sm:$0xf]  ;;  %v8521_v60 = vld [vmem:[#allocation2 + $0x9a4] sm:$0xf0] }
 0x4c2   :  { %3155 = vmatpush.bf16.msrb.mxu0 %v7196_v2  ;;  %v7236_v29 = vor.u32 %v8524_v21, %v7233_v8  ;;  %v8507_v50 = vld [vmem:[#allocation2 + $0x934] sm:$0xf0]  ;;  %v8506_v2 = vld [vmem:[#allocation2 + $0x934] sm:$0xf]  ;;  %v8516_v21 = vld [vmem:[#allocation2 + $0x984] sm:$0xf]  ;;  %v7200_v8 = vor.u32 %v8517_v20, %v7199_v19 }
 0x4c3   :  { %2920 = vmatpush.bf16.msra.mxu1 %v7076_v38  ;;  %v7164_v10 = vor.u32 %v8506_v2, %v7161_v4  ;;  %v7361_v4 = vld [vmem:[#allocation2 + $0xab0] sm:$0xf]  ;;  %v8560_v19 = vld [vmem:[#allocation2 + $0xae4] sm:$0xf]  ;;  %v7387_v20 = vld [vmem:[#allocation2 + $0xae8] sm:$0xf0] }
 0x4c5   :  { %2894 = vmatpush.bf16.msrb.mxu3 %v7072_v36  ;;  %3130 = vmatpush.bf16.msra.mxu2 %v7184_v27  ;;  %v8518_v27 = vld [vmem:[#allocation2 + $0x994] sm:$0xf] }
 0x4c6   :  { %3156 = vmatpush.bf16.msrb.mxu0 %v7188_v16  ;;  %v7212_v12 = vor.u32 %v8518_v27, %v7209_v11  ;;  %v8505_v16 = vld [vmem:[#allocation2 + $0x924] sm:$0xf0] }
 0x4c7   :  { %3168 = vmatpush.bf16.msrb.mxu1 %v7260_v58  ;;  %v7169_v58 = vld [vmem:[#allocation2 + $0x948] sm:$0xf0] }
 0x4c8   :  { %v7172_v61 = vor.u32 %v8508_v6, %v7169_v58  ;;  %v8545_v6 = vld [vmem:[#allocation2 + $0xa64] sm:$0xf0] }
 0x4c9   :  { %3142 = vmatpush.bf16.msra.mxu3 %v7256_v55  ;;  %3131 = vmatpush.bf16.msra.mxu2 %v7176_v25  ;;  %v7167_v55 = vld [vmem:[#allocation2 + $0x940] sm:$0xf]  ;;  %v7204_v25 = vor.u32 %v8516_v21, %v7201_v22 }
 0x4ca   :  { %3157 = vmatpush.bf16.msrb.mxu0 %v7180_v63  ;;  %v7168_v57 = vor.u32 %v8509_v56, %v7167_v55  ;;  %v7143_v63 = vld [vmem:[#allocation2 + $0x910] sm:$0xf]  ;;  %v8559_v55 = vld [vmem:[#allocation2 + $0xad4] sm:$0xf0]  ;;  %v7321_v56 = vld [vmem:[#allocation2 + $0xa60] sm:$0xf] }
 0x4cb   :  { %3169 = vmatpush.bf16.msrb.mxu1 %v7252_v1  ;;  %v7159_v1 = vld [vmem:[#allocation2 + $0x930] sm:$0xf]  ;;  %v9124_v58 = vor.u32 %v8545_v6, %v7321_v56  ;;  %v7307_v56 = vld [vmem:[#allocation2 + $0xa48] sm:$0xf0] }
 0x4cc   :  { %v7160_v3 = vor.u32 %v8507_v50, %v7159_v1  ;;  %v8543_v1 = vld [vmem:[#allocation2 + $0xa54] sm:$0xf0] }
 0x4cd   :  { %3143 = vmatpush.bf16.msra.mxu3 %v7248_v62  ;;  %v7216_v62 = vor.u32 %v8521_v60, %v7215_v59  ;;  %3132 = vmatpush.bf16.msra.mxu2 %v7168_v57  ;;  %v7369_v59 = vld [vmem:[#allocation2 + $0xac0] sm:$0xf]  ;;  %v8557_v60 = vld [vmem:[#allocation2 + $0xac4] sm:$0xf0] }
 0x4ce   :  { %3158 = vmatpush.bf16.msrb.mxu0 %v7172_v61  ;;  %v9128_v13 = vor.u32 %v8557_v60, %v7369_v59  ;;  %v7353_v59 = vld [vmem:[#allocation2 + $0xaa0] sm:$0xf]  ;;  %v8553_v60 = vld [vmem:[#allocation2 + $0xaa4] sm:$0xf0] }
 0x4cf   :  { %3170 = vmatpush.bf16.msrb.mxu1 %v7244_v34  ;;  %v7153_v34 = vld [vmem:[#allocation2 + $0x928] sm:$0xf0] }
 0x4d0   :  { %v7156_v18 = vor.u32 %v8504_v17, %v7153_v34  ;;  %9935 = vst [vmem:[#allocation16_spill] sm:$0xff] %v9128_v13 }
 0x4d1   :  { %3144 = vmatpush.bf16.msra.mxu3 %v7240_v15  ;;  %3133 = vmatpush.bf16.msra.mxu2 %v7160_v3  ;;  %v7151_v15 = vld [vmem:[#allocation2 + $0x920] sm:$0xf] }
 0x4d2   :  { %3159 = vmatpush.bf16.msrb.mxu0 %v7164_v10  ;;  %v7152_v9 = vor.u32 %v8505_v16, %v7151_v15  ;;  %v8555_v10 = vld [vmem:[#allocation2 + $0xab4] sm:$0xf0]  ;;  %v7395_v15 = vld [vmem:[#allocation2 + $0xaf8] sm:$0xf0] }
 0x4d3   :  { %3171 = vmatpush.bf16.msrb.mxu1 %v7236_v29  ;;  %v7145_v29 = vld [vmem:[#allocation2 + $0x918] sm:$0xf0]  ;;  %v9133_v5 = vor.u32 %v8555_v10, %v7361_v4  ;;  %v8538_v4 = vld [vmem:[#allocation2 + $0xa34] sm:$0xf] }
 0x4d4   :  { %v7299_v10 = vld [vmem:[#allocation2 + $0xa38] sm:$0xf0] }
 0x4d5   :  { %3145 = vmatpush.bf16.msra.mxu3 %v7232_v28  ;;  %3134 = vmatpush.bf16.msra.mxu2 %v7152_v9  ;;  %v8502_v28 = vld [vmem:[#allocation2 + $0x914] sm:$0xf] }
 0x4d6   :  { %3160 = vmatpush.bf16.msrb.mxu0 %v7156_v18 }
 0x4d7   :  { %3172 = vmatpush.bf16.msrb.mxu1 %v7228_v54  ;;  %v7377_v54 = vld [vmem:[#allocation2 + $0xad0] sm:$0xf] }
 0x4d8   :  { %v9122_v57 = vor.u32 %v8559_v55, %v7377_v54  ;;  %v8540_v54 = vld [vmem:[#allocation2 + $0xa44] sm:$0xf] }
 0x4d9   :  { %3146 = vmatpush.bf16.msra.mxu3 %v7224_v52  ;;  %v8547_v52 = vld [vmem:[#allocation2 + $0xa74] sm:$0xf0]  ;;  %v9168_v6 = vor.u32 %v8540_v54, %v7307_v56  ;;  %v8578_v54 = vld [vmem:[#allocation2 + $0xb74] sm:$0xf] }
 0x4da   :  { %v9118_v53 = vor.u32 %v8547_v52, %v7329_v51  ;;  %v7305_v51 = vld [vmem:[#allocation2 + $0xa40] sm:$0xf]  ;;  %v8541_v52 = vld [vmem:[#allocation2 + $0xa44] sm:$0xf0] }
 0x4db   :  { %3173 = vmatpush.bf16.msrb.mxu1 %v7220_v23  ;;  %v7313_v23 = vld [vmem:[#allocation2 + $0xa50] sm:$0xf]  ;;  %v9166_v55 = vor.u32 %v8541_v52, %v7305_v51  ;;  %v8579_v52 = vld [vmem:[#allocation2 + $0xb74] sm:$0xf0] }
 0x4dc   :  { %v9131_v3 = vor.u32 %v8543_v1, %v7313_v23  ;;  %v7297_v23 = vld [vmem:[#allocation2 + $0xa30] sm:$0xf]  ;;  %v8539_v1 = vld [vmem:[#allocation2 + $0xa34] sm:$0xf0] }
 0x4dd   :  { %3147 = vmatpush.bf16.msra.mxu3 %v7216_v62  ;;  %v2708_v62 = vld [vmem:[#allocation4 + $0x14] ss:$8 sm:$0x3]  ;;  %v7457_v51 = vld [vmem:[#allocation2 + $0xb70] sm:$0xf] }
 0x4de   :  { %v2711_v0 = vperm.slane %v2708_v62, 1  ;;  %v2710_v11 = vperm.slane %v2708_v62, 0  ;;  %v9171_v62 = vor.u32 %v8553_v60, %v7353_v59  ;;  %v9214_v56 = vor.u32 %v8579_v52, %v7457_v51  ;;  %v7459_v59 = vld [vmem:[#allocation2 + $0xb78] sm:$0xf0]  ;;  %v7433_v52 = vld [vmem:[#allocation2 + $0xb40] sm:$0xf] }
 0x4df   :  { %3174 = vmatpush.bf16.msrb.mxu1 %v7212_v12  ;;  %v8562_v12 = vld [vmem:[#allocation2 + $0xaf4] sm:$0xf]  ;;  %v9216_v60 = vor.u32 %v8578_v54, %v7459_v59  ;;  %v8573_v54 = vld [vmem:[#allocation2 + $0xb44] sm:$0xf0]  ;;  %v8572_v59 = vld [vmem:[#allocation2 + $0xb44] sm:$0xf] }
 0x4e0   :  { %v9137_v9 = vor.u32 %v8562_v12, %v7395_v15  ;;  %9937 = vst [vmem:[#allocation18_spill] sm:$0xff] %v9171_v62  ;;  %v7347_v15 = vld [vmem:[#allocation2 + $0xa98] sm:$0xf0] }
 0x4e1   :  { %3148 = vmatpush.bf16.msra.mxu3 %v7208_v7 }
 0x4e3   :  { %3175 = vmatpush.bf16.msrb.mxu1 %v7204_v25  ;;  %v8546_v25 = vld [vmem:[#allocation2 + $0xa74] sm:$0xf] }
 0x4e5   :  { %3149 = vmatpush.bf16.msra.mxu3 %v7200_v8 }
 0x537   :  { %v2667_v26 = vpop.f32.mrf.mxu1 }
 0x53d   :  { %v2641_v31 = vpop.f32.mrf.mxu3  ;;  %v2654_v32 = vpop.f32.mrf.mxu0 }
 0x53e   :  { %v2655_v49 = vadd.f32 %v2654_v32, %v2456_v30  ;;  %v7148_v30 = vor.u32 %v8502_v28, %v7145_v29  ;;  %v8501_v32 = vld [vmem:[#allocation2 + $0x904] sm:$0xf0]  ;;  %v8558_v28 = vld [vmem:[#allocation2 + $0xad4] sm:$0xf]  ;;  %v7379_v29 = vld [vmem:[#allocation2 + $0xad8] sm:$0xf0] }
 0x53f   :  { %v2669_v35 = vpop.f32.mrf.mxu1 }
 0x540   :  { %v2668_v36 = vadd.f32 %v2667_v26, %v2655_v49  ;;  %v8503_v26 = vld [vmem:[#allocation2 + $0x914] sm:$0xf0]  ;;  %3161 = vmatpush.bf16.msrb.mxu0 %v7148_v30  ;;  %v8500_v49 = vld [vmem:[#allocation2 + $0x904] sm:$0xf] }
 0x541   :  { %v7144_v33 = vor.u32 %v8503_v26, %v7143_v63  ;;  %v7331_v63 = vld [vmem:[#allocation2 + $0xa78] sm:$0xf0]  ;;  %v9140_v26 = vor.u32 %v8560_v19, %v7387_v20  ;;  %v8536_v19 = vld [vmem:[#allocation2 + $0xa24] sm:$0xf]  ;;  %v7291_v20 = vld [vmem:[#allocation2 + $0xa28] sm:$0xf0] }
 0x542   :  { %v2672_v38 = vmax.f32 %v2668_v36, 0.0  ;;  %v7137_v36 = vld [vmem:[#allocation2 + $0x908] sm:$0xf0]  ;;  %v9142_v30 = vor.u32 %v8546_v25, %v7331_v63  ;;  %v8548_v25 = vld [vmem:[#allocation2 + $0xa84] sm:$0xf] }
 0x543   :  { %v2628_v14 = vpop.f32.mrf.mxu2  ;;  %3135 = vmatpush.bf16.msra.mxu2 %v7144_v33 }
 0x544   :  { %v2706_v39 = vpack.c.bf16 %v2672_v38, %v2672_v38  ;;  %v2629_v40 = vadd.f32 %v2628_v14, %v2455_v37  ;;  %v7140_v37 = vor.u32 %v8500_v49, %v7137_v36  ;;  %v8596_v38 = vld [vmem:[#allocation6 + $0x14] sm:$0xf]  ;;  %v7265_v14 = vld [vmem:[#allocation6 + $0x18] sm:$0xf0]  ;;  %v9145_v36 = vor.u32 %v8558_v28, %v7379_v29  ;;  %v7281_v29 = vld [vmem:[#allocation2 + $0xa10] sm:$0xf] }
 0x545   :  { %v2643_v41 = vpop.f32.mrf.mxu3  ;;  %v2656_v42 = vpop.f32.mrf.mxu0  ;;  %v7323_v49 = vld [vmem:[#allocation2 + $0xa68] sm:$0xf0] }
 0x546   :  { %v2642_v43 = vadd.f32 %v2641_v31, %v2629_v40  ;;  %2895 = vmatmul.bf16.vlgmr.msrb.gmra.mxu3 %v2706_v39  ;;  %2921 = vmatmul.bf16.vlgmr.msra.gmra.mxu1 %v2706_v39  ;;  %v7135_v31 = vld [vmem:[#allocation2 + $0x900] sm:$0xf]  ;;  %v7393_v39 = vld [vmem:[#allocation2 + $0xaf0] sm:$0xf]  ;;  %v7268_v40 = vor.u32 %v8596_v38, %v7265_v14  ;;  %v8563_v41 = vld [vmem:[#allocation2 + $0xaf4] sm:$0xf0] }
 0x547   :  { %v7136_v35 = vor.u32 %v8501_v32, %v7135_v31  ;;  %3162 = vmatpush.bf16.msrb.mxu0 %v7140_v37  ;;  %v9113_v42 = vor.u32 %v8563_v41, %v7393_v39  ;;  %v8544_v32 = vld [vmem:[#allocation2 + $0xa64] sm:$0xf]  ;;  %v7371_v38 = vld [vmem:[#allocation2 + $0xac8] sm:$0xf0]  ;;  %v8542_v39 = vld [vmem:[#allocation2 + $0xa54] sm:$0xf] }
 0x548   :  { %v2671_v44 = vmax.f32 %v2642_v43, 0.0  ;;  %v7385_v43 = vld [vmem:[#allocation2 + $0xae0] sm:$0xf]  ;;  %3291 = vmatpush.bf16.msrb.mxu3 %v7268_v40  ;;  %v8556_v37 = vld [vmem:[#allocation2 + $0xac4] sm:$0xf]  ;;  %v9148_v14 = vor.u32 %v8544_v32, %v7323_v49 }
 0x549   :  { %3136 = vmatpush.bf16.msra.mxu2 %v7136_v35  ;;  %3472 = vmatpush.bf16.msra.mxu1 %v9113_v42  ;;  %v7315_v40 = vld [vmem:[#allocation2 + $0xa58] sm:$0xf0]  ;;  %v9151_v41 = vor.u32 %v8556_v37, %v7371_v38  ;;  %v8534_v32 = vld [vmem:[#allocation2 + $0xa14] sm:$0xf]  ;;  %v7273_v38 = vld [vmem:[#allocation2 + $0xa00] sm:$0xf] }
 0x54a   :  { %v2705_v45 = vpack.c.bf16 %v2671_v44, %v2671_v44  ;;  %v8561_v44 = vld [vmem:[#allocation2 + $0xae4] sm:$0xf0] }
 0x54b   :  { %v2630_v46 = vpop.f32.mrf.mxu2  ;;  %v9116_v24 = vor.u32 %v8561_v44, %v7385_v43  ;;  %9936 = vst [vmem:[#allocation17_spill] sm:$0xff] %v9151_v41  ;;  %v8554_v43 = vld [vmem:[#allocation2 + $0xab4] sm:$0xf]  ;;  %v7363_v44 = vld [vmem:[#allocation2 + $0xab8] sm:$0xf0] }
 0x54c   :  { %2882 = vmatmul.bf16.vlgmr.msrb.gmra.mxu2 %v2705_v45  ;;  %2908 = vmatmul.bf16.vlgmr.msra.gmra.mxu0 %v2705_v45  ;;  %v7263_v45 = vld [vmem:[#allocation6 + $0x10] sm:$0xf]  ;;  %v8597_v46 = vld [vmem:[#allocation6 + $0x14] sm:$0xf0] }
 0x54d   :  { %v7264_v48 = vor.u32 %v8597_v46, %v7263_v45  ;;  %3459 = vmatpush.bf16.msra.mxu0 %v9118_v53  ;;  %3473 = vmatpush.bf16.msra.mxu1 %v9116_v24  ;;  %v9154_v45 = vor.u32 %v8542_v39, %v7315_v40  ;;  %v9157_v46 = vor.u32 %v8554_v43, %v7363_v44  ;;  %v8533_v39 = vld [vmem:[#allocation2 + $0xa04] sm:$0xf0]  ;;  %v8532_v40 = vld [vmem:[#allocation2 + $0xa04] sm:$0xf]  ;;  %v7275_v44 = vld [vmem:[#allocation2 + $0xa08] sm:$0xf0] }
 0x54e   :  { %v9208_v43 = vor.u32 %v8533_v39, %v7273_v38  ;;  %v8592_v39 = vld [vmem:[#allocation2 + $0xbe4] sm:$0xf] }
 0x54f   :  { %3278 = vmatpush.bf16.msrb.mxu2 %v7264_v48  ;;  %v8782_v48 = vld [vmem:[%s9862_s1] sm:$0xf] }
 0x550   :  { %9946 = vst [vmem:[#allocation27_spill] sm:$0xff] %v9208_v43 }
 0x551   :  { %3460 = vmatpush.bf16.msra.mxu0 %v9124_v58  ;;  %3474 = vmatpush.bf16.msra.mxu1 %v9122_v57 }
 0x555   :  { %3475 = vmatpush.bf16.msra.mxu1 %v9128_v13  ;;  %3461 = vmatpush.bf16.msra.mxu0 %v9131_v3 }
 0x559   :  { %3476 = vmatpush.bf16.msra.mxu1 %v9133_v5  ;;  %3462 = vmatpush.bf16.msra.mxu0 %v9166_v55 }
 0x55d   :  { %3477 = vmatpush.bf16.msra.mxu1 %v9171_v62 }
 0x5c3   :  { %v2922_v61 = vpop.f32.mrf.mxu1 }
 0x5c9   :  { %v2896_v50 = vpop.f32.mrf.mxu3  ;;  %v2909_v2 = vpop.f32.mrf.mxu0 }
 0x5ca   :  { %v2910_v47 = vadd.f32 %v2909_v2, %v2711_v0  ;;  %v7355_v0 = vld [vmem:[#allocation2 + $0xaa8] sm:$0xf0]  ;;  %v9176_v2 = vor.u32 %v8539_v1, %v7297_v23  ;;  %v8576_v23 = vld [vmem:[#allocation2 + $0xb64] sm:$0xf] }
 0x5cb   :  { %v2924_v7 = vpop.f32.mrf.mxu1  ;;  %v2963_v1 = vld [vmem:[#allocation4 + $0x15] ss:$8 sm:$0x3] }
 0x5cc   :  { %v2923_v27 = vadd.f32 %v2922_v61, %v2910_v47  ;;  %v8552_v61 = vld [vmem:[#allocation2 + $0xaa4] sm:$0xf]  ;;  %v9179_v47 = vor.u32 %v8538_v4, %v7299_v10  ;;  %v7345_v7 = vld [vmem:[#allocation2 + $0xa90] sm:$0xf]  ;;  %3463 = vmatpush.bf16.msra.mxu0 %v9176_v2  ;;  %v7451_v10 = vld [vmem:[#allocation2 + $0xb68] sm:$0xf0] }
 0x5ce   :  { %v2927_v16 = vmax.f32 %v2923_v27, 0.0  ;;  %9939 = vst [vmem:[#allocation20_spill] sm:$0xff] %v9179_v47  ;;  %v8551_v27 = vld [vmem:[#allocation2 + $0xa94] sm:$0xf0] }
 0x5cf   :  { %v2883_v17 = vpop.f32.mrf.mxu2  ;;  %v9183_v12 = vor.u32 %v8551_v27, %v7345_v7  ;;  %v7521_v7 = vld [vmem:[#allocation2 + $0xbf0] sm:$0xf]  ;;  %v9222_v27 = vor.u32 %v8576_v23, %v7451_v10  ;;  %v8591_v10 = vld [vmem:[#allocation2 + $0xbd4] sm:$0xf0] }
 0x5d0   :  { %v2961_v34 = vpack.c.bf16 %v2927_v16, %v2927_v16  ;;  %v2884_v18 = vadd.f32 %v2883_v17, %v2710_v11  ;;  %v8550_v11 = vld [vmem:[#allocation2 + $0xa94] sm:$0xf]  ;;  %v7289_v17 = vld [vmem:[#allocation2 + $0xa20] sm:$0xf]  ;;  %v7505_v23 = vld [vmem:[#allocation2 + $0xbd0] sm:$0xf] }
 0x5d1   :  { %v2898_v21 = vpop.f32.mrf.mxu3  ;;  %v2911_v8 = vpop.f32.mrf.mxu0  ;;  %9940 = vst [vmem:[#allocation21_spill] sm:$0xff] %v9183_v12  ;;  %v9186_v16 = vor.u32 %v8550_v11, %v7347_v15  ;;  %3478 = vmatpush.bf16.msra.mxu1 %v9183_v12  ;;  %v8595_v11 = vld [vmem:[#allocation2 + $0xbf4] sm:$0xf0]  ;;  %v8594_v15 = vld [vmem:[#allocation2 + $0xbf4] sm:$0xf] }
 0x5d2   :  { %v2897_v22 = vadd.f32 %v2896_v50, %v2884_v18  ;;  %3150 = vmatmul.bf16.vlgmr.msra.gmra.mxu3 %v2961_v34  ;;  %3176 = vmatmul.bf16.vlgmr.msrb.gmra.mxu1 %v2961_v34  ;;  %v9174_v50 = vor.u32 %v8552_v61, %v7355_v0  ;;  %v8537_v34 = vld [vmem:[#allocation2 + $0xa24] sm:$0xf0]  ;;  %v9192_v21 = vor.u32 %v8536_v19, %v7291_v20  ;;  %v7337_v8 = vld [vmem:[#allocation2 + $0xa80] sm:$0xf] }
 0x5d3   :  { %3498 = vmatpush.bf16.msra.mxu3 %v9137_v9  ;;  %9941 = vst [vmem:[#allocation22_spill] sm:$0xff] %v9186_v16  ;;  %v9189_v18 = vor.u32 %v8537_v34, %v7289_v17  ;;  %v7449_v61 = vld [vmem:[#allocation2 + $0xb60] sm:$0xf]  ;;  %v8577_v0 = vld [vmem:[#allocation2 + $0xb64] sm:$0xf0]  ;;  %v9225_v19 = vor.u32 %v8595_v11, %v7521_v7 }
 0x5d4   :  { %v2926_v33 = vmax.f32 %v2897_v22, 0.0  ;;  %9938 = vst [vmem:[#allocation19_spill] sm:$0xff] %v9174_v50  ;;  %v8549_v22 = vld [vmem:[#allocation2 + $0xa84] sm:$0xf0]  ;;  %v9220_v4 = vor.u32 %v8577_v0, %v7449_v61  ;;  %v7523_v17 = vld [vmem:[#allocation2 + $0xbf8] sm:$0xf0]  ;;  %v9242_v61 = vor.u32 %v8573_v54, %v7433_v52 }
 0x5d5   :  { %9942 = vst [vmem:[#allocation23_spill] sm:$0xff] %v9192_v21  ;;  %3464 = vmatpush.bf16.msra.mxu0 %v9189_v18  ;;  %v9195_v63 = vor.u32 %v8549_v22, %v7337_v8  ;;  %v9227_v20 = vor.u32 %v8594_v15, %v7523_v17  ;;  %v7441_v8 = vld [vmem:[#allocation2 + $0xb50] sm:$0xf]  ;;  %v8575_v22 = vld [vmem:[#allocation2 + $0xb54] sm:$0xf0]  ;;  %v9248_v17 = vor.u32 %v8591_v10, %v7505_v23 }
 0x5d6   :  { %v2960_v31 = vpack.c.bf16 %v2926_v33, %v2926_v33  ;;  %v7339_v33 = vld [vmem:[#allocation2 + $0xa88] sm:$0xf0] }
 0x5d7   :  { %v2885_v35 = vpop.f32.mrf.mxu2  ;;  %3499 = vmatpush.bf16.msra.mxu3 %v9140_v26  ;;  %v9198_v28 = vor.u32 %v8548_v25, %v7339_v33  ;;  %3479 = vmatpush.bf16.msra.mxu1 %v9195_v63  ;;  %v8574_v25 = vld [vmem:[#allocation2 + $0xb54] sm:$0xf]  ;;  %v9230_v33 = vor.u32 %v8575_v22, %v7441_v8  ;;  %v7435_v0 = vld [vmem:[#allocation2 + $0xb48] sm:$0xf0]  ;;  %v7507_v22 = vld [vmem:[#allocation2 + $0xbd8] sm:$0xf0] }
 0x5d8   :  { %3137 = vmatmul.bf16.vlgmr.msra.gmra.mxu2 %v2960_v31  ;;  %3163 = vmatmul.bf16.vlgmr.msrb.gmra.mxu0 %v2960_v31  ;;  %v8535_v31 = vld [vmem:[#allocation2 + $0xa14] sm:$0xf0]  ;;  %v7283_v35 = vld [vmem:[#allocation2 + $0xa18] sm:$0xf0]  ;;  %v9246_v15 = vor.u32 %v8572_v59, %v7435_v0  ;;  %v8590_v8 = vld [vmem:[#allocation2 + $0xbd4] sm:$0xf] }
 0x5d9   :  { %3485 = vmatpush.bf16.msra.mxu2 %v9142_v30  ;;  %9943 = vst [vmem:[#allocation24_spill] sm:$0xff] %v9198_v28  ;;  %v9201_v49 = vor.u32 %v8535_v31, %v7281_v29  ;;  %v9204_v37 = vor.u32 %v8534_v32, %v7283_v35  ;;  %v7443_v29 = vld [vmem:[#allocation2 + $0xb58] sm:$0xf0]  ;;  %v7513_v31 = vld [vmem:[#allocation2 + $0xbe0] sm:$0xf] }
 0x5da   :  { %v8593_v32 = vld [vmem:[#allocation2 + $0xbe4] sm:$0xf0]  ;;  %v9234_v35 = vor.u32 %v8574_v25, %v7443_v29  ;;  %v9250_v29 = vor.u32 %v8590_v8, %v7507_v22  ;;  %v7425_v22 = vld [vmem:[#allocation2 + $0xb30] sm:$0xf] }
 0x5db   :  { %3500 = vmatpush.bf16.msra.mxu3 %v9145_v36  ;;  %9944 = vst [vmem:[#allocation25_spill] sm:$0xff] %v9201_v49  ;;  %3465 = vmatpush.bf16.msra.mxu0 %v9201_v49  ;;  %v9236_v38 = vor.u32 %v8593_v32, %v7513_v31 }
 0x5dc   :  { %9945 = vst [vmem:[#allocation26_spill] sm:$0xff] %v9204_v37  ;;  %3688 = vmatpush.bf16.msrb.mxu1 %v9225_v19 }
 0x5dd   :  { %3486 = vmatpush.bf16.msra.mxu2 %v9148_v14 }
 0x5df   :  { %3501 = vmatpush.bf16.msra.mxu3 %v9151_v41  ;;  %3466 = vmatpush.bf16.msra.mxu0 %v9208_v43 }
 0x5e0   :  { %3689 = vmatpush.bf16.msrb.mxu1 %v9236_v38 }
 0x5e1   :  { %3487 = vmatpush.bf16.msra.mxu2 %v9154_v45 }
 0x5e2   :  { %7270 = vmatmul.msk.bf16.vlgmr.msrb.gmra.mxu3 %vm1910_vm7, %v8782_v48 }
 0x5e3   :  { %3502 = vmatpush.bf16.msra.mxu3 %v9157_v46  ;;  %3675 = vmatpush.bf16.msrb.mxu0 %v9214_v56 }
 0x5e4   :  { %3690 = vmatpush.bf16.msrb.mxu1 %v9248_v17 }
 0x5e5   :  { %3488 = vmatpush.bf16.msra.mxu2 %v9168_v6 }
 0x5e7   :  { %3503 = vmatpush.bf16.msra.mxu3 %v9174_v50  ;;  %3676 = vmatpush.bf16.msrb.mxu0 %v9220_v4 }
 0x5e8   :  { %7269 = vmatmul.msk.bf16.vlgmr.msrb.gmra.mxu2 %vm1910_vm7, %v8782_v48  ;;  %v9210_v48 = vor.u32 %v8532_v40, %v7275_v44  ;;  %v7515_v40 = vld [vmem:[#allocation2 + $0xbe8] sm:$0xf0]  ;;  %v2966_v44 = vperm.slane %v2963_v1, 1 }
 0x5e9   :  { %3489 = vmatpush.bf16.msra.mxu2 %v9179_v47  ;;  %v9238_v51 = vor.u32 %v8592_v39, %v7515_v40  ;;  %v2965_v39 = vperm.slane %v2963_v1, 0 }
 0x5ea   :  { %9947 = vst [vmem:[#allocation28_spill] sm:$0xff] %v9210_v48 }
 0x5eb   :  { %3504 = vmatpush.bf16.msra.mxu3 %v9186_v16  ;;  %3677 = vmatpush.bf16.msrb.mxu0 %v9230_v33 }
 0x5ed   :  { %3490 = vmatpush.bf16.msra.mxu2 %v9192_v21 }
 0x5ef   :  { %3505 = vmatpush.bf16.msra.mxu3 %v9198_v28  ;;  %3678 = vmatpush.bf16.msrb.mxu0 %v9242_v61 }
 0x5f1   :  { %3491 = vmatpush.bf16.msra.mxu2 %v9204_v37 }
 0x5f3   :  { %3714 = vmatpush.bf16.msrb.mxu3 %v9227_v20 }
 0x5f5   :  { %3492 = vmatpush.bf16.msra.mxu2 %v9210_v48 }
 0x5f7   :  { %3715 = vmatpush.bf16.msrb.mxu3 %v9238_v51 }
 0x5f9   :  { %3701 = vmatpush.bf16.msrb.mxu2 %v9216_v60 }
 0x5fb   :  { %3716 = vmatpush.bf16.msrb.mxu3 %v9250_v29 }
 0x5fd   :  { %3702 = vmatpush.bf16.msrb.mxu2 %v9222_v27 }
 0x601   :  { %3703 = vmatpush.bf16.msrb.mxu2 %v9234_v35 }
 0x605   :  { %3704 = vmatpush.bf16.msrb.mxu2 %v9246_v15 }
 0x64f   :  { %v3177_v34 = vpop.f32.mrf.mxu1 }
 0x655   :  { %v3151_v7 = vpop.f32.mrf.mxu3  ;;  %v3164_v11 = vpop.f32.mrf.mxu0 }
 0x656   :  { %v3165_v25 = vadd.f32 %v3164_v11, %v2966_v44 }
 0x657   :  { %v3179_v31 = vpop.f32.mrf.mxu1 }
 0x658   :  { %v9253_v32 = vadd.f32 %v3177_v34, %v3165_v25  ;;  %v8571_v25 = vld [vmem:[#allocation2 + $0xb34] sm:$0xf0]  ;;  %v8570_v31 = vld [vmem:[#allocation2 + $0xb34] sm:$0xf] }
 0x65a   :  { %9948 = vst [vmem:[#allocation29_spill] sm:$0xff] %v9253_v32  ;;  %v3298_v40 = vpack.c.bf16 %v9253_v32, %v9253_v32  ;;  %v8569_v32 = vld [vmem:[#allocation2 + $0xb24] sm:$0xf0] }
 0x65b   :  { %v3138_v52 = vpop.f32.mrf.mxu2 }
 0x65c   :  { %v3139_v54 = vadd.f32 %v3138_v52, %v2965_v39  ;;  %3480 = vmatmul.bf16.vlgmr.msra.gmra.mxu1 %v3298_v40  ;;  %3506 = vmatmul.bf16.vlgmr.msra.gmra.mxu3 %v3298_v40  ;;  %v9268_v39 = vor.u32 %v8571_v25, %v7425_v22  ;;  %v7427_v40 = vld [vmem:[#allocation2 + $0xb38] sm:$0xf0]  ;;  %v7497_v52 = vld [vmem:[#allocation2 + $0xbc0] sm:$0xf]  ;;  %v8568_v22 = vld [vmem:[#allocation2 + $0xb24] sm:$0xf] }
 0x65d   :  { %v3153_v44 = vpop.f32.mrf.mxu3  ;;  %v3166_v59 = vpop.f32.mrf.mxu0  ;;  %v7419_v25 = vld [vmem:[#allocation2 + $0xb28] sm:$0xf0] }
 0x65e   :  { %v9260_v0 = vadd.f32 %v3151_v7, %v3139_v54  ;;  %v9270_v7 = vor.u32 %v8570_v31, %v7427_v40  ;;  %v8589_v54 = vld [vmem:[#allocation2 + $0xbc4] sm:$0xf0]  ;;  %v8588_v44 = vld [vmem:[#allocation2 + $0xbc4] sm:$0xf]  ;;  %3679 = vmatpush.bf16.msrb.mxu0 %v9268_v39  ;;  %v9281_v31 = vor.u32 %v8568_v22, %v7419_v25  ;;  %v7489_v40 = vld [vmem:[#allocation2 + $0xbb0] sm:$0xf] }
 0x65f   :  { %v9273_v59 = vor.u32 %v8589_v54, %v7497_v52  ;;  %v8587_v52 = vld [vmem:[#allocation2 + $0xbb4] sm:$0xf0]  ;;  %v8586_v54 = vld [vmem:[#allocation2 + $0xbb4] sm:$0xf]  ;;  %v7411_v25 = vld [vmem:[#allocation2 + $0xb18] sm:$0xf0] }
 0x660   :  { %9949 = vst [vmem:[#allocation30_spill] sm:$0xff] %v9260_v0  ;;  %v3297_v1 = vpack.c.bf16 %v9260_v0, %v9260_v0  ;;  %3705 = vmatpush.bf16.msrb.mxu2 %v9270_v7  ;;  %v9285_v0 = vor.u32 %v8587_v52, %v7489_v40  ;;  %v8585_v40 = vld [vmem:[#allocation2 + $0xba4] sm:$0xf0]  ;;  %v8584_v52 = vld [vmem:[#allocation2 + $0xba4] sm:$0xf] }
 0x661   :  { %9950 = vst [vmem:[#allocation31_spill] sm:$0xff] %v9270_v7  ;;  %3691 = vmatpush.bf16.msrb.mxu1 %v9273_v59  ;;  %v7491_v7 = vld [vmem:[#allocation2 + $0xbb8] sm:$0xf0] }
 0x662   :  { %3467 = vmatmul.bf16.vlgmr.msra.gmra.mxu0 %v3297_v1  ;;  %3493 = vmatmul.bf16.vlgmr.msra.gmra.mxu2 %v3297_v1  ;;  %v7499_v1 = vld [vmem:[#allocation2 + $0xbc8] sm:$0xf0]  ;;  %9953 = vst [vmem:[#allocation34_spill] sm:$0xff] %v9281_v31 }
 0x663   :  { %v3140_v34 = vpop.f32.mrf.mxu2  ;;  %9954 = vst [vmem:[#allocation35_spill] sm:$0xff] %v9285_v0 }
 0x664   :  { %v7417_v34 = vld [vmem:[#allocation2 + $0xb20] sm:$0xf]  ;;  %3706 = vmatpush.bf16.msrb.mxu2 %v9281_v31 }
 0x665   :  { %v9264_v23 = vpop.f32.mrf.mxu3  ;;  %3692 = vmatpush.bf16.msrb.mxu1 %v9285_v0  ;;  %v7401_v0 = vld [vmem:[#allocation2 + $0xb00] sm:$0xf] }
 0x66b   :  { %v9266_v10 = vpop.f32.mrf.mxu2 }
 0x66d   :  { %v3295_v11 = vpop.f32.mrf.mxu3 }
 0x66e   :  { %v9276_v11 = vor.u32 %v8588_v44, %v7499_v1  ;;  %v7409_v44 = vld [vmem:[#allocation2 + $0xb10] sm:$0xf]  ;;  %v8567_v1 = vld [vmem:[#allocation2 + $0xb14] sm:$0xf0] }
 0x66f   :  { %v9291_v22 = vor.u32 %v8567_v1, %v7409_v44  ;;  %v8565_v44 = vld [vmem:[#allocation2 + $0xb04] sm:$0xf0]  ;;  %v8564_v1 = vld [vmem:[#allocation2 + $0xb04] sm:$0xf] }
 0x670   :  { %9951 = vst [vmem:[#allocation32_spill] sm:$0xff] %v9276_v11  ;;  %3717 = vmatpush.bf16.msrb.mxu3 %v9276_v11 }
 0x671   :  { %9956 = vst [vmem:[#allocation37_spill] sm:$0xff] %v9291_v22 }
 0x673   :  { %v3282_v8 = vpop.f32.mrf.mxu2 }
 0x674   :  { %v9278_v8 = vor.u32 %v8569_v32, %v7417_v34  ;;  %v9288_v32 = vor.u32 %v8586_v54, %v7491_v7  ;;  %v8566_v34 = vld [vmem:[#allocation2 + $0xb14] sm:$0xf]  ;;  %v7483_v7 = vld [vmem:[#allocation2 + $0xba8] sm:$0xf0] }
 0x675   :  { %v9294_v11 = vor.u32 %v8566_v34, %v7411_v25  ;;  %v9300_v54 = vor.u32 %v8584_v52, %v7483_v7  ;;  %v7403_v34 = vld [vmem:[#allocation2 + $0xb08] sm:$0xf0]  ;;  %v7475_v52 = vld [vmem:[#allocation2 + $0xb98] sm:$0xf0] }
 0x676   :  { %9952 = vst [vmem:[#allocation33_spill] sm:$0xff] %v9278_v8  ;;  %3680 = vmatpush.bf16.msrb.mxu0 %v9278_v8  ;;  %3718 = vmatpush.bf16.msrb.mxu3 %v9288_v32  ;;  %v7481_v8 = vld [vmem:[#allocation2 + $0xba0] sm:$0xf]  ;;  %v9306_v25 = vor.u32 %v8564_v1, %v7403_v34  ;;  %v8580_v1 = vld [vmem:[#allocation2 + $0xb84] sm:$0xf] }
 0x677   :  { %9955 = vst [vmem:[#allocation36_spill] sm:$0xff] %v9288_v32  ;;  %v9297_v31 = vor.u32 %v8585_v40, %v7481_v8  ;;  %3707 = vmatpush.bf16.msrb.mxu2 %v9294_v11  ;;  %v9303_v32 = vor.u32 %v8565_v44, %v7401_v0  ;;  %v8583_v8 = vld [vmem:[#allocation2 + $0xb94] sm:$0xf0]  ;;  %v8582_v40 = vld [vmem:[#allocation2 + $0xb94] sm:$0xf] }
 0x678   :  { %9957 = vst [vmem:[#allocation38_spill] sm:$0xff] %v9294_v11  ;;  %v9312_v7 = vor.u32 %v8582_v40, %v7475_v52  ;;  %v7465_v0 = vld [vmem:[#allocation2 + $0xb80] sm:$0xf]  ;;  %v8581_v44 = vld [vmem:[#allocation2 + $0xb84] sm:$0xf0] }
 0x679   :  { %9958 = vst [vmem:[#allocation39_spill] sm:$0xff] %v9297_v31  ;;  %3693 = vmatpush.bf16.msrb.mxu1 %v9297_v31  ;;  %v9318_v34 = vor.u32 %v8581_v44, %v7465_v0  ;;  %v3255_v40 = vld [vmem:[#allocation4 + $0x16] ss:$8 sm:$0x3] }
 0x67a   :  { %3681 = vmatpush.bf16.msrb.mxu0 %v9291_v22  ;;  %9959 = vst [vmem:[#allocation40_spill] sm:$0xff] %v9300_v54  ;;  %3719 = vmatpush.bf16.msrb.mxu3 %v9300_v54  ;;  %v7473_v22 = vld [vmem:[#allocation2 + $0xb90] sm:$0xf]  ;;  %v3257_v0 = vperm.slane %v3255_v40, 0 }
 0x67b   :  { %9960 = vst [vmem:[#allocation41_spill] sm:$0xff] %v9303_v32  ;;  %v9309_v11 = vor.u32 %v8583_v8, %v7473_v22  ;;  %3708 = vmatpush.bf16.msrb.mxu2 %v9306_v25  ;;  %v7467_v22 = vld [vmem:[#allocation2 + $0xb88] sm:$0xf0] }
 0x67c   :  { %9961 = vst [vmem:[#allocation42_spill] sm:$0xff] %v9306_v25  ;;  %v9320_v8 = vor.u32 %v8580_v1, %v7467_v22  ;;  %v9344_v44 = vadd.f32 %v9266_v10, %v3257_v0 }
 0x67d   :  { %9962 = vst [vmem:[#allocation43_spill] sm:$0xff] %v9309_v11  ;;  %3694 = vmatpush.bf16.msrb.mxu1 %v9309_v11 }
 0x67e   :  { %3682 = vmatpush.bf16.msrb.mxu0 %v9303_v32  ;;  %9963 = vst [vmem:[#allocation44_spill] sm:$0xff] %v9312_v7  ;;  %3720 = vmatpush.bf16.msrb.mxu3 %v9312_v7 }
 0x67f   :  { %3755 = vmatpush.bf16.msra.mxu2 %v9142_v30  ;;  %9964 = vst [vmem:[#allocation45_spill] sm:$0xff] %v9318_v34 }
 0x680   :  { %9965 = vst [vmem:[#allocation46_spill] sm:$0xff] %v9320_v8 }
 0x681   :  { %3695 = vmatpush.bf16.msrb.mxu1 %v9318_v34 }
 0x682   :  { %3729 = vmatpush.bf16.msra.mxu0 %v9118_v53  ;;  %3721 = vmatpush.bf16.msrb.mxu3 %v9320_v8 }
 0x683   :  { %3756 = vmatpush.bf16.msra.mxu2 %v9148_v14 }
 0x685   :  { %3742 = vmatpush.bf16.msra.mxu1 %v9113_v42 }
 0x686   :  { %3730 = vmatpush.bf16.msra.mxu0 %v9124_v58  ;;  %3768 = vmatpush.bf16.msra.mxu3 %v9137_v9 }
 0x687   :  { %3757 = vmatpush.bf16.msra.mxu2 %v9154_v45 }
 0x689   :  { %3743 = vmatpush.bf16.msra.mxu1 %v9116_v24 }
 0x68a   :  { %3731 = vmatpush.bf16.msra.mxu0 %v9131_v3  ;;  %3769 = vmatpush.bf16.msra.mxu3 %v9140_v26 }
 0x68b   :  { %3758 = vmatpush.bf16.msra.mxu2 %v9168_v6 }
 0x68d   :  { %3744 = vmatpush.bf16.msra.mxu1 %v9122_v57 }
 0x68e   :  { %3732 = vmatpush.bf16.msra.mxu0 %v9166_v55  ;;  %3770 = vmatpush.bf16.msra.mxu3 %v9145_v36 }
 0x68f   :  { %3759 = vmatpush.bf16.msra.mxu2 %v9179_v47  ;;  %v3258_v47 = vperm.slane %v3255_v40, 1 }
 0x691   :  { %3745 = vmatpush.bf16.msra.mxu1 %v9128_v13  ;;  %v9354_v10 = vadd.f32 %v9264_v23, %v3258_v47 }
 0x692   :  { %3733 = vmatpush.bf16.msra.mxu0 %v9176_v2  ;;  %3771 = vmatpush.bf16.msra.mxu3 %v9151_v41 }
 0x693   :  { %3760 = vmatpush.bf16.msra.mxu2 %v9192_v21 }
 0x695   :  { %3746 = vmatpush.bf16.msra.mxu1 %v9133_v5 }
 0x696   :  { %3734 = vmatpush.bf16.msra.mxu0 %v9189_v18  ;;  %3772 = vmatpush.bf16.msra.mxu3 %v9157_v46 }
 0x697   :  { %3761 = vmatpush.bf16.msra.mxu2 %v9204_v37 }
 0x699   :  { %3747 = vmatpush.bf16.msra.mxu1 %v9171_v62 }
 0x69a   :  { %3735 = vmatpush.bf16.msra.mxu0 %v9201_v49  ;;  %3773 = vmatpush.bf16.msra.mxu3 %v9174_v50 }
 0x69b   :  { %3762 = vmatpush.bf16.msra.mxu2 %v9210_v48 }
 0x69d   :  { %3748 = vmatpush.bf16.msra.mxu1 %v9183_v12 }
 0x69e   :  { %3736 = vmatpush.bf16.msra.mxu0 %v9208_v43  ;;  %3774 = vmatpush.bf16.msra.mxu3 %v9186_v16 }
 0x6a1   :  { %3749 = vmatpush.bf16.msra.mxu1 %v9195_v63 }
 0x6a2   :  { %3775 = vmatpush.bf16.msra.mxu3 %v9198_v28 }
 0x6d9   :  { %v3481_v52 = vpop.f32.mrf.mxu1 }
 0x6df   :  { %v3468_v1 = vpop.f32.mrf.mxu0  ;;  %v3507_v22 = vpop.f32.mrf.mxu3 }
 0x6e0   :  { %v3469_v13 = vadd.f32 %v3468_v1, %v9344_v44 }
 0x6e1   :  { %v3483_v41 = vpop.f32.mrf.mxu1 }
 0x6e2   :  { %v3482_v21 = vadd.f32 %v3481_v52, %v3469_v13 }
 0x6e4   :  { %v3511_v0 = vmax.f32 %v3482_v21, 0.0 }
 0x6e5   :  { %v3494_v49 = vpop.f32.mrf.mxu2 }
 0x6e6   :  { %v3513_v40 = vpack.c.bf16 %v3511_v0, %v3511_v0  ;;  %v3495_v1 = vadd.f32 %v3494_v49, %v9354_v10  ;;  %v9966_v49 = vld [vmem:[#allocation31_spill] sm:$0xff]  ;;  %v9968_v0 = vld [vmem:[#allocation33_spill] sm:$0xff] }
 0x6e7   :  { %v3470_v41 = vpop.f32.mrf.mxu0  ;;  %v3509_v13 = vpop.f32.mrf.mxu3 }
 0x6e8   :  { %v3508_v52 = vadd.f32 %v3507_v22, %v3495_v1  ;;  %3683 = vmatmul.bf16.vlgmr.msrb.gmra.mxu0 %v3513_v40  ;;  %3709 = vmatmul.bf16.vlgmr.msrb.gmra.mxu2 %v3513_v40  ;;  %v9967_v22 = vld [vmem:[#allocation32_spill] sm:$0xff]  ;;  %v9969_v40 = vld [vmem:[#allocation34_spill] sm:$0xff]  ;;  %v9970_v1 = vld [vmem:[#allocation35_spill] sm:$0xff] }
 0x6e9   :  { %3785 = vmatpush.bf16.msrb.mxu0 %v9214_v56  ;;  %3811 = vmatpush.bf16.msrb.mxu2 %v9216_v60  ;;  %v9971_v41 = vld [vmem:[#allocation36_spill] sm:$0xff]  ;;  %v9972_v13 = vld [vmem:[#allocation37_spill] sm:$0xff] }
 0x6ea   :  { %v3512_v47 = vmax.f32 %v3508_v52, 0.0  ;;  %v9973_v52 = vld [vmem:[#allocation38_spill] sm:$0xff] }
 0x6ec   :  { %v3514_v21 = vpack.c.bf16 %v3512_v47, %v3512_v47  ;;  %v3246_v47 = vld [vmem:[#allocation4 + $0x17] ss:$8 sm:$0x3] }
 0x6ed   :  { %v3496_v23 = vpop.f32.mrf.mxu2  ;;  %3786 = vmatpush.bf16.msrb.mxu0 %v9220_v4  ;;  %3812 = vmatpush.bf16.msrb.mxu2 %v9222_v27 }
 0x6ee   :  { %3696 = vmatmul.bf16.vlgmr.msrb.gmra.mxu1 %v3514_v21  ;;  %3722 = vmatmul.bf16.vlgmr.msrb.gmra.mxu3 %v3514_v21  ;;  %v9394_v23 = vperm.slane %v3246_v47, 0 }
 0x6ef   :  { %3798 = vmatpush.bf16.msrb.mxu1 %v9225_v19  ;;  %3824 = vmatpush.bf16.msrb.mxu3 %v9227_v20 }
 0x6f1   :  { %3787 = vmatpush.bf16.msrb.mxu0 %v9230_v33  ;;  %3813 = vmatpush.bf16.msrb.mxu2 %v9234_v35 }
 0x6f3   :  { %3799 = vmatpush.bf16.msrb.mxu1 %v9236_v38  ;;  %3825 = vmatpush.bf16.msrb.mxu3 %v9238_v51 }
 0x6f5   :  { %3788 = vmatpush.bf16.msrb.mxu0 %v9242_v61  ;;  %3814 = vmatpush.bf16.msrb.mxu2 %v9246_v15 }
 0x6f7   :  { %3800 = vmatpush.bf16.msrb.mxu1 %v9248_v17  ;;  %3826 = vmatpush.bf16.msrb.mxu3 %v9250_v29 }
 0x6f9   :  { %3789 = vmatpush.bf16.msrb.mxu0 %v9268_v39  ;;  %3815 = vmatpush.bf16.msrb.mxu2 %v9966_v49 }
 0x6fb   :  { %3801 = vmatpush.bf16.msrb.mxu1 %v9273_v59  ;;  %3827 = vmatpush.bf16.msrb.mxu3 %v9967_v22 }
 0x6fd   :  { %3790 = vmatpush.bf16.msrb.mxu0 %v9968_v0  ;;  %3816 = vmatpush.bf16.msrb.mxu2 %v9969_v40 }
 0x6ff   :  { %3802 = vmatpush.bf16.msrb.mxu1 %v9970_v1  ;;  %3828 = vmatpush.bf16.msrb.mxu3 %v9971_v41 }
 0x701   :  { %3791 = vmatpush.bf16.msrb.mxu0 %v9972_v13  ;;  %3817 = vmatpush.bf16.msrb.mxu2 %v9973_v52 }
 0x703   :  { %3803 = vmatpush.bf16.msrb.mxu1 %v9297_v31  ;;  %3829 = vmatpush.bf16.msrb.mxu3 %v9300_v54 }
 0x705   :  { %3792 = vmatpush.bf16.msrb.mxu0 %v9303_v32  ;;  %3818 = vmatpush.bf16.msrb.mxu2 %v9306_v25  ;;  %v9397_v32 = vperm.slane %v3246_v47, 1 }
 0x707   :  { %3804 = vmatpush.bf16.msrb.mxu1 %v9309_v11  ;;  %3830 = vmatpush.bf16.msrb.mxu3 %v9312_v7 }
 0x70b   :  { %3805 = vmatpush.bf16.msrb.mxu1 %v9318_v34  ;;  %3831 = vmatpush.bf16.msrb.mxu3 %v9320_v8 }
 0x765   :  { %v3684_v21 = vpop.f32.mrf.mxu0 }
 0x766   :  { %v3685_v31 = vadd.f32 %v3684_v21, %v9394_v23 }
 0x76b   :  { %v3697_v52 = vpop.f32.mrf.mxu1  ;;  %v3710_v54 = vpop.f32.mrf.mxu2 }
 0x76c   :  { %v3698_v13 = vadd.f32 %v3697_v52, %v3685_v31  ;;  %v3711_v11 = vadd.f32 %v3710_v54, %v9397_v32  ;;  %v9975_v54 = vld [vmem:[#allocation16_spill] sm:$0xff] }
 0x76d   :  { %v3686_v25 = vpop.f32.mrf.mxu0 }
 0x76e   :  { %v3727_v41 = vpack.c.bf16 %v3698_v13, %v3698_v13  ;;  %v9976_v25 = vld [vmem:[#allocation17_spill] sm:$0xff] }
 0x770   :  { %3737 = vmatmul.bf16.vlgmr.msra.gmra.mxu0 %v3727_v41  ;;  %3763 = vmatmul.bf16.vlgmr.msra.gmra.mxu2 %v3727_v41 }
 0x771   :  { %v3723_v34 = vpop.f32.mrf.mxu3  ;;  %3841 = vmatpush.bf16.msra.mxu0 %v9118_v53  ;;  %3867 = vmatpush.bf16.msra.mxu2 %v9142_v30 }
 0x772   :  { %v3724_v8 = vadd.f32 %v3723_v34, %v3711_v11  ;;  %v9974_v11 = vld [vmem:[#allocation20_spill] sm:$0xff]  ;;  %v9978_v34 = vld [vmem:[#allocation25_spill] sm:$0xff] }
 0x773   :  { %v3699_v7 = vpop.f32.mrf.mxu1  ;;  %v3712_v1 = vpop.f32.mrf.mxu2 }
 0x774   :  { %v3728_v21 = vpack.c.bf16 %v3724_v8, %v3724_v8  ;;  %v9977_v7 = vld [vmem:[#allocation23_spill] sm:$0xff] }
 0x775   :  { %3842 = vmatpush.bf16.msra.mxu0 %v9124_v58  ;;  %3868 = vmatpush.bf16.msra.mxu2 %v9148_v14 }
 0x776   :  { %3750 = vmatmul.bf16.vlgmr.msra.gmra.mxu1 %v3728_v21  ;;  %3776 = vmatmul.bf16.vlgmr.msra.gmra.mxu3 %v3728_v21 }
 0x777   :  { %3854 = vmatpush.bf16.msra.mxu1 %v9113_v42  ;;  %3880 = vmatpush.bf16.msra.mxu3 %v9137_v9 }
 0x779   :  { %v3725_v31 = vpop.f32.mrf.mxu3  ;;  %3843 = vmatpush.bf16.msra.mxu0 %v9131_v3  ;;  %3869 = vmatpush.bf16.msra.mxu2 %v9154_v45 }
 0x77b   :  { %3855 = vmatpush.bf16.msra.mxu1 %v9116_v24  ;;  %3881 = vmatpush.bf16.msra.mxu3 %v9140_v26 }
 0x77d   :  { %3844 = vmatpush.bf16.msra.mxu0 %v9166_v55  ;;  %3870 = vmatpush.bf16.msra.mxu2 %v9168_v6 }
 0x77f   :  { %3856 = vmatpush.bf16.msra.mxu1 %v9122_v57  ;;  %3882 = vmatpush.bf16.msra.mxu3 %v9145_v36 }
 0x781   :  { %3845 = vmatpush.bf16.msra.mxu0 %v9176_v2  ;;  %3871 = vmatpush.bf16.msra.mxu2 %v9974_v11 }
 0x783   :  { %3857 = vmatpush.bf16.msra.mxu1 %v9975_v54  ;;  %3883 = vmatpush.bf16.msra.mxu3 %v9976_v25 }
 0x785   :  { %3846 = vmatpush.bf16.msra.mxu0 %v9189_v18  ;;  %3872 = vmatpush.bf16.msra.mxu2 %v9977_v7 }
 0x787   :  { %3858 = vmatpush.bf16.msra.mxu1 %v9133_v5  ;;  %3884 = vmatpush.bf16.msra.mxu3 %v9157_v46 }
 0x789   :  { %3847 = vmatpush.bf16.msra.mxu0 %v9978_v34  ;;  %3873 = vmatpush.bf16.msra.mxu2 %v9204_v37 }
 0x78b   :  { %3859 = vmatpush.bf16.msra.mxu1 %v9171_v62  ;;  %3885 = vmatpush.bf16.msra.mxu3 %v9174_v50 }
 0x78d   :  { %3848 = vmatpush.bf16.msra.mxu0 %v9208_v43  ;;  %3874 = vmatpush.bf16.msra.mxu2 %v9210_v48 }
 0x78f   :  { %3860 = vmatpush.bf16.msra.mxu1 %v9183_v12  ;;  %3886 = vmatpush.bf16.msra.mxu3 %v9186_v16 }
 0x793   :  { %3861 = vmatpush.bf16.msra.mxu1 %v9195_v63  ;;  %3887 = vmatpush.bf16.msra.mxu3 %v9198_v28 }
 0x7ed   :  { %v3738_v8 = vpop.f32.mrf.mxu0 }
 0x7ee   :  { %v3739_v1 = vadd.f32 %v3738_v8, %v9344_v44 }
 0x7f3   :  { %v3751_v41 = vpop.f32.mrf.mxu1  ;;  %v3764_v13 = vpop.f32.mrf.mxu2 }
 0x7f4   :  { %v3752_v52 = vadd.f32 %v3751_v41, %v3739_v1  ;;  %v3765_v43 = vadd.f32 %v3764_v13, %v9354_v10  ;;  %v9985_v41 = vld [vmem:[#allocation41_spill] sm:$0xff]  ;;  %v9986_v13 = vld [vmem:[#allocation42_spill] sm:$0xff] }
 0x7f5   :  { %v3740_v47 = vpop.f32.mrf.mxu0 }
 0x7f6   :  { %v3781_v21 = vmax.f32 %v3752_v52, 0.0  ;;  %v9987_v52 = vld [vmem:[#allocation43_spill] sm:$0xff]  ;;  %v9988_v47 = vld [vmem:[#allocation44_spill] sm:$0xff] }
 0x7f8   :  { %v3783_v31 = vpack.c.bf16 %v3781_v21, %v3781_v21  ;;  %v9989_v21 = vld [vmem:[#allocation45_spill] sm:$0xff] }
 0x7f9   :  { %v3777_v48 = vpop.f32.mrf.mxu3 }
 0x7fa   :  { %v3778_v50 = vadd.f32 %v3777_v48, %v3765_v43  ;;  %3793 = vmatmul.bf16.vlgmr.msrb.gmra.mxu0 %v3783_v31  ;;  %3819 = vmatmul.bf16.vlgmr.msrb.gmra.mxu2 %v3783_v31  ;;  %v9983_v43 = vld [vmem:[#allocation39_spill] sm:$0xff]  ;;  %v9984_v48 = vld [vmem:[#allocation40_spill] sm:$0xff]  ;;  %v9990_v31 = vld [vmem:[#allocation46_spill] sm:$0xff] }
 0x7fb   :  { %v3753_v16 = vpop.f32.mrf.mxu1  ;;  %v3766_v12 = vpop.f32.mrf.mxu2  ;;  %3897 = vmatpush.bf16.msrb.mxu0 %v9214_v56  ;;  %3923 = vmatpush.bf16.msrb.mxu2 %v9216_v60 }
 0x7fc   :  { %v3782_v28 = vmax.f32 %v3778_v50, 0.0  ;;  %v9979_v50 = vld [vmem:[#allocation35_spill] sm:$0xff]  ;;  %v9980_v12 = vld [vmem:[#allocation36_spill] sm:$0xff]  ;;  %v9981_v16 = vld [vmem:[#allocation37_spill] sm:$0xff] }
 0x7fe   :  { %v3784_v8 = vpack.c.bf16 %v3782_v28, %v3782_v28  ;;  %v9982_v28 = vld [vmem:[#allocation38_spill] sm:$0xff] }
 0x7ff   :  { %3898 = vmatpush.bf16.msrb.mxu0 %v9220_v4  ;;  %3924 = vmatpush.bf16.msrb.mxu2 %v9222_v27 }
 0x800   :  { %3806 = vmatmul.bf16.vlgmr.msrb.gmra.mxu1 %v3784_v8  ;;  %3832 = vmatmul.bf16.vlgmr.msrb.gmra.mxu3 %v3784_v8 }
 0x801   :  { %v3779_v1 = vpop.f32.mrf.mxu3  ;;  %3910 = vmatpush.bf16.msrb.mxu1 %v9225_v19  ;;  %3936 = vmatpush.bf16.msrb.mxu3 %v9227_v20 }
 0x803   :  { %3899 = vmatpush.bf16.msrb.mxu0 %v9230_v33  ;;  %3925 = vmatpush.bf16.msrb.mxu2 %v9234_v35 }
 0x805   :  { %3911 = vmatpush.bf16.msrb.mxu1 %v9236_v38  ;;  %3937 = vmatpush.bf16.msrb.mxu3 %v9238_v51 }
 0x807   :  { %3900 = vmatpush.bf16.msrb.mxu0 %v9242_v61  ;;  %3926 = vmatpush.bf16.msrb.mxu2 %v9246_v15 }
 0x809   :  { %3912 = vmatpush.bf16.msrb.mxu1 %v9248_v17  ;;  %3938 = vmatpush.bf16.msrb.mxu3 %v9250_v29 }
 0x80b   :  { %3901 = vmatpush.bf16.msrb.mxu0 %v9268_v39  ;;  %3927 = vmatpush.bf16.msrb.mxu2 %v9966_v49 }
 0x80d   :  { %3913 = vmatpush.bf16.msrb.mxu1 %v9273_v59  ;;  %3939 = vmatpush.bf16.msrb.mxu3 %v9967_v22 }
 0x80f   :  { %3902 = vmatpush.bf16.msrb.mxu0 %v9968_v0  ;;  %3928 = vmatpush.bf16.msrb.mxu2 %v9969_v40 }
 0x811   :  { %3914 = vmatpush.bf16.msrb.mxu1 %v9979_v50  ;;  %3940 = vmatpush.bf16.msrb.mxu3 %v9980_v12 }
 0x813   :  { %3903 = vmatpush.bf16.msrb.mxu0 %v9981_v16  ;;  %3929 = vmatpush.bf16.msrb.mxu2 %v9982_v28 }
 0x815   :  { %3915 = vmatpush.bf16.msrb.mxu1 %v9983_v43  ;;  %3941 = vmatpush.bf16.msrb.mxu3 %v9984_v48  ;;  %v9991_v48 = vld [vmem:[#allocation30_spill] sm:$0xff] }
 0x817   :  { %3904 = vmatpush.bf16.msrb.mxu0 %v9985_v41  ;;  %3930 = vmatpush.bf16.msrb.mxu2 %v9986_v13 }
 0x819   :  { %3916 = vmatpush.bf16.msrb.mxu1 %v9987_v52  ;;  %3942 = vmatpush.bf16.msrb.mxu3 %v9988_v47 }
 0x81d   :  { %3917 = vmatpush.bf16.msrb.mxu1 %v9989_v21  ;;  %3943 = vmatpush.bf16.msrb.mxu3 %v9990_v31 }
 0x877   :  { %v3794_v8 = vpop.f32.mrf.mxu0 }
 0x878   :  { %v3795_v1 = vadd.f32 %v3794_v8, %v9394_v23 }
 0x87d   :  { %v3807_v28 = vpop.f32.mrf.mxu1  ;;  %v3820_v16 = vpop.f32.mrf.mxu2 }
 0x87e   :  { %v3808_v43 = vadd.f32 %v3807_v28, %v3795_v1  ;;  %v3821_v52 = vadd.f32 %v3820_v16, %v9397_v32  ;;  %v9993_v28 = vld [vmem:[#allocation29_spill] sm:$0xff] }
 0x87f   :  { %v3796_v12 = vpop.f32.mrf.mxu0 }
 0x880   :  { %v9468_v50 = vadd.f32 %v3808_v43, %v9991_v48  ;;  %v9995_v48 = vld [vmem:[#allocation19_spill] sm:$0xff] }
 0x882   :  { %9992 = vst [vmem:[#allocation31_spill] sm:$0xff] %v9468_v50  ;;  %v3839_v13 = vpack.c.bf16 %v9468_v50, %v9468_v50 }
 0x883   :  { %v3833_v47 = vpop.f32.mrf.mxu3 }
 0x884   :  { %v3834_v41 = vadd.f32 %v3833_v47, %v3821_v52  ;;  %3849 = vmatmul.bf16.vlgmr.msra.gmra.mxu0 %v3839_v13  ;;  %3875 = vmatmul.bf16.vlgmr.msra.gmra.mxu2 %v3839_v13  ;;  %v9997_v13 = vld [vmem:[#allocation28_spill] sm:$0xff]  ;;  %v9998_v52 = vld [vmem:[#allocation21_spill] sm:$0xff]  ;;  %v9999_v47 = vld [vmem:[#allocation22_spill] sm:$0xff] }
 0x885   :  { %v3809_v31 = vpop.f32.mrf.mxu1  ;;  %v3822_v21 = vpop.f32.mrf.mxu2  ;;  %3951 = vmatpush.bf16.msra.mxu0 %v9118_v53  ;;  %3977 = vmatpush.bf16.msra.mxu2 %v9142_v30 }
 0x886   :  { %v9476_v12 = vadd.f32 %v3834_v41, %v9993_v28  ;;  %v9996_v41 = vld [vmem:[#allocation27_spill] sm:$0xff]  ;;  %v10000_v21 = vld [vmem:[#allocation24_spill] sm:$0xff] }
 0x888   :  { %9994 = vst [vmem:[#allocation32_spill] sm:$0xff] %v9476_v12  ;;  %v3840_v43 = vpack.c.bf16 %v9476_v12, %v9476_v12 }
 0x889   :  { %3952 = vmatpush.bf16.msra.mxu0 %v9124_v58  ;;  %3978 = vmatpush.bf16.msra.mxu2 %v9148_v14 }
 0x88a   :  { %3862 = vmatmul.bf16.vlgmr.msra.gmra.mxu1 %v3840_v43  ;;  %3888 = vmatmul.bf16.vlgmr.msra.gmra.mxu3 %v3840_v43 }
 0x88b   :  { %v3835_v16 = vpop.f32.mrf.mxu3  ;;  %3964 = vmatpush.bf16.msra.mxu1 %v9113_v42  ;;  %3990 = vmatpush.bf16.msra.mxu3 %v9137_v9 }
 0x88d   :  { %3953 = vmatpush.bf16.msra.mxu0 %v9131_v3  ;;  %3979 = vmatpush.bf16.msra.mxu2 %v9154_v45 }
 0x88f   :  { %3965 = vmatpush.bf16.msra.mxu1 %v9116_v24  ;;  %3991 = vmatpush.bf16.msra.mxu3 %v9140_v26 }
 0x891   :  { %3954 = vmatpush.bf16.msra.mxu0 %v9166_v55  ;;  %3980 = vmatpush.bf16.msra.mxu2 %v9168_v6 }
 0x893   :  { %3966 = vmatpush.bf16.msra.mxu1 %v9122_v57  ;;  %3992 = vmatpush.bf16.msra.mxu3 %v9145_v36 }
 0x895   :  { %3955 = vmatpush.bf16.msra.mxu0 %v9176_v2  ;;  %3981 = vmatpush.bf16.msra.mxu2 %v9974_v11 }
 0x897   :  { %3967 = vmatpush.bf16.msra.mxu1 %v9975_v54  ;;  %3993 = vmatpush.bf16.msra.mxu3 %v9976_v25 }
 0x899   :  { %3956 = vmatpush.bf16.msra.mxu0 %v9189_v18  ;;  %3982 = vmatpush.bf16.msra.mxu2 %v9977_v7 }
 0x89b   :  { %3968 = vmatpush.bf16.msra.mxu1 %v9133_v5  ;;  %3994 = vmatpush.bf16.msra.mxu3 %v9157_v46 }
 0x89d   :  { %3957 = vmatpush.bf16.msra.mxu0 %v9978_v34  ;;  %3983 = vmatpush.bf16.msra.mxu2 %v9204_v37 }
 0x89f   :  { %3969 = vmatpush.bf16.msra.mxu1 %v9171_v62  ;;  %3995 = vmatpush.bf16.msra.mxu3 %v9995_v48 }
 0x8a1   :  { %3958 = vmatpush.bf16.msra.mxu0 %v9996_v41  ;;  %3984 = vmatpush.bf16.msra.mxu2 %v9997_v13 }
 0x8a3   :  { %3970 = vmatpush.bf16.msra.mxu1 %v9998_v52  ;;  %3996 = vmatpush.bf16.msra.mxu3 %v9999_v47 }
 0x8a7   :  { %3971 = vmatpush.bf16.msra.mxu1 %v9195_v63  ;;  %3997 = vmatpush.bf16.msra.mxu3 %v10000_v21 }
 0x901   :  { %v3850_v31 = vpop.f32.mrf.mxu0 }
 0x902   :  { %v3851_v8 = vadd.f32 %v3850_v31, %v9344_v44 }
 0x907   :  { %v3863_v1 = vpop.f32.mrf.mxu1  ;;  %v3876_v28 = vpop.f32.mrf.mxu2 }
 0x908   :  { %v3864_v43 = vadd.f32 %v3863_v1, %v3851_v8  ;;  %v3877_v41 = vadd.f32 %v3876_v28, %v9354_v10  ;;  %v10008_v8 = vld [vmem:[#allocation42_spill] sm:$0xff]  ;;  %v10009_v1 = vld [vmem:[#allocation43_spill] sm:$0xff]  ;;  %v10010_v28 = vld [vmem:[#allocation44_spill] sm:$0xff] }
 0x909   :  { %v3852_v16 = vpop.f32.mrf.mxu0 }
 0x90a   :  { %v3893_v12 = vmax.f32 %v3864_v43, 0.0  ;;  %v10011_v43 = vld [vmem:[#allocation45_spill] sm:$0xff]  ;;  %v10012_v16 = vld [vmem:[#allocation46_spill] sm:$0xff] }
 0x90c   :  { %v3895_v50 = vpack.c.bf16 %v3893_v12, %v3893_v12 }
 0x90d   :  { %v3889_v13 = vpop.f32.mrf.mxu3 }
 0x90e   :  { %v3890_v48 = vadd.f32 %v3889_v13, %v3877_v41  ;;  %3905 = vmatmul.bf16.vlgmr.msrb.gmra.mxu0 %v3895_v50  ;;  %3931 = vmatmul.bf16.vlgmr.msrb.gmra.mxu2 %v3895_v50  ;;  %v10001_v50 = vld [vmem:[#allocation35_spill] sm:$0xff]  ;;  %v10003_v41 = vld [vmem:[#allocation37_spill] sm:$0xff]  ;;  %v10004_v13 = vld [vmem:[#allocation38_spill] sm:$0xff] }
 0x90f   :  { %v3865_v47 = vpop.f32.mrf.mxu1  ;;  %v3878_v52 = vpop.f32.mrf.mxu2  ;;  %4007 = vmatpush.bf16.msrb.mxu0 %v9214_v56  ;;  %4033 = vmatpush.bf16.msrb.mxu2 %v9216_v60 }
 0x910   :  { %v3894_v21 = vmax.f32 %v3890_v48, 0.0  ;;  %v10002_v48 = vld [vmem:[#allocation36_spill] sm:$0xff]  ;;  %v10005_v52 = vld [vmem:[#allocation39_spill] sm:$0xff] }
 0x911   :  { %v10006_v47 = vld [vmem:[#allocation40_spill] sm:$0xff] }
 0x912   :  { %v3896_v31 = vpack.c.bf16 %v3894_v21, %v3894_v21  ;;  %v10007_v21 = vld [vmem:[#allocation41_spill] sm:$0xff] }
 0x913   :  { %4008 = vmatpush.bf16.msrb.mxu0 %v9220_v4  ;;  %4034 = vmatpush.bf16.msrb.mxu2 %v9222_v27 }
 0x914   :  { %3918 = vmatmul.bf16.vlgmr.msrb.gmra.mxu1 %v3896_v31  ;;  %3944 = vmatmul.bf16.vlgmr.msrb.gmra.mxu3 %v3896_v31 }
 0x915   :  { %v3891_v12 = vpop.f32.mrf.mxu3  ;;  %4020 = vmatpush.bf16.msrb.mxu1 %v9225_v19  ;;  %4046 = vmatpush.bf16.msrb.mxu3 %v9227_v20 }
 0x917   :  { %4009 = vmatpush.bf16.msrb.mxu0 %v9230_v33  ;;  %4035 = vmatpush.bf16.msrb.mxu2 %v9234_v35 }
 0x919   :  { %4021 = vmatpush.bf16.msrb.mxu1 %v9236_v38  ;;  %4047 = vmatpush.bf16.msrb.mxu3 %v9238_v51 }
 0x91b   :  { %4010 = vmatpush.bf16.msrb.mxu0 %v9242_v61  ;;  %4036 = vmatpush.bf16.msrb.mxu2 %v9246_v15 }
 0x91d   :  { %4022 = vmatpush.bf16.msrb.mxu1 %v9248_v17  ;;  %4048 = vmatpush.bf16.msrb.mxu3 %v9250_v29 }
 0x91f   :  { %4011 = vmatpush.bf16.msrb.mxu0 %v9268_v39  ;;  %4037 = vmatpush.bf16.msrb.mxu2 %v9966_v49 }
 0x921   :  { %4023 = vmatpush.bf16.msrb.mxu1 %v9273_v59  ;;  %4049 = vmatpush.bf16.msrb.mxu3 %v9967_v22 }
 0x923   :  { %4012 = vmatpush.bf16.msrb.mxu0 %v9968_v0  ;;  %4038 = vmatpush.bf16.msrb.mxu2 %v9969_v40 }
 0x925   :  { %4024 = vmatpush.bf16.msrb.mxu1 %v10001_v50  ;;  %4050 = vmatpush.bf16.msrb.mxu3 %v10002_v48 }
 0x927   :  { %4013 = vmatpush.bf16.msrb.mxu0 %v10003_v41  ;;  %4039 = vmatpush.bf16.msrb.mxu2 %v10004_v13 }
 0x929   :  { %4025 = vmatpush.bf16.msrb.mxu1 %v10005_v52  ;;  %4051 = vmatpush.bf16.msrb.mxu3 %v10006_v47 }
 0x92b   :  { %4014 = vmatpush.bf16.msrb.mxu0 %v10007_v21  ;;  %4040 = vmatpush.bf16.msrb.mxu2 %v10008_v8 }
 0x92d   :  { %4026 = vmatpush.bf16.msrb.mxu1 %v10009_v1  ;;  %4052 = vmatpush.bf16.msrb.mxu3 %v10010_v28 }
 0x931   :  { %4027 = vmatpush.bf16.msrb.mxu1 %v10011_v43  ;;  %4053 = vmatpush.bf16.msrb.mxu3 %v10012_v16 }
 0x98b   :  { %v3906_v31 = vpop.f32.mrf.mxu0 }
 0x98c   :  { %v3907_v12 = vadd.f32 %v3906_v31, %v9394_v23 }
 0x991   :  { %v3919_v13 = vpop.f32.mrf.mxu1  ;;  %v3932_v41 = vpop.f32.mrf.mxu2 }
 0x992   :  { %v3920_v52 = vadd.f32 %v3919_v13, %v3907_v12  ;;  %v3933_v21 = vadd.f32 %v3932_v41, %v9397_v32  ;;  %v10013_v41 = vld [vmem:[#allocation19_spill] sm:$0xff] }
 0x993   :  { %v3908_v48 = vpop.f32.mrf.mxu0  ;;  %v10014_v13 = vld [vmem:[#allocation27_spill] sm:$0xff] }
 0x994   :  { %v3949_v47 = vpack.c.bf16 %v3920_v52, %v3920_v52  ;;  %v10015_v52 = vld [vmem:[#allocation28_spill] sm:$0xff] }
 0x996   :  { %3959 = vmatmul.bf16.vlgmr.msra.gmra.mxu0 %v3949_v47  ;;  %3985 = vmatmul.bf16.vlgmr.msra.gmra.mxu2 %v3949_v47  ;;  %v10016_v47 = vld [vmem:[#allocation21_spill] sm:$0xff] }
 0x997   :  { %v3945_v8 = vpop.f32.mrf.mxu3  ;;  %4063 = vmatpush.bf16.msra.mxu0 %v9118_v53  ;;  %4089 = vmatpush.bf16.msra.mxu2 %v9142_v30 }
 0x998   :  { %v3946_v43 = vadd.f32 %v3945_v8, %v3933_v21  ;;  %v10017_v21 = vld [vmem:[#allocation22_spill] sm:$0xff]  ;;  %v10018_v8 = vld [vmem:[#allocation24_spill] sm:$0xff] }
 0x999   :  { %v3921_v28 = vpop.f32.mrf.mxu1  ;;  %v3934_v16 = vpop.f32.mrf.mxu2 }
 0x99a   :  { %v3950_v1 = vpack.c.bf16 %v3946_v43, %v3946_v43 }
 0x99b   :  { %4064 = vmatpush.bf16.msra.mxu0 %v9124_v58  ;;  %4090 = vmatpush.bf16.msra.mxu2 %v9148_v14 }
 0x99c   :  { %3972 = vmatmul.bf16.vlgmr.msra.gmra.mxu1 %v3950_v1  ;;  %3998 = vmatmul.bf16.vlgmr.msra.gmra.mxu3 %v3950_v1 }
 0x99d   :  { %4076 = vmatpush.bf16.msra.mxu1 %v9113_v42  ;;  %4102 = vmatpush.bf16.msra.mxu3 %v9137_v9 }
 0x99f   :  { %v3947_v48 = vpop.f32.mrf.mxu3  ;;  %4065 = vmatpush.bf16.msra.mxu0 %v9131_v3  ;;  %4091 = vmatpush.bf16.msra.mxu2 %v9154_v45 }
 0x9a1   :  { %4077 = vmatpush.bf16.msra.mxu1 %v9116_v24  ;;  %4103 = vmatpush.bf16.msra.mxu3 %v9140_v26 }
 0x9a3   :  { %4066 = vmatpush.bf16.msra.mxu0 %v9166_v55  ;;  %4092 = vmatpush.bf16.msra.mxu2 %v9168_v6 }
 0x9a5   :  { %4078 = vmatpush.bf16.msra.mxu1 %v9122_v57  ;;  %4104 = vmatpush.bf16.msra.mxu3 %v9145_v36 }
 0x9a7   :  { %4067 = vmatpush.bf16.msra.mxu0 %v9176_v2  ;;  %4093 = vmatpush.bf16.msra.mxu2 %v9974_v11 }
 0x9a9   :  { %4079 = vmatpush.bf16.msra.mxu1 %v9975_v54  ;;  %4105 = vmatpush.bf16.msra.mxu3 %v9976_v25 }
 0x9ab   :  { %4068 = vmatpush.bf16.msra.mxu0 %v9189_v18  ;;  %4094 = vmatpush.bf16.msra.mxu2 %v9977_v7 }
 0x9ad   :  { %4080 = vmatpush.bf16.msra.mxu1 %v9133_v5  ;;  %4106 = vmatpush.bf16.msra.mxu3 %v9157_v46 }
 0x9af   :  { %4069 = vmatpush.bf16.msra.mxu0 %v9978_v34  ;;  %4095 = vmatpush.bf16.msra.mxu2 %v9204_v37 }
 0x9b1   :  { %4081 = vmatpush.bf16.msra.mxu1 %v9171_v62  ;;  %4107 = vmatpush.bf16.msra.mxu3 %v10013_v41 }
 0x9b3   :  { %4070 = vmatpush.bf16.msra.mxu0 %v10014_v13  ;;  %4096 = vmatpush.bf16.msra.mxu2 %v10015_v52 }
 0x9b5   :  { %4082 = vmatpush.bf16.msra.mxu1 %v10016_v47  ;;  %4108 = vmatpush.bf16.msra.mxu3 %v10017_v21 }
 0x9b9   :  { %4083 = vmatpush.bf16.msra.mxu1 %v9195_v63  ;;  %4109 = vmatpush.bf16.msra.mxu3 %v10018_v8 }
 0xa13   :  { %v3960_v1 = vpop.f32.mrf.mxu0 }
 0xa14   :  { %v3961_v28 = vadd.f32 %v3960_v1, %v9344_v44 }
 0xa19   :  { %v3973_v43 = vpop.f32.mrf.mxu1  ;;  %v3986_v16 = vpop.f32.mrf.mxu2 }
 0xa1a   :  { %v3974_v31 = vadd.f32 %v3973_v43, %v3961_v28  ;;  %v3987_v13 = vadd.f32 %v3986_v16, %v9354_v10  ;;  %v10026_v43 = vld [vmem:[#allocation43_spill] sm:$0xff]  ;;  %v10027_v16 = vld [vmem:[#allocation44_spill] sm:$0xff] }
 0xa1b   :  { %v3962_v12 = vpop.f32.mrf.mxu0 }
 0xa1c   :  { %v4003_v48 = vmax.f32 %v3974_v31, 0.0  ;;  %v10028_v31 = vld [vmem:[#allocation45_spill] sm:$0xff]  ;;  %v10029_v12 = vld [vmem:[#allocation46_spill] sm:$0xff] }
 0xa1e   :  { %v4005_v41 = vpack.c.bf16 %v4003_v48, %v4003_v48 }
 0xa1f   :  { %v3999_v52 = vpop.f32.mrf.mxu3 }
 0xa20   :  { %v4000_v62 = vadd.f32 %v3999_v52, %v3987_v13  ;;  %4015 = vmatmul.bf16.vlgmr.msrb.gmra.mxu0 %v4005_v41  ;;  %4041 = vmatmul.bf16.vlgmr.msrb.gmra.mxu2 %v4005_v41  ;;  %v10020_v41 = vld [vmem:[#allocation37_spill] sm:$0xff]  ;;  %v10021_v13 = vld [vmem:[#allocation38_spill] sm:$0xff]  ;;  %v10022_v52 = vld [vmem:[#allocation39_spill] sm:$0xff] }
 0xa21   :  { %v3975_v21 = vpop.f32.mrf.mxu1  ;;  %v3988_v47 = vpop.f32.mrf.mxu2  ;;  %4119 = vmatpush.bf16.msrb.mxu0 %v9214_v56  ;;  %4145 = vmatpush.bf16.msrb.mxu2 %v9216_v60 }
 0xa22   :  { %v4004_v8 = vmax.f32 %v4000_v62, 0.0  ;;  %v10019_v62 = vld [vmem:[#allocation36_spill] sm:$0xff]  ;;  %v10024_v21 = vld [vmem:[#allocation41_spill] sm:$0xff] }
 0xa23   :  { %v10023_v47 = vld [vmem:[#allocation40_spill] sm:$0xff] }
 0xa24   :  { %v4006_v1 = vpack.c.bf16 %v4004_v8, %v4004_v8  ;;  %v10025_v8 = vld [vmem:[#allocation42_spill] sm:$0xff] }
 0xa25   :  { %4120 = vmatpush.bf16.msrb.mxu0 %v9220_v4  ;;  %4146 = vmatpush.bf16.msrb.mxu2 %v9222_v27 }
 0xa26   :  { %4028 = vmatmul.bf16.vlgmr.msrb.gmra.mxu1 %v4006_v1  ;;  %4054 = vmatmul.bf16.vlgmr.msrb.gmra.mxu3 %v4006_v1 }
 0xa27   :  { %v4001_v28 = vpop.f32.mrf.mxu3  ;;  %4132 = vmatpush.bf16.msrb.mxu1 %v9225_v19  ;;  %4158 = vmatpush.bf16.msrb.mxu3 %v9227_v20 }
 0xa29   :  { %4121 = vmatpush.bf16.msrb.mxu0 %v9230_v33  ;;  %4147 = vmatpush.bf16.msrb.mxu2 %v9234_v35 }
 0xa2b   :  { %4133 = vmatpush.bf16.msrb.mxu1 %v9236_v38  ;;  %4159 = vmatpush.bf16.msrb.mxu3 %v9238_v51 }
 0xa2d   :  { %4122 = vmatpush.bf16.msrb.mxu0 %v9242_v61  ;;  %4148 = vmatpush.bf16.msrb.mxu2 %v9246_v15 }
 0xa2f   :  { %4134 = vmatpush.bf16.msrb.mxu1 %v9248_v17  ;;  %4160 = vmatpush.bf16.msrb.mxu3 %v9250_v29 }
 0xa31   :  { %4123 = vmatpush.bf16.msrb.mxu0 %v9268_v39  ;;  %4149 = vmatpush.bf16.msrb.mxu2 %v9966_v49 }
 0xa33   :  { %4135 = vmatpush.bf16.msrb.mxu1 %v9273_v59  ;;  %4161 = vmatpush.bf16.msrb.mxu3 %v9967_v22 }
 0xa35   :  { %4124 = vmatpush.bf16.msrb.mxu0 %v9968_v0  ;;  %4150 = vmatpush.bf16.msrb.mxu2 %v9969_v40 }
 0xa37   :  { %4136 = vmatpush.bf16.msrb.mxu1 %v10001_v50  ;;  %4162 = vmatpush.bf16.msrb.mxu3 %v10019_v62 }
 0xa39   :  { %4125 = vmatpush.bf16.msrb.mxu0 %v10020_v41  ;;  %4151 = vmatpush.bf16.msrb.mxu2 %v10021_v13 }
 0xa3b   :  { %4137 = vmatpush.bf16.msrb.mxu1 %v10022_v52  ;;  %4163 = vmatpush.bf16.msrb.mxu3 %v10023_v47  ;;  %v10030_v47 = vld [vmem:[#allocation31_spill] sm:$0xff] }
 0xa3d   :  { %4126 = vmatpush.bf16.msrb.mxu0 %v10024_v21  ;;  %4152 = vmatpush.bf16.msrb.mxu2 %v10025_v8 }
 0xa3f   :  { %4138 = vmatpush.bf16.msrb.mxu1 %v10026_v43  ;;  %4164 = vmatpush.bf16.msrb.mxu3 %v10027_v16 }
 0xa43   :  { %4139 = vmatpush.bf16.msrb.mxu1 %v10028_v31  ;;  %4165 = vmatpush.bf16.msrb.mxu3 %v10029_v12 }
 0xa9d   :  { %v4016_v48 = vpop.f32.mrf.mxu0 }
 0xa9e   :  { %v4017_v1 = vadd.f32 %v4016_v48, %v9394_v23  ;;  %v10032_v48 = vld [vmem:[#allocation32_spill] sm:$0xff] }
 0xaa3   :  { %v4029_v28 = vpop.f32.mrf.mxu1  ;;  %v4042_v13 = vpop.f32.mrf.mxu2 }
 0xaa4   :  { %v4030_v52 = vadd.f32 %v4029_v28, %v4017_v1  ;;  %v4043_v43 = vadd.f32 %v4042_v13, %v9397_v32 }
 0xaa5   :  { %v4018_v41 = vpop.f32.mrf.mxu0 }
 0xaa6   :  { %v9614_v62 = vadd.f32 %v4030_v52, %v10030_v47  ;;  %v10034_v47 = vld [vmem:[#allocation18_spill] sm:$0xff] }
 0xaa8   :  { %10031 = vst [vmem:[#allocation33_spill] sm:$0xff] %v9614_v62  ;;  %v4061_v8 = vpack.c.bf16 %v9614_v62, %v9614_v62 }
 0xaa9   :  { %v4055_v16 = vpop.f32.mrf.mxu3 }
 0xaaa   :  { %v4056_v21 = vadd.f32 %v4055_v16, %v4043_v43  ;;  %4071 = vmatmul.bf16.vlgmr.msra.gmra.mxu0 %v4061_v8  ;;  %4097 = vmatmul.bf16.vlgmr.msra.gmra.mxu2 %v4061_v8  ;;  %v10036_v8 = vld [vmem:[#allocation27_spill] sm:$0xff]  ;;  %v10037_v43 = vld [vmem:[#allocation28_spill] sm:$0xff]  ;;  %v10038_v16 = vld [vmem:[#allocation21_spill] sm:$0xff] }
 0xaab   :  { %v4031_v12 = vpop.f32.mrf.mxu1  ;;  %v4044_v31 = vpop.f32.mrf.mxu2  ;;  %4173 = vmatpush.bf16.msra.mxu0 %v9118_v53  ;;  %4199 = vmatpush.bf16.msra.mxu2 %v9142_v30 }
 0xaac   :  { %v9622_v41 = vadd.f32 %v4056_v21, %v10032_v48  ;;  %v10035_v21 = vld [vmem:[#allocation19_spill] sm:$0xff]  ;;  %v10039_v31 = vld [vmem:[#allocation22_spill] sm:$0xff]  ;;  %v10040_v12 = vld [vmem:[#allocation24_spill] sm:$0xff] }
 0xaae   :  { %10033 = vst [vmem:[#allocation34_spill] sm:$0xff] %v9622_v41  ;;  %v4062_v52 = vpack.c.bf16 %v9622_v41, %v9622_v41 }
 0xaaf   :  { %4174 = vmatpush.bf16.msra.mxu0 %v9124_v58  ;;  %4200 = vmatpush.bf16.msra.mxu2 %v9148_v14 }
 0xab0   :  { %4084 = vmatmul.bf16.vlgmr.msra.gmra.mxu1 %v4062_v52  ;;  %4110 = vmatmul.bf16.vlgmr.msra.gmra.mxu3 %v4062_v52 }
 0xab1   :  { %v4057_v13 = vpop.f32.mrf.mxu3  ;;  %4186 = vmatpush.bf16.msra.mxu1 %v9113_v42  ;;  %4212 = vmatpush.bf16.msra.mxu3 %v9137_v9 }
 0xab3   :  { %4175 = vmatpush.bf16.msra.mxu0 %v9131_v3  ;;  %4201 = vmatpush.bf16.msra.mxu2 %v9154_v45 }
 0xab5   :  { %4187 = vmatpush.bf16.msra.mxu1 %v9116_v24  ;;  %4213 = vmatpush.bf16.msra.mxu3 %v9140_v26 }
 0xab7   :  { %4176 = vmatpush.bf16.msra.mxu0 %v9166_v55  ;;  %4202 = vmatpush.bf16.msra.mxu2 %v9168_v6 }
 0xab9   :  { %4188 = vmatpush.bf16.msra.mxu1 %v9122_v57  ;;  %4214 = vmatpush.bf16.msra.mxu3 %v9145_v36 }
 0xabb   :  { %4177 = vmatpush.bf16.msra.mxu0 %v9176_v2  ;;  %4203 = vmatpush.bf16.msra.mxu2 %v9974_v11 }
 0xabd   :  { %4189 = vmatpush.bf16.msra.mxu1 %v9975_v54  ;;  %4215 = vmatpush.bf16.msra.mxu3 %v9976_v25 }
 0xabf   :  { %4178 = vmatpush.bf16.msra.mxu0 %v9189_v18  ;;  %4204 = vmatpush.bf16.msra.mxu2 %v9977_v7 }
 0xac1   :  { %4190 = vmatpush.bf16.msra.mxu1 %v9133_v5  ;;  %4216 = vmatpush.bf16.msra.mxu3 %v9157_v46 }
 0xac3   :  { %4179 = vmatpush.bf16.msra.mxu0 %v9978_v34  ;;  %4205 = vmatpush.bf16.msra.mxu2 %v9204_v37 }
 0xac5   :  { %4191 = vmatpush.bf16.msra.mxu1 %v10034_v47  ;;  %4217 = vmatpush.bf16.msra.mxu3 %v10035_v21 }
 0xac7   :  { %4180 = vmatpush.bf16.msra.mxu0 %v10036_v8  ;;  %4206 = vmatpush.bf16.msra.mxu2 %v10037_v43 }
 0xac9   :  { %4192 = vmatpush.bf16.msra.mxu1 %v10038_v16  ;;  %4218 = vmatpush.bf16.msra.mxu3 %v10039_v31 }
 0xacd   :  { %4193 = vmatpush.bf16.msra.mxu1 %v9195_v63  ;;  %4219 = vmatpush.bf16.msra.mxu3 %v10040_v12 }
 0xb27   :  { %v4072_v1 = vpop.f32.mrf.mxu0 }
 0xb28   :  { %v4073_v28 = vadd.f32 %v4072_v1, %v9344_v44 }
 0xb2d   :  { %v4085_v48 = vpop.f32.mrf.mxu1  ;;  %v4098_v52 = vpop.f32.mrf.mxu2 }
 0xb2e   :  { %v4086_v13 = vadd.f32 %v4085_v48, %v4073_v28  ;;  %v4099_v8 = vadd.f32 %v4098_v52, %v9354_v10  ;;  %v10049_v28 = vld [vmem:[#allocation44_spill] sm:$0xff]  ;;  %v10050_v48 = vld [vmem:[#allocation45_spill] sm:$0xff]  ;;  %v10051_v52 = vld [vmem:[#allocation46_spill] sm:$0xff] }
 0xb2f   :  { %v4074_v41 = vpop.f32.mrf.mxu0 }
 0xb30   :  { %v4115_v62 = vmax.f32 %v4086_v13, 0.0  ;;  %v10041_v41 = vld [vmem:[#allocation36_spill] sm:$0xff] }
 0xb32   :  { %v4117_v21 = vpack.c.bf16 %v4115_v62, %v4115_v62 }
 0xb33   :  { %v4111_v43 = vpop.f32.mrf.mxu3 }
 0xb34   :  { %v4112_v47 = vadd.f32 %v4111_v43, %v4099_v8  ;;  %4127 = vmatmul.bf16.vlgmr.msrb.gmra.mxu0 %v4117_v21  ;;  %4153 = vmatmul.bf16.vlgmr.msrb.gmra.mxu2 %v4117_v21  ;;  %v10043_v21 = vld [vmem:[#allocation38_spill] sm:$0xff]  ;;  %v10044_v8 = vld [vmem:[#allocation39_spill] sm:$0xff]  ;;  %v10045_v43 = vld [vmem:[#allocation40_spill] sm:$0xff] }
 0xb35   :  { %v4087_v31 = vpop.f32.mrf.mxu1  ;;  %v4100_v16 = vpop.f32.mrf.mxu2  ;;  %4229 = vmatpush.bf16.msrb.mxu0 %v9214_v56  ;;  %4255 = vmatpush.bf16.msrb.mxu2 %v9216_v60 }
 0xb36   :  { %v4116_v12 = vmax.f32 %v4112_v47, 0.0  ;;  %v10042_v47 = vld [vmem:[#allocation37_spill] sm:$0xff]  ;;  %v10047_v31 = vld [vmem:[#allocation42_spill] sm:$0xff] }
 0xb37   :  { %v10046_v16 = vld [vmem:[#allocation41_spill] sm:$0xff] }
 0xb38   :  { %v4118_v1 = vpack.c.bf16 %v4116_v12, %v4116_v12  ;;  %v10048_v12 = vld [vmem:[#allocation43_spill] sm:$0xff] }
 0xb39   :  { %4230 = vmatpush.bf16.msrb.mxu0 %v9220_v4  ;;  %4256 = vmatpush.bf16.msrb.mxu2 %v9222_v27 }
 0xb3a   :  { %4140 = vmatmul.bf16.vlgmr.msrb.gmra.mxu1 %v4118_v1  ;;  %4166 = vmatmul.bf16.vlgmr.msrb.gmra.mxu3 %v4118_v1 }
 0xb3b   :  { %v4113_v62 = vpop.f32.mrf.mxu3  ;;  %4242 = vmatpush.bf16.msrb.mxu1 %v9225_v19  ;;  %4268 = vmatpush.bf16.msrb.mxu3 %v9227_v20 }
 0xb3d   :  { %4231 = vmatpush.bf16.msrb.mxu0 %v9230_v33  ;;  %4257 = vmatpush.bf16.msrb.mxu2 %v9234_v35 }
 0xb3f   :  { %4243 = vmatpush.bf16.msrb.mxu1 %v9236_v38  ;;  %4269 = vmatpush.bf16.msrb.mxu3 %v9238_v51 }
 0xb41   :  { %4232 = vmatpush.bf16.msrb.mxu0 %v9242_v61  ;;  %4258 = vmatpush.bf16.msrb.mxu2 %v9246_v15 }
 0xb43   :  { %4244 = vmatpush.bf16.msrb.mxu1 %v9248_v17  ;;  %4270 = vmatpush.bf16.msrb.mxu3 %v9250_v29 }
 0xb45   :  { %4233 = vmatpush.bf16.msrb.mxu0 %v9268_v39  ;;  %4259 = vmatpush.bf16.msrb.mxu2 %v9966_v49 }
 0xb47   :  { %4245 = vmatpush.bf16.msrb.mxu1 %v9273_v59  ;;  %4271 = vmatpush.bf16.msrb.mxu3 %v9967_v22 }
 0xb49   :  { %4234 = vmatpush.bf16.msrb.mxu0 %v9968_v0  ;;  %4260 = vmatpush.bf16.msrb.mxu2 %v9969_v40 }
 0xb4b   :  { %4246 = vmatpush.bf16.msrb.mxu1 %v10001_v50  ;;  %4272 = vmatpush.bf16.msrb.mxu3 %v10041_v41 }
 0xb4d   :  { %4235 = vmatpush.bf16.msrb.mxu0 %v10042_v47  ;;  %4261 = vmatpush.bf16.msrb.mxu2 %v10043_v21 }
 0xb4f   :  { %4247 = vmatpush.bf16.msrb.mxu1 %v10044_v8  ;;  %4273 = vmatpush.bf16.msrb.mxu3 %v10045_v43 }
 0xb51   :  { %4236 = vmatpush.bf16.msrb.mxu0 %v10046_v16  ;;  %4262 = vmatpush.bf16.msrb.mxu2 %v10047_v31 }
 0xb53   :  { %4248 = vmatpush.bf16.msrb.mxu1 %v10048_v12  ;;  %4274 = vmatpush.bf16.msrb.mxu3 %v10049_v28 }
 0xb57   :  { %4249 = vmatpush.bf16.msrb.mxu1 %v10050_v48  ;;  %4275 = vmatpush.bf16.msrb.mxu3 %v10051_v52 }
 0xbb1   :  { %v4128_v13 = vpop.f32.mrf.mxu0 }
 0xbb2   :  { %v4129_v1 = vadd.f32 %v4128_v13, %v9394_v23 }
 0xbb7   :  { %v4141_v62 = vpop.f32.mrf.mxu1  ;;  %v4154_v21 = vpop.f32.mrf.mxu2 }
 0xbb8   :  { %v4142_v8 = vadd.f32 %v4141_v62, %v4129_v1  ;;  %v4155_v16 = vadd.f32 %v4154_v21, %v9397_v32  ;;  %v10052_v21 = vld [vmem:[#allocation18_spill] sm:$0xff] }
 0xbb9   :  { %v4130_v47 = vpop.f32.mrf.mxu0 }
 0xbba   :  { %v4171_v43 = vpack.c.bf16 %v4142_v8, %v4142_v8  ;;  %v10053_v8 = vld [vmem:[#allocation19_spill] sm:$0xff] }
 0xbbc   :  { %4181 = vmatmul.bf16.vlgmr.msra.gmra.mxu0 %v4171_v43  ;;  %4207 = vmatmul.bf16.vlgmr.msra.gmra.mxu2 %v4171_v43  ;;  %v10054_v43 = vld [vmem:[#allocation27_spill] sm:$0xff] }
 0xbbd   :  { %v4167_v31 = vpop.f32.mrf.mxu3  ;;  %4285 = vmatpush.bf16.msra.mxu0 %v9118_v53  ;;  %4311 = vmatpush.bf16.msra.mxu2 %v9142_v30 }
 0xbbe   :  { %v4168_v48 = vadd.f32 %v4167_v31, %v4155_v16  ;;  %v10055_v16 = vld [vmem:[#allocation28_spill] sm:$0xff]  ;;  %v10056_v31 = vld [vmem:[#allocation21_spill] sm:$0xff] }
 0xbbf   :  { %v4143_v28 = vpop.f32.mrf.mxu1  ;;  %v4156_v52 = vpop.f32.mrf.mxu2 }
 0xbc0   :  { %v4172_v12 = vpack.c.bf16 %v4168_v48, %v4168_v48  ;;  %v10058_v28 = vld [vmem:[#allocation24_spill] sm:$0xff] }
 0xbc1   :  { %4286 = vmatpush.bf16.msra.mxu0 %v9124_v58  ;;  %4312 = vmatpush.bf16.msra.mxu2 %v9148_v14 }
 0xbc2   :  { %4194 = vmatmul.bf16.vlgmr.msra.gmra.mxu1 %v4172_v12  ;;  %4220 = vmatmul.bf16.vlgmr.msra.gmra.mxu3 %v4172_v12  ;;  %v10057_v12 = vld [vmem:[#allocation22_spill] sm:$0xff] }
 0xbc3   :  { %4298 = vmatpush.bf16.msra.mxu1 %v9113_v42  ;;  %4324 = vmatpush.bf16.msra.mxu3 %v9137_v9 }
 0xbc5   :  { %v4169_v47 = vpop.f32.mrf.mxu3  ;;  %4287 = vmatpush.bf16.msra.mxu0 %v9131_v3  ;;  %4313 = vmatpush.bf16.msra.mxu2 %v9154_v45 }
 0xbc7   :  { %4299 = vmatpush.bf16.msra.mxu1 %v9116_v24  ;;  %4325 = vmatpush.bf16.msra.mxu3 %v9140_v26 }
 0xbc9   :  { %4288 = vmatpush.bf16.msra.mxu0 %v9166_v55  ;;  %4314 = vmatpush.bf16.msra.mxu2 %v9168_v6 }
 0xbcb   :  { %4300 = vmatpush.bf16.msra.mxu1 %v9122_v57  ;;  %4326 = vmatpush.bf16.msra.mxu3 %v9145_v36 }
 0xbcd   :  { %4289 = vmatpush.bf16.msra.mxu0 %v9176_v2  ;;  %4315 = vmatpush.bf16.msra.mxu2 %v9974_v11 }
 0xbcf   :  { %4301 = vmatpush.bf16.msra.mxu1 %v9975_v54  ;;  %4327 = vmatpush.bf16.msra.mxu3 %v9976_v25 }
 0xbd1   :  { %4290 = vmatpush.bf16.msra.mxu0 %v9189_v18  ;;  %4316 = vmatpush.bf16.msra.mxu2 %v9977_v7 }
 0xbd3   :  { %4302 = vmatpush.bf16.msra.mxu1 %v9133_v5  ;;  %4328 = vmatpush.bf16.msra.mxu3 %v9157_v46 }
 0xbd5   :  { %4291 = vmatpush.bf16.msra.mxu0 %v9978_v34  ;;  %4317 = vmatpush.bf16.msra.mxu2 %v9204_v37 }
 0xbd7   :  { %4303 = vmatpush.bf16.msra.mxu1 %v10052_v21  ;;  %4329 = vmatpush.bf16.msra.mxu3 %v10053_v8 }
 0xbd9   :  { %4292 = vmatpush.bf16.msra.mxu0 %v10054_v43  ;;  %4318 = vmatpush.bf16.msra.mxu2 %v10055_v16 }
 0xbdb   :  { %4304 = vmatpush.bf16.msra.mxu1 %v10056_v31  ;;  %4330 = vmatpush.bf16.msra.mxu3 %v10057_v12 }
 0xbdf   :  { %4305 = vmatpush.bf16.msra.mxu1 %v9195_v63  ;;  %4331 = vmatpush.bf16.msra.mxu3 %v10058_v28 }
 0xc39   :  { %v4182_v48 = vpop.f32.mrf.mxu0 }
 0xc3a   :  { %v4183_v52 = vadd.f32 %v4182_v48, %v9344_v44 }
 0xc3f   :  { %v4195_v13 = vpop.f32.mrf.mxu1  ;;  %v4208_v1 = vpop.f32.mrf.mxu2 }
 0xc40   :  { %v4196_v62 = vadd.f32 %v4195_v13, %v4183_v52  ;;  %v4209_v43 = vadd.f32 %v4208_v1, %v9354_v10  ;;  %v10066_v52 = vld [vmem:[#allocation44_spill] sm:$0xff]  ;;  %v10067_v13 = vld [vmem:[#allocation45_spill] sm:$0xff]  ;;  %v10068_v1 = vld [vmem:[#allocation46_spill] sm:$0xff] }
 0xc41   :  { %v4184_v47 = vpop.f32.mrf.mxu0 }
 0xc42   :  { %v4225_v8 = vmax.f32 %v4196_v62, 0.0 }
 0xc44   :  { %v4227_v21 = vpack.c.bf16 %v4225_v8, %v4225_v8 }
 0xc45   :  { %v4221_v16 = vpop.f32.mrf.mxu3 }
 0xc46   :  { %v4222_v37 = vadd.f32 %v4221_v16, %v4209_v43  ;;  %4237 = vmatmul.bf16.vlgmr.msrb.gmra.mxu0 %v4227_v21  ;;  %4263 = vmatmul.bf16.vlgmr.msrb.gmra.mxu2 %v4227_v21  ;;  %v10060_v21 = vld [vmem:[#allocation38_spill] sm:$0xff]  ;;  %v10061_v43 = vld [vmem:[#allocation39_spill] sm:$0xff]  ;;  %v10062_v16 = vld [vmem:[#allocation40_spill] sm:$0xff] }
 0xc47   :  { %v4197_v12 = vpop.f32.mrf.mxu1  ;;  %v4210_v31 = vpop.f32.mrf.mxu2  ;;  %4341 = vmatpush.bf16.msrb.mxu0 %v9214_v56  ;;  %4367 = vmatpush.bf16.msrb.mxu2 %v9216_v60 }
 0xc48   :  { %v4226_v28 = vmax.f32 %v4222_v37, 0.0  ;;  %v10059_v37 = vld [vmem:[#allocation37_spill] sm:$0xff]  ;;  %v10064_v12 = vld [vmem:[#allocation42_spill] sm:$0xff] }
 0xc49   :  { %v10063_v31 = vld [vmem:[#allocation41_spill] sm:$0xff] }
 0xc4a   :  { %v4228_v48 = vpack.c.bf16 %v4226_v28, %v4226_v28  ;;  %v10065_v28 = vld [vmem:[#allocation43_spill] sm:$0xff] }
 0xc4b   :  { %4342 = vmatpush.bf16.msrb.mxu0 %v9220_v4  ;;  %4368 = vmatpush.bf16.msrb.mxu2 %v9222_v27 }
 0xc4c   :  { %4250 = vmatmul.bf16.vlgmr.msrb.gmra.mxu1 %v4228_v48  ;;  %4276 = vmatmul.bf16.vlgmr.msrb.gmra.mxu3 %v4228_v48 }
 0xc4d   :  { %v4223_v8 = vpop.f32.mrf.mxu3  ;;  %4354 = vmatpush.bf16.msrb.mxu1 %v9225_v19  ;;  %4380 = vmatpush.bf16.msrb.mxu3 %v9227_v20 }
 0xc4f   :  { %4343 = vmatpush.bf16.msrb.mxu0 %v9230_v33  ;;  %4369 = vmatpush.bf16.msrb.mxu2 %v9234_v35 }
 0xc51   :  { %4355 = vmatpush.bf16.msrb.mxu1 %v9236_v38  ;;  %4381 = vmatpush.bf16.msrb.mxu3 %v9238_v51 }
 0xc53   :  { %4344 = vmatpush.bf16.msrb.mxu0 %v9242_v61  ;;  %4370 = vmatpush.bf16.msrb.mxu2 %v9246_v15 }
 0xc55   :  { %4356 = vmatpush.bf16.msrb.mxu1 %v9248_v17  ;;  %4382 = vmatpush.bf16.msrb.mxu3 %v9250_v29 }
 0xc57   :  { %4345 = vmatpush.bf16.msrb.mxu0 %v9268_v39  ;;  %4371 = vmatpush.bf16.msrb.mxu2 %v9966_v49 }
 0xc59   :  { %4357 = vmatpush.bf16.msrb.mxu1 %v9273_v59  ;;  %4383 = vmatpush.bf16.msrb.mxu3 %v9967_v22 }
 0xc5b   :  { %4346 = vmatpush.bf16.msrb.mxu0 %v9968_v0  ;;  %4372 = vmatpush.bf16.msrb.mxu2 %v9969_v40 }
 0xc5d   :  { %4358 = vmatpush.bf16.msrb.mxu1 %v10001_v50  ;;  %4384 = vmatpush.bf16.msrb.mxu3 %v10041_v41 }
 0xc5f   :  { %4347 = vmatpush.bf16.msrb.mxu0 %v10059_v37  ;;  %4373 = vmatpush.bf16.msrb.mxu2 %v10060_v21 }
 0xc61   :  { %4359 = vmatpush.bf16.msrb.mxu1 %v10061_v43  ;;  %4385 = vmatpush.bf16.msrb.mxu3 %v10062_v16  ;;  %v10069_v16 = vld [vmem:[#allocation33_spill] sm:$0xff] }
 0xc63   :  { %4348 = vmatpush.bf16.msrb.mxu0 %v10063_v31  ;;  %4374 = vmatpush.bf16.msrb.mxu2 %v10064_v12 }
 0xc65   :  { %4360 = vmatpush.bf16.msrb.mxu1 %v10065_v28  ;;  %4386 = vmatpush.bf16.msrb.mxu3 %v10066_v52 }
 0xc69   :  { %4361 = vmatpush.bf16.msrb.mxu1 %v10067_v13  ;;  %4387 = vmatpush.bf16.msrb.mxu3 %v10068_v1 }
 0xcc3   :  { %v4238_v62 = vpop.f32.mrf.mxu0 }
 0xcc4   :  { %v4239_v47 = vadd.f32 %v4238_v62, %v9394_v23  ;;  %v10070_v62 = vld [vmem:[#allocation34_spill] sm:$0xff] }
 0xcc9   :  { %v4251_v48 = vpop.f32.mrf.mxu1  ;;  %v4264_v8 = vpop.f32.mrf.mxu2 }
 0xcca   :  { %v4252_v43 = vadd.f32 %v4251_v48, %v4239_v47  ;;  %v4265_v28 = vadd.f32 %v4264_v8, %v9397_v32  ;;  %v8613_v47 = vld [vmem:[#allocation2 + $0xc74] sm:$0xf0]  ;;  %v7587_v8 = vld [vmem:[#allocation2 + $0xc60] sm:$0xf] }
 0xccb   :  { %v4240_v21 = vpop.f32.mrf.mxu0 }
 0xccc   :  { %v9760_v37 = vadd.f32 %v4252_v43, %v10069_v16 }
 0xcce   :  { %v4283_v12 = vpack.c.bf16 %v9760_v37, %v9760_v37 }
 0xccf   :  { %v4277_v52 = vpop.f32.mrf.mxu3 }
 0xcd0   :  { %v4278_v31 = vadd.f32 %v4277_v52, %v4265_v28  ;;  %4293 = vmatmul.bf16.vlgmr.msra.gmra.mxu0 %v4283_v12  ;;  %4319 = vmatmul.bf16.vlgmr.msra.gmra.mxu2 %v4283_v12  ;;  %v7529_v28 = vld [vmem:[#allocation6 + $0x20] sm:$0xf]  ;;  %v8631_v52 = vld [vmem:[#allocation6 + $0x24] sm:$0xf0] }
 0xcd1   :  { %v4253_v1 = vpop.f32.mrf.mxu1  ;;  %v4266_v13 = vpop.f32.mrf.mxu2  ;;  %4395 = vmatpush.bf16.msra.mxu0 %v9118_v53  ;;  %4421 = vmatpush.bf16.msra.mxu2 %v9142_v30  ;;  %v10073_v53 = vld [vmem:[#allocation19_spill] sm:$0xff] }
 0xcd2   :  { %v9768_v21 = vadd.f32 %v4278_v31, %v10070_v62  ;;  %v7595_v13 = vld [vmem:[#allocation2 + $0xc70] sm:$0xf]  ;;  %v7530_v1 = vor.u32 %v8631_v52, %v7529_v28  ;;  %v8611_v62 = vld [vmem:[#allocation2 + $0xc64] sm:$0xf0]  ;;  %v7573_v28 = vld [vmem:[#allocation2 + $0xc48] sm:$0xf0] }
 0xcd3   :  { %v7596_v48 = vor.u32 %v8613_v47, %v7595_v13  ;;  %v7645_v47 = vld [vmem:[#allocation2 + $0xcd8] sm:$0xf0] }
 0xcd4   :  { %v4284_v43 = vpack.c.bf16 %v9768_v21, %v9768_v21 }
 0xcd5   :  { %4396 = vmatpush.bf16.msra.mxu0 %v9124_v58  ;;  %4422 = vmatpush.bf16.msra.mxu2 %v9148_v14  ;;  %v10075_v58 = vld [vmem:[#allocation28_spill] sm:$0xff] }
 0xcd6   :  { %4306 = vmatmul.bf16.vlgmr.msra.gmra.mxu1 %v4284_v43  ;;  %4332 = vmatmul.bf16.vlgmr.msra.gmra.mxu3 %v4284_v43  ;;  %v8630_v43 = vld [vmem:[#allocation6 + $0x24] sm:$0xf] }
 0xcd7   :  { %v4279_v16 = vpop.f32.mrf.mxu3  ;;  %4408 = vmatpush.bf16.msra.mxu1 %v9113_v42  ;;  %4434 = vmatpush.bf16.msra.mxu3 %v9137_v9  ;;  %v10071_v42 = vld [vmem:[#allocation26_spill] sm:$0xff] }
 0xcd8   :  { %v10077_v9 = vld [vmem:[#allocation22_spill] sm:$0xff]  ;;  %v7531_v16 = vld [vmem:[#allocation6 + $0x28] sm:$0xf0] }
 0xcd9   :  { %4397 = vmatpush.bf16.msra.mxu0 %v9131_v3  ;;  %4423 = vmatpush.bf16.msra.mxu2 %v9154_v45  ;;  %v10076_v3 = vld [vmem:[#allocation21_spill] sm:$0xff] }
 0xcdb   :  { %4409 = vmatpush.bf16.msra.mxu1 %v9116_v24  ;;  %4435 = vmatpush.bf16.msra.mxu3 %v9140_v26  ;;  %v10072_v24 = vld [vmem:[#allocation18_spill] sm:$0xff] }
 0xcdd   :  { %4398 = vmatpush.bf16.msra.mxu0 %v9166_v55  ;;  %4424 = vmatpush.bf16.msra.mxu2 %v9168_v6 }
 0xcdf   :  { %4410 = vmatpush.bf16.msra.mxu1 %v9122_v57  ;;  %4436 = vmatpush.bf16.msra.mxu3 %v9145_v36  ;;  %v10074_v57 = vld [vmem:[#allocation27_spill] sm:$0xff] }
 0xce1   :  { %4399 = vmatpush.bf16.msra.mxu0 %v9176_v2  ;;  %4425 = vmatpush.bf16.msra.mxu2 %v9974_v11 }
 0xce3   :  { %4411 = vmatpush.bf16.msra.mxu1 %v9975_v54  ;;  %4437 = vmatpush.bf16.msra.mxu3 %v9976_v25 }
 0xce5   :  { %4400 = vmatpush.bf16.msra.mxu0 %v9189_v18  ;;  %4426 = vmatpush.bf16.msra.mxu2 %v9977_v7 }
 0xce7   :  { %4412 = vmatpush.bf16.msra.mxu1 %v9133_v5  ;;  %4438 = vmatpush.bf16.msra.mxu3 %v9157_v46  ;;  %v10078_v5 = vld [vmem:[#allocation24_spill] sm:$0xff] }
 0xce9   :  { %4401 = vmatpush.bf16.msra.mxu0 %v9978_v34  ;;  %4427 = vmatpush.bf16.msra.mxu2 %v10071_v42  ;;  %v7588_v42 = vor.u32 %v8611_v62, %v7587_v8  ;;  %v8604_v8 = vld [vmem:[#allocation2 + $0xc34] sm:$0xf]  ;;  %v7565_v62 = vld [vmem:[#allocation2 + $0xc38] sm:$0xf0] }
 0xceb   :  { %4413 = vmatpush.bf16.msra.mxu1 %v10072_v24  ;;  %4439 = vmatpush.bf16.msra.mxu3 %v10073_v53  ;;  %v7534_v24 = vor.u32 %v8630_v43, %v7531_v16  ;;  %v7659_v53 = vld [vmem:[#allocation2 + $0xcf0] sm:$0xf]  ;;  %v7568_v16 = vor.u32 %v8604_v8, %v7565_v62  ;;  %v8660_v62 = vld [vmem:[#allocation2 + $0xde4] sm:$0xf] }
 0xced   :  { %4402 = vmatpush.bf16.msra.mxu0 %v10074_v57  ;;  %4428 = vmatpush.bf16.msra.mxu2 %v10075_v58  ;;  %v8629_v57 = vld [vmem:[#allocation2 + $0xcf4] sm:$0xf0] }
 0xcee   :  { %v7660_v58 = vor.u32 %v8629_v57, %v7659_v53  ;;  %v8623_v53 = vld [vmem:[#allocation2 + $0xcc4] sm:$0xf0]  ;;  %v8622_v57 = vld [vmem:[#allocation2 + $0xcc4] sm:$0xf] }
 0xcef   :  { %4414 = vmatpush.bf16.msra.mxu1 %v10076_v3  ;;  %4440 = vmatpush.bf16.msra.mxu3 %v10077_v9  ;;  %v7579_v3 = vld [vmem:[#allocation2 + $0xc50] sm:$0xf]  ;;  %v8609_v9 = vld [vmem:[#allocation2 + $0xc54] sm:$0xf0] }
 0xcf3   :  { %4415 = vmatpush.bf16.msra.mxu1 %v9195_v63  ;;  %4441 = vmatpush.bf16.msra.mxu3 %v10078_v5  ;;  %v7651_v5 = vld [vmem:[#allocation2 + $0xce0] sm:$0xf] }
 0xd4d   :  { %v4294_v26 = vpop.f32.mrf.mxu0 }
 0xd4e   :  { %v4295_v30 = vadd.f32 %v4294_v26, %v9344_v44  ;;  %v8627_v26 = vld [vmem:[#allocation2 + $0xce4] sm:$0xf0] }
 0xd53   :  { %v4307_v36 = vpop.f32.mrf.mxu1  ;;  %v4320_v14 = vpop.f32.mrf.mxu2 }
 0xd54   :  { %v4308_v45 = vadd.f32 %v4307_v36, %v4295_v30  ;;  %v4321_v2 = vadd.f32 %v4320_v14, %v9354_v10  ;;  %v7580_v30 = vor.u32 %v8609_v9, %v7579_v3  ;;  %v7652_v36 = vor.u32 %v8627_v26, %v7651_v5  ;;  %v7571_v14 = vld [vmem:[#allocation2 + $0xc40] sm:$0xf]  ;;  %v7637_v3 = vld [vmem:[#allocation2 + $0xcc8] sm:$0xf0]  ;;  %v8603_v26 = vld [vmem:[#allocation2 + $0xc24] sm:$0xf0] }
 0xd55   :  { %v4296_v46 = vpop.f32.mrf.mxu0  ;;  %v7640_v9 = vor.u32 %v8622_v57, %v7637_v3  ;;  %v7555_v5 = vld [vmem:[#allocation2 + $0xc20] sm:$0xf]  ;;  %v7725_v57 = vld [vmem:[#allocation2 + $0xd78] sm:$0xf0] }
 0xd56   :  { %v4337_v55 = vmax.f32 %v4308_v45, 0.0  ;;  %v8607_v45 = vld [vmem:[#allocation2 + $0xc44] sm:$0xf0]  ;;  %v7643_v46 = vld [vmem:[#allocation2 + $0xcd0] sm:$0xf] }
 0xd58   :  { %v4339_v6 = vpack.c.bf16 %v4337_v55, %v4337_v55  ;;  %v8625_v55 = vld [vmem:[#allocation2 + $0xcd4] sm:$0xf0] }
 0xd59   :  { %v4333_v18 = vpop.f32.mrf.mxu3 }
 0xd5a   :  { %v4334_v11 = vadd.f32 %v4333_v18, %v4321_v2  ;;  %4349 = vmatmul.bf16.vlgmr.msrb.gmra.mxu0 %v4339_v6  ;;  %4375 = vmatmul.bf16.vlgmr.msrb.gmra.mxu2 %v4339_v6  ;;  %v7644_v6 = vor.u32 %v8625_v55, %v7643_v46  ;;  %v7572_v18 = vor.u32 %v8607_v45, %v7571_v14  ;;  %v7557_v14 = vld [vmem:[#allocation2 + $0xc28] sm:$0xf0]  ;;  %v7627_v45 = vld [vmem:[#allocation2 + $0xcb0] sm:$0xf]  ;;  %v8621_v46 = vld [vmem:[#allocation2 + $0xcb4] sm:$0xf0] }
 0xd5b   :  { %v4309_v54 = vpop.f32.mrf.mxu1  ;;  %v4322_v25 = vpop.f32.mrf.mxu2  ;;  %4451 = vmatpush.bf16.msrb.mxu0 %v9214_v56  ;;  %4477 = vmatpush.bf16.msrb.mxu2 %v9216_v60  ;;  %v10079_v56 = vld [vmem:[#allocation37_spill] sm:$0xff]  ;;  %v10080_v60 = vld [vmem:[#allocation38_spill] sm:$0xff] }
 0xd5c   :  { %v4338_v63 = vmax.f32 %v4334_v11, 0.0  ;;  %v7563_v11 = vld [vmem:[#allocation2 + $0xc30] sm:$0xf]  ;;  %v8605_v54 = vld [vmem:[#allocation2 + $0xc34] sm:$0xf0] }
 0xd5d   :  { %v7564_v25 = vor.u32 %v8605_v54, %v7563_v11  ;;  %v7547_v54 = vld [vmem:[#allocation2 + $0xc10] sm:$0xf] }
 0xd5e   :  { %v4340_v7 = vpack.c.bf16 %v4338_v63, %v4338_v63 }
 0xd5f   :  { %4452 = vmatpush.bf16.msrb.mxu0 %v9220_v4  ;;  %4478 = vmatpush.bf16.msrb.mxu2 %v9222_v27  ;;  %v10081_v4 = vld [vmem:[#allocation39_spill] sm:$0xff]  ;;  %v10082_v27 = vld [vmem:[#allocation40_spill] sm:$0xff] }
 0xd60   :  { %4362 = vmatmul.bf16.vlgmr.msrb.gmra.mxu1 %v4340_v7  ;;  %4388 = vmatmul.bf16.vlgmr.msrb.gmra.mxu3 %v4340_v7 }
 0xd61   :  { %v4335_v34 = vpop.f32.mrf.mxu3  ;;  %4464 = vmatpush.bf16.msrb.mxu1 %v9225_v19  ;;  %4490 = vmatpush.bf16.msrb.mxu3 %v9227_v20  ;;  %v10083_v19 = vld [vmem:[#allocation41_spill] sm:$0xff]  ;;  %v10084_v20 = vld [vmem:[#allocation42_spill] sm:$0xff] }
 0xd63   :  { %4453 = vmatpush.bf16.msrb.mxu0 %v9230_v33  ;;  %4479 = vmatpush.bf16.msrb.mxu2 %v9234_v35  ;;  %v10085_v33 = vld [vmem:[#allocation43_spill] sm:$0xff]  ;;  %v10086_v35 = vld [vmem:[#allocation44_spill] sm:$0xff] }
 0xd65   :  { %4465 = vmatpush.bf16.msrb.mxu1 %v9236_v38  ;;  %4491 = vmatpush.bf16.msrb.mxu3 %v9238_v51  ;;  %v10087_v38 = vld [vmem:[#allocation45_spill] sm:$0xff]  ;;  %v10088_v51 = vld [vmem:[#allocation46_spill] sm:$0xff] }
 0xd67   :  { %4454 = vmatpush.bf16.msrb.mxu0 %v9242_v61  ;;  %4480 = vmatpush.bf16.msrb.mxu2 %v9246_v15 }
 0xd69   :  { %4466 = vmatpush.bf16.msrb.mxu1 %v9248_v17  ;;  %4492 = vmatpush.bf16.msrb.mxu3 %v9250_v29 }
 0xd6b   :  { %4455 = vmatpush.bf16.msrb.mxu0 %v9268_v39  ;;  %4481 = vmatpush.bf16.msrb.mxu2 %v9966_v49 }
 0xd6d   :  { %4467 = vmatpush.bf16.msrb.mxu1 %v9273_v59  ;;  %4493 = vmatpush.bf16.msrb.mxu3 %v9967_v22 }
 0xd6f   :  { %4456 = vmatpush.bf16.msrb.mxu0 %v9968_v0  ;;  %4482 = vmatpush.bf16.msrb.mxu2 %v9969_v40 }
 0xd71   :  { %4468 = vmatpush.bf16.msrb.mxu1 %v10001_v50  ;;  %4494 = vmatpush.bf16.msrb.mxu3 %v10041_v41 }
 0xd73   :  { %4457 = vmatpush.bf16.msrb.mxu0 %v10079_v56  ;;  %4483 = vmatpush.bf16.msrb.mxu2 %v10080_v60  ;;  %v8612_v60 = vld [vmem:[#allocation2 + $0xc74] sm:$0xf] }
 0xd75   :  { %4469 = vmatpush.bf16.msrb.mxu1 %v10081_v4  ;;  %4495 = vmatpush.bf16.msrb.mxu3 %v10082_v27  ;;  %v7597_v4 = vld [vmem:[#allocation2 + $0xc78] sm:$0xf0] }
 0xd77   :  { %4458 = vmatpush.bf16.msrb.mxu0 %v10083_v19  ;;  %4484 = vmatpush.bf16.msrb.mxu2 %v10084_v20  ;;  %v7600_v20 = vor.u32 %v8612_v60, %v7597_v4  ;;  %v7619_v60 = vld [vmem:[#allocation2 + $0xca0] sm:$0xf]  ;;  %v8619_v4 = vld [vmem:[#allocation2 + $0xca4] sm:$0xf0] }
 0xd79   :  { %4470 = vmatpush.bf16.msrb.mxu1 %v10085_v33  ;;  %4496 = vmatpush.bf16.msrb.mxu3 %v10086_v35 }
 0xd7d   :  { %4471 = vmatpush.bf16.msrb.mxu1 %v10087_v38  ;;  %4497 = vmatpush.bf16.msrb.mxu3 %v10088_v51  ;;  %v8610_v38 = vld [vmem:[#allocation2 + $0xc64] sm:$0xf]  ;;  %v7589_v51 = vld [vmem:[#allocation2 + $0xc68] sm:$0xf0] }
 0xdd7   :  { %v4350_v61 = vpop.f32.mrf.mxu0 }
 0xdd8   :  { %v4351_v15 = vadd.f32 %v4350_v61, %v9394_v23 }
 0xddd   :  { %v4363_v17 = vpop.f32.mrf.mxu1  ;;  %v4376_v29 = vpop.f32.mrf.mxu2 }
 0xdde   :  { %v4364_v39 = vadd.f32 %v4363_v17, %v4351_v15  ;;  %v4377_v22 = vadd.f32 %v4376_v29, %v9397_v32  ;;  %v8628_v17 = vld [vmem:[#allocation2 + $0xcf4] sm:$0xf] }
 0xddf   :  { %v4352_v59 = vpop.f32.mrf.mxu0 }
 0xde0   :  { %v4393_v49 = vpack.c.bf16 %v4364_v39, %v4364_v39  ;;  %v7592_v59 = vor.u32 %v8610_v38, %v7589_v51  ;;  %v8599_v38 = vld [vmem:[#allocation2 + $0xc04] sm:$0xf0]  ;;  %v8598_v51 = vld [vmem:[#allocation2 + $0xc04] sm:$0xf] }
 0xde2   :  { %4403 = vmatmul.bf16.vlgmr.msra.gmra.mxu0 %v4393_v49  ;;  %4429 = vmatmul.bf16.vlgmr.msra.gmra.mxu2 %v4393_v49 }
 0xde3   :  { %v4389_v0 = vpop.f32.mrf.mxu3  ;;  %4558 = vmatpush.bf16.msra.mxu0 %v7530_v1  ;;  %4737 = vmatpush.bf16.msra.mxu2 %v7596_v48  ;;  %v8624_v1 = vld [vmem:[#allocation2 + $0xcd4] sm:$0xf] }
 0xde4   :  { %v4390_v40 = vadd.f32 %v4389_v0, %v4377_v22  ;;  %v8608_v22 = vld [vmem:[#allocation2 + $0xc54] sm:$0xf]  ;;  %v7581_v0 = vld [vmem:[#allocation2 + $0xc58] sm:$0xf0]  ;;  %v7648_v43 = vor.u32 %v8624_v1, %v7645_v47  ;;  %v7779_v47 = vld [vmem:[#allocation2 + $0xde0] sm:$0xf] }
 0xde5   :  { %v4365_v50 = vpop.f32.mrf.mxu1  ;;  %v4378_v41 = vpop.f32.mrf.mxu2  ;;  %v7789_v1 = vld [vmem:[#allocation2 + $0xdf8] sm:$0xf0] }
 0xde6   :  { %v4394_v31 = vpack.c.bf16 %v4390_v40, %v4390_v40  ;;  %v8626_v41 = vld [vmem:[#allocation2 + $0xce4] sm:$0xf] }
 0xde7   :  { %4738 = vmatpush.bf16.msra.mxu2 %v7588_v42  ;;  %v8783_v42 = vld [vmem:[%s9862_s1] sm:$0xf] }
 0xde8   :  { %4416 = vmatmul.bf16.vlgmr.msra.gmra.mxu1 %v4394_v31  ;;  %4442 = vmatmul.bf16.vlgmr.msra.gmra.mxu3 %v4394_v31  ;;  %v7653_v31 = vld [vmem:[#allocation2 + $0xce8] sm:$0xf0] }
 0xde9   :  { %4571 = vmatpush.bf16.msra.mxu1 %v7534_v24  ;;  %4750 = vmatpush.bf16.msra.mxu3 %v7660_v58  ;;  %v7656_v13 = vor.u32 %v8626_v41, %v7653_v31  ;;  %v7635_v24 = vld [vmem:[#allocation2 + $0xcc0] sm:$0xf]  ;;  %v7605_v31 = vld [vmem:[#allocation2 + $0xc88] sm:$0xf0] }
 0xdea   :  { %v7636_v58 = vor.u32 %v8623_v53, %v7635_v24  ;;  %v8647_v24 = vld [vmem:[#allocation2 + $0xd74] sm:$0xf0]  ;;  %v8646_v53 = vld [vmem:[#allocation2 + $0xd74] sm:$0xf] }
 0xdeb   :  { %v4391_v12 = vpop.f32.mrf.mxu3  ;;  %4739 = vmatpush.bf16.msra.mxu2 %v7580_v30  ;;  %v8602_v30 = vld [vmem:[#allocation2 + $0xc24] sm:$0xf] }
 0xdec   :  { %v8606_v12 = vld [vmem:[#allocation2 + $0xc44] sm:$0xf]  ;;  %v7560_v55 = vor.u32 %v8602_v30, %v7557_v14  ;;  %v8658_v30 = vld [vmem:[#allocation2 + $0xdd4] sm:$0xf]  ;;  %v7715_v14 = vld [vmem:[#allocation2 + $0xd60] sm:$0xf] }
 0xded   :  { %4751 = vmatpush.bf16.msra.mxu3 %v7652_v36  ;;  %v7576_v48 = vor.u32 %v8606_v12, %v7573_v28  ;;  %v7556_v36 = vor.u32 %v8603_v26, %v7555_v5  ;;  %v7787_v12 = vld [vmem:[#allocation2 + $0xdf0] sm:$0xf]  ;;  %v8663_v28 = vld [vmem:[#allocation2 + $0xdf4] sm:$0xf0] }
 0xdee   :  { %v7771_v5 = vld [vmem:[#allocation2 + $0xdd0] sm:$0xf]  ;;  %v8659_v26 = vld [vmem:[#allocation2 + $0xdd4] sm:$0xf0] }
 0xdef   :  { %4740 = vmatpush.bf16.msra.mxu2 %v7572_v18  ;;  %v7629_v18 = vld [vmem:[#allocation2 + $0xcb8] sm:$0xf0] }
 0xdf1   :  { %4752 = vmatpush.bf16.msra.mxu3 %v7644_v6  ;;  %v7628_v6 = vor.u32 %v8621_v46, %v7627_v45  ;;  %v8645_v45 = vld [vmem:[#allocation2 + $0xd64] sm:$0xf0] }
 0xdf2   :  { %v7716_v46 = vor.u32 %v8645_v45, %v7715_v14  ;;  %v7739_v14 = vld [vmem:[#allocation2 + $0xd90] sm:$0xf]  ;;  %v8651_v45 = vld [vmem:[#allocation2 + $0xd94] sm:$0xf0] }
 0xdf3   :  { %4741 = vmatpush.bf16.msra.mxu2 %v7564_v25  ;;  %v8601_v25 = vld [vmem:[#allocation2 + $0xc14] sm:$0xf0] }
 0xdf5   :  { %4753 = vmatpush.bf16.msra.mxu3 %v7636_v58 }
 0xdf7   :  { %4742 = vmatpush.bf16.msra.mxu2 %v7556_v36  ;;  %v7773_v36 = vld [vmem:[#allocation2 + $0xdd8] sm:$0xf0] }
 0xdf9   :  { %4754 = vmatpush.bf16.msra.mxu3 %v7628_v6  ;;  %v7717_v6 = vld [vmem:[#allocation2 + $0xd68] sm:$0xf0] }
 0xe5f   :  { %v4404_v2 = vpop.f32.mrf.mxu0 }
 0xe60   :  { %v4405_v63 = vadd.f32 %v4404_v2, %v9344_v44  ;;  %v7661_v44 = vld [vmem:[#allocation2 + $0xcf8] sm:$0xf0]  ;;  %v8620_v2 = vld [vmem:[#allocation2 + $0xcb4] sm:$0xf] }
 0xe61   :  { %v7664_v40 = vor.u32 %v8628_v17, %v7661_v44  ;;  %v7632_v11 = vor.u32 %v8620_v2, %v7629_v18  ;;  %v7611_v44 = vld [vmem:[#allocation2 + $0xc90] sm:$0xf]  ;;  %v7772_v2 = vor.u32 %v8659_v26, %v7771_v5  ;;  %v8638_v5 = vld [vmem:[#allocation2 + $0xd34] sm:$0xf] }
 0xe65   :  { %v4417_v7 = vpop.f32.mrf.mxu1  ;;  %v4430_v34 = vpop.f32.mrf.mxu2 }
 0xe66   :  { %v4418_v56 = vadd.f32 %v4417_v7, %v4405_v63  ;;  %v4431_v35 = vadd.f32 %v4430_v34, %v9354_v10  ;;  %v7584_v10 = vor.u32 %v8608_v22, %v7581_v0  ;;  %v8600_v63 = vld [vmem:[#allocation2 + $0xc14] sm:$0xf]  ;;  %v7548_v7 = vor.u32 %v8601_v25, %v7547_v54  ;;  %v7549_v34 = vld [vmem:[#allocation2 + $0xc18] sm:$0xf0]  ;;  %v7603_v0 = vld [vmem:[#allocation2 + $0xc80] sm:$0xf] }
 0xe67   :  { %v4406_v27 = vpop.f32.mrf.mxu0  ;;  %v7763_v54 = vld [vmem:[#allocation2 + $0xdc0] sm:$0xf]  ;;  %v8657_v25 = vld [vmem:[#allocation2 + $0xdc4] sm:$0xf0] }
 0xe68   :  { %v4447_v19 = vmax.f32 %v4418_v56, 0.0  ;;  %v7552_v56 = vor.u32 %v8600_v63, %v7549_v34  ;;  %v8618_v27 = vld [vmem:[#allocation2 + $0xca4] sm:$0xf]  ;;  %4743 = vmatpush.bf16.msra.mxu2 %v7548_v7  ;;  %v7765_v7 = vld [vmem:[#allocation2 + $0xdc8] sm:$0xf0] }
 0xe69   :  { %v8656_v63 = vld [vmem:[#allocation2 + $0xdc4] sm:$0xf]  ;;  %v7707_v34 = vld [vmem:[#allocation2 + $0xd50] sm:$0xf] }
 0xe6a   :  { %v4449_v33 = vpack.c.bf16 %v4447_v19, %v4447_v19  ;;  %v7620_v19 = vor.u32 %v8619_v4, %v7619_v60  ;;  %v8642_v60 = vld [vmem:[#allocation2 + $0xd54] sm:$0xf]  ;;  %v7764_v4 = vor.u32 %v8657_v25, %v7763_v54  ;;  %v8636_v25 = vld [vmem:[#allocation2 + $0xd24] sm:$0xf] }
 0xe6b   :  { %v4443_v61 = vpop.f32.mrf.mxu3 }
 0xe6c   :  { %v4444_v15 = vadd.f32 %v4443_v61, %v4431_v35  ;;  %4459 = vmatmul.bf16.vlgmr.msrb.gmra.mxu0 %v4449_v33  ;;  %4485 = vmatmul.bf16.vlgmr.msrb.gmra.mxu2 %v4449_v33  ;;  %v7539_v35 = vld [vmem:[#allocation2 + $0xc00] sm:$0xf] }
 0xe6d   :  { %v4419_v29 = vpop.f32.mrf.mxu1  ;;  %v4432_v39 = vpop.f32.mrf.mxu2  ;;  %4763 = vmatpush.bf16.msrb.mxu0 %v7600_v20  ;;  %v7621_v20 = vld [vmem:[#allocation2 + $0xca8] sm:$0xf0]  ;;  %4755 = vmatpush.bf16.msra.mxu3 %v7620_v19  ;;  %v7540_v61 = vor.u32 %v8599_v38, %v7539_v35  ;;  %v7709_v19 = vld [vmem:[#allocation2 + $0xd58] sm:$0xf0] }
 0xe6e   :  { %v4448_v49 = vmax.f32 %v4444_v15, 0.0  ;;  %v7624_v33 = vor.u32 %v8618_v27, %v7621_v20  ;;  %v7541_v15 = vld [vmem:[#allocation2 + $0xc08] sm:$0xf0]  ;;  %v8617_v29 = vld [vmem:[#allocation2 + $0xc94] sm:$0xf0]  ;;  %v7712_v35 = vor.u32 %v8642_v60, %v7709_v19 }
 0xe6f   :  { %v7544_v17 = vor.u32 %v8598_v51, %v7541_v15  ;;  %v8616_v39 = vld [vmem:[#allocation2 + $0xc94] sm:$0xf]  ;;  %4744 = vmatpush.bf16.msra.mxu2 %v7540_v61  ;;  %v8648_v60 = vld [vmem:[#allocation2 + $0xd84] sm:$0xf] }
 0xe70   :  { %v4450_v50 = vpack.c.bf16 %v4448_v49, %v4448_v49  ;;  %v7613_v49 = vld [vmem:[#allocation2 + $0xc98] sm:$0xf0] }
 0xe71   :  { %4764 = vmatpush.bf16.msrb.mxu0 %v7592_v59  ;;  %v7612_v59 = vor.u32 %v8617_v29, %v7611_v44  ;;  %v7616_v22 = vor.u32 %v8616_v39, %v7613_v49 }
 0xe72   :  { %4472 = vmatmul.bf16.vlgmr.msrb.gmra.mxu1 %v4450_v50  ;;  %4498 = vmatmul.bf16.vlgmr.msrb.gmra.mxu3 %v4450_v50  ;;  %v8614_v50 = vld [vmem:[#allocation2 + $0xc84] sm:$0xf] }
 0xe73   :  { %v4445_v52 = vpop.f32.mrf.mxu3  ;;  %4776 = vmatpush.bf16.msrb.mxu1 %v7664_v40  ;;  %4756 = vmatpush.bf16.msra.mxu3 %v7612_v59  ;;  %v8615_v40 = vld [vmem:[#allocation2 + $0xc84] sm:$0xf0] }
 0xe74   :  { %v7604_v41 = vor.u32 %v8615_v40, %v7603_v0  ;;  %v8662_v52 = vld [vmem:[#allocation2 + $0xdf4] sm:$0xf] }
 0xe75   :  { %4765 = vmatpush.bf16.msrb.mxu0 %v7584_v10  ;;  %v7608_v10 = vor.u32 %v8614_v50, %v7605_v31  ;;  %v7792_v8 = vor.u32 %v8662_v52, %v7789_v1 }
 0xe77   :  { %4777 = vmatpush.bf16.msrb.mxu1 %v7656_v13  ;;  %4757 = vmatpush.bf16.msra.mxu3 %v7604_v41  ;;  %v7788_v13 = vor.u32 %v8663_v28, %v7787_v12  ;;  %v7755_v12 = vld [vmem:[#allocation2 + $0xdb0] sm:$0xf]  ;;  %v8654_v28 = vld [vmem:[#allocation2 + $0xdb4] sm:$0xf] }
 0xe79   :  { %4766 = vmatpush.bf16.msrb.mxu0 %v7576_v48  ;;  %v8661_v48 = vld [vmem:[#allocation2 + $0xde4] sm:$0xf0] }
 0xe7b   :  { %4778 = vmatpush.bf16.msrb.mxu1 %v7648_v43  ;;  %v7781_v43 = vld [vmem:[#allocation2 + $0xde8] sm:$0xf0]  ;;  %5014 = vmatpush.bf16.msrb.mxu3 %v7788_v13  ;;  %v7757_v13 = vld [vmem:[#allocation2 + $0xdb8] sm:$0xf0] }
 0xe7c   :  { %7535 = vmatmul.msk.bf16.vlgmr.msra.gmra.mxu0 %vm1910_vm7, %v8783_v42  ;;  %v7784_v58 = vor.u32 %v8660_v62, %v7781_v43  ;;  %v7760_v1 = vor.u32 %v8654_v28, %v7757_v13  ;;  %v7701_v62 = vld [vmem:[#allocation2 + $0xd48] sm:$0xf0]  ;;  %v7747_v43 = vld [vmem:[#allocation2 + $0xda0] sm:$0xf]  ;;  %v7851_v28 = vld [vmem:[#allocation2 + $0xe70] sm:$0xf] }
 0xe7d   :  { %4767 = vmatpush.bf16.msrb.mxu0 %v7568_v16  ;;  %v7723_v16 = vld [vmem:[#allocation2 + $0xd70] sm:$0xf]  ;;  %v8679_v13 = vld [vmem:[#allocation2 + $0xe74] sm:$0xf0] }
 0xe7e   :  { %v7724_v3 = vor.u32 %v8647_v24, %v7723_v16  ;;  %v8653_v16 = vld [vmem:[#allocation2 + $0xda4] sm:$0xf0] }
 0xe7f   :  { %4779 = vmatpush.bf16.msrb.mxu1 %v7640_v9  ;;  %v7728_v9 = vor.u32 %v8646_v53, %v7725_v57  ;;  %v7748_v24 = vor.u32 %v8653_v16, %v7747_v43  ;;  %v8652_v53 = vld [vmem:[#allocation2 + $0xda4] sm:$0xf]  ;;  %v7749_v57 = vld [vmem:[#allocation2 + $0xda8] sm:$0xf0]  ;;  %v8691_v43 = vld [vmem:[#allocation2 + $0xed4] sm:$0xf0] }
 0xe80   :  { %5001 = vmatpush.bf16.msrb.mxu2 %v7724_v3  ;;  %v7691_v3 = vld [vmem:[#allocation2 + $0xd30] sm:$0xf]  ;;  %v8690_v16 = vld [vmem:[#allocation2 + $0xed4] sm:$0xf] }
 0xe81   :  { %4768 = vmatpush.bf16.msrb.mxu0 %v7560_v55  ;;  %v8644_v55 = vld [vmem:[#allocation2 + $0xd64] sm:$0xf] }
 0xe82   :  { %7536 = vmatmul.msk.bf16.vlgmr.msra.gmra.mxu1 %vm1910_vm7, %v8783_v42  ;;  %v7780_v42 = vor.u32 %v8661_v48, %v7779_v47  ;;  %v7720_v18 = vor.u32 %v8644_v55, %v7717_v6  ;;  %v7699_v47 = vld [vmem:[#allocation2 + $0xd40] sm:$0xf]  ;;  %v8641_v48 = vld [vmem:[#allocation2 + $0xd44] sm:$0xf0]  ;;  %v7740_v55 = vor.u32 %v8651_v45, %v7739_v14  ;;  %v7741_v6 = vld [vmem:[#allocation2 + $0xd98] sm:$0xf0] }
 0xe83   :  { %4780 = vmatpush.bf16.msrb.mxu1 %v7632_v11  ;;  %v7776_v11 = vor.u32 %v8658_v30, %v7773_v36  ;;  %v7693_v30 = vld [vmem:[#allocation2 + $0xd38] sm:$0xf0]  ;;  %v7835_v14 = vld [vmem:[#allocation2 + $0xe50] sm:$0xf]  ;;  %v8675_v45 = vld [vmem:[#allocation2 + $0xe54] sm:$0xf0] }
 0xe84   :  { %5015 = vmatpush.bf16.msrb.mxu3 %v7780_v42  ;;  %5002 = vmatpush.bf16.msrb.mxu2 %v7716_v46  ;;  %v7696_v36 = vor.u32 %v8638_v5, %v7693_v30  ;;  %v8650_v46 = vld [vmem:[#allocation2 + $0xd94] sm:$0xf]  ;;  %v8689_v30 = vld [vmem:[#allocation2 + $0xec4] sm:$0xf0] }
 0xe85   :  { %4769 = vmatpush.bf16.msrb.mxu0 %v7552_v56  ;;  %v8643_v56 = vld [vmem:[#allocation2 + $0xd54] sm:$0xf0] }
 0xe86   :  { %v7708_v27 = vor.u32 %v8643_v56, %v7707_v34  ;;  %v7731_v34 = vld [vmem:[#allocation2 + $0xd80] sm:$0xf]  ;;  %v8649_v56 = vld [vmem:[#allocation2 + $0xd84] sm:$0xf0] }
 0xe87   :  { %4781 = vmatpush.bf16.msrb.mxu1 %v7624_v33  ;;  %v7768_v33 = vor.u32 %v8656_v63, %v7765_v7  ;;  %v7685_v63 = vld [vmem:[#allocation2 + $0xd28] sm:$0xf0] }
 0xe88   :  { %5016 = vmatpush.bf16.msrb.mxu3 %v7772_v2  ;;  %5003 = vmatpush.bf16.msrb.mxu2 %v7708_v27  ;;  %v7744_v2 = vor.u32 %v8650_v46, %v7741_v6  ;;  %v7688_v7 = vor.u32 %v8636_v25, %v7685_v63  ;;  %v7733_v27 = vld [vmem:[#allocation2 + $0xd88] sm:$0xf0]  ;;  %v8674_v46 = vld [vmem:[#allocation2 + $0xe54] sm:$0xf] }
 0xe89   :  { %4770 = vmatpush.bf16.msrb.mxu0 %v7544_v17  ;;  %v7736_v19 = vor.u32 %v8648_v60, %v7733_v27  ;;  %v7893_v6 = vld [vmem:[#allocation2 + $0xec8] sm:$0xf0] }
 0xe8b   :  { %4782 = vmatpush.bf16.msrb.mxu1 %v7616_v22 }
 0xe8c   :  { %5017 = vmatpush.bf16.msrb.mxu3 %v7764_v4  ;;  %v7732_v4 = vor.u32 %v8649_v56, %v7731_v34 }
 0xe8d   :  { %5027 = vmatpush.bf16.msra.mxu0 %v7728_v9  ;;  %v8639_v9 = vld [vmem:[#allocation2 + $0xd34] sm:$0xf0] }
 0xe8e   :  { %v7692_v26 = vor.u32 %v8639_v9, %v7691_v3  ;;  %v7845_v3 = vld [vmem:[#allocation2 + $0xe68] sm:$0xf0] }
 0xe8f   :  { %4783 = vmatpush.bf16.msrb.mxu1 %v7608_v10 }
 0xe91   :  { %5028 = vmatpush.bf16.msra.mxu0 %v7720_v18  ;;  %v7683_v18 = vld [vmem:[#allocation2 + $0xd20] sm:$0xf] }
 0xe93   :  { %5040 = vmatpush.bf16.msra.mxu1 %v7792_v8  ;;  %v8640_v8 = vld [vmem:[#allocation2 + $0xd44] sm:$0xf] }
 0xe94   :  { %v7704_v42 = vor.u32 %v8640_v8, %v7701_v62  ;;  %v7852_v8 = vor.u32 %v8679_v13, %v7851_v28  ;;  %v7899_v62 = vld [vmem:[#allocation2 + $0xed0] sm:$0xf]  ;;  %v7875_v28 = vld [vmem:[#allocation2 + $0xea0] sm:$0xf] }
 0xe95   :  { %5029 = vmatpush.bf16.msra.mxu0 %v7712_v35  ;;  %v8634_v35 = vld [vmem:[#allocation2 + $0xd14] sm:$0xf]  ;;  %v7900_v9 = vor.u32 %v8691_v43, %v7899_v62  ;;  %v8671_v62 = vld [vmem:[#allocation2 + $0xe34] sm:$0xf0] }
 0xe96   :  { %v8670_v43 = vld [vmem:[#allocation2 + $0xe34] sm:$0xf] }
 0xe97   :  { %5041 = vmatpush.bf16.msra.mxu1 %v7784_v58  ;;  %v7752_v58 = vor.u32 %v8652_v53, %v7749_v57  ;;  %v8677_v53 = vld [vmem:[#allocation2 + $0xe64] sm:$0xf0] }
 0xe99   :  { %5030 = vmatpush.bf16.msra.mxu0 %v7704_v42  ;;  %v7901_v42 = vld [vmem:[#allocation2 + $0xed8] sm:$0xf0] }
 0xe9b   :  { %5042 = vmatpush.bf16.msra.mxu1 %v7776_v11  ;;  %v8637_v11 = vld [vmem:[#allocation2 + $0xd24] sm:$0xf0] }
 0xe9c   :  { %v7684_v54 = vor.u32 %v8637_v11, %v7683_v18  ;;  %v7836_v18 = vor.u32 %v8675_v45, %v7835_v14  ;;  %v7813_v45 = vld [vmem:[#allocation2 + $0xe28] sm:$0xf0] }
 0xe9d   :  { %5031 = vmatpush.bf16.msra.mxu0 %v7696_v36  ;;  %v7904_v36 = vor.u32 %v8690_v16, %v7901_v42  ;;  %v7821_v42 = vld [vmem:[#allocation2 + $0xe38] sm:$0xf0] }
 0xe9f   :  { %5043 = vmatpush.bf16.msra.mxu1 %v7768_v33  ;;  %v8635_v33 = vld [vmem:[#allocation2 + $0xd14] sm:$0xf0] }
 0xea1   :  { %5032 = vmatpush.bf16.msra.mxu0 %v7688_v7  ;;  %v4790_v7 = vld [vmem:[#allocation4 + $0x20] ss:$8 sm:$0x3] }
 0xea2   :  { %v4793_v56 = vperm.slane %v4790_v7, 1 }
 0xea3   :  { %5044 = vmatpush.bf16.msra.mxu1 %v7760_v1  ;;  %v8678_v1 = vld [vmem:[#allocation2 + $0xe74] sm:$0xf] }
 0xea7   :  { %5045 = vmatpush.bf16.msra.mxu1 %v7752_v58  ;;  %v8676_v58 = vld [vmem:[#allocation2 + $0xe64] sm:$0xf] }
 0xea8   :  { %v7848_v5 = vor.u32 %v8676_v58, %v7845_v3  ;;  %v8682_v3 = vld [vmem:[#allocation2 + $0xe94] sm:$0xf] }
 0xeab   :  { %5046 = vmatpush.bf16.msra.mxu1 %v7744_v2  ;;  %v7837_v2 = vld [vmem:[#allocation2 + $0xe58] sm:$0xf0] }
 0xeac   :  { %v7840_v11 = vor.u32 %v8674_v46, %v7837_v2  ;;  %v8680_v2 = vld [vmem:[#allocation2 + $0xe84] sm:$0xf] }
 0xeaf   :  { %5047 = vmatpush.bf16.msra.mxu1 %v7736_v19 }
 0xee9   :  { %v4460_v20 = vpop.f32.mrf.mxu0 }
 0xeea   :  { %v4461_v38 = vadd.f32 %v4460_v20, %v9394_v23  ;;  %v7675_v20 = vld [vmem:[#allocation2 + $0xd10] sm:$0xf] }
 0xeef   :  { %v4473_v51 = vpop.f32.mrf.mxu1  ;;  %v4486_v61 = vpop.f32.mrf.mxu2 }
 0xef0   :  { %v4474_v15 = vadd.f32 %v4473_v51, %v4461_v38  ;;  %v4487_v39 = vadd.f32 %v4486_v61, %v9397_v32  ;;  %v8655_v32 = vld [vmem:[#allocation2 + $0xdb4] sm:$0xf0]  ;;  %v7676_v38 = vor.u32 %v8635_v33, %v7675_v20  ;;  %v7677_v51 = vld [vmem:[#allocation2 + $0xd18] sm:$0xf0] }
 0xef1   :  { %v4462_v17 = vpop.f32.mrf.mxu0  ;;  %v7756_v52 = vor.u32 %v8655_v32, %v7755_v12  ;;  %v7680_v61 = vor.u32 %v8634_v35, %v7677_v51  ;;  %v8692_v12 = vld [vmem:[#allocation2 + $0xee4] sm:$0xf]  ;;  %v7909_v32 = vld [vmem:[#allocation2 + $0xee8] sm:$0xf0] }
 0xef2   :  { %v4503_v44 = vadd.f32 %v4474_v15, %v9760_v37  ;;  %v7667_v15 = vld [vmem:[#allocation2 + $0xd00] sm:$0xf]  ;;  %v8633_v17 = vld [vmem:[#allocation2 + $0xd04] sm:$0xf0] }
 0xef3   :  { %5018 = vmatpush.bf16.msrb.mxu3 %v7756_v52  ;;  %5033 = vmatpush.bf16.msra.mxu0 %v7680_v61 }
 0xef4   :  { %v4537_v29 = vpack.c.bf16 %v4503_v44, %v4503_v44  ;;  %v8632_v44 = vld [vmem:[#allocation2 + $0xd04] sm:$0xf] }
 0xef5   :  { %v4499_v59 = vpop.f32.mrf.mxu3 }
 0xef6   :  { %v4500_v49 = vadd.f32 %v4499_v59, %v4487_v39  ;;  %4745 = vmatmul.bf16.vlgmr.msra.gmra.mxu2 %v4537_v29  ;;  %4771 = vmatmul.bf16.vlgmr.msrb.gmra.mxu0 %v4537_v29  ;;  %v7668_v29 = vor.u32 %v8633_v17, %v7667_v15  ;;  %v7669_v39 = vld [vmem:[#allocation2 + $0xd08] sm:$0xf0] }
 0xef7   :  { %v4475_v22 = vpop.f32.mrf.mxu1  ;;  %v4488_v0 = vpop.f32.mrf.mxu2  ;;  %5019 = vmatpush.bf16.msrb.mxu3 %v7748_v24  ;;  %v7672_v59 = vor.u32 %v8632_v44, %v7669_v39  ;;  %v7843_v24 = vld [vmem:[#allocation2 + $0xe60] sm:$0xf] }
 0xef8   :  { %v4504_v40 = vadd.f32 %v4500_v49, %v9768_v21  ;;  %v7700_v21 = vor.u32 %v8641_v48, %v7699_v47  ;;  %v7915_v49 = vld [vmem:[#allocation2 + $0xef0] sm:$0xf]  ;;  %v8695_v22 = vld [vmem:[#allocation2 + $0xef4] sm:$0xf0]  ;;  %v8694_v0 = vld [vmem:[#allocation2 + $0xef4] sm:$0xf]  ;;  %v7912_v48 = vor.u32 %v8692_v12, %v7909_v32  ;;  %v7844_v57 = vor.u32 %v8677_v53, %v7843_v24 }
 0xef9   :  { %v9849_v50 = vpop.f32.mrf.mxu0  ;;  %5034 = vmatpush.bf16.msra.mxu0 %v7672_v59  ;;  %v7853_v47 = vld [vmem:[#allocation2 + $0xe78] sm:$0xf0]  ;;  %v7829_v32 = vld [vmem:[#allocation2 + $0xe48] sm:$0xf0]  ;;  %v7824_v24 = vor.u32 %v8670_v43, %v7821_v42  ;;  %v7867_v53 = vld [vmem:[#allocation2 + $0xe90] sm:$0xf] }
 0xefa   :  { %v4538_v23 = vpack.c.bf16 %v4504_v40, %v4504_v40  ;;  %5004 = vmatpush.bf16.msrb.mxu2 %v7700_v21  ;;  %v7916_v40 = vor.u32 %v8695_v22, %v7915_v49  ;;  %v7856_v21 = vor.u32 %v8678_v1, %v7853_v47  ;;  %v7883_v49 = vld [vmem:[#allocation2 + $0xeb0] sm:$0xf]  ;;  %v8687_v22 = vld [vmem:[#allocation2 + $0xeb4] sm:$0xf0]  ;;  %v8684_v47 = vld [vmem:[#allocation2 + $0xea4] sm:$0xf] }
 0xefb   :  { %5020 = vmatpush.bf16.msrb.mxu3 %v7740_v55  ;;  %v8688_v55 = vld [vmem:[#allocation2 + $0xec4] sm:$0xf]  ;;  %v8721_v43 = vld [vmem:[#allocation2 + $0xfc4] sm:$0xf0]  ;;  %v7963_v42 = vld [vmem:[#allocation2 + $0xf50] sm:$0xf] }
 0xefc   :  { %4758 = vmatmul.bf16.vlgmr.msra.gmra.mxu3 %v4538_v23  ;;  %4784 = vmatmul.bf16.vlgmr.msrb.gmra.mxu1 %v4538_v23  ;;  %v7917_v23 = vld [vmem:[#allocation2 + $0xef8] sm:$0xf0]  ;;  %v7896_v63 = vor.u32 %v8688_v55, %v7893_v6  ;;  %v7859_v55 = vld [vmem:[#allocation2 + $0xe80] sm:$0xf]  ;;  %v8681_v6 = vld [vmem:[#allocation2 + $0xe84] sm:$0xf0] }
 0xefd   :  { %v4501_v41 = vpop.f32.mrf.mxu3  ;;  %5282 = vmatpush.bf16.msrb.mxu0 %v7856_v21  ;;  %v7819_v21 = vld [vmem:[#allocation2 + $0xe30] sm:$0xf] }
 0xefe   :  { %5005 = vmatpush.bf16.msrb.mxu2 %v7692_v26  ;;  %v7907_v41 = vld [vmem:[#allocation2 + $0xee0] sm:$0xf]  ;;  %v7820_v16 = vor.u32 %v8671_v62, %v7819_v21 }
 0xeff   :  { %v9851_v31 = vpop.f32.mrf.mxu1  ;;  %5021 = vmatpush.bf16.msrb.mxu3 %v7732_v4  ;;  %v7891_v26 = vld [vmem:[#allocation2 + $0xec0] sm:$0xf] }
 0xf00   :  { %v7892_v25 = vor.u32 %v8689_v30, %v7891_v26  ;;  %v7811_v26 = vld [vmem:[#allocation2 + $0xe20] sm:$0xf]  ;;  %v8669_v30 = vld [vmem:[#allocation2 + $0xe24] sm:$0xf0] }
 0xf01   :  { %v4562_v37 = vpop.f32.mrf.mxu0  ;;  %5283 = vmatpush.bf16.msrb.mxu0 %v7848_v5  ;;  %v7812_v14 = vor.u32 %v8669_v30, %v7811_v26  ;;  %v8019_v62 = vld [vmem:[#allocation2 + $0xfc0] sm:$0xf] }
 0xf02   :  { %5006 = vmatpush.bf16.msrb.mxu2 %v7684_v54  ;;  %v8693_v37 = vld [vmem:[#allocation2 + $0xee4] sm:$0xf0] }
 0xf03   :  { %5269 = vmatpush.bf16.msra.mxu3 %v7916_v40  ;;  %v7908_v52 = vor.u32 %v8693_v37, %v7907_v41  ;;  %v7884_v40 = vor.u32 %v8687_v22, %v7883_v49  ;;  %v7827_v41 = vld [vmem:[#allocation2 + $0xe40] sm:$0xf]  ;;  %v8673_v37 = vld [vmem:[#allocation2 + $0xe44] sm:$0xf0]  ;;  %v7979_v49 = vld [vmem:[#allocation2 + $0xf70] sm:$0xf] }
 0xf04   :  { %v7828_v12 = vor.u32 %v8673_v37, %v7827_v41  ;;  %v4835_v30 = vld [vmem:[#allocation4 + $0x21] ss:$8 sm:$0x3] }
 0xf05   :  { %5284 = vmatpush.bf16.msrb.mxu0 %v7840_v11  ;;  %v7861_v11 = vld [vmem:[#allocation2 + $0xe88] sm:$0xf0] }
 0xf06   :  { %5007 = vmatpush.bf16.msrb.mxu2 %v7676_v38  ;;  %v4792_v38 = vperm.slane %v4790_v7, 0 }
 0xf07   :  { %v4575_v10 = vpop.f32.mrf.mxu1  ;;  %5270 = vmatpush.bf16.msra.mxu3 %v7908_v52  ;;  %v8685_v52 = vld [vmem:[#allocation2 + $0xea4] sm:$0xf0] }
 0xf08   :  { %v7920_v10 = vor.u32 %v8694_v0, %v7917_v23  ;;  %v8686_v0 = vld [vmem:[#allocation2 + $0xeb4] sm:$0xf]  ;;  %v7876_v1 = vor.u32 %v8685_v52, %v7875_v28  ;;  %v8029_v28 = vld [vmem:[#allocation2 + $0xfd8] sm:$0xf0]  ;;  %v7971_v52 = vld [vmem:[#allocation2 + $0xf60] sm:$0xf] }
 0xf0a   :  { %5008 = vmatpush.bf16.msrb.mxu2 %v7668_v29  ;;  %5295 = vmatpush.bf16.msrb.mxu1 %v7920_v10  ;;  %v8672_v10 = vld [vmem:[#allocation2 + $0xe44] sm:$0xf] }
 0xf0b   :  { %5271 = vmatpush.bf16.msra.mxu3 %v7900_v9  ;;  %v7832_v13 = vor.u32 %v8672_v10, %v7829_v32  ;;  %v7869_v9 = vld [vmem:[#allocation2 + $0xe98] sm:$0xf0]  ;;  %v8027_v10 = vld [vmem:[#allocation2 + $0xfd0] sm:$0xf]  ;;  %v8722_v32 = vld [vmem:[#allocation2 + $0xfd4] sm:$0xf] }
 0xf0c   :  { %v7872_v5 = vor.u32 %v8682_v3, %v7869_v9  ;;  %v7965_v3 = vld [vmem:[#allocation2 + $0xf58] sm:$0xf0] }
 0xf0d   :  { %5285 = vmatpush.bf16.msrb.mxu0 %v7832_v13  ;;  %v8709_v13 = vld [vmem:[#allocation2 + $0xf64] sm:$0xf0] }
 0xf0e   :  { %5256 = vmatpush.bf16.msra.mxu2 %v7852_v8  ;;  %5296 = vmatpush.bf16.msrb.mxu1 %v7912_v48  ;;  %v7877_v48 = vld [vmem:[#allocation2 + $0xea8] sm:$0xf0] }
 0xf0f   :  { %5272 = vmatpush.bf16.msra.mxu3 %v7892_v25  ;;  %v7880_v8 = vor.u32 %v8684_v47, %v7877_v48  ;;  %v7803_v25 = vld [vmem:[#allocation2 + $0xe10] sm:$0xf]  ;;  %v8708_v47 = vld [vmem:[#allocation2 + $0xf64] sm:$0xf]  ;;  %v7973_v48 = vld [vmem:[#allocation2 + $0xf68] sm:$0xf0] }
 0xf10   :  { %v7976_v21 = vor.u32 %v8708_v47, %v7973_v48  ;;  %v7997_v47 = vld [vmem:[#allocation2 + $0xf98] sm:$0xf0] }
 0xf11   :  { %5286 = vmatpush.bf16.msrb.mxu0 %v7824_v24  ;;  %v8707_v24 = vld [vmem:[#allocation2 + $0xf54] sm:$0xf0] }
 0xf12   :  { %5257 = vmatpush.bf16.msra.mxu2 %v7844_v57  ;;  %5297 = vmatpush.bf16.msrb.mxu1 %v7904_v36  ;;  %v8683_v57 = vld [vmem:[#allocation2 + $0xe94] sm:$0xf0]  ;;  %v8668_v36 = vld [vmem:[#allocation2 + $0xe24] sm:$0xf]  ;;  %v7964_v9 = vor.u32 %v8707_v24, %v7963_v42  ;;  %v7987_v24 = vld [vmem:[#allocation2 + $0xf80] sm:$0xf] }
 0xf13   :  { %5273 = vmatpush.bf16.msra.mxu3 %v7884_v40  ;;  %v7868_v58 = vor.u32 %v8683_v57, %v7867_v53  ;;  %v7816_v46 = vor.u32 %v8668_v36, %v7813_v45  ;;  %v8710_v40 = vld [vmem:[#allocation2 + $0xf74] sm:$0xf]  ;;  %v8720_v57 = vld [vmem:[#allocation2 + $0xfc4] sm:$0xf]  ;;  %v8020_v36 = vor.u32 %v8721_v43, %v8019_v62  ;;  %v4838_v45 = vperm.slane %v4835_v30, 1 }
 0xf14   :  { %v8706_v53 = vld [vmem:[#allocation2 + $0xf54] sm:$0xf]  ;;  %v8700_v62 = vld [vmem:[#allocation2 + $0xf24] sm:$0xf] }
 0xf15   :  { %5287 = vmatpush.bf16.msrb.mxu0 %v7816_v46 }
 0xf16   :  { %5258 = vmatpush.bf16.msra.mxu2 %v7836_v18  ;;  %5298 = vmatpush.bf16.msrb.mxu1 %v7896_v63  ;;  %v7860_v18 = vor.u32 %v8681_v6, %v7859_v55  ;;  %v8667_v63 = vld [vmem:[#allocation2 + $0xe14] sm:$0xf0] }
 0xf17   :  { %5274 = vmatpush.bf16.msra.mxu3 %v7876_v1  ;;  %v7804_v7 = vor.u32 %v8667_v63, %v7803_v25  ;;  %v7972_v1 = vor.u32 %v8709_v13, %v7971_v52  ;;  %v8715_v52 = vld [vmem:[#allocation2 + $0xf94] sm:$0xf0] }
 0xf1a   :  { %5259 = vmatpush.bf16.msra.mxu2 %v7828_v12  ;;  %v8723_v12 = vld [vmem:[#allocation2 + $0xfd4] sm:$0xf0] }
 0xf1b   :  { %5275 = vmatpush.bf16.msra.mxu3 %v7868_v58  ;;  %v8021_v58 = vld [vmem:[#allocation2 + $0xfc8] sm:$0xf0] }
 0xf1e   :  { %5260 = vmatpush.bf16.msra.mxu2 %v7820_v16  ;;  %v8032_v16 = vor.u32 %v8722_v32, %v8029_v28  ;;  %v7995_v28 = vld [vmem:[#allocation2 + $0xf90] sm:$0xf] }
 0xf1f   :  { %5276 = vmatpush.bf16.msra.mxu3 %v7860_v18  ;;  %v7996_v13 = vor.u32 %v8715_v52, %v7995_v28  ;;  %v8738_v28 = vld [vmem:[#allocation2 + $0x1054] sm:$0xf]  ;;  %v8752_v52 = vld [vmem:[#allocation2 + $0x10c4] sm:$0xf] }
 0xf22   :  { %5261 = vmatpush.bf16.msra.mxu2 %v7812_v14  ;;  %v8024_v14 = vor.u32 %v8720_v57, %v8021_v58  ;;  %v8712_v57 = vld [vmem:[#allocation2 + $0xf84] sm:$0xf] }
 0xf26   :  { %5262 = vmatpush.bf16.msra.mxu2 %v7804_v7 }
 0xf73   :  { %v4772_v54 = vpop.f32.mrf.mxu0 }
 0xf74   :  { %v4773_v34 = vadd.f32 %v4772_v54, %v9851_v31  ;;  %v7864_v54 = vor.u32 %v8680_v2, %v7861_v11  ;;  %v4837_v11 = vperm.slane %v4835_v30, 0 }
 0xf79   :  { %v4746_v60 = vpop.f32.mrf.mxu2  ;;  %v4785_v4 = vpop.f32.mrf.mxu1 }
 0xf7a   :  { %v4786_v27 = vadd.f32 %v4785_v4, %v4773_v34  ;;  %v4747_v33 = vadd.f32 %v4746_v60, %v9849_v50  ;;  %v7885_v50 = vld [vmem:[#allocation2 + $0xeb8] sm:$0xf0]  ;;  %v8666_v34 = vld [vmem:[#allocation2 + $0xe14] sm:$0xf]  ;;  %v7795_v4 = vld [vmem:[#allocation2 + $0xe00] sm:$0xf] }
 0xf7b   :  { %v4774_v19 = vpop.f32.mrf.mxu0  ;;  %v7888_v23 = vor.u32 %v8686_v0, %v7885_v50  ;;  %v8711_v0 = vld [vmem:[#allocation2 + $0xf74] sm:$0xf0]  ;;  %v7981_v50 = vld [vmem:[#allocation2 + $0xf78] sm:$0xf0] }
 0xf7c   :  { %v4797_v20 = vadd.f32 %v4793_v56, %v4786_v27  ;;  %v7805_v56 = vld [vmem:[#allocation2 + $0xe18] sm:$0xf0]  ;;  %v8665_v27 = vld [vmem:[#allocation2 + $0xe04] sm:$0xf0]  ;;  %v8664_v19 = vld [vmem:[#allocation2 + $0xe04] sm:$0xf]  ;;  %v7980_v41 = vor.u32 %v8711_v0, %v7979_v49  ;;  %v7984_v37 = vor.u32 %v8710_v40, %v7981_v50 }
 0xf7d   :  { %5299 = vmatpush.bf16.msrb.mxu1 %v7888_v23  ;;  %v7808_v60 = vor.u32 %v8666_v34, %v7805_v56  ;;  %v8716_v0 = vld [vmem:[#allocation2 + $0xfa4] sm:$0xf]  ;;  %v8005_v40 = vld [vmem:[#allocation2 + $0xfa8] sm:$0xf0] }
 0xf7e   :  { %v4799_v35 = vmax.f32 %v4797_v20, 0.0  ;;  %v7796_v20 = vor.u32 %v8665_v27, %v7795_v4  ;;  %v8008_v50 = vor.u32 %v8716_v0, %v8005_v40  ;;  %v8740_v0 = vld [vmem:[#allocation2 + $0x1064] sm:$0xf]  ;;  %v8101_v40 = vld [vmem:[#allocation2 + $0x1068] sm:$0xf0] }
 0xf7f   :  { %v4759_v51 = vpop.f32.mrf.mxu3  ;;  %5288 = vmatpush.bf16.msrb.mxu0 %v7808_v60 }
 0xf80   :  { %v4833_v61 = vpack.c.bf16 %v4799_v35, %v4799_v35  ;;  %v4760_v15 = vadd.f32 %v4759_v51, %v4747_v33  ;;  %v7797_v33 = vld [vmem:[#allocation2 + $0xe08] sm:$0xf0]  ;;  %5263 = vmatpush.bf16.msra.mxu2 %v7796_v20  ;;  %v8727_v51 = vld [vmem:[#allocation2 + $0xff4] sm:$0xf0]  ;;  %v8011_v20 = vld [vmem:[#allocation2 + $0xfb0] sm:$0xf] }
 0xf81   :  { %v4748_v17 = vpop.f32.mrf.mxu2  ;;  %v4787_v44 = vpop.f32.mrf.mxu1  ;;  %5300 = vmatpush.bf16.msrb.mxu1 %v7880_v8  ;;  %v7800_v35 = vor.u32 %v8664_v19, %v7797_v33  ;;  %v8028_v8 = vor.u32 %v8723_v12, %v8027_v10  ;;  %v8719_v33 = vld [vmem:[#allocation2 + $0xfb4] sm:$0xf0]  ;;  %v7949_v12 = vld [vmem:[#allocation2 + $0xf38] sm:$0xf0] }
 0xf82   :  { %v4796_v29 = vadd.f32 %v4792_v38, %v4760_v15  ;;  %5022 = vmatmul.bf16.vlgmr.msrb.gmra.mxu3 %v4833_v61  ;;  %5048 = vmatmul.bf16.vlgmr.msra.gmra.mxu1 %v4833_v61  ;;  %v8043_v38 = vld [vmem:[#allocation2 + $0xff0] sm:$0xf]  ;;  %v8726_v61 = vld [vmem:[#allocation2 + $0xff4] sm:$0xf]  ;;  %v8045_v17 = vld [vmem:[#allocation2 + $0xff8] sm:$0xf0] }
 0xf83   :  { %5289 = vmatpush.bf16.msrb.mxu0 %v7800_v35  ;;  %v8044_v15 = vor.u32 %v8727_v51, %v8043_v38  ;;  %v8035_v44 = vld [vmem:[#allocation2 + $0xfe0] sm:$0xf]  ;;  %v8718_v35 = vld [vmem:[#allocation2 + $0xfb4] sm:$0xf]  ;;  %v8012_v38 = vor.u32 %v8719_v33, %v8011_v20  ;;  %v8013_v51 = vld [vmem:[#allocation2 + $0xfb8] sm:$0xf0] }
 0xf84   :  { %v4798_v31 = vmax.f32 %v4796_v29, 0.0  ;;  %v8725_v29 = vld [vmem:[#allocation2 + $0xfe4] sm:$0xf0]  ;;  %v8107_v20 = vld [vmem:[#allocation2 + $0x1070] sm:$0xf] }
 0xf85   :  { %5301 = vmatpush.bf16.msrb.mxu1 %v7872_v5  ;;  %5524 = vmatpush.bf16.msrb.mxu3 %v8044_v15  ;;  %v8036_v22 = vor.u32 %v8725_v29, %v8035_v44  ;;  %v7968_v5 = vor.u32 %v8706_v53, %v7965_v3  ;;  %v7955_v15 = vld [vmem:[#allocation2 + $0xf40] sm:$0xf]  ;;  %v8704_v44 = vld [vmem:[#allocation2 + $0xf44] sm:$0xf]  ;;  %v8713_v53 = vld [vmem:[#allocation2 + $0xf84] sm:$0xf0] }
 0xf86   :  { %v4832_v39 = vpack.c.bf16 %v4798_v31, %v4798_v31  ;;  %v8048_v31 = vor.u32 %v8726_v61, %v8045_v17  ;;  %v8016_v61 = vor.u32 %v8718_v35, %v8013_v51  ;;  %v8705_v17 = vld [vmem:[#allocation2 + $0xf44] sm:$0xf0]  ;;  %v7988_v58 = vor.u32 %v8713_v53, %v7987_v24  ;;  %v7989_v3 = vld [vmem:[#allocation2 + $0xf88] sm:$0xf0]  ;;  %v8743_v35 = vld [vmem:[#allocation2 + $0x1074] sm:$0xf0] }
 0xf87   :  { %v4761_v59 = vpop.f32.mrf.mxu3  ;;  %v7956_v29 = vor.u32 %v8705_v17, %v7955_v15  ;;  %v8109_v51 = vld [vmem:[#allocation2 + $0x1078] sm:$0xf0]  ;;  %v8108_v15 = vor.u32 %v8743_v35, %v8107_v20  ;;  %v8748_v35 = vld [vmem:[#allocation2 + $0x10a4] sm:$0xf] }
 0xf88   :  { %5009 = vmatmul.bf16.vlgmr.msrb.gmra.mxu2 %v4832_v39  ;;  %5035 = vmatmul.bf16.vlgmr.msra.gmra.mxu0 %v4832_v39  ;;  %v8724_v39 = vld [vmem:[#allocation2 + $0xfe4] sm:$0xf]  ;;  %v8037_v59 = vld [vmem:[#allocation2 + $0xfe8] sm:$0xf0] }
 0xf89   :  { %5302 = vmatpush.bf16.msrb.mxu1 %v7864_v54  ;;  %v8040_v23 = vor.u32 %v8724_v39, %v8037_v59  ;;  %5511 = vmatpush.bf16.msrb.mxu2 %v7980_v41  ;;  %v8003_v39 = vld [vmem:[#allocation2 + $0xfa0] sm:$0xf]  ;;  %v8717_v59 = vld [vmem:[#allocation2 + $0xfa4] sm:$0xf0]  ;;  %v8703_v41 = vld [vmem:[#allocation2 + $0xf34] sm:$0xf0] }
 0xf8a   :  { %5537 = vmatpush.bf16.msra.mxu0 %v7984_v37  ;;  %5525 = vmatpush.bf16.msrb.mxu3 %v8036_v22  ;;  %v8004_v22 = vor.u32 %v8717_v59, %v8003_v39  ;;  %v8702_v37 = vld [vmem:[#allocation2 + $0xf34] sm:$0xf]  ;;  %v8157_v39 = vld [vmem:[#allocation2 + $0x10d8] sm:$0xf0]  ;;  %v8099_v59 = vld [vmem:[#allocation2 + $0x1060] sm:$0xf] }
 0xf8b   :  { %v7952_v32 = vor.u32 %v8702_v37, %v7949_v12  ;;  %v8753_v37 = vld [vmem:[#allocation2 + $0x10c4] sm:$0xf0]  ;;  %v8091_v12 = vld [vmem:[#allocation2 + $0x1050] sm:$0xf] }
 0xf8d   :  { %5550 = vmatpush.bf16.msra.mxu1 %v8048_v31  ;;  %5512 = vmatpush.bf16.msrb.mxu2 %v7972_v1  ;;  %v7957_v31 = vld [vmem:[#allocation2 + $0xf48] sm:$0xf0]  ;;  %v8714_v1 = vld [vmem:[#allocation2 + $0xf94] sm:$0xf] }
 0xf8e   :  { %5538 = vmatpush.bf16.msra.mxu0 %v7976_v21  ;;  %5526 = vmatpush.bf16.msrb.mxu3 %v8028_v8  ;;  %v7960_v49 = vor.u32 %v8704_v44, %v7957_v31  ;;  %v8000_v48 = vor.u32 %v8714_v1, %v7997_v47  ;;  %v7939_v8 = vld [vmem:[#allocation2 + $0xf20] sm:$0xf]  ;;  %v8701_v21 = vld [vmem:[#allocation2 + $0xf24] sm:$0xf0]  ;;  %v8155_v44 = vld [vmem:[#allocation2 + $0x10d0] sm:$0xf] }
 0xf8f   :  { %v7940_v43 = vor.u32 %v8701_v21, %v7939_v8  ;;  %v8754_v31 = vld [vmem:[#allocation2 + $0x10d4] sm:$0xf]  ;;  %v8093_v1 = vld [vmem:[#allocation2 + $0x1058] sm:$0xf0] }
 0xf90   :  { %v5090_v21 = vld [vmem:[#allocation4 + $0x22] ss:$8 sm:$0x3] }
 0xf91   :  { %5551 = vmatpush.bf16.msra.mxu1 %v8040_v23  ;;  %5513 = vmatpush.bf16.msrb.mxu2 %v7964_v9  ;;  %v7947_v23 = vld [vmem:[#allocation2 + $0xf30] sm:$0xf]  ;;  %v7992_v9 = vor.u32 %v8712_v57, %v7989_v3  ;;  %v5092_v3 = vperm.slane %v5090_v21, 0 }
 0xf92   :  { %5539 = vmatpush.bf16.msra.mxu0 %v7968_v5  ;;  %5527 = vmatpush.bf16.msrb.mxu3 %v8020_v36  ;;  %v7948_v10 = vor.u32 %v8703_v41, %v7947_v23  ;;  %v7931_v5 = vld [vmem:[#allocation2 + $0xf10] sm:$0xf]  ;;  %v8698_v36 = vld [vmem:[#allocation2 + $0xf14] sm:$0xf]  ;;  %v8104_v23 = vor.u32 %v8740_v0, %v8101_v40  ;;  %v8147_v41 = vld [vmem:[#allocation2 + $0x10c0] sm:$0xf] }
 0xf93   :  { %v8125_v0 = vld [vmem:[#allocation2 + $0x1098] sm:$0xf0] }
 0xf95   :  { %5552 = vmatpush.bf16.msra.mxu1 %v8032_v16  ;;  %5514 = vmatpush.bf16.msrb.mxu2 %v7956_v29  ;;  %v7941_v16 = vld [vmem:[#allocation2 + $0xf28] sm:$0xf0]  ;;  %v8755_v29 = vld [vmem:[#allocation2 + $0x10d4] sm:$0xf0] }
 0xf96   :  { %5528 = vmatpush.bf16.msrb.mxu3 %v8012_v38  ;;  %5540 = vmatpush.bf16.msra.mxu0 %v7960_v49  ;;  %v7944_v42 = vor.u32 %v8700_v62, %v7941_v16  ;;  %v8742_v38 = vld [vmem:[#allocation2 + $0x1074] sm:$0xf]  ;;  %v8741_v49 = vld [vmem:[#allocation2 + $0x1064] sm:$0xf0]  ;;  %v8148_v62 = vor.u32 %v8753_v37, %v8147_v41  ;;  %v5093_v16 = vperm.slane %v5090_v21, 1 }
 0xf97   :  { %v8112_v17 = vor.u32 %v8742_v38, %v8109_v51  ;;  %v8133_v38 = vld [vmem:[#allocation2 + $0x10a8] sm:$0xf0]  ;;  %v8732_v41 = vld [vmem:[#allocation2 + $0x1024] sm:$0xf] }
 0xf98   :  { %v8136_v51 = vor.u32 %v8748_v35, %v8133_v38 }
 0xf99   :  { %5553 = vmatpush.bf16.msra.mxu1 %v8024_v14  ;;  %5515 = vmatpush.bf16.msrb.mxu2 %v7948_v10  ;;  %v7933_v14 = vld [vmem:[#allocation2 + $0xf18] sm:$0xf0]  ;;  %v8160_v10 = vor.u32 %v8754_v31, %v8157_v39  ;;  %v8123_v39 = vld [vmem:[#allocation2 + $0x1090] sm:$0xf] }
 0xf9a   :  { %5529 = vmatpush.bf16.msrb.mxu3 %v8004_v22  ;;  %5541 = vmatpush.bf16.msra.mxu0 %v7952_v32  ;;  %v8100_v22 = vor.u32 %v8741_v49, %v8099_v59  ;;  %v8739_v32 = vld [vmem:[#allocation2 + $0x1054] sm:$0xf0] }
 0xf9b   :  { %v8092_v47 = vor.u32 %v8739_v32, %v8091_v12  ;;  %v8747_v59 = vld [vmem:[#allocation2 + $0x1094] sm:$0xf0]  ;;  %v8115_v32 = vld [vmem:[#allocation2 + $0x1080] sm:$0xf] }
 0xf9c   :  { %v8124_v49 = vor.u32 %v8747_v59, %v8123_v39 }
 0xf9d   :  { %5554 = vmatpush.bf16.msra.mxu1 %v8016_v61  ;;  %5516 = vmatpush.bf16.msrb.mxu2 %v7940_v43 }
 0xf9e   :  { %5530 = vmatpush.bf16.msrb.mxu3 %v7996_v13  ;;  %5542 = vmatpush.bf16.msra.mxu0 %v7944_v42  ;;  %v8149_v13 = vld [vmem:[#allocation2 + $0x10c8] sm:$0xf0] }
 0xf9f   :  { %v8152_v43 = vor.u32 %v8752_v52, %v8149_v13  ;;  %v8744_v52 = vld [vmem:[#allocation2 + $0x1084] sm:$0xf] }
 0xfa1   :  { %5555 = vmatpush.bf16.msra.mxu1 %v8008_v50  ;;  %v8156_v50 = vor.u32 %v8755_v29, %v8155_v44  ;;  %v8077_v29 = vld [vmem:[#allocation2 + $0x1038] sm:$0xf0] }
 0xfa2   :  { %5531 = vmatpush.bf16.msrb.mxu3 %v7988_v58 }
 0xfa5   :  { %5556 = vmatpush.bf16.msra.mxu1 %v8000_v48  ;;  %v8096_v48 = vor.u32 %v8738_v28, %v8093_v1  ;;  %v8745_v28 = vld [vmem:[#allocation2 + $0x1084] sm:$0xf0]  ;;  %v8117_v1 = vld [vmem:[#allocation2 + $0x1088] sm:$0xf0] }
 0xfa6   :  { %v8116_v13 = vor.u32 %v8745_v28, %v8115_v32 }
 0xfa9   :  { %5557 = vmatpush.bf16.msra.mxu1 %v7992_v9 }
 0xfff   :  { %v5049_v26 = vpop.f32.mrf.mxu1 }
0x1005   :  { %v5023_v46 = vpop.f32.mrf.mxu3  ;;  %v5036_v55 = vpop.f32.mrf.mxu0 }
0x1006   :  { %v5037_v6 = vadd.f32 %v5036_v55, %v4838_v45  ;;  %v7936_v45 = vor.u32 %v8698_v36, %v7933_v14  ;;  %v8697_v55 = vld [vmem:[#allocation2 + $0xf04] sm:$0xf0] }
0x1007   :  { %v5051_v2 = vpop.f32.mrf.mxu1 }
0x1008   :  { %v5050_v18 = vadd.f32 %v5049_v26, %v5037_v6  ;;  %v8699_v26 = vld [vmem:[#allocation2 + $0xf14] sm:$0xf0]  ;;  %5543 = vmatpush.bf16.msra.mxu0 %v7936_v45  ;;  %v8696_v6 = vld [vmem:[#allocation2 + $0xf04] sm:$0xf] }
0x1009   :  { %v7932_v30 = vor.u32 %v8699_v26, %v7931_v5 }
0x100a   :  { %v5054_v54 = vmax.f32 %v5050_v18, 0.0  ;;  %v7925_v18 = vld [vmem:[#allocation2 + $0xf08] sm:$0xf0] }
0x100b   :  { %v5010_v25 = vpop.f32.mrf.mxu2  ;;  %5517 = vmatpush.bf16.msrb.mxu2 %v7932_v30 }
0x100c   :  { %v5088_v63 = vpack.c.bf16 %v5054_v54, %v5054_v54  ;;  %v5011_v7 = vadd.f32 %v5010_v25, %v4837_v11  ;;  %v7928_v11 = vor.u32 %v8696_v6, %v7925_v18  ;;  %v8171_v54 = vld [vmem:[#allocation2 + $0x10f0] sm:$0xf]  ;;  %v8759_v25 = vld [vmem:[#allocation2 + $0x10f4] sm:$0xf0] }
0x100d   :  { %v5025_v34 = vpop.f32.mrf.mxu3  ;;  %v5038_v56 = vpop.f32.mrf.mxu0  ;;  %v8751_v18 = vld [vmem:[#allocation2 + $0x10b4] sm:$0xf0] }
0x100e   :  { %v5024_v60 = vadd.f32 %v5023_v46, %v5011_v7  ;;  %5277 = vmatmul.bf16.vlgmr.msra.gmra.mxu3 %v5088_v63  ;;  %5303 = vmatmul.bf16.vlgmr.msrb.gmra.mxu1 %v5088_v63  ;;  %v7923_v46 = vld [vmem:[#allocation2 + $0xf00] sm:$0xf]  ;;  %v8758_v63 = vld [vmem:[#allocation2 + $0x10f4] sm:$0xf]  ;;  %v8172_v7 = vor.u32 %v8759_v25, %v8171_v54  ;;  %v8173_v34 = vld [vmem:[#allocation2 + $0x10f8] sm:$0xf0] }
0x100f   :  { %v7924_v2 = vor.u32 %v8697_v55, %v7923_v46  ;;  %5544 = vmatpush.bf16.msra.mxu0 %v7928_v11  ;;  %v8163_v56 = vld [vmem:[#allocation2 + $0x10e0] sm:$0xf]  ;;  %v8750_v11 = vld [vmem:[#allocation2 + $0x10b4] sm:$0xf]  ;;  %v8141_v25 = vld [vmem:[#allocation2 + $0x10b8] sm:$0xf0] }
0x1010   :  { %v5053_v4 = vmax.f32 %v5024_v60, 0.0  ;;  %v8757_v60 = vld [vmem:[#allocation2 + $0x10e4] sm:$0xf0]  ;;  %5779 = vmatpush.bf16.msra.mxu3 %v8172_v7  ;;  %v8083_v7 = vld [vmem:[#allocation2 + $0x1040] sm:$0xf] }
0x1011   :  { %5518 = vmatpush.bf16.msrb.mxu2 %v7924_v2  ;;  %v8164_v33 = vor.u32 %v8757_v60, %v8163_v56  ;;  %v8139_v2 = vld [vmem:[#allocation2 + $0x10b0] sm:$0xf]  ;;  %v8736_v56 = vld [vmem:[#allocation2 + $0x1044] sm:$0xf] }
0x1012   :  { %v5087_v27 = vpack.c.bf16 %v5053_v4, %v5053_v4  ;;  %v8176_v4 = vor.u32 %v8758_v63, %v8173_v34  ;;  %v8140_v54 = vor.u32 %v8751_v18, %v8139_v2  ;;  %v8144_v63 = vor.u32 %v8750_v11, %v8141_v25  ;;  %v8737_v34 = vld [vmem:[#allocation2 + $0x1044] sm:$0xf0] }
0x1013   :  { %v5012_v19 = vpop.f32.mrf.mxu2  ;;  %v8084_v60 = vor.u32 %v8737_v34, %v8083_v7 }
0x1014   :  { %5264 = vmatmul.bf16.vlgmr.msra.gmra.mxu2 %v5087_v27  ;;  %5290 = vmatmul.bf16.vlgmr.msrb.gmra.mxu0 %v5087_v27  ;;  %v8756_v27 = vld [vmem:[#allocation2 + $0x10e4] sm:$0xf]  ;;  %v8165_v19 = vld [vmem:[#allocation2 + $0x10e8] sm:$0xf0] }
0x1015   :  { %5805 = vmatpush.bf16.msrb.mxu1 %v8176_v4  ;;  %v8168_v61 = vor.u32 %v8756_v27, %v8165_v19  ;;  %5766 = vmatpush.bf16.msra.mxu2 %v8108_v15  ;;  %v8085_v4 = vld [vmem:[#allocation2 + $0x1048] sm:$0xf0]  ;;  %v8131_v27 = vld [vmem:[#allocation2 + $0x10a0] sm:$0xf]  ;;  %v8749_v19 = vld [vmem:[#allocation2 + $0x10a4] sm:$0xf0] }
0x1016   :  { %5792 = vmatpush.bf16.msrb.mxu0 %v8112_v17  ;;  %5780 = vmatpush.bf16.msra.mxu3 %v8164_v33  ;;  %v8088_v20 = vor.u32 %v8736_v56, %v8085_v4  ;;  %v8132_v33 = vor.u32 %v8749_v19, %v8131_v27  ;;  %v8735_v15 = vld [vmem:[#allocation2 + $0x1034] sm:$0xf0]  ;;  %v8734_v17 = vld [vmem:[#allocation2 + $0x1034] sm:$0xf] }
0x1017   :  { %v8080_v31 = vor.u32 %v8734_v17, %v8077_v29  ;;  %v5600_v4 = vld [vmem:[#allocation4 + $0x24] ss:$8 sm:$0x3] }
0x1018   :  { %v5603_v27 = vperm.slane %v5600_v4, 1 }
0x1019   :  { %5806 = vmatpush.bf16.msrb.mxu1 %v8168_v61  ;;  %5767 = vmatpush.bf16.msra.mxu2 %v8100_v22  ;;  %v8075_v61 = vld [vmem:[#allocation2 + $0x1030] sm:$0xf]  ;;  %v8746_v22 = vld [vmem:[#allocation2 + $0x1094] sm:$0xf] }
0x101a   :  { %5793 = vmatpush.bf16.msrb.mxu0 %v8104_v23  ;;  %5781 = vmatpush.bf16.msra.mxu3 %v8156_v50  ;;  %v8076_v44 = vor.u32 %v8735_v15, %v8075_v61  ;;  %v8128_v40 = vor.u32 %v8746_v22, %v8125_v0  ;;  %v8067_v50 = vld [vmem:[#allocation2 + $0x1020] sm:$0xf]  ;;  %v8733_v23 = vld [vmem:[#allocation2 + $0x1024] sm:$0xf0] }
0x101b   :  { %v8068_v37 = vor.u32 %v8733_v23, %v8067_v50 }
0x101d   :  { %5807 = vmatpush.bf16.msrb.mxu1 %v8160_v10  ;;  %5768 = vmatpush.bf16.msra.mxu2 %v8092_v47  ;;  %v8069_v10 = vld [vmem:[#allocation2 + $0x1028] sm:$0xf0]  ;;  %v8120_v47 = vor.u32 %v8744_v52, %v8117_v1 }
0x101e   :  { %5794 = vmatpush.bf16.msrb.mxu0 %v8096_v48  ;;  %5782 = vmatpush.bf16.msra.mxu3 %v8148_v62  ;;  %v8072_v12 = vor.u32 %v8732_v41, %v8069_v10  ;;  %v8059_v48 = vld [vmem:[#allocation2 + $0x1010] sm:$0xf]  ;;  %v8730_v62 = vld [vmem:[#allocation2 + $0x1014] sm:$0xf] }
0x1021   :  { %5808 = vmatpush.bf16.msrb.mxu1 %v8152_v43  ;;  %5769 = vmatpush.bf16.msra.mxu2 %v8084_v60  ;;  %v8061_v43 = vld [vmem:[#allocation2 + $0x1018] sm:$0xf0] }
0x1022   :  { %5783 = vmatpush.bf16.msra.mxu3 %v8140_v54  ;;  %5795 = vmatpush.bf16.msrb.mxu0 %v8088_v20 }
0x1025   :  { %5809 = vmatpush.bf16.msrb.mxu1 %v8144_v63  ;;  %5770 = vmatpush.bf16.msra.mxu2 %v8076_v44 }
0x1026   :  { %5784 = vmatpush.bf16.msra.mxu3 %v8132_v33  ;;  %5796 = vmatpush.bf16.msrb.mxu0 %v8080_v31 }
0x1029   :  { %5810 = vmatpush.bf16.msrb.mxu1 %v8136_v51  ;;  %5771 = vmatpush.bf16.msra.mxu2 %v8068_v37  ;;  %v5602_v51 = vperm.slane %v5600_v4, 0 }
0x102a   :  { %5785 = vmatpush.bf16.msra.mxu3 %v8124_v49  ;;  %5797 = vmatpush.bf16.msrb.mxu0 %v8072_v12 }
0x102d   :  { %5811 = vmatpush.bf16.msrb.mxu1 %v8128_v40 }
0x102e   :  { %5786 = vmatpush.bf16.msra.mxu3 %v8116_v13 }
0x1031   :  { %5812 = vmatpush.bf16.msrb.mxu1 %v8120_v47 }
0x108b   :  { %v5304_v8 = vpop.f32.mrf.mxu1 }
0x1091   :  { %v5278_v42 = vpop.f32.mrf.mxu3  ;;  %v5291_v24 = vpop.f32.mrf.mxu0 }
0x1092   :  { %v5292_v53 = vadd.f32 %v5291_v24, %v5093_v16  ;;  %v8064_v16 = vor.u32 %v8730_v62, %v8061_v43  ;;  %v8729_v24 = vld [vmem:[#allocation2 + $0x1004] sm:$0xf0] }
0x1093   :  { %v5306_v57 = vpop.f32.mrf.mxu1 }
0x1094   :  { %v5305_v58 = vadd.f32 %v5304_v8, %v5292_v53  ;;  %v8731_v8 = vld [vmem:[#allocation2 + $0x1014] sm:$0xf0]  ;;  %5798 = vmatpush.bf16.msrb.mxu0 %v8064_v16  ;;  %v8728_v53 = vld [vmem:[#allocation2 + $0x1004] sm:$0xf] }
0x1095   :  { %v8060_v21 = vor.u32 %v8731_v8, %v8059_v48 }
0x1096   :  { %v5309_v9 = vmax.f32 %v5305_v58, 0.0  ;;  %v8053_v58 = vld [vmem:[#allocation2 + $0x1008] sm:$0xf0] }
0x1097   :  { %v5265_v5 = vpop.f32.mrf.mxu2  ;;  %5772 = vmatpush.bf16.msra.mxu2 %v8060_v21 }
0x1098   :  { %v5343_v26 = vpack.c.bf16 %v5309_v9, %v5309_v9  ;;  %v5266_v30 = vadd.f32 %v5265_v5, %v5092_v3  ;;  %v8056_v3 = vor.u32 %v8728_v53, %v8053_v58  ;;  %v5345_v5 = vld [vmem:[#allocation4 + $0x23] ss:$8 sm:$0x3] }
0x1099   :  { %v5280_v36 = vpop.f32.mrf.mxu3  ;;  %v5293_v14 = vpop.f32.mrf.mxu0 }
0x109a   :  { %v5279_v45 = vadd.f32 %v5278_v42, %v5266_v30  ;;  %5532 = vmatmul.bf16.vlgmr.msrb.gmra.mxu3 %v5343_v26  ;;  %5558 = vmatmul.bf16.vlgmr.msra.gmra.mxu1 %v5343_v26  ;;  %v8051_v42 = vld [vmem:[#allocation2 + $0x1000] sm:$0xf]  ;;  %v5348_v26 = vperm.slane %v5345_v5, 1 }
0x109b   :  { %v8052_v57 = vor.u32 %v8729_v24, %v8051_v42  ;;  %5799 = vmatpush.bf16.msrb.mxu0 %v8056_v3 }
0x109c   :  { %v5308_v46 = vmax.f32 %v5279_v45, 0.0 }
0x109d   :  { %5773 = vmatpush.bf16.msra.mxu2 %v8052_v57 }
0x109e   :  { %v5342_v55 = vpack.c.bf16 %v5308_v46, %v5308_v46 }
0x109f   :  { %v5267_v6 = vpop.f32.mrf.mxu2 }
0x10a0   :  { %5519 = vmatmul.bf16.vlgmr.msrb.gmra.mxu2 %v5342_v55  ;;  %5545 = vmatmul.bf16.vlgmr.msra.gmra.mxu0 %v5342_v55  ;;  %v5347_v55 = vperm.slane %v5345_v5, 0 }
0x1117   :  { %v5559_v9 = vpop.f32.mrf.mxu1 }
0x111d   :  { %v5533_v30 = vpop.f32.mrf.mxu3  ;;  %v5546_v36 = vpop.f32.mrf.mxu0 }
0x111e   :  { %v5547_v14 = vadd.f32 %v5546_v36, %v5348_v26 }
0x111f   :  { %v5561_v45 = vpop.f32.mrf.mxu1 }
0x1120   :  { %v5560_v46 = vadd.f32 %v5559_v9, %v5547_v14 }
0x1122   :  { %v5564_v6 = vmax.f32 %v5560_v46, 0.0 }
0x1123   :  { %v5520_v2 = vpop.f32.mrf.mxu2 }
0x1124   :  { %v5598_v18 = vpack.c.bf16 %v5564_v6, %v5564_v6  ;;  %v5521_v11 = vadd.f32 %v5520_v2, %v5347_v55 }
0x1125   :  { %v5535_v54 = vpop.f32.mrf.mxu3  ;;  %v5548_v25 = vpop.f32.mrf.mxu0 }
0x1126   :  { %v5534_v63 = vadd.f32 %v5533_v30, %v5521_v11  ;;  %5787 = vmatmul.bf16.vlgmr.msra.gmra.mxu3 %v5598_v18  ;;  %5813 = vmatmul.bf16.vlgmr.msrb.gmra.mxu1 %v5598_v18 }
0x1128   :  { %v5563_v7 = vmax.f32 %v5534_v63, 0.0 }
0x112a   :  { %v5597_v34 = vpack.c.bf16 %v5563_v7, %v5563_v7 }
0x112b   :  { %v5522_v56 = vpop.f32.mrf.mxu2 }
0x112c   :  { %5774 = vmatmul.bf16.vlgmr.msra.gmra.mxu2 %v5597_v34  ;;  %5800 = vmatmul.bf16.vlgmr.msrb.gmra.mxu0 %v5597_v34 }
0x11a3   :  { %v5814_v60 = vpop.f32.mrf.mxu1 }
0x11a9   :  { %v5788_v19 = vpop.f32.mrf.mxu3  ;;  %v5801_v20 = vpop.f32.mrf.mxu0 }
0x11aa   :  { %v5802_v33 = vadd.f32 %v5801_v20, %v5603_v27 }
0x11ab   :  { %v5816_v35 = vpop.f32.mrf.mxu1 }
0x11ac   :  { %v5815_v38 = vadd.f32 %v5814_v60, %v5802_v33 }
0x11ae   :  { %5819 = vst [vmem:[%s9870_s9 + $0x8] sm:$0xff] %v5815_v38 }
0x11af   :  { %v5775_v61 = vpop.f32.mrf.mxu2 }
0x11b0   :  { %v5776_v15 = vadd.f32 %v5775_v61, %v5602_v51 }
0x11b1   :  { %v5790_v17 = vpop.f32.mrf.mxu3  ;;  %v5803_v44 = vpop.f32.mrf.mxu0 }
0x11b2   :  { %v5789_v29 = vadd.f32 %v5788_v19, %v5776_v15 }
0x11b4   :  { %5818 = vst [vmem:[%s9870_s9] sm:$0xff] %v5789_v29 }
0x11b7   :  { %v5777_v31 = vpop.f32.mrf.mxu2 }
0x11b8   :  { %5834 = vsyncpa [#allocation3], 1 }
0x11b9   :  { %5835 = vsyncpa [#allocation5], 1 }
0x11ba   :  { %5836 = vsyncpa [#allocation8], 1 }
0x11bb   :  { %5837 = vsyncpa [#allocation11], 1 }

</bundles_post_ra>
